<compile_context>
chip_gen: v7x
topology: tpu7x:2x2x1
jax: 0.10.0
libtpu: 0.0.40
codegen_flags: <defaults>
</compile_context>

<pallas_src>
import math

import jax
import jax.numpy as jnp
from jax.experimental import pallas as pl
from jax.experimental.pallas import tpu as pltpu

N_FEAT = 32      # n_feat
N_HIDDEN = 32    # n_hidden
N_CLASSES = 8    # n_classes
assert N_FEAT == N_HIDDEN == 32 and N_CLASSES <= N_FEAT


# ------------------- exact erf GELU (trimmed VALU form) -----------------------
_P_SCALED = 0.3275911 / math.sqrt(2.0)          # p / sqrt(2) folded into |x|
_B1 = 0.5 * 0.254829592                          # A&S 7.1.26 coeffs pre-halved
_B2 = 0.5 * -0.284496736
_B3 = 0.5 * 1.421413741
_B4 = 0.5 * -1.453152027
_B5 = 0.5 * 1.061405429


def _gelu(x):
    """Exact (erf-based) GELU matching PyTorch nn.GELU() default.

    GELU(x) = max(x,0) - |x| * halfpoly(t) * exp(-x^2/2),
    t = 1/(1 + (p/sqrt2)*|x|)   (A&S 7.1.26, |erf err| < 1.5e-7).
    The relu form drops the sign()/1+erf bookkeeping of the textbook form and
    the 0.5 is folded into the polynomial coefficients (compile-time).  The
    reciprocal is the EUP approximate one plus one Newton step on the VPU, so
    it stays f32-accurate while the EUP rides its otherwise-idle slot.
    # TODO(synk): a 3-term minimax erf would shave ~4 more VALU ops/elem but
    # needs on-hardware re-validation against the 1e-4 tolerance first.
    """
    ax = jnp.abs(x)
    d = 1.0 + _P_SCALED * ax
    r = pl.reciprocal(d, approx=True)            # EUP
    t = r * (2.0 - d * r)                        # one Newton step (VPU)
    half_poly = ((((_B5 * t + _B4) * t + _B3) * t + _B2) * t + _B1) * t
    tail = half_poly * jnp.exp(-0.5 * (x * x))   # exp on EUP
    return jnp.maximum(x, 0.0) - ax * tail


# ------------------------------- kernel ---------------------------------------
def context_ae_kernel(in_ref, w_ref, col_ref, out_ref):
    f32 = jnp.float32
    tb = in_ref.shape[-1]

    xin = in_ref[...]                            # (4, tb): rows x, c, t, mask
    x = xin[0:1, :]
    cls = xin[1:2, :].astype(jnp.int32)          # class ids are exact in f32
    tt = xin[2:3, :]
    msk = xin[3:4, :]

    # stacked (out, in) weight blocks, all (32, 32)
    we1, we2, we3, wt1 = w_ref[0], w_ref[1], w_ref[2], w_ref[3]
    wc0, wc1 = w_ref[4], w_ref[5]
    wd0x, wd0t, wd0c = w_ref[6], w_ref[7], w_ref[8]
    wd1, wd2 = w_ref[9], w_ref[10]

    # stacked (32, 1) columns: width-1 weights + biases (broadcast over lanes)
    we0c, be0, be1_, be2_, be3_ = (col_ref[0], col_ref[1], col_ref[2],
                                   col_ref[3], col_ref[4])
    wt0c, bt0, bt1_ = col_ref[5], col_ref[6], col_ref[7]
    bc0, bc1_ = col_ref[8], col_ref[9]
    bd0, bd1_, bd2_ = col_ref[10], col_ref[11], col_ref[12]
    wd3c = col_ref[13]                           # final linear weights (32,1)
    bd3 = col_ref[14][0:1, :]                    # final scalar bias (1,1)

    dot = lambda w, v: jnp.dot(w, v, preferred_element_type=f32)

    # ---------------- encoder (features on sublanes, batch on lanes) ---------
    h = _gelu(we0c * x + be0)                    # outer product -> (F, tb)
    h = _gelu(dot(we1, h) + be1_)
    h = _gelu(dot(we2, h) + be2_)
    x_enc = dot(we3, h) + be3_                   # (H, tb), no activation

    # ---------------- time embedding ----------------
    te = _gelu(wt0c * tt + bt0)
    temb = dot(wt1, te) + bt1_                   # (H, tb)

    # ------- context: 32-row one-hot (ids < 8; padded rows never match) ------
    iota = jax.lax.broadcasted_iota(jnp.int32, (N_FEAT, tb), 0)
    onehot = (iota == cls).astype(f32)           # (32, tb)
    cvec = onehot * (msk - 1.0)                  # mask-1 == -1*(1-mask)
    ce = _gelu(dot(wc0, cvec) + bc0)             # wc0 in-dim zero-padded 8->32
    cemb = dot(wc1, ce) + bc1_                   # (H, tb)

    # ---------------- decoder ----------------
    # torch.cat((x, temb, cemb), 1) @ Wd0  ==  three accumulating K=32 matmuls
    # (no (96, tb) concat buffer through the vector ld/st slots)
    d = _gelu(dot(wd0x, x_enc) + dot(wd0t, temb) + dot(wd0c, cemb) + bd0)
    d = _gelu(dot(wd1, d) + bd1_)
    d = _gelu(dot(wd2, d) + bd2_)
    # final Linear(n_feat, 1): sublane reduction -> lane-dense (1, tb) row
    out = jnp.sum(d * wd3c, axis=0, keepdims=True) + bd3
    out_ref[...] = out.astype(out_ref.dtype)


# ------------------------------- packing --------------------------------------
def pack_params_for_kernel(params):
    """Stack all (out,in) matrices into (11,32,32) and all columns into (15,32,1)."""
    ((we0, be0), (we1, be1), (we2, be2), (we3, be3),
     (wt0, bt0), (wt1, bt1), (wc0, bc0), (wc1, bc1),
     (wd0, bd0), (wd1, bd1), (wd2, bd2), (wd3, bd3)) = params
    f32 = jnp.float32
    F, H, C = N_FEAT, N_HIDDEN, N_CLASSES

    def T(w):                                    # canonical (in,out) -> (out,in)
        return jnp.asarray(w, f32).T

    wc0_p = jnp.pad(T(wc0), ((0, 0), (0, F - C)))        # (32, 8) -> (32, 32)
    wd0_T = T(wd0)                                       # (32, 96)
    w_stack = jnp.stack(
        [T(we1), T(we2), T(we3), T(wt1), wc0_p, T(wc1),
         wd0_T[:, 0:H], wd0_T[:, H:2 * H], wd0_T[:, 2 * H:3 * H],
         T(wd1), T(wd2)], axis=0)                        # (11, 32, 32)

    def col(v):
        return jnp.asarray(v, f32).reshape(F, 1)

    bd3_c = jnp.pad(jnp.asarray(bd3, f32).reshape(1, 1), ((0, F - 1), (0, 0)))
    col_stack = jnp.stack(
        [col(we0), col(be0), col(be1), col(be2), col(be3),
         col(wt0), col(bt0), col(bt1), col(bc0), col(bc1),
         col(bd0), col(bd1), col(bd2), col(wd3), bd3_c], axis=0)  # (15, 32, 1)
    return w_stack, col_stack


# ------------------------------- wrapper ---------------------------------------
def context_ae_forward(x, c, t, context_mask, params, *, tb_max=4096):
    """x, t, context_mask: float (B,1) or (B,);  c: int (B,1) or (B,)."""
    assert tb_max % 256 == 0, "batch tile cap must be a multiple of 256"
    B = int(jnp.asarray(x).shape[0])

    # Batch tile: as large as possible (amortizes ~0.35us/grid-step overhead,
    # widens the MXU N dim, lane-dense DMAs) but capped at 4096 so the f32
    # intermediates fit every generation's scoped-VMEM budget without tuning.
    tb = min(tb_max, ((B + 255) // 256) * 256)
    n_steps = pl.cdiv(B, tb)
    if n_steps > 1 and n_steps % 2:
        n_steps += 1                 # even grid length -> both v7x TCs busy
    B_pad = n_steps * tb

    def row(a):
        return jnp.asarray(a).reshape(1, -1).astype(jnp.float32)

    packed = jnp.concatenate([row(x), row(c), row(t), row(context_mask)], axis=0)
    if B_pad != B:
        packed = jnp.pad(packed, ((0, 0), (0, B_pad - B)))

    w_stack, col_stack = pack_params_for_kernel(params)

    out = pl.pallas_call(
        context_ae_kernel,
        out_shape=jax.ShapeDtypeStruct((1, B_pad), jnp.float32),
        grid=(n_steps,),
        in_specs=[
            pl.BlockSpec((4, tb), lambda i: (0, i)),               # inputs
            pl.BlockSpec(w_stack.shape, lambda i: (0, 0, 0)),      # weights
            pl.BlockSpec(col_stack.shape, lambda i: (0, 0, 0)),    # bias cols
        ],
        out_specs=pl.BlockSpec((1, tb), lambda i: (0, i)),
        compiler_params=pltpu.CompilerParams(
            dimension_semantics=("parallel",),
            vmem_limit_bytes=32 * 1024 * 1024),
    )(packed, w_stack, col_stack)

    return out[0, :B].reshape(B, 1)


# ---------------------------- parameter init -----------------------------------
def init_params(key, n_feat=N_FEAT, n_hidden=N_HIDDEN, n_classes=N_CLASSES):
    """PyTorch-Linear-style init; weights stored canonically as (in, out)."""
    def linear(k, fan_in, fan_out):
        kw, kb = jax.random.split(k)
        bound = 1.0 / math.sqrt(fan_in)
        W = jax.random.uniform(kw, (fan_in, fan_out), jnp.float32, -bound, bound)
        b = jax.random.uniform(kb, (1, fan_out), jnp.float32, -bound, bound)
        return W, b

    ks = jax.random.split(key, 12)
    return [
        linear(ks[0], 1, n_feat),              # encode[0]
        linear(ks[1], n_feat, n_feat),         # encode[1].0
        linear(ks[2], n_feat, n_feat),         # encode[1].2
        linear(ks[3], n_feat, n_hidden),       # encode[1].4 (no activation)
        linear(ks[4], 1, n_hidden),            # timeembed1.0
        linear(ks[5], n_hidden, n_hidden),     # timeembed1.2
        linear(ks[6], n_classes, n_hidden),    # contextembed1.0
        linear(ks[7], n_hidden, n_hidden),     # contextembed1.2
        linear(ks[8], 3 * n_hidden, n_feat),   # decode[0]
        linear(ks[9], n_feat, n_feat),         # decode[1].0
        linear(ks[10], n_feat, n_feat),        # decode[1].2
        linear(ks[11], n_feat, 1),             # decode[1].4
    ]


# ------------------------- pure-JAX reference (exact erf) ----------------------
def reference(x, c, t, mask, params):
    ((we0, be0), (we1, be1), (we2, be2), (we3, be3),
     (wt0, bt0), (wt1, bt1), (wc0, bc0), (wc1, bc1),
     (wd0, bd0), (wd1, bd1), (wd2, bd2), (wd3, bd3)) = params
    g = lambda v: jax.nn.gelu(v, approximate=False)
    h = g(x @ we0 + be0)
    h = g(h @ we1 + be1)
    h = g(h @ we2 + be2)
    xe = h @ we3 + be3
    onehot = jax.nn.one_hot(c[:, 0], N_CLASSES, dtype=jnp.float32)
    cm = -1.0 * (1.0 - mask)
    cv = onehot * cm
    cemb = g(cv @ wc0 + bc0) @ wc1 + bc1
    temb = g(t @ wt0 + bt0) @ wt1 + bt1
    d = g(jnp.concatenate([xe, temb, cemb], axis=1) @ wd0 + bd0)
    d = g(d @ wd1 + bd1)
    d = g(d @ wd2 + bd2)
    return d @ wd3 + bd3


if __name__ == "__main__":
    key = jax.random.PRNGKey(0)
    kx, kc, kt, km, kp = jax.random.split(key, 5)

    B = 600
    x = jax.random.normal(kx, (B, 1), jnp.float32)
    c = jax.random.randint(kc, (B, 1), 0, N_CLASSES, dtype=jnp.int32)
    t = jax.random.uniform(kt, (B, 1), jnp.float32)
    context_mask = jax.random.bernoulli(km, 0.5, (B, 1)).astype(jnp.float32)

    params = init_params(kp)
    ref = reference(x, c, t, context_mask, params)

    # default config: B=600 -> single 768-lane batch tile
    out = jax.block_until_ready(context_ae_forward(x, c, t, context_mask, params))
    # small-tile config: exercises the multi-step grid (3 steps padded to an
    # even 4 for the two v7x TensorCores) and the batch-padding path
    out2 = jax.block_until_ready(
        context_ae_forward(x, c, t, context_mask, params, tb_max=256))

    assert out.shape == (B, 1) and out2.shape == (B, 1)
    for o in (out, out2):
        max_err = jnp.max(jnp.abs(o - ref))
        assert jnp.allclose(o, ref, atol=1e-4, rtol=1e-4), f"max abs err {max_err}"

    print("KERNEL_OK")
</pallas_src>

<mosaic_0001>
module attributes {stable_mosaic.version = 11 : i64} {
  func.func @context_ae_kernel(%arg0: i32, %arg1: memref<4x768xf32, #tpu.memory_space<vmem>>, %arg2: memref<11x32x32xf32, #tpu.memory_space<vmem>>, %arg3: memref<15x32x1xf32, #tpu.memory_space<vmem>>, %arg4: memref<1x768xf32, #tpu.memory_space<vmem>>) attributes {dimension_semantics = [#tpu.dimension_semantics<parallel>], iteration_bounds = array<i64: 1>, scalar_prefetch = 0 : i64, scratch_operands = 0 : i64, tpu.core_type = #tpu.core_type<tc>, window_params = [{transform_indices = @transform_0, window_bounds = array<i64: 4, 768>}, {pipeline_mode = #tpu.pipeline_mode<synchronous>, transform_indices = @transform_1, window_bounds = array<i64: 11, 32, 32>}, {pipeline_mode = #tpu.pipeline_mode<synchronous>, transform_indices = @transform_2, window_bounds = array<i64: 15, 32, 1>}, {transform_indices = @transform_3, window_bounds = array<i64: 1, 768>}]} {
    %c0 = arith.constant 0 : index
    %c0_0 = arith.constant 0 : index
    %0 = vector.load %arg1[%c0, %c0_0] : memref<4x768xf32, #tpu.memory_space<vmem>>, vector<4x768xf32>
    %1 = vector.extract_strided_slice %0 {offsets = [0, 0], sizes = [1, 768], strides = [1, 1]} : vector<4x768xf32> to vector<1x768xf32>
    %2 = vector.extract_strided_slice %0 {offsets = [1, 0], sizes = [1, 768], strides = [1, 1]} : vector<4x768xf32> to vector<1x768xf32>
    %3 = arith.fptosi %2 : vector<1x768xf32> to vector<1x768xi32>
    %4 = vector.extract_strided_slice %0 {offsets = [2, 0], sizes = [1, 768], strides = [1, 1]} : vector<4x768xf32> to vector<1x768xf32>
    %5 = vector.extract_strided_slice %0 {offsets = [3, 0], sizes = [1, 768], strides = [1, 1]} : vector<4x768xf32> to vector<1x768xf32>
    %c0_1 = arith.constant 0 : index
    %c0_2 = arith.constant 0 : index
    %c0_3 = arith.constant 0 : index
    %6 = vector.load %arg2[%c0_1, %c0_2, %c0_3] : memref<11x32x32xf32, #tpu.memory_space<vmem>>, vector<1x32x32xf32>
    %7 = vector.shape_cast %6 : vector<1x32x32xf32> to vector<32x32xf32>
    %c1 = arith.constant 1 : index
    %c0_4 = arith.constant 0 : index
    %c0_5 = arith.constant 0 : index
    %8 = vector.load %arg2[%c1, %c0_4, %c0_5] : memref<11x32x32xf32, #tpu.memory_space<vmem>>, vector<1x32x32xf32>
    %9 = vector.shape_cast %8 : vector<1x32x32xf32> to vector<32x32xf32>
    %c2 = arith.constant 2 : index
    %c0_6 = arith.constant 0 : index
    %c0_7 = arith.constant 0 : index
    %10 = vector.load %arg2[%c2, %c0_6, %c0_7] : memref<11x32x32xf32, #tpu.memory_space<vmem>>, vector<1x32x32xf32>
    %11 = vector.shape_cast %10 : vector<1x32x32xf32> to vector<32x32xf32>
    %c3 = arith.constant 3 : index
    %c0_8 = arith.constant 0 : index
    %c0_9 = arith.constant 0 : index
    %12 = vector.load %arg2[%c3, %c0_8, %c0_9] : memref<11x32x32xf32, #tpu.memory_space<vmem>>, vector<1x32x32xf32>
    %13 = vector.shape_cast %12 : vector<1x32x32xf32> to vector<32x32xf32>
    %c4 = arith.constant 4 : index
    %c0_10 = arith.constant 0 : index
    %c0_11 = arith.constant 0 : index
    %14 = vector.load %arg2[%c4, %c0_10, %c0_11] : memref<11x32x32xf32, #tpu.memory_space<vmem>>, vector<1x32x32xf32>
    %15 = vector.shape_cast %14 : vector<1x32x32xf32> to vector<32x32xf32>
    %c5 = arith.constant 5 : index
    %c0_12 = arith.constant 0 : index
    %c0_13 = arith.constant 0 : index
    %16 = vector.load %arg2[%c5, %c0_12, %c0_13] : memref<11x32x32xf32, #tpu.memory_space<vmem>>, vector<1x32x32xf32>
    %17 = vector.shape_cast %16 : vector<1x32x32xf32> to vector<32x32xf32>
    %c6 = arith.constant 6 : index
    %c0_14 = arith.constant 0 : index
    %c0_15 = arith.constant 0 : index
    %18 = vector.load %arg2[%c6, %c0_14, %c0_15] : memref<11x32x32xf32, #tpu.memory_space<vmem>>, vector<1x32x32xf32>
    %19 = vector.shape_cast %18 : vector<1x32x32xf32> to vector<32x32xf32>
    %c7 = arith.constant 7 : index
    %c0_16 = arith.constant 0 : index
    %c0_17 = arith.constant 0 : index
    %20 = vector.load %arg2[%c7, %c0_16, %c0_17] : memref<11x32x32xf32, #tpu.memory_space<vmem>>, vector<1x32x32xf32>
    %21 = vector.shape_cast %20 : vector<1x32x32xf32> to vector<32x32xf32>
    %c8 = arith.constant 8 : index
    %c0_18 = arith.constant 0 : index
    %c0_19 = arith.constant 0 : index
    %22 = vector.load %arg2[%c8, %c0_18, %c0_19] : memref<11x32x32xf32, #tpu.memory_space<vmem>>, vector<1x32x32xf32>
    %23 = vector.shape_cast %22 : vector<1x32x32xf32> to vector<32x32xf32>
    %c9 = arith.constant 9 : index
    %c0_20 = arith.constant 0 : index
    %c0_21 = arith.constant 0 : index
    %24 = vector.load %arg2[%c9, %c0_20, %c0_21] : memref<11x32x32xf32, #tpu.memory_space<vmem>>, vector<1x32x32xf32>
    %25 = vector.shape_cast %24 : vector<1x32x32xf32> to vector<32x32xf32>
    %c10 = arith.constant 10 : index
    %c0_22 = arith.constant 0 : index
    %c0_23 = arith.constant 0 : index
    %26 = vector.load %arg2[%c10, %c0_22, %c0_23] : memref<11x32x32xf32, #tpu.memory_space<vmem>>, vector<1x32x32xf32>
    %27 = vector.shape_cast %26 : vector<1x32x32xf32> to vector<32x32xf32>
    %c0_24 = arith.constant 0 : index
    %c0_25 = arith.constant 0 : index
    %c0_26 = arith.constant 0 : index
    %28 = vector.load %arg3[%c0_24, %c0_25, %c0_26] : memref<15x32x1xf32, #tpu.memory_space<vmem>>, vector<1x32x1xf32>
    %29 = vector.shape_cast %28 : vector<1x32x1xf32> to vector<32x1xf32>
    %c1_27 = arith.constant 1 : index
    %c0_28 = arith.constant 0 : index
    %c0_29 = arith.constant 0 : index
    %30 = vector.load %arg3[%c1_27, %c0_28, %c0_29] : memref<15x32x1xf32, #tpu.memory_space<vmem>>, vector<1x32x1xf32>
    %31 = vector.shape_cast %30 : vector<1x32x1xf32> to vector<32x1xf32>
    %c2_30 = arith.constant 2 : index
    %c0_31 = arith.constant 0 : index
    %c0_32 = arith.constant 0 : index
    %32 = vector.load %arg3[%c2_30, %c0_31, %c0_32] : memref<15x32x1xf32, #tpu.memory_space<vmem>>, vector<1x32x1xf32>
    %33 = vector.shape_cast %32 : vector<1x32x1xf32> to vector<32x1xf32>
    %c3_33 = arith.constant 3 : index
    %c0_34 = arith.constant 0 : index
    %c0_35 = arith.constant 0 : index
    %34 = vector.load %arg3[%c3_33, %c0_34, %c0_35] : memref<15x32x1xf32, #tpu.memory_space<vmem>>, vector<1x32x1xf32>
    %35 = vector.shape_cast %34 : vector<1x32x1xf32> to vector<32x1xf32>
    %c4_36 = arith.constant 4 : index
    %c0_37 = arith.constant 0 : index
    %c0_38 = arith.constant 0 : index
    %36 = vector.load %arg3[%c4_36, %c0_37, %c0_38] : memref<15x32x1xf32, #tpu.memory_space<vmem>>, vector<1x32x1xf32>
    %37 = vector.shape_cast %36 : vector<1x32x1xf32> to vector<32x1xf32>
    %c5_39 = arith.constant 5 : index
    %c0_40 = arith.constant 0 : index
    %c0_41 = arith.constant 0 : index
    %38 = vector.load %arg3[%c5_39, %c0_40, %c0_41] : memref<15x32x1xf32, #tpu.memory_space<vmem>>, vector<1x32x1xf32>
    %39 = vector.shape_cast %38 : vector<1x32x1xf32> to vector<32x1xf32>
    %c6_42 = arith.constant 6 : index
    %c0_43 = arith.constant 0 : index
    %c0_44 = arith.constant 0 : index
    %40 = vector.load %arg3[%c6_42, %c0_43, %c0_44] : memref<15x32x1xf32, #tpu.memory_space<vmem>>, vector<1x32x1xf32>
    %41 = vector.shape_cast %40 : vector<1x32x1xf32> to vector<32x1xf32>
    %c7_45 = arith.constant 7 : index
    %c0_46 = arith.constant 0 : index
    %c0_47 = arith.constant 0 : index
    %42 = vector.load %arg3[%c7_45, %c0_46, %c0_47] : memref<15x32x1xf32, #tpu.memory_space<vmem>>, vector<1x32x1xf32>
    %43 = vector.shape_cast %42 : vector<1x32x1xf32> to vector<32x1xf32>
    %c8_48 = arith.constant 8 : index
    %c0_49 = arith.constant 0 : index
    %c0_50 = arith.constant 0 : index
    %44 = vector.load %arg3[%c8_48, %c0_49, %c0_50] : memref<15x32x1xf32, #tpu.memory_space<vmem>>, vector<1x32x1xf32>
    %45 = vector.shape_cast %44 : vector<1x32x1xf32> to vector<32x1xf32>
    %c9_51 = arith.constant 9 : index
    %c0_52 = arith.constant 0 : index
    %c0_53 = arith.constant 0 : index
    %46 = vector.load %arg3[%c9_51, %c0_52, %c0_53] : memref<15x32x1xf32, #tpu.memory_space<vmem>>, vector<1x32x1xf32>
    %47 = vector.shape_cast %46 : vector<1x32x1xf32> to vector<32x1xf32>
    %c10_54 = arith.constant 10 : index
    %c0_55 = arith.constant 0 : index
    %c0_56 = arith.constant 0 : index
    %48 = vector.load %arg3[%c10_54, %c0_55, %c0_56] : memref<15x32x1xf32, #tpu.memory_space<vmem>>, vector<1x32x1xf32>
    %49 = vector.shape_cast %48 : vector<1x32x1xf32> to vector<32x1xf32>
    %c11 = arith.constant 11 : index
    %c0_57 = arith.constant 0 : index
    %c0_58 = arith.constant 0 : index
    %50 = vector.load %arg3[%c11, %c0_57, %c0_58] : memref<15x32x1xf32, #tpu.memory_space<vmem>>, vector<1x32x1xf32>
    %51 = vector.shape_cast %50 : vector<1x32x1xf32> to vector<32x1xf32>
    %c12 = arith.constant 12 : index
    %c0_59 = arith.constant 0 : index
    %c0_60 = arith.constant 0 : index
    %52 = vector.load %arg3[%c12, %c0_59, %c0_60] : memref<15x32x1xf32, #tpu.memory_space<vmem>>, vector<1x32x1xf32>
    %53 = vector.shape_cast %52 : vector<1x32x1xf32> to vector<32x1xf32>
    %c13 = arith.constant 13 : index
    %c0_61 = arith.constant 0 : index
    %c0_62 = arith.constant 0 : index
    %54 = vector.load %arg3[%c13, %c0_61, %c0_62] : memref<15x32x1xf32, #tpu.memory_space<vmem>>, vector<1x32x1xf32>
    %55 = vector.shape_cast %54 : vector<1x32x1xf32> to vector<32x1xf32>
    %c14 = arith.constant 14 : index
    %c0_63 = arith.constant 0 : index
    %c0_64 = arith.constant 0 : index
    %56 = vector.load %arg3[%c14, %c0_63, %c0_64] : memref<15x32x1xf32, #tpu.memory_space<vmem>>, vector<1x32x1xf32>
    %57 = vector.shape_cast %56 : vector<1x32x1xf32> to vector<32x1xf32>
    %58 = vector.extract_strided_slice %57 {offsets = [0, 0], sizes = [1, 1], strides = [1, 1]} : vector<32x1xf32> to vector<1x1xf32>
    %59 = vector.broadcast %29 : vector<32x1xf32> to vector<32x768xf32>
    %60 = vector.broadcast %1 : vector<1x768xf32> to vector<32x768xf32>
    %61 = arith.mulf %59, %60 : vector<32x768xf32>
    %62 = vector.broadcast %31 : vector<32x1xf32> to vector<32x768xf32>
    %63 = arith.addf %61, %62 : vector<32x768xf32>
    %64 = math.absf %63 : vector<32x768xf32>
    %cst = arith.constant 0.231641889 : f32
    %65 = vector.broadcast %cst : f32 to vector<32x768xf32>
    %66 = arith.mulf %65, %64 : vector<32x768xf32>
    %cst_65 = arith.constant 1.000000e+00 : f32
    %67 = vector.broadcast %cst_65 : f32 to vector<32x768xf32>
    %68 = arith.addf %67, %66 : vector<32x768xf32>
    %69 = tpu.reciprocal %68 {approx = true} : vector<32x768xf32> -> vector<32x768xf32>
    %70 = arith.mulf %68, %69 : vector<32x768xf32>
    %cst_66 = arith.constant 2.000000e+00 : f32
    %71 = vector.broadcast %cst_66 : f32 to vector<32x768xf32>
    %72 = arith.subf %71, %70 : vector<32x768xf32>
    %73 = arith.mulf %69, %72 : vector<32x768xf32>
    %cst_67 = arith.constant 0.53070271 : f32
    %74 = vector.broadcast %cst_67 : f32 to vector<32x768xf32>
    %75 = arith.mulf %74, %73 : vector<32x768xf32>
    %cst_68 = arith.constant -0.72657603 : f32
    %76 = vector.broadcast %cst_68 : f32 to vector<32x768xf32>
    %77 = arith.addf %75, %76 : vector<32x768xf32>
    %78 = arith.mulf %77, %73 : vector<32x768xf32>
    %cst_69 = arith.constant 0.710706889 : f32
    %79 = vector.broadcast %cst_69 : f32 to vector<32x768xf32>
    %80 = arith.addf %78, %79 : vector<32x768xf32>
    %81 = arith.mulf %80, %73 : vector<32x768xf32>
    %cst_70 = arith.constant -0.142248362 : f32
    %82 = vector.broadcast %cst_70 : f32 to vector<32x768xf32>
    %83 = arith.addf %81, %82 : vector<32x768xf32>
    %84 = arith.mulf %83, %73 : vector<32x768xf32>
    %cst_71 = arith.constant 0.127414793 : f32
    %85 = vector.broadcast %cst_71 : f32 to vector<32x768xf32>
    %86 = arith.addf %84, %85 : vector<32x768xf32>
    %87 = arith.mulf %86, %73 : vector<32x768xf32>
    %88 = arith.mulf %63, %63 : vector<32x768xf32>
    %cst_72 = arith.constant -5.000000e-01 : f32
    %89 = vector.broadcast %cst_72 : f32 to vector<32x768xf32>
    %90 = arith.mulf %89, %88 : vector<32x768xf32>
    %91 = math.exp %90 : vector<32x768xf32>
    %92 = arith.mulf %87, %91 : vector<32x768xf32>
    %cst_73 = arith.constant 0.000000e+00 : f32
    %93 = vector.broadcast %cst_73 : f32 to vector<32x768xf32>
    %94 = arith.maximumf %63, %93 : vector<32x768xf32>
    %95 = arith.mulf %64, %92 : vector<32x768xf32>
    %96 = arith.subf %94, %95 : vector<32x768xf32>
    %cst_74 = arith.constant dense<0.000000e+00> : vector<32x768xf32>
    %97 = tpu.matmul %7, %96, %cst_74 {dimension_numbers = #tpu.dot_dimension_numbers<[1], [0], [0], [1], [0, 0, 1, 1], [], []>} : vector<32x32xf32>, vector<32x768xf32>, vector<32x768xf32> -> vector<32x768xf32>
    %98 = vector.broadcast %33 : vector<32x1xf32> to vector<32x768xf32>
    %99 = arith.addf %97, %98 : vector<32x768xf32>
    %100 = math.absf %99 : vector<32x768xf32>
    %cst_75 = arith.constant 0.231641889 : f32
    %101 = vector.broadcast %cst_75 : f32 to vector<32x768xf32>
    %102 = arith.mulf %101, %100 : vector<32x768xf32>
    %cst_76 = arith.constant 1.000000e+00 : f32
    %103 = vector.broadcast %cst_76 : f32 to vector<32x768xf32>
    %104 = arith.addf %103, %102 : vector<32x768xf32>
    %105 = tpu.reciprocal %104 {approx = true} : vector<32x768xf32> -> vector<32x768xf32>
    %106 = arith.mulf %104, %105 : vector<32x768xf32>
    %cst_77 = arith.constant 2.000000e+00 : f32
    %107 = vector.broadcast %cst_77 : f32 to vector<32x768xf32>
    %108 = arith.subf %107, %106 : vector<32x768xf32>
    %109 = arith.mulf %105, %108 : vector<32x768xf32>
    %cst_78 = arith.constant 0.53070271 : f32
    %110 = vector.broadcast %cst_78 : f32 to vector<32x768xf32>
    %111 = arith.mulf %110, %109 : vector<32x768xf32>
    %cst_79 = arith.constant -0.72657603 : f32
    %112 = vector.broadcast %cst_79 : f32 to vector<32x768xf32>
    %113 = arith.addf %111, %112 : vector<32x768xf32>
    %114 = arith.mulf %113, %109 : vector<32x768xf32>
    %cst_80 = arith.constant 0.710706889 : f32
    %115 = vector.broadcast %cst_80 : f32 to vector<32x768xf32>
    %116 = arith.addf %114, %115 : vector<32x768xf32>
    %117 = arith.mulf %116, %109 : vector<32x768xf32>
    %cst_81 = arith.constant -0.142248362 : f32
    %118 = vector.broadcast %cst_81 : f32 to vector<32x768xf32>
    %119 = arith.addf %117, %118 : vector<32x768xf32>
    %120 = arith.mulf %119, %109 : vector<32x768xf32>
    %cst_82 = arith.constant 0.127414793 : f32
    %121 = vector.broadcast %cst_82 : f32 to vector<32x768xf32>
    %122 = arith.addf %120, %121 : vector<32x768xf32>
    %123 = arith.mulf %122, %109 : vector<32x768xf32>
    %124 = arith.mulf %99, %99 : vector<32x768xf32>
    %cst_83 = arith.constant -5.000000e-01 : f32
    %125 = vector.broadcast %cst_83 : f32 to vector<32x768xf32>
    %126 = arith.mulf %125, %124 : vector<32x768xf32>
    %127 = math.exp %126 : vector<32x768xf32>
    %128 = arith.mulf %123, %127 : vector<32x768xf32>
    %cst_84 = arith.constant 0.000000e+00 : f32
    %129 = vector.broadcast %cst_84 : f32 to vector<32x768xf32>
    %130 = arith.maximumf %99, %129 : vector<32x768xf32>
    %131 = arith.mulf %100, %128 : vector<32x768xf32>
    %132 = arith.subf %130, %131 : vector<32x768xf32>
    %cst_85 = arith.constant dense<0.000000e+00> : vector<32x768xf32>
    %133 = tpu.matmul %9, %132, %cst_85 {dimension_numbers = #tpu.dot_dimension_numbers<[1], [0], [0], [1], [0, 0, 1, 1], [], []>} : vector<32x32xf32>, vector<32x768xf32>, vector<32x768xf32> -> vector<32x768xf32>
    %134 = vector.broadcast %35 : vector<32x1xf32> to vector<32x768xf32>
    %135 = arith.addf %133, %134 : vector<32x768xf32>
    %136 = math.absf %135 : vector<32x768xf32>
    %cst_86 = arith.constant 0.231641889 : f32
    %137 = vector.broadcast %cst_86 : f32 to vector<32x768xf32>
    %138 = arith.mulf %137, %136 : vector<32x768xf32>
    %cst_87 = arith.constant 1.000000e+00 : f32
    %139 = vector.broadcast %cst_87 : f32 to vector<32x768xf32>
    %140 = arith.addf %139, %138 : vector<32x768xf32>
    %141 = tpu.reciprocal %140 {approx = true} : vector<32x768xf32> -> vector<32x768xf32>
    %142 = arith.mulf %140, %141 : vector<32x768xf32>
    %cst_88 = arith.constant 2.000000e+00 : f32
    %143 = vector.broadcast %cst_88 : f32 to vector<32x768xf32>
    %144 = arith.subf %143, %142 : vector<32x768xf32>
    %145 = arith.mulf %141, %144 : vector<32x768xf32>
    %cst_89 = arith.constant 0.53070271 : f32
    %146 = vector.broadcast %cst_89 : f32 to vector<32x768xf32>
    %147 = arith.mulf %146, %145 : vector<32x768xf32>
    %cst_90 = arith.constant -0.72657603 : f32
    %148 = vector.broadcast %cst_90 : f32 to vector<32x768xf32>
    %149 = arith.addf %147, %148 : vector<32x768xf32>
    %150 = arith.mulf %149, %145 : vector<32x768xf32>
    %cst_91 = arith.constant 0.710706889 : f32
    %151 = vector.broadcast %cst_91 : f32 to vector<32x768xf32>
    %152 = arith.addf %150, %151 : vector<32x768xf32>
    %153 = arith.mulf %152, %145 : vector<32x768xf32>
    %cst_92 = arith.constant -0.142248362 : f32
    %154 = vector.broadcast %cst_92 : f32 to vector<32x768xf32>
    %155 = arith.addf %153, %154 : vector<32x768xf32>
    %156 = arith.mulf %155, %145 : vector<32x768xf32>
    %cst_93 = arith.constant 0.127414793 : f32
    %157 = vector.broadcast %cst_93 : f32 to vector<32x768xf32>
    %158 = arith.addf %156, %157 : vector<32x768xf32>
    %159 = arith.mulf %158, %145 : vector<32x768xf32>
    %160 = arith.mulf %135, %135 : vector<32x768xf32>
    %cst_94 = arith.constant -5.000000e-01 : f32
    %161 = vector.broadcast %cst_94 : f32 to vector<32x768xf32>
    %162 = arith.mulf %161, %160 : vector<32x768xf32>
    %163 = math.exp %162 : vector<32x768xf32>
    %164 = arith.mulf %159, %163 : vector<32x768xf32>
    %cst_95 = arith.constant 0.000000e+00 : f32
    %165 = vector.broadcast %cst_95 : f32 to vector<32x768xf32>
    %166 = arith.maximumf %135, %165 : vector<32x768xf32>
    %167 = arith.mulf %136, %164 : vector<32x768xf32>
    %168 = arith.subf %166, %167 : vector<32x768xf32>
    %cst_96 = arith.constant dense<0.000000e+00> : vector<32x768xf32>
    %169 = tpu.matmul %11, %168, %cst_96 {dimension_numbers = #tpu.dot_dimension_numbers<[1], [0], [0], [1], [0, 0, 1, 1], [], []>} : vector<32x32xf32>, vector<32x768xf32>, vector<32x768xf32> -> vector<32x768xf32>
    %170 = vector.broadcast %37 : vector<32x1xf32> to vector<32x768xf32>
    %171 = arith.addf %169, %170 : vector<32x768xf32>
    %172 = vector.broadcast %39 : vector<32x1xf32> to vector<32x768xf32>
    %173 = vector.broadcast %4 : vector<1x768xf32> to vector<32x768xf32>
    %174 = arith.mulf %172, %173 : vector<32x768xf32>
    %175 = vector.broadcast %41 : vector<32x1xf32> to vector<32x768xf32>
    %176 = arith.addf %174, %175 : vector<32x768xf32>
    %177 = math.absf %176 : vector<32x768xf32>
    %cst_97 = arith.constant 0.231641889 : f32
    %178 = vector.broadcast %cst_97 : f32 to vector<32x768xf32>
    %179 = arith.mulf %178, %177 : vector<32x768xf32>
    %cst_98 = arith.constant 1.000000e+00 : f32
    %180 = vector.broadcast %cst_98 : f32 to vector<32x768xf32>
    %181 = arith.addf %180, %179 : vector<32x768xf32>
    %182 = tpu.reciprocal %181 {approx = true} : vector<32x768xf32> -> vector<32x768xf32>
    %183 = arith.mulf %181, %182 : vector<32x768xf32>
    %cst_99 = arith.constant 2.000000e+00 : f32
    %184 = vector.broadcast %cst_99 : f32 to vector<32x768xf32>
    %185 = arith.subf %184, %183 : vector<32x768xf32>
    %186 = arith.mulf %182, %185 : vector<32x768xf32>
    %cst_100 = arith.constant 0.53070271 : f32
    %187 = vector.broadcast %cst_100 : f32 to vector<32x768xf32>
    %188 = arith.mulf %187, %186 : vector<32x768xf32>
    %cst_101 = arith.constant -0.72657603 : f32
    %189 = vector.broadcast %cst_101 : f32 to vector<32x768xf32>
    %190 = arith.addf %188, %189 : vector<32x768xf32>
    %191 = arith.mulf %190, %186 : vector<32x768xf32>
    %cst_102 = arith.constant 0.710706889 : f32
    %192 = vector.broadcast %cst_102 : f32 to vector<32x768xf32>
    %193 = arith.addf %191, %192 : vector<32x768xf32>
    %194 = arith.mulf %193, %186 : vector<32x768xf32>
    %cst_103 = arith.constant -0.142248362 : f32
    %195 = vector.broadcast %cst_103 : f32 to vector<32x768xf32>
    %196 = arith.addf %194, %195 : vector<32x768xf32>
    %197 = arith.mulf %196, %186 : vector<32x768xf32>
    %cst_104 = arith.constant 0.127414793 : f32
    %198 = vector.broadcast %cst_104 : f32 to vector<32x768xf32>
    %199 = arith.addf %197, %198 : vector<32x768xf32>
    %200 = arith.mulf %199, %186 : vector<32x768xf32>
    %201 = arith.mulf %176, %176 : vector<32x768xf32>
    %cst_105 = arith.constant -5.000000e-01 : f32
    %202 = vector.broadcast %cst_105 : f32 to vector<32x768xf32>
    %203 = arith.mulf %202, %201 : vector<32x768xf32>
    %204 = math.exp %203 : vector<32x768xf32>
    %205 = arith.mulf %200, %204 : vector<32x768xf32>
    %cst_106 = arith.constant 0.000000e+00 : f32
    %206 = vector.broadcast %cst_106 : f32 to vector<32x768xf32>
    %207 = arith.maximumf %176, %206 : vector<32x768xf32>
    %208 = arith.mulf %177, %205 : vector<32x768xf32>
    %209 = arith.subf %207, %208 : vector<32x768xf32>
    %cst_107 = arith.constant dense<0.000000e+00> : vector<32x768xf32>
    %210 = tpu.matmul %13, %209, %cst_107 {dimension_numbers = #tpu.dot_dimension_numbers<[1], [0], [0], [1], [0, 0, 1, 1], [], []>} : vector<32x32xf32>, vector<32x768xf32>, vector<32x768xf32> -> vector<32x768xf32>
    %211 = vector.broadcast %43 : vector<32x1xf32> to vector<32x768xf32>
    %212 = arith.addf %210, %211 : vector<32x768xf32>
    %213 = tpu.iota {dimensions = array<i32: 0>} : vector<32x768xi32>
    %214 = vector.broadcast %3 : vector<1x768xi32> to vector<32x768xi32>
    %215 = arith.cmpi eq, %213, %214 : vector<32x768xi32>
    %216 = arith.extui %215 : vector<32x768xi1> to vector<32x768xi32>
    %217 = arith.sitofp %216 : vector<32x768xi32> to vector<32x768xf32>
    %cst_108 = arith.constant 1.000000e+00 : f32
    %218 = vector.broadcast %cst_108 : f32 to vector<1x768xf32>
    %219 = arith.subf %5, %218 : vector<1x768xf32>
    %220 = vector.broadcast %219 : vector<1x768xf32> to vector<32x768xf32>
    %221 = arith.mulf %217, %220 : vector<32x768xf32>
    %cst_109 = arith.constant dense<0.000000e+00> : vector<32x768xf32>
    %222 = tpu.matmul %15, %221, %cst_109 {dimension_numbers = #tpu.dot_dimension_numbers<[1], [0], [0], [1], [0, 0, 1, 1], [], []>} : vector<32x32xf32>, vector<32x768xf32>, vector<32x768xf32> -> vector<32x768xf32>
    %223 = vector.broadcast %45 : vector<32x1xf32> to vector<32x768xf32>
    %224 = arith.addf %222, %223 : vector<32x768xf32>
    %225 = math.absf %224 : vector<32x768xf32>
    %cst_110 = arith.constant 0.231641889 : f32
    %226 = vector.broadcast %cst_110 : f32 to vector<32x768xf32>
    %227 = arith.mulf %226, %225 : vector<32x768xf32>
    %cst_111 = arith.constant 1.000000e+00 : f32
    %228 = vector.broadcast %cst_111 : f32 to vector<32x768xf32>
    %229 = arith.addf %228, %227 : vector<32x768xf32>
    %230 = tpu.reciprocal %229 {approx = true} : vector<32x768xf32> -> vector<32x768xf32>
    %231 = arith.mulf %229, %230 : vector<32x768xf32>
    %cst_112 = arith.constant 2.000000e+00 : f32
    %232 = vector.broadcast %cst_112 : f32 to vector<32x768xf32>
    %233 = arith.subf %232, %231 : vector<32x768xf32>
    %234 = arith.mulf %230, %233 : vector<32x768xf32>
    %cst_113 = arith.constant 0.53070271 : f32
    %235 = vector.broadcast %cst_113 : f32 to vector<32x768xf32>
    %236 = arith.mulf %235, %234 : vector<32x768xf32>
    %cst_114 = arith.constant -0.72657603 : f32
    %237 = vector.broadcast %cst_114 : f32 to vector<32x768xf32>
    %238 = arith.addf %236, %237 : vector<32x768xf32>
    %239 = arith.mulf %238, %234 : vector<32x768xf32>
    %cst_115 = arith.constant 0.710706889 : f32
    %240 = vector.broadcast %cst_115 : f32 to vector<32x768xf32>
    %241 = arith.addf %239, %240 : vector<32x768xf32>
    %242 = arith.mulf %241, %234 : vector<32x768xf32>
    %cst_116 = arith.constant -0.142248362 : f32
    %243 = vector.broadcast %cst_116 : f32 to vector<32x768xf32>
    %244 = arith.addf %242, %243 : vector<32x768xf32>
    %245 = arith.mulf %244, %234 : vector<32x768xf32>
    %cst_117 = arith.constant 0.127414793 : f32
    %246 = vector.broadcast %cst_117 : f32 to vector<32x768xf32>
    %247 = arith.addf %245, %246 : vector<32x768xf32>
    %248 = arith.mulf %247, %234 : vector<32x768xf32>
    %249 = arith.mulf %224, %224 : vector<32x768xf32>
    %cst_118 = arith.constant -5.000000e-01 : f32
    %250 = vector.broadcast %cst_118 : f32 to vector<32x768xf32>
    %251 = arith.mulf %250, %249 : vector<32x768xf32>
    %252 = math.exp %251 : vector<32x768xf32>
    %253 = arith.mulf %248, %252 : vector<32x768xf32>
    %cst_119 = arith.constant 0.000000e+00 : f32
    %254 = vector.broadcast %cst_119 : f32 to vector<32x768xf32>
    %255 = arith.maximumf %224, %254 : vector<32x768xf32>
    %256 = arith.mulf %225, %253 : vector<32x768xf32>
    %257 = arith.subf %255, %256 : vector<32x768xf32>
    %cst_120 = arith.constant dense<0.000000e+00> : vector<32x768xf32>
    %258 = tpu.matmul %17, %257, %cst_120 {dimension_numbers = #tpu.dot_dimension_numbers<[1], [0], [0], [1], [0, 0, 1, 1], [], []>} : vector<32x32xf32>, vector<32x768xf32>, vector<32x768xf32> -> vector<32x768xf32>
    %259 = vector.broadcast %47 : vector<32x1xf32> to vector<32x768xf32>
    %260 = arith.addf %258, %259 : vector<32x768xf32>
    %cst_121 = arith.constant dense<0.000000e+00> : vector<32x768xf32>
    %261 = tpu.matmul %19, %171, %cst_121 {dimension_numbers = #tpu.dot_dimension_numbers<[1], [0], [0], [1], [0, 0, 1, 1], [], []>} : vector<32x32xf32>, vector<32x768xf32>, vector<32x768xf32> -> vector<32x768xf32>
    %cst_122 = arith.constant dense<0.000000e+00> : vector<32x768xf32>
    %262 = tpu.matmul %21, %212, %cst_122 {dimension_numbers = #tpu.dot_dimension_numbers<[1], [0], [0], [1], [0, 0, 1, 1], [], []>} : vector<32x32xf32>, vector<32x768xf32>, vector<32x768xf32> -> vector<32x768xf32>
    %263 = arith.addf %261, %262 : vector<32x768xf32>
    %cst_123 = arith.constant dense<0.000000e+00> : vector<32x768xf32>
    %264 = tpu.matmul %23, %260, %cst_123 {dimension_numbers = #tpu.dot_dimension_numbers<[1], [0], [0], [1], [0, 0, 1, 1], [], []>} : vector<32x32xf32>, vector<32x768xf32>, vector<32x768xf32> -> vector<32x768xf32>
    %265 = arith.addf %263, %264 : vector<32x768xf32>
    %266 = vector.broadcast %49 : vector<32x1xf32> to vector<32x768xf32>
    %267 = arith.addf %265, %266 : vector<32x768xf32>
    %268 = math.absf %267 : vector<32x768xf32>
    %cst_124 = arith.constant 0.231641889 : f32
    %269 = vector.broadcast %cst_124 : f32 to vector<32x768xf32>
    %270 = arith.mulf %269, %268 : vector<32x768xf32>
    %cst_125 = arith.constant 1.000000e+00 : f32
    %271 = vector.broadcast %cst_125 : f32 to vector<32x768xf32>
    %272 = arith.addf %271, %270 : vector<32x768xf32>
    %273 = tpu.reciprocal %272 {approx = true} : vector<32x768xf32> -> vector<32x768xf32>
    %274 = arith.mulf %272, %273 : vector<32x768xf32>
    %cst_126 = arith.constant 2.000000e+00 : f32
    %275 = vector.broadcast %cst_126 : f32 to vector<32x768xf32>
    %276 = arith.subf %275, %274 : vector<32x768xf32>
    %277 = arith.mulf %273, %276 : vector<32x768xf32>
    %cst_127 = arith.constant 0.53070271 : f32
    %278 = vector.broadcast %cst_127 : f32 to vector<32x768xf32>
    %279 = arith.mulf %278, %277 : vector<32x768xf32>
    %cst_128 = arith.constant -0.72657603 : f32
    %280 = vector.broadcast %cst_128 : f32 to vector<32x768xf32>
    %281 = arith.addf %279, %280 : vector<32x768xf32>
    %282 = arith.mulf %281, %277 : vector<32x768xf32>
    %cst_129 = arith.constant 0.710706889 : f32
    %283 = vector.broadcast %cst_129 : f32 to vector<32x768xf32>
    %284 = arith.addf %282, %283 : vector<32x768xf32>
    %285 = arith.mulf %284, %277 : vector<32x768xf32>
    %cst_130 = arith.constant -0.142248362 : f32
    %286 = vector.broadcast %cst_130 : f32 to vector<32x768xf32>
    %287 = arith.addf %285, %286 : vector<32x768xf32>
    %288 = arith.mulf %287, %277 : vector<32x768xf32>
    %cst_131 = arith.constant 0.127414793 : f32
    %289 = vector.broadcast %cst_131 : f32 to vector<32x768xf32>
    %290 = arith.addf %288, %289 : vector<32x768xf32>
    %291 = arith.mulf %290, %277 : vector<32x768xf32>
    %292 = arith.mulf %267, %267 : vector<32x768xf32>
    %cst_132 = arith.constant -5.000000e-01 : f32
    %293 = vector.broadcast %cst_132 : f32 to vector<32x768xf32>
    %294 = arith.mulf %293, %292 : vector<32x768xf32>
    %295 = math.exp %294 : vector<32x768xf32>
    %296 = arith.mulf %291, %295 : vector<32x768xf32>
    %cst_133 = arith.constant 0.000000e+00 : f32
    %297 = vector.broadcast %cst_133 : f32 to vector<32x768xf32>
    %298 = arith.maximumf %267, %297 : vector<32x768xf32>
    %299 = arith.mulf %268, %296 : vector<32x768xf32>
    %300 = arith.subf %298, %299 : vector<32x768xf32>
    %cst_134 = arith.constant dense<0.000000e+00> : vector<32x768xf32>
    %301 = tpu.matmul %25, %300, %cst_134 {dimension_numbers = #tpu.dot_dimension_numbers<[1], [0], [0], [1], [0, 0, 1, 1], [], []>} : vector<32x32xf32>, vector<32x768xf32>, vector<32x768xf32> -> vector<32x768xf32>
    %302 = vector.broadcast %51 : vector<32x1xf32> to vector<32x768xf32>
    %303 = arith.addf %301, %302 : vector<32x768xf32>
    %304 = math.absf %303 : vector<32x768xf32>
    %cst_135 = arith.constant 0.231641889 : f32
    %305 = vector.broadcast %cst_135 : f32 to vector<32x768xf32>
    %306 = arith.mulf %305, %304 : vector<32x768xf32>
    %cst_136 = arith.constant 1.000000e+00 : f32
    %307 = vector.broadcast %cst_136 : f32 to vector<32x768xf32>
    %308 = arith.addf %307, %306 : vector<32x768xf32>
    %309 = tpu.reciprocal %308 {approx = true} : vector<32x768xf32> -> vector<32x768xf32>
    %310 = arith.mulf %308, %309 : vector<32x768xf32>
    %cst_137 = arith.constant 2.000000e+00 : f32
    %311 = vector.broadcast %cst_137 : f32 to vector<32x768xf32>
    %312 = arith.subf %311, %310 : vector<32x768xf32>
    %313 = arith.mulf %309, %312 : vector<32x768xf32>
    %cst_138 = arith.constant 0.53070271 : f32
    %314 = vector.broadcast %cst_138 : f32 to vector<32x768xf32>
    %315 = arith.mulf %314, %313 : vector<32x768xf32>
    %cst_139 = arith.constant -0.72657603 : f32
    %316 = vector.broadcast %cst_139 : f32 to vector<32x768xf32>
    %317 = arith.addf %315, %316 : vector<32x768xf32>
    %318 = arith.mulf %317, %313 : vector<32x768xf32>
    %cst_140 = arith.constant 0.710706889 : f32
    %319 = vector.broadcast %cst_140 : f32 to vector<32x768xf32>
    %320 = arith.addf %318, %319 : vector<32x768xf32>
    %321 = arith.mulf %320, %313 : vector<32x768xf32>
    %cst_141 = arith.constant -0.142248362 : f32
    %322 = vector.broadcast %cst_141 : f32 to vector<32x768xf32>
    %323 = arith.addf %321, %322 : vector<32x768xf32>
    %324 = arith.mulf %323, %313 : vector<32x768xf32>
    %cst_142 = arith.constant 0.127414793 : f32
    %325 = vector.broadcast %cst_142 : f32 to vector<32x768xf32>
    %326 = arith.addf %324, %325 : vector<32x768xf32>
    %327 = arith.mulf %326, %313 : vector<32x768xf32>
    %328 = arith.mulf %303, %303 : vector<32x768xf32>
    %cst_143 = arith.constant -5.000000e-01 : f32
    %329 = vector.broadcast %cst_143 : f32 to vector<32x768xf32>
    %330 = arith.mulf %329, %328 : vector<32x768xf32>
    %331 = math.exp %330 : vector<32x768xf32>
    %332 = arith.mulf %327, %331 : vector<32x768xf32>
    %cst_144 = arith.constant 0.000000e+00 : f32
    %333 = vector.broadcast %cst_144 : f32 to vector<32x768xf32>
    %334 = arith.maximumf %303, %333 : vector<32x768xf32>
    %335 = arith.mulf %304, %332 : vector<32x768xf32>
    %336 = arith.subf %334, %335 : vector<32x768xf32>
    %cst_145 = arith.constant dense<0.000000e+00> : vector<32x768xf32>
    %337 = tpu.matmul %27, %336, %cst_145 {dimension_numbers = #tpu.dot_dimension_numbers<[1], [0], [0], [1], [0, 0, 1, 1], [], []>} : vector<32x32xf32>, vector<32x768xf32>, vector<32x768xf32> -> vector<32x768xf32>
    %338 = vector.broadcast %53 : vector<32x1xf32> to vector<32x768xf32>
    %339 = arith.addf %337, %338 : vector<32x768xf32>
    %340 = math.absf %339 : vector<32x768xf32>
    %cst_146 = arith.constant 0.231641889 : f32
    %341 = vector.broadcast %cst_146 : f32 to vector<32x768xf32>
    %342 = arith.mulf %341, %340 : vector<32x768xf32>
    %cst_147 = arith.constant 1.000000e+00 : f32
    %343 = vector.broadcast %cst_147 : f32 to vector<32x768xf32>
    %344 = arith.addf %343, %342 : vector<32x768xf32>
    %345 = tpu.reciprocal %344 {approx = true} : vector<32x768xf32> -> vector<32x768xf32>
    %346 = arith.mulf %344, %345 : vector<32x768xf32>
    %cst_148 = arith.constant 2.000000e+00 : f32
    %347 = vector.broadcast %cst_148 : f32 to vector<32x768xf32>
    %348 = arith.subf %347, %346 : vector<32x768xf32>
    %349 = arith.mulf %345, %348 : vector<32x768xf32>
    %cst_149 = arith.constant 0.53070271 : f32
    %350 = vector.broadcast %cst_149 : f32 to vector<32x768xf32>
    %351 = arith.mulf %350, %349 : vector<32x768xf32>
    %cst_150 = arith.constant -0.72657603 : f32
    %352 = vector.broadcast %cst_150 : f32 to vector<32x768xf32>
    %353 = arith.addf %351, %352 : vector<32x768xf32>
    %354 = arith.mulf %353, %349 : vector<32x768xf32>
    %cst_151 = arith.constant 0.710706889 : f32
    %355 = vector.broadcast %cst_151 : f32 to vector<32x768xf32>
    %356 = arith.addf %354, %355 : vector<32x768xf32>
    %357 = arith.mulf %356, %349 : vector<32x768xf32>
    %cst_152 = arith.constant -0.142248362 : f32
    %358 = vector.broadcast %cst_152 : f32 to vector<32x768xf32>
    %359 = arith.addf %357, %358 : vector<32x768xf32>
    %360 = arith.mulf %359, %349 : vector<32x768xf32>
    %cst_153 = arith.constant 0.127414793 : f32
    %361 = vector.broadcast %cst_153 : f32 to vector<32x768xf32>
    %362 = arith.addf %360, %361 : vector<32x768xf32>
    %363 = arith.mulf %362, %349 : vector<32x768xf32>
    %364 = arith.mulf %339, %339 : vector<32x768xf32>
    %cst_154 = arith.constant -5.000000e-01 : f32
    %365 = vector.broadcast %cst_154 : f32 to vector<32x768xf32>
    %366 = arith.mulf %365, %364 : vector<32x768xf32>
    %367 = math.exp %366 : vector<32x768xf32>
    %368 = arith.mulf %363, %367 : vector<32x768xf32>
    %cst_155 = arith.constant 0.000000e+00 : f32
    %369 = vector.broadcast %cst_155 : f32 to vector<32x768xf32>
    %370 = arith.maximumf %339, %369 : vector<32x768xf32>
    %371 = arith.mulf %340, %368 : vector<32x768xf32>
    %372 = arith.subf %370, %371 : vector<32x768xf32>
    %373 = vector.broadcast %55 : vector<32x1xf32> to vector<32x768xf32>
    %374 = arith.mulf %372, %373 : vector<32x768xf32>
    %cst_156 = arith.constant dense<0.000000e+00> : vector<768xf32>
    %375 = vector.multi_reduction <add>, %374, %cst_156 [0] : vector<32x768xf32> to vector<768xf32>
    %376 = vector.shape_cast %375 : vector<768xf32> to vector<1x768xf32>
    %377 = vector.broadcast %58 : vector<1x1xf32> to vector<1x768xf32>
    %378 = arith.addf %376, %377 : vector<1x768xf32>
    %c0_157 = arith.constant 0 : index
    %c0_158 = arith.constant 0 : index
    %379 = vector.load %arg4[%c0_157, %c0_158] : memref<1x768xf32, #tpu.memory_space<vmem>>, vector<1x768xf32>
    tpu.vector_store %arg4[%c0_157, %c0_158], %378 {strides = array<i32>} : memref<1x768xf32, #tpu.memory_space<vmem>>, vector<1x768xf32>,
    return
  }
  func.func @transform_0(%arg0: i32) -> (i32, i32) {
    %c0_i32 = arith.constant 0 : i32
    %c0_i32_0 = arith.constant 0 : i32
    return %c0_i32, %arg0 : i32, i32
  }
  func.func @transform_1(%arg0: i32) -> (i32, i32, i32) {
    %c0_i32 = arith.constant 0 : i32
    %c0_i32_0 = arith.constant 0 : i32
    %c0_i32_1 = arith.constant 0 : i32
    %c0_i32_2 = arith.constant 0 : i32
    return %c0_i32, %c0_i32_0, %c0_i32_1 : i32, i32, i32
  }
  func.func @transform_2(%arg0: i32) -> (i32, i32, i32) {
    %c0_i32 = arith.constant 0 : i32
    %c0_i32_0 = arith.constant 0 : i32
    %c0_i32_1 = arith.constant 0 : i32
    %c0_i32_2 = arith.constant 0 : i32
    return %c0_i32, %c0_i32_0, %c0_i32_1 : i32, i32, i32
  }
  func.func @transform_3(%arg0: i32) -> (i32, i32) {
    %c0_i32 = arith.constant 0 : i32
    %c0_i32_0 = arith.constant 0 : i32
    return %c0_i32, %arg0 : i32, i32
  }
}

</mosaic_0001>

<bundles_post_ra>
// kernel: tpu_custom_call.1
= control target key start
LH: loop header
LB: loop body
LE: loop exit
PB: predicated region body
PF: predicated region fallthrough
CT: control target
= control target key end

     0   :  { %v10105_v2 = vmov 0   ;;  %s16502_s0 = inlined_call_operand.vmem [shape: f32[4,768], index: 0, kind: input, shape index: {}]   ;;  %s16503_s1 = inlined_call_operand.vmem [shape: f32[11,32,32], index: 1, kind: input, shape index: {}]   ;;  %s16504_s2 = inlined_call_operand.vmem [shape: f32[15,32,1], index: 2, kind: input, shape index: {}]   ;;  %s16505_s3 = inlined_call_operand.hbm [shape: f32[1,768], index: 3, kind: output, shape index: {}]  }
   0x1   :  { %v8763_v0 = vld [vmem:[%s16504_s2 + $0x20] sm:$0xff]  ;;  %9302 = vset.pattern.permute.xlu1 %v10105_v2  ;;  %9301 = vset.pattern.permute.xlu0 %v10105_v2  ;;  %v8764_v3 = vld [vmem:[%s16504_s2 + $0x28] sm:$0xff]  ;;  %v78_v5 = vld [vmem:[%s16504_s2 + $0x18] sm:$0xff] }
   0x2   :  { %v75_v1 = vld [vmem:[%s16504_s2] sm:$0xff]  ;;  %249 = vperm.xlu1 %9302, %v8763_v0   ;;  %v76_v4 = vld [vmem:[%s16504_s2 + $0x8] sm:$0xff]  ;;  %v77_v6 = vld [vmem:[%s16504_s2 + $0x10] sm:$0xff] }
   0x3   :  { %148 = vperm.xlu0 %9301, %v75_v1   ;;  %v8766_v7 = vld [vmem:[%s16504_s2 + $0x38] sm:$0xff]  ;;  %v8765_v8 = vld [vmem:[%s16504_s2 + $0x30] sm:$0xff]  ;;  %v8768_v9 = vld [vmem:[%s16504_s2 + $0x48] sm:$0xff] }
   0x4   :  { %v8767_v10 = vld [vmem:[%s16504_s2 + $0x40] sm:$0xff]  ;;  %v8770_v11 = vld [vmem:[%s16504_s2 + $0x58] sm:$0xff]  ;;  %v8769_v12 = vld [vmem:[%s16504_s2 + $0x50] sm:$0xff] }
   0x6   :  { %254 = vperm.xlu1 %9302, %v8764_v3  }
   0x7   :  { %153 = vperm.xlu0 %9301, %v76_v4  }
   0xa   :  { %163 = vperm.xlu1 %9302, %v78_v5  }
   0xb   :  { %158 = vperm.xlu0 %9301, %v77_v6  }
   0xe   :  { %264 = vperm.xlu1 %9302, %v8766_v7  }
   0xf   :  { %259 = vperm.xlu0 %9301, %v8765_v8  }
  0x12   :  { %874 = vperm.xlu1 %9302, %v8768_v9  }
  0x13   :  { %869 = vperm.xlu0 %9301, %v8767_v10  }
  0x14   :  { %8 = vsyncpa [#allocation3], 0  ;;  %v8772_v13 = vld [vmem:[%s16504_s2 + $0x68] sm:$0xff]  ;;  %v8771_v14 = vld [vmem:[%s16504_s2 + $0x60] sm:$0xff]  ;;  %v16506_v57 = vlaneseq  ;;  %vm887_vm0 = vcmask 261120  }
  0x15   :  { %v8774_v15 = vld [vmem:[%s16504_s2 + $0x78] sm:$0xff]  ;;  %v8773_v16 = vld [vmem:[%s16504_s2 + $0x70] sm:$0xff]  ;;  %v8780_v17 = vld [vmem:[%s16504_s2 + $0xa8] sm:$0xff] }
  0x16   :  { %884 = vperm.xlu1 %9302, %v8770_v11   ;;  %v8779_v18 = vld [vmem:[%s16504_s2 + $0xa0] sm:$0xff]  ;;  %v8784_v19 = vld [vmem:[%s16504_s2 + $0xc8] sm:$0xff]  ;;  %v8782_v21 = vld [vmem:[%s16504_s2 + $0xb8] sm:$0xff]  ;;  %v10301_v59 = vshrl.u32 %v16506_v57, 7 }
  0x17   :  { %879 = vperm.xlu0 %9301, %v8769_v12   ;;  %v8783_v20 = vld [vmem:[%s16504_s2 + $0xc0] sm:$0xff]  ;;  %v8781_v22 = vld [vmem:[%s16504_s2 + $0xb0] sm:$0xff]  ;;  %v8786_v23 = vld [vmem:[%s16504_s2 + $0xd8] sm:$0xff] }
  0x18   :  { %v8785_v24 = vld [vmem:[%s16504_s2 + $0xd0] sm:$0xff]  ;;  %v8792_v25 = vld [vmem:[%s16504_s2 + $0x108] sm:$0xff]  ;;  %v8791_v26 = vld [vmem:[%s16504_s2 + $0x100] sm:$0xff]  ;;  %16801 = vst [vmem:[#allocation5_spill] sm:$0xff] %v10301_v59  ;;  %v171_v60 = vsub.s32 0, %v10301_v59  ;;  %v175_v8 = vsub.s32 4, %v10301_v59 }
  0x19   :  { %v8794_v27 = vld [vmem:[%s16504_s2 + $0x118] sm:$0xff]  ;;  %v8793_v28 = vld [vmem:[%s16504_s2 + $0x110] sm:$0xff]  ;;  %v8788_v29 = vld [vmem:[%s16504_s2 + $0xe8] sm:$0xff] }
  0x1a   :  { %1750 = vperm.xlu1 %9302, %v8772_v13   ;;  %v8787_v30 = vld [vmem:[%s16504_s2 + $0xe0] sm:$0xff]  ;;  %v8790_v31 = vld [vmem:[%s16504_s2 + $0xf8] sm:$0xff]  ;;  %v8789_v32 = vld [vmem:[%s16504_s2 + $0xf0] sm:$0xff] }
  0x1b   :  { %1745 = vperm.xlu0 %9301, %v8771_v14   ;;  %v8776_v33 = vld [vmem:[%s16504_s2 + $0x88] sm:$0xff]  ;;  %v8775_v34 = vld [vmem:[%s16504_s2 + $0x80] sm:$0xff]  ;;  %v8778_v35 = vld [vmem:[%s16504_s2 + $0x98] sm:$0xff] }
  0x1c   :  { %v8777_v36 = vld [vmem:[%s16504_s2 + $0x90] sm:$0xff]  ;;  %v8796_v37 = vld [vmem:[%s16504_s2 + $0x128] sm:$0xff]  ;;  %v8795_v38 = vld [vmem:[%s16504_s2 + $0x120] sm:$0xff] }
  0x1d   :  { %v8798_v39 = vld [vmem:[%s16504_s2 + $0x138] sm:$0xff]  ;;  %v8797_v40 = vld [vmem:[%s16504_s2 + $0x130] sm:$0xff]  ;;  %v8800_v41 = vld [vmem:[%s16504_s2 + $0x148] sm:$0xff] }
  0x1e   :  { %1760 = vperm.xlu1 %9302, %v8774_v15   ;;  %v8799_v42 = vld [vmem:[%s16504_s2 + $0x140] sm:$0xff]  ;;  %v8802_v43 = vld [vmem:[%s16504_s2 + $0x158] sm:$0xff]  ;;  %v8801_v44 = vld [vmem:[%s16504_s2 + $0x150] sm:$0xff] }
  0x1f   :  { %1755 = vperm.xlu0 %9301, %v8773_v16   ;;  %v8804_v45 = vld [vmem:[%s16504_s2 + $0x168] sm:$0xff]  ;;  %v8803_v46 = vld [vmem:[%s16504_s2 + $0x160] sm:$0xff]  ;;  %v8806_v47 = vld [vmem:[%s16504_s2 + $0x178] sm:$0xff] }
  0x20   :  { %v8805_v48 = vld [vmem:[%s16504_s2 + $0x170] sm:$0xff]  ;;  %v8808_v49 = vld [vmem:[%s16504_s2 + $0x188] sm:$0xff]  ;;  %v8807_v50 = vld [vmem:[%s16504_s2 + $0x180] sm:$0xff] }
  0x21   :  { %v8810_v51 = vld [vmem:[%s16504_s2 + $0x198] sm:$0xff]  ;;  %v8809_v52 = vld [vmem:[%s16504_s2 + $0x190] sm:$0xff]  ;;  %v8812_v53 = vld [vmem:[%s16504_s2 + $0x1a8] sm:$0xff] }
  0x22   :  { %2924 = vperm.xlu1 %9302, %v8780_v17   ;;  %v8811_v54 = vld [vmem:[%s16504_s2 + $0x1a0] sm:$0xff]  ;;  %v8814_v55 = vld [vmem:[%s16504_s2 + $0x1b8] sm:$0xff]  ;;  %v8813_v56 = vld [vmem:[%s16504_s2 + $0x1b0] sm:$0xff] }
  0x23   :  { %2919 = vperm.xlu0 %9301, %v8779_v18   ;;  %v8815_v58 = vld [vmem:[%s16504_s2 + $0x1c0] sm:$0xff]  ;;  %v16_v61 = vld [vmem:[%s16502_s0 + $0x8] sm:$0xff]  ;;  %v17_v62 = vld [vmem:[%s16502_s0 + $0x10] sm:$0xff] }
  0x24   :  { %v180_v63 = vrot.slane %v16_v61, %v171_v60  ;;  %v188_v0 = vrot.slane %v17_v62, %v171_v60  ;;  %v192_v13 = vrot.slane %v17_v62, %v175_v8 }
  0x26   :  { %3022 = vperm.xlu1 %9302, %v8784_v19   ;;  %v210_v1 = vrot.slane %v180_v63, %v171_v60  ;;  %v218_v2 = vrot.slane %v188_v0, %v171_v60  ;;  %v10326_v17 = vrot.slane %v192_v13, %v171_v60 }
  0x27   :  { %3017 = vperm.xlu0 %9301, %v8783_v20  }
  0x2a   :  { %2934 = vperm.xlu1 %9302, %v8782_v21  }
  0x2b   :  { %2929 = vperm.xlu0 %9301, %v8781_v22  }
  0x2e   :  { %3032 = vperm.xlu1 %9302, %v8786_v23  }
  0x2f   :  { %3027 = vperm.xlu0 %9301, %v8785_v24  }
  0x32   :  { %4150 = vperm.xlu1 %9302, %v8792_v25  }
  0x33   :  { %4145 = vperm.xlu0 %9301, %v8791_v26  }
  0x36   :  { %4160 = vperm.xlu1 %9302, %v8794_v27  }
  0x37   :  { %4155 = vperm.xlu0 %9301, %v8793_v28  }
  0x3a   :  { %3642 = vperm.xlu1 %9302, %v8788_v29  }
  0x3b   :  { %3637 = vperm.xlu0 %9301, %v8787_v30  }
  0x3e   :  { %3652 = vperm.xlu1 %9302, %v8790_v31   ;;  %v15_v31 = vld [vmem:[%s16502_s0] sm:$0xff] }
  0x3f   :  { %3647 = vperm.xlu0 %9301, %v8789_v32   ;;  %v176_v32 = vrot.slane %v15_v31, %v175_v8 }
  0x42   :  { %2625 = vperm.xlu1 %9302, %v8776_v33   ;;  %v206_v33 = vrot.slane %v176_v32, %v171_v60 }
  0x43   :  { %2620 = vperm.xlu0 %9301, %v8775_v34  }
  0x46   :  { %2635 = vperm.xlu1 %9302, %v8778_v35  }
  0x47   :  { %2630 = vperm.xlu0 %9301, %v8777_v36   ;;  %v172_v36 = vrot.slane %v15_v31, %v171_v60 }
  0x4a   :  { %5025 = vperm.xlu1 %9302, %v8796_v37   ;;  %v184_v37 = vrot.slane %v16_v61, %v175_v8 }
  0x4b   :  { %5020 = vperm.xlu0 %9301, %v8795_v38  }
  0x4e   :  { %5035 = vperm.xlu1 %9302, %v8798_v39  }
  0x4f   :  { %5030 = vperm.xlu0 %9301, %v8797_v40   ;;  %v202_v40 = vrot.slane %v172_v36, %v171_v60 }
  0x52   :  { %6185 = vperm.xlu1 %9302, %v8800_v41   ;;  %v214_v41 = vrot.slane %v184_v37, %v171_v60 }
  0x53   :  { %6180 = vperm.xlu0 %9301, %v8799_v42  }
  0x56   :  { %6195 = vperm.xlu1 %9302, %v8802_v43  }
  0x57   :  { %6190 = vperm.xlu0 %9301, %v8801_v44  }
  0x5a   :  { %6805 = vperm.xlu1 %9302, %v8804_v45  }
  0x5b   :  { %6800 = vperm.xlu0 %9301, %v8803_v46  }
  0x5e   :  { %6815 = vperm.xlu1 %9302, %v8806_v47  }
  0x5f   :  { %6810 = vperm.xlu0 %9301, %v8805_v48  }
  0x62   :  { %7680 = vperm.xlu1 %9302, %v8808_v49  }
  0x63   :  { %7675 = vperm.xlu0 %9301, %v8807_v50  }
  0x66   :  { %7690 = vperm.xlu1 %9302, %v8810_v51  }
  0x67   :  { %7685 = vperm.xlu0 %9301, %v8809_v52  }
  0x6a   :  { %8555 = vperm.xlu1 %9302, %v8812_v53  }
  0x6b   :  { %8550 = vperm.xlu0 %9301, %v8811_v54  }
  0x6e   :  { %8565 = vperm.xlu1 %9302, %v8814_v55  }
  0x6f   :  { %8560 = vperm.xlu0 %9301, %v8813_v56  }
  0x73   :  { %8648 = vperm.xlu0 %9301, %v8815_v58  }
  0x81   :  { %v10310_v3 = vpop.permute.xlu1 %249 }
  0x82   :  { %v149_v4 = vpop.permute.xlu0 %148 }
  0x83   :  { %v225_v5 = vmul.f32 %v210_v1, %v149_v4  ;;  %v227_v6 = vmul.f32 %v218_v2, %v149_v4  ;;  %v224_v34 = vmul.f32 %v206_v33, %v149_v4  ;;  %v223_v48 = vmul.f32 %v202_v40, %v149_v4 }
  0x84   :  { %v226_v52 = vmul.f32 %v214_v41, %v149_v4  ;;  %v228_v53 = vmul.f32 %v10326_v17, %v149_v4 }
  0x85   :  { %v10313_v7 = vadd.f32 %v10310_v3, %v225_v5  ;;  %v10317_v9 = vadd.f32 %v10310_v3, %v227_v6  ;;  %v10319_v10 = vpop.permute.xlu1 %254  ;;  %v10354_v35 = vadd.f32 %v10310_v3, %v224_v34 }
  0x86   :  { %v10321_v11 = vpop.permute.xlu0 %153  ;;  %v10393_v5 = vadd.f32 %v10310_v3, %v226_v52  ;;  %v10396_v6 = vadd.f32 %v10310_v3, %v228_v53 }
  0x87   :  { %v233_v12 = vmul.f32 %v218_v2, %v10321_v11  ;;  %v231_v38 = vmul.f32 %v210_v1, %v10321_v11  ;;  %v16515_v39 = vand.u32 2147483647, %v10354_v35  ;;  %v677_v45 = vmul.f32 %v10313_v7, %v10313_v7 }
  0x88   :  { %v679_v49 = vmul.f32 %v10317_v9, %v10317_v9  ;;  %16808 = vst [vmem:[#allocation12_spill] sm:$0xff] %v10396_v6 }
  0x89   :  { %v164_v14 = vpop.permute.xlu1 %163  ;;  %v10359_v42 = vadd.f32 %v10319_v10, %v231_v38  ;;  %v316_v44 = vmul.f32 0.23164189, %v16515_v39  ;;  %v10366_v46 = vadd.f32 %v10319_v10, %v233_v12  ;;  %v701_v60 = vmul.f32 -0.5, %v677_v45 }
  0x8a   :  { %v10324_v15 = vpop.permute.xlu0 %158  ;;  %v245_v16 = vmul.f32 %v218_v2, %v164_v14  ;;  %v243_v19 = vmul.f32 %v210_v1, %v164_v14  ;;  %v246_v21 = vmul.f32 %v10326_v17, %v164_v14  ;;  %v241_v43 = vmul.f32 %v202_v40, %v164_v14 }
  0x8b   :  { %v239_v20 = vmul.f32 %v218_v2, %v10324_v15  ;;  %v237_v26 = vmul.f32 %v210_v1, %v10324_v15  ;;  %v240_v28 = vmul.f32 %v10326_v17, %v10324_v15  ;;  %v242_v47 = vmul.f32 %v206_v33, %v164_v14 }
  0x8c   :  { %v244_v50 = vmul.f32 %v214_v41, %v164_v14  ;;  %v683_v55 = vmul.f32 %v10359_v42, %v10359_v42  ;;  %v10379_v58 = vadd.f32 1.0, %v316_v44  ;;  %v685_v61 = vmul.f32 %v10366_v46, %v10366_v46 }
  0x8d   :  { %v265_v18 = vpop.permute.xlu1 %264  ;;  %v703_v62 = vmul.f32 -0.5, %v679_v49  ;;  %v235_v63 = vmul.f32 %v202_v40, %v10324_v15  ;;  %v10387_v1 = vadd.f32 %v10310_v3, %v223_v48  ;;  %v230_v2 = vmul.f32 %v206_v33, %v10321_v11 }
  0x8e   :  { %v10330_v22 = vadd.f32 %v265_v18, %v243_v19  ;;  %v10332_v23 = vadd.f32 %v265_v18, %v245_v16  ;;  %v10334_v24 = vadd.f32 %v265_v18, %v246_v21  ;;  %v10336_v25 = vpop.permute.xlu0 %259  ;;  %v10370_v51 = vadd.f32 %v265_v18, %v241_v43 }
  0x8f   :  { %v10340_v27 = vadd.f32 %v10336_v25, %v237_v26  ;;  %v10345_v29 = vadd.f32 %v10336_v25, %v239_v20  ;;  %v10348_v30 = vadd.f32 %v10336_v25, %v240_v28  ;;  %v10373_v54 = vadd.f32 %v265_v18, %v242_v47 }
  0x90   :  { %16802 = vst [vmem:[#allocation6_spill] sm:$0xff] %v10330_v22  ;;  %16803 = vst [vmem:[#allocation7_spill] sm:$0xff] %v10332_v23  ;;  %v10377_v56 = vadd.f32 %v265_v18, %v244_v50  ;;  %v693_v0 = vmul.f32 %v10370_v51, %v10370_v51  ;;  %v707_v8 = vmul.f32 -0.5, %v683_v55  ;;  %v10401_v13 = vadd.f32 %v10336_v25, %v235_v63 }
  0x91   :  { %16804 = vst [vmem:[#allocation8_spill] sm:$0xff] %v10334_v24  ;;  %16805 = vst [vmem:[#allocation9_spill] sm:$0xff] %v10340_v27  ;;  %v694_v4 = vmul.f32 %v10373_v54, %v10373_v54  ;;  %9303 = vrcp.f32 %v10379_v58  ;;  %v727_v14 = vmul.f32 1.442695, %v701_v60  ;;  %v229_v16 = vmul.f32 %v202_v40, %v10321_v11 }
  0x92   :  { %16806 = vst [vmem:[#allocation10_spill] sm:$0xff] %v10345_v29  ;;  %16807 = vst [vmem:[#allocation11_spill] sm:$0xff] %v10348_v30  ;;  %v696_v12 = vmul.f32 %v10377_v56, %v10377_v56  ;;  %v709_v18 = vmul.f32 -0.5, %v685_v61  ;;  %v236_v19 = vmul.f32 %v206_v33, %v10324_v15  ;;  %v731_v20 = vmul.f32 1.442695, %v703_v62 }
  0x93   :  { %v10407_v21 = vmul.f32 %v214_v41, %v10321_v11  ;;  %v698_v3 = vmul.f32 %v10334_v24, %v10334_v24  ;;  %v717_v26 = vmul.f32 -0.5, %v693_v0  ;;  %v238_v28 = vmul.f32 %v214_v41, %v10324_v15 }
  0x94   :  { %v718_v31 = vmul.f32 -0.5, %v694_v4  ;;  %v10413_v32 = vadd.f32 %v10336_v25, %v236_v19  ;;  %v10416_v34 = vadd.f32 %v10319_v10, %v230_v2  ;;  %v10420_v33 = vmul.f32 %v10326_v17, %v10321_v11 }
  0x95   :  { %v739_v36 = vmul.f32 1.442695, %v707_v8  ;;  %v720_v37 = vmul.f32 -0.5, %v696_v12  ;;  %v687_v38 = vmul.f32 %v10401_v13, %v10401_v13  ;;  %9305 = vpow2.f32 %v727_v14 }
  0x96   :  { %v743_v40 = vmul.f32 1.442695, %v709_v18  ;;  %v10425_v15 = vadd.f32 %v10336_v25, %v238_v28  ;;  %v676_v41 = vmul.f32 %v10354_v35, %v10354_v35  ;;  %9307 = vpow2.f32 %v731_v20 }
  0x97   :  { %v722_v43 = vmul.f32 -0.5, %v698_v3  ;;  %v759_v44 = vmul.f32 1.442695, %v717_v26  ;;  %v10430_v45 = vadd.f32 %v10319_v10, %v229_v16  ;;  %v695_v11 = vmul.f32 %v10330_v22, %v10330_v22 }
  0x98   :  { %v761_v17 = vmul.f32 1.442695, %v718_v31  ;;  %v688_v47 = vmul.f32 %v10413_v32, %v10413_v32  ;;  %v16514_v48 = vand.u32 2147483647, %v10416_v34  ;;  %9309 = vpow2.f32 %v739_v36 }
  0x99   :  { %v765_v25 = vmul.f32 1.442695, %v720_v37  ;;  %v711_v49 = vmul.f32 -0.5, %v687_v38  ;;  %9311 = vpow2.f32 %v743_v40  ;;  %v690_v52 = vmul.f32 %v10425_v15, %v10425_v15 }
  0x9a   :  { %v682_v53 = vmul.f32 %v10416_v34, %v10416_v34  ;;  %v16512_v55 = vand.u32 2147483647, %v10387_v1  ;;  %9313 = vpow2.f32 %v759_v44  ;;  %v769_v61 = vmul.f32 1.442695, %v722_v43 }
  0x9b   :  { %v9304_v60 = vpop.eup %9303  ;;  %v692_v62 = vmul.f32 %v10348_v30, %v10348_v30  ;;  %v16511_v63 = vand.u32 2147483647, %v10430_v45  ;;  %v10446_v0 = vmul.f32 -0.5, %v695_v11  ;;  %9315 = vpow2.f32 %v761_v17 }
  0x9c   :  { %v712_v2 = vmul.f32 -0.5, %v688_v47  ;;  %v322_v4 = vmul.f32 0.23164189, %v16514_v48  ;;  %9317 = vpow2.f32 %v765_v25  ;;  %v10452_v8 = vmul.f32 %v10340_v27, %v10340_v27 }
  0x9d   :  { %16809 = vst [vmem:[#allocation13_spill] sm:$0xff] %v10446_v0  ;;  %v747_v12 = vmul.f32 1.442695, %v711_v49  ;;  %v700_v14 = vmul.f32 -0.5, %v676_v41  ;;  %v10454_v16 = vmul.f32 -0.5, %v690_v52  ;;  %v388_v18 = vmul.f32 %v9304_v60, %v10379_v58 }
  0x9e   :  { %16810 = vst [vmem:[#allocation14_spill] sm:$0xff] %v10452_v8  ;;  %v706_v19 = vmul.f32 -0.5, %v682_v53  ;;  %v315_v20 = vmul.f32 0.23164189, %v16512_v55  ;;  %9319 = vpow2.f32 %v769_v61  ;;  %v10459_v3 = vmul.f32 -0.5, %v692_v62 }
  0x9f   :  { %v321_v26 = vmul.f32 0.23164189, %v16511_v63  ;;  %v675_v28 = vmul.f32 %v10387_v1, %v10387_v1  ;;  %v10465_v31 = vpop.eup %9305  ;;  %v749_v36 = vmul.f32 1.442695, %v712_v2  ;;  %v10467_v37 = vadd.f32 1.0, %v322_v4 }
  0xa0   :  { %16811 = vst [vmem:[#allocation15_spill] sm:$0xff] %v10465_v31  ;;  %v412_v38 = vsub.f32 2.0, %v388_v18  ;;  %v681_v58 = vmul.f32 %v10430_v45, %v10430_v45  ;;  %v10471_v40 = vpop.eup %9307  ;;  %9321 = vpow2.f32 %v747_v12  ;;  %v725_v41 = vmul.f32 1.442695, %v700_v14 }
  0xa1   :  { %16812 = vst [vmem:[#allocation16_spill] sm:$0xff] %v10471_v40  ;;  %v699_v44 = vmul.f32 -0.5, %v675_v28  ;;  %v737_v17 = vmul.f32 1.442695, %v706_v19  ;;  %v10476_v47 = vadd.f32 1.0, %v315_v20  ;;  %v10481_v52 = vadd.f32 1.0, %v321_v26 }
  0xa2   :  { %v10474_v11 = vmul.f32 %v9304_v60, %v412_v38  ;;  %v16507_v25 = vand.u32 2147483647, %v10413_v32  ;;  %v10479_v49 = vpop.eup %9309  ;;  %v705_v53 = vmul.f32 -0.5, %v681_v58  ;;  %v16508_v62 = vand.u32 2147483647, %v10373_v54 }
  0xa3   :  { %16813 = vst [vmem:[#allocation17_spill] sm:$0xff] %v10479_v49  ;;  %v10485_v2 = vpop.eup %9311  ;;  %9323 = vrcp.f32 %v10467_v37  ;;  %v723_v18 = vmul.f32 1.442695, %v699_v44  ;;  %v16509_v20 = vand.u32 2147483647, %v10401_v13 }
  0xa4   :  { %16814 = vst [vmem:[#allocation18_spill] sm:$0xff] %v10485_v2  ;;  %v460_v60 = vmul.f32 0.5307027, %v10474_v11  ;;  %v328_v12 = vmul.f32 0.23164189, %v16507_v25  ;;  %v10492_v14 = vpop.eup %9313  ;;  %9325 = vpow2.f32 %v749_v36 }
  0xa5   :  { %v334_v19 = vmul.f32 0.23164189, %v16508_v62  ;;  %v10497_v26 = vpop.eup %9315  ;;  %9327 = vpow2.f32 %v725_v41  ;;  %v16510_v58 = vand.u32 2147483647, %v10370_v51  ;;  %v735_v25 = vmul.f32 1.442695, %v705_v53 }
  0xa6   :  { %v484_v28 = vadd.f32 -0.72657603, %v460_v60  ;;  %v10501_v57 = vpop.eup %9317  ;;  %9329 = vrcp.f32 %v10476_v47  ;;  %v10504_v36 = vadd.f32 1.0, %v328_v12  ;;  %v327_v44 = vmul.f32 0.23164189, %v16509_v20 }
  0xa7   :  { %16815 = vst [vmem:[#allocation19_spill] sm:$0xff] %v10501_v57  ;;  %9331 = vrcp.f32 %v10481_v52  ;;  %v10510_v60 = vadd.f32 1.0, %v334_v19  ;;  %v333_v41 = vmul.f32 0.23164189, %v16510_v58  ;;  %v10520_v53 = vadd.f32 %v10319_v10, %v10407_v21 }
  0xa8   :  { %v508_v62 = vmul.f32 %v484_v28, %v10474_v11  ;;  %v10514_v38 = vpop.eup %9319  ;;  %9333 = vpow2.f32 %v737_v17  ;;  %v10516_v4 = vadd.f32 1.0, %v327_v44  ;;  %v16513_v12 = vand.u32 2147483647, %v10393_v5 }
  0xa9   :  { %16816 = vst [vmem:[#allocation20_spill] sm:$0xff] %v10514_v38  ;;  %9335 = vpow2.f32 %v723_v18  ;;  %v10523_v28 = vadd.f32 1.0, %v333_v41  ;;  %v678_v19 = vmul.f32 %v10393_v5, %v10393_v5  ;;  %v16516_v17 = vand.u32 2147483647, %v10520_v53 }
  0xaa   :  { %v532_v20 = vadd.f32 0.7107069, %v508_v62  ;;  %v10527_v61 = vpop.eup %9321  ;;  %9337 = vrcp.f32 %v10504_v36  ;;  %v318_v44 = vmul.f32 0.23164189, %v16513_v12  ;;  %v684_v21 = vmul.f32 %v10520_v53, %v10520_v53 }
  0xab   :  { %9339 = vrcp.f32 %v10510_v60  ;;  %v702_v41 = vmul.f32 -0.5, %v678_v19  ;;  %v324_v58 = vmul.f32 0.23164189, %v16516_v17 }
  0xac   :  { %v556_v62 = vmul.f32 %v532_v20, %v10474_v11  ;;  %9341 = vrcp.f32 %v10516_v4  ;;  %v10541_v63 = vadd.f32 1.0, %v318_v44  ;;  %v708_v55 = vmul.f32 -0.5, %v684_v21 }
  0xad   :  { %v9324_v43 = vpop.eup %9323  ;;  %9343 = vrcp.f32 %v10523_v28  ;;  %v729_v20 = vmul.f32 1.442695, %v702_v41  ;;  %v10548_v19 = vadd.f32 1.0, %v324_v58  ;;  %v10554_v21 = vadd.f32 %v10319_v10, %v10420_v33 }
  0xae   :  { %v580_v12 = vadd.f32 -0.14224836, %v556_v62  ;;  %v10545_v50 = vpop.eup %9325  ;;  %v394_v18 = vmul.f32 %v9324_v43, %v10467_v37  ;;  %9345 = vrcp.f32 %v10541_v63  ;;  %v741_v39 = vmul.f32 1.442695, %v708_v55 }
  0xaf   :  { %v9328_v17 = vpop.eup %9327  ;;  %9347 = vpow2.f32 %v735_v25  ;;  %16817 = vst [vmem:[#allocation21_spill] sm:$0xff] %v10554_v21  ;;  %v16519_v62 = vand.u32 2147483647, %v10396_v6  ;;  %v680_v37 = vmul.f32 %v10396_v6, %v10396_v6  ;;  %v16520_v25 = vand.u32 2147483647, %v10554_v21 }
  0xb0   :  { %v604_v44 = vmul.f32 %v580_v12, %v10474_v11  ;;  %v9330_v41 = vpop.eup %9329  ;;  %v418_v48 = vsub.f32 2.0, %v394_v18  ;;  %9349 = vrcp.f32 %v10548_v19 }
  0xb1   :  { %v9332_v55 = vpop.eup %9331  ;;  %v387_v12 = vmul.f32 %v9330_v41, %v10476_v47  ;;  %9351 = vpow2.f32 %v729_v20  ;;  %v320_v59 = vmul.f32 0.23164189, %v16519_v62  ;;  %v326_v47 = vmul.f32 0.23164189, %v16520_v25 }
  0xb2   :  { %v628_v58 = vadd.f32 0.1274148, %v604_v44  ;;  %v10563_v10 = vpop.eup %9333  ;;  %v10565_v33 = vmul.f32 %v9324_v43, %v418_v48  ;;  %v393_v18 = vmul.f32 %v9332_v55, %v10481_v52  ;;  %9353 = vpow2.f32 %v741_v39 }
  0xb3   :  { %v10570_v38 = vpop.eup %9335  ;;  %v411_v44 = vsub.f32 2.0, %v387_v12  ;;  %v10577_v20 = vmul.f32 %v10554_v21, %v10554_v21  ;;  %v10580_v39 = vadd.f32 1.0, %v320_v59  ;;  %v10582_v57 = vmul.f32 -0.5, %v680_v37 }
  0xb4   :  { %v652_v0 = vmul.f32 %v628_v58, %v10474_v11  ;;  %v9338_v48 = vpop.eup %9337  ;;  %v466_v43 = vmul.f32 0.5307027, %v10565_v33  ;;  %v417_v52 = vsub.f32 2.0, %v393_v18  ;;  %v10587_v58 = vadd.f32 1.0, %v326_v47 }
  0xb5   :  { %v9340_v62 = vpop.eup %9339  ;;  %v10584_v40 = vmul.f32 %v9330_v41, %v411_v44  ;;  %v400_v11 = vmul.f32 %v9338_v48, %v10504_v36  ;;  %9355 = vrcp.f32 %v10580_v39  ;;  %v16818_v37 = vand.u32 2147483647, %v10354_v35 }
  0xb6   :  { %v772_v2 = vmul.f32 %v9328_v17, %v652_v0  ;;  %v9342_v12 = vpop.eup %9341  ;;  %v490_v25 = vadd.f32 -0.72657603, %v466_v43  ;;  %v10589_v49 = vmul.f32 %v9332_v55, %v417_v52  ;;  %v406_v31 = vmul.f32 %v9340_v62, %v10510_v60 }
  0xb7   :  { %v9344_v59 = vpop.eup %9343  ;;  %v459_v0 = vmul.f32 0.5307027, %v10584_v40  ;;  %v424_v17 = vsub.f32 2.0, %v400_v11  ;;  %v399_v41 = vmul.f32 %v9342_v12, %v10516_v4  ;;  %v16819_v52 = vmax.f32 %v10354_v35, 0.0 }
  0xb8   :  { %v820_v18 = vmul.f32 %v772_v2, %v16818_v37  ;;  %v9346_v36 = vpop.eup %9345  ;;  %v514_v44 = vmul.f32 %v490_v25, %v10565_v33  ;;  %v465_v47 = vmul.f32 0.5307027, %v10589_v49  ;;  %v430_v55 = vsub.f32 2.0, %v406_v31 }
  0xb9   :  { %v405_v43 = vmul.f32 %v9344_v59, %v10523_v28  ;;  %v10600_v60 = vpop.eup %9347  ;;  %v483_v2 = vadd.f32 -0.72657603, %v459_v0  ;;  %v10606_v37 = vmul.f32 %v9338_v48, %v424_v17  ;;  %v423_v11 = vsub.f32 2.0, %v399_v41 }
  0xba   :  { %v10604_v23 = vsub.f32 %v16819_v52, %v820_v18  ;;  %v9350_v29 = vpop.eup %9349  ;;  %v538_v4 = vadd.f32 0.7107069, %v514_v44  ;;  %v489_v22 = vadd.f32 -0.72657603, %v465_v47  ;;  %v10608_v27 = vmul.f32 %v9340_v62, %v430_v55 }
  0xbb   :  { %v429_v25 = vsub.f32 2.0, %v405_v43  ;;  %v10610_v24 = vpop.eup %9351  ;;  %v507_v31 = vmul.f32 %v483_v2, %v10584_v40  ;;  %v472_v28 = vmul.f32 0.5307027, %v10606_v37  ;;  %v10614_v21 = vmul.f32 %v9342_v12, %v423_v11 }
  0xbc   :  { %v390_v35 = vmul.f32 %v9346_v36, %v10541_v63  ;;  %v10617_v18 = vpop.eup %9353  ;;  %v562_v48 = vmul.f32 %v538_v4, %v10565_v33  ;;  %v513_v0 = vmul.f32 %v489_v22, %v10589_v49  ;;  %v478_v62 = vmul.f32 0.5307027, %v10608_v27 }
  0xbd   :  { %v10622_v17 = vmul.f32 %v9344_v59, %v429_v25  ;;  %v531_v41 = vadd.f32 0.7107069, %v507_v31  ;;  %v496_v44 = vadd.f32 -0.72657603, %v472_v28  ;;  %v471_v47 = vmul.f32 0.5307027, %v10614_v21 }
  0xbe   :  { %v396_v55 = vmul.f32 %v9350_v29, %v10548_v19  ;;  %v586_v12 = vadd.f32 -0.14224836, %v562_v48  ;;  %v537_v43 = vadd.f32 0.7107069, %v513_v0  ;;  %v502_v52 = vadd.f32 -0.72657603, %v478_v62 }
  0xbf   :  { %9357 = vrcp.f32 %v10587_v58  ;;  %v555_v63 = vmul.f32 %v531_v41, %v10584_v40  ;;  %v520_v2 = vmul.f32 %v496_v44, %v10606_v37  ;;  %v477_v22 = vmul.f32 0.5307027, %v10622_v17  ;;  %v10630_v59 = vpop.eup %9355 }
  0xc0   :  { %v495_v11 = vadd.f32 -0.72657603, %v471_v47  ;;  %v610_v4 = vmul.f32 %v586_v12, %v10565_v33  ;;  %v561_v25 = vmul.f32 %v537_v43, %v10589_v49  ;;  %v526_v19 = vmul.f32 %v502_v52, %v10608_v27 }
  0xc1   :  { %v414_v31 = vsub.f32 2.0, %v390_v35  ;;  %v579_v28 = vadd.f32 -0.14224836, %v555_v63  ;;  %v544_v48 = vadd.f32 0.7107069, %v520_v2  ;;  %v420_v2 = vsub.f32 2.0, %v396_v55 }
  0xc2   :  { %v501_v0 = vadd.f32 -0.72657603, %v477_v22  ;;  %v519_v62 = vmul.f32 %v495_v11, %v10614_v21  ;;  %v634_v41 = vadd.f32 0.1274148, %v610_v4  ;;  %v585_v30 = vadd.f32 -0.14224836, %v561_v25 }
  0xc3   :  { %v550_v44 = vadd.f32 0.7107069, %v526_v19  ;;  %v10636_v6 = vmul.f32 %v9346_v36, %v414_v31  ;;  %v603_v47 = vmul.f32 %v579_v28, %v10584_v40  ;;  %v568_v8 = vmul.f32 %v544_v48, %v10606_v37 }
  0xc4   :  { %v525_v12 = vmul.f32 %v501_v0, %v10622_v17  ;;  %v543_v43 = vadd.f32 0.7107069, %v519_v62  ;;  %v658_v52 = vmul.f32 %v634_v41, %v10565_v33  ;;  %v609_v35 = vmul.f32 %v585_v30, %v10589_v49 }
  0xc5   :  { %v574_v63 = vmul.f32 %v550_v44, %v10608_v27  ;;  %v627_v22 = vadd.f32 0.1274148, %v603_v47  ;;  %v592_v11 = vadd.f32 -0.14224836, %v568_v8  ;;  %v10646_v28 = vmul.f32 %v9350_v29, %v420_v2 }
  0xc6   :  { %v549_v4 = vadd.f32 0.7107069, %v525_v12  ;;  %v567_v36 = vmul.f32 %v543_v43, %v10614_v21  ;;  %v778_v25 = vmul.f32 %v10563_v10, %v658_v52  ;;  %v633_v19 = vadd.f32 0.1274148, %v609_v35 }
  0xc7   :  { %v598_v31 = vadd.f32 -0.14224836, %v574_v63  ;;  %v651_v48 = vmul.f32 %v627_v22, %v10584_v40  ;;  %v616_v33 = vmul.f32 %v592_v11, %v10606_v37  ;;  %v16820_v55 = vand.u32 2147483647, %v10416_v34 }
  0xc8   :  { %v573_v30 = vmul.f32 %v549_v4, %v10622_v17  ;;  %v591_v0 = vadd.f32 -0.14224836, %v567_v36  ;;  %v657_v41 = vmul.f32 %v633_v19, %v10589_v49  ;;  %v462_v10 = vmul.f32 0.5307027, %v10636_v6 }
  0xc9   :  { %v9358_v62 = vpop.eup %9357  ;;  %v826_v8 = vmul.f32 %v778_v25, %v16820_v55  ;;  %v622_v44 = vmul.f32 %v598_v31, %v10608_v27  ;;  %v771_v29 = vmul.f32 %v10570_v38, %v651_v48  ;;  %v640_v47 = vadd.f32 0.1274148, %v616_v33 }
  0xca   :  { %v597_v12 = vadd.f32 -0.14224836, %v573_v30  ;;  %v615_v40 = vmul.f32 %v591_v0, %v10614_v21  ;;  %v16821_v43 = vmax.f32 %v10416_v34, 0.0  ;;  %v777_v35 = vmul.f32 %v10600_v60, %v657_v41 }
  0xcb   :  { %v646_v63 = vadd.f32 0.1274148, %v622_v44  ;;  %v468_v2 = vmul.f32 0.5307027, %v10646_v28  ;;  %v16822_v49 = vand.u32 2147483647, %v10387_v1  ;;  %v664_v11 = vmul.f32 %v640_v47, %v10606_v37 }
  0xcc   :  { %v850_v52 = vsub.f32 %v16821_v43, %v826_v8  ;;  %v621_v4 = vmul.f32 %v597_v12, %v10622_v17  ;;  %v639_v38 = vadd.f32 0.1274148, %v615_v40  ;;  %v16823_v25 = vand.u32 2147483647, %v10430_v45 }
  0xcd   :  { %v819_v22 = vmul.f32 %v771_v29, %v16822_v49  ;;  %v670_v34 = vmul.f32 %v646_v63, %v10608_v27  ;;  %v486_v31 = vadd.f32 -0.72657603, %v462_v10  ;;  %v16824_v60 = vmax.f32 %v10387_v1, 0.0 }
  0xce   :  { %v8975_v36 = vpack.c.bf16 %v850_v52, %v10604_v23  ;;  %v825_v19 = vmul.f32 %v777_v35, %v16823_v25  ;;  %v784_v33 = vmul.f32 %v10545_v50, %v664_v11  ;;  %v645_v30 = vadd.f32 0.1274148, %v621_v4 }
  0xcf   :  { %v843_v48 = vsub.f32 %v16824_v60, %v819_v22  ;;  %v663_v0 = vmul.f32 %v639_v38, %v10614_v21  ;;  %v16825_v37 = vmax.f32 %v10430_v45, 0.0  ;;  %v790_v23 = vmul.f32 %v10497_v26, %v670_v34 }
  0xd0   :  { %8976 = vmatprep.subr.bf16.mxu0 %v8975_v36  ;;  %9239 = vmatprep.subr.bf16.mxu1 %v8975_v36  ;;  %v492_v8 = vadd.f32 -0.72657603, %v468_v2  ;;  %v510_v41 = vmul.f32 %v486_v31, %v10636_v6  ;;  %v16826_v27 = vand.u32 2147483647, %v10413_v32  ;;  %v669_v1 = vmul.f32 %v645_v30, %v10622_v17 }
  0xd1   :  { %v849_v55 = vsub.f32 %v16825_v37, %v825_v19  ;;  %v783_v50 = vmul.f32 %v10527_v61, %v663_v0  ;;  %v392_v21 = vmul.f32 %v10630_v59, %v10580_v39  ;;  %v16827_v29 = vand.u32 2147483647, %v10373_v54 }
  0xd2   :  { %v832_v44 = vmul.f32 %v784_v33, %v16826_v27  ;;  %v516_v47 = vmul.f32 %v492_v8, %v10646_v28  ;;  %v534_v26 = vadd.f32 0.7107069, %v510_v41  ;;  %v16828_v12 = vmax.f32 %v10413_v32, 0.0 }
  0xd3   :  { %v8977_v10 = vpack.c.bf16 %v849_v55, %v843_v48  ;;  %v838_v45 = vmul.f32 %v790_v23, %v16827_v29  ;;  %v789_v43 = vmul.f32 %v10492_v14, %v669_v1  ;;  %v16829_v52 = vand.u32 2147483647, %v10401_v13 }
  0xd4   :  { %v856_v40 = vsub.f32 %v16828_v12, %v832_v44  ;;  %v398_v61 = vmul.f32 %v9358_v62, %v10587_v58  ;;  %v16830_v39 = vmax.f32 %v10373_v54, 0.0  ;;  %v540_v63 = vadd.f32 0.7107069, %v516_v47 }
  0xd5   :  { %v831_v17 = vmul.f32 %v783_v50, %v16829_v52  ;;  %8978 = vmatpush1.bf16.msra.mxu0 %v8977_v10  ;;  %9241 = vmatpush1.bf16.msra.mxu1 %v8977_v10  ;;  %v558_v2 = vmul.f32 %v534_v26, %v10636_v6  ;;  %v416_v49 = vsub.f32 2.0, %v392_v21  ;;  %v16831_v22 = vand.u32 2147483647, %v10370_v51  ;;  %v10749_v26 = vld [vmem:[%s16503_s1 + $0x8] sm:$0xff] }
  0xd6   :  { %v862_v35 = vsub.f32 %v16830_v39, %v838_v45  ;;  %v16832_v11 = vmax.f32 %v10401_v13, 0.0  ;;  %v422_v4 = vsub.f32 2.0, %v398_v61  ;;  %v710_v38 = vmul.f32 -0.5, %v10577_v20 }
  0xd7   :  { %v837_v32 = vmul.f32 %v789_v43, %v16831_v22  ;;  %v564_v58 = vmul.f32 %v540_v63, %v10646_v28  ;;  %v582_v25 = vadd.f32 -0.14224836, %v558_v2  ;;  %v10703_v54 = vmul.f32 %v10630_v59, %v416_v49 }
  0xd8   :  { %v855_v14 = vsub.f32 %v16832_v11, %v831_v17  ;;  %v8979_v36 = vpack.c.bf16 %v862_v35, %v856_v40  ;;  %v753_v19 = vmul.f32 1.442695, %v10454_v16  ;;  %v10707_v34 = vmul.f32 1.442695, %v10459_v3 }
  0xd9   :  { %v16833_v31 = vmax.f32 %v10370_v51, 0.0  ;;  %v10711_v13 = vmul.f32 %v9358_v62, %v422_v4  ;;  %v588_v20 = vadd.f32 -0.14224836, %v564_v58  ;;  %v606_v48 = vmul.f32 %v582_v25, %v10636_v6  ;;  %v10720_v51 = vld [vmem:[%s16503_s1] sm:$0xff] }
  0xda   :  { %8980 = vmatprep.subr.bf16.mxu0 %v8979_v36  ;;  %9240 = vmatprep.subr.bf16.mxu1 %v8979_v36  ;;  %v464_v33 = vmul.f32 0.5307027, %v10703_v54  ;;  %v733_v59 = vmul.f32 1.442695, %v10582_v57  ;;  %v745_v0 = vmul.f32 1.442695, %v710_v38  ;;  %9359 = vpow2.f32 %v753_v19 }
  0xdb   :  { %v861_v60 = vsub.f32 %v16833_v31, %v837_v32  ;;  %v470_v16 = vmul.f32 0.5307027, %v10711_v13  ;;  %v612_v3 = vmul.f32 %v588_v20, %v10646_v28  ;;  %v630_v62 = vadd.f32 0.1274148, %v606_v48  ;;  %v10728_v57 = vld [vmem:[%s16503_s1 + $0x10] sm:$0xff]  ;;  %v16837_v48 = vld [vmem:[#allocation12_spill] sm:$0xff] }
  0xdc   :  { %v488_v37 = vadd.f32 -0.72657603, %v464_v33  ;;  %v16536_v55 = vmov 0.0   ;;  %v293_v8 = vand.u32 2147483647, %v10313_v7  ;;  %9361 = vpow2.f32 %v733_v59  ;;  %v16836_v31 = vld [vmem:[#allocation14_spill] sm:$0xff] }
  0xdd   :  { %v8981_v30 = vpack.c.bf16 %v861_v60, %v855_v14  ;;  %964 = vmatprep.mubr.f32.mxu0 %v16536_v55  ;;  %976 = vmatprep.mubr.f32.mxu1 %v16536_v55  ;;  %v494_v23 = vadd.f32 -0.72657603, %v470_v16  ;;  %v299_v41 = vand.u32 2147483647, %v10359_v42  ;;  %v636_v27 = vadd.f32 0.1274148, %v612_v3 }
  0xde   :  { %v654_v44 = vmul.f32 %v630_v62, %v10636_v6  ;;  %v512_v1 = vmul.f32 %v488_v37, %v10703_v54  ;;  %9363 = vpow2.f32 %v745_v0  ;;  %v317_v21 = vmul.f32 0.23164189, %v293_v8 }
  0xdf   :  { %8982 = vmatpush1.bf16.msra.mxu0 %v8981_v30  ;;  %9242 = vmatpush1.bf16.msra.mxu1 %v8981_v30  ;;  %v518_v50 = vmul.f32 %v494_v23, %v10711_v13  ;;  %v323_v10 = vmul.f32 0.23164189, %v299_v41  ;;  %v660_v29 = vmul.f32 %v636_v27, %v10646_v28  ;;  %v295_v6 = vand.u32 2147483647, %v10317_v9  ;;  %v10754_v28 = vld [vmem:[%s16503_s1 + $0x18] sm:$0xff] }
  0xe0   :  { %v774_v45 = vmul.f32 %v10610_v24, %v654_v44  ;;  %v536_v47 = vadd.f32 0.7107069, %v512_v1  ;;  %v10756_v12 = vadd.f32 1.0, %v317_v21  ;;  %v301_v43 = vand.u32 2147483647, %v10366_v46  ;;  %v16838_v23 = vld [vmem:[#allocation11_spill] sm:$0xff] }
  0xe1   :  { %v542_v24 = vadd.f32 0.7107069, %v518_v50  ;;  %v10758_v40 = vadd.f32 1.0, %v323_v10  ;;  %v780_v52 = vmul.f32 %v10617_v18, %v660_v29  ;;  %v16834_v17 = vand.u32 2147483647, %v10393_v5  ;;  %v16839_v1 = vld [vmem:[#allocation21_spill] sm:$0xff] }
  0xe2   :  { %8816 = vmatmul.mubr.msk.f32.vlgmr.msra.gmra.mrb[0].mxu0 %vm887_vm0, %v10720_v51  ;;  %8818 = vmatmul.mubr.msk.f32.vlgmr.msra.gmra.mrb[0].mxu1 %vm887_vm0, %v10728_v57  ;;  %v560_v39 = vmul.f32 %v536_v47, %v10703_v54  ;;  %v319_v35 = vmul.f32 0.23164189, %v295_v6  ;;  %v798_v63 = vmax.f32 %v10393_v5, 0.0  ;;  %9365 = vrcp.f32 %v10756_v12  ;;  %v16840_v10 = vld [vmem:[#allocation8_spill] sm:$0xff] }
  0xe3   :  { %970 = vmatprep.mubr.f32.mxu0 %v16536_v55  ;;  %982 = vmatprep.mubr.f32.mxu1 %v16536_v55  ;;  %v822_v61 = vmul.f32 %v774_v45, %v16834_v17  ;;  %v566_v2 = vmul.f32 %v542_v24, %v10711_v13  ;;  %v325_v49 = vmul.f32 0.23164189, %v301_v43  ;;  %v804_v22 = vmax.f32 %v10520_v53, 0.0 }
  0xe4   :  { %v16835_v18 = vand.u32 2147483647, %v10520_v53  ;;  %v584_v11 = vadd.f32 -0.14224836, %v560_v39  ;;  %9367 = vrcp.f32 %v10758_v40  ;;  %v343_v4 = vadd.f32 1.0, %v319_v35  ;;  %v10789_v19 = vpop.eup %9359 }
  0xe5   :  { %v846_v5 = vsub.f32 %v798_v63, %v822_v61  ;;  %v590_v14 = vadd.f32 -0.14224836, %v566_v2  ;;  %v10782_v38 = vadd.f32 1.0, %v325_v49  ;;  %v306_v58 = vand.u32 2147483647, %v10425_v15  ;;  %v16841_v61 = vld [vmem:[#allocation9_spill] sm:$0xff] }
  0xe6   :  { %v828_v32 = vmul.f32 %v780_v52, %v16835_v18  ;;  %8817 = vmatmul.mubr.msk.f32.gmra.mrb[2].mxu0 %vm887_vm0, %v10749_v26  ;;  %8819 = vmatmul.mubr.msk.f32.gmra.mrb[2].mxu1 %vm887_vm0, %v10754_v28  ;;  %v608_v36 = vmul.f32 %v584_v11, %v10703_v54  ;;  %v312_v25 = vand.u32 2147483647, %v10377_v56  ;;  %v10792_v60 = vmul.f32 -0.5, %v16836_v31  ;;  %v9362_v59 = vpop.eup %9361  ;;  %v16842_v2 = vld [vmem:[#allocation6_spill] sm:$0xff] }
  0xe7   :  { %1053 = vmatprep.mubr.f32.mxu1 %v16536_v55  ;;  %1142 = vmatprep.mubr.f32.mxu0 %v16536_v55  ;;  %v614_v20 = vmul.f32 %v590_v14, %v10711_v13  ;;  %v800_v33 = vmax.f32 %v16837_v48, 0.0  ;;  %9369 = vrcp.f32 %v343_v4  ;;  %v330_v0 = vmul.f32 0.23164189, %v306_v58 }
  0xe8   :  { %v852_v53 = vsub.f32 %v804_v22, %v828_v32  ;;  %v632_v16 = vadd.f32 0.1274148, %v608_v36  ;;  %9371 = vrcp.f32 %v10782_v38  ;;  %v9364_v3 = vpop.eup %9363  ;;  %v336_v37 = vmul.f32 0.23164189, %v312_v25 }
  0xe9   :  { %9373 = vpow2.f32 %v10707_v34  ;;  %v638_v62 = vadd.f32 0.1274148, %v614_v20  ;;  %v16542_v27 = vand.u32 2147483647, %v16838_v23  ;;  %v806_v50 = vmax.f32 %v16839_v1, 0.0 }
  0xea   :  { %v8983_v30 = vpack.c.bf16 %v852_v53, %v846_v5  ;;  %v656_v44 = vmul.f32 %v632_v16, %v10703_v54  ;;  %v354_v21 = vadd.f32 1.0, %v330_v0  ;;  %v16541_v29 = vand.u32 2147483647, %v16840_v10 }
  0xeb   :  { %v662_v45 = vmul.f32 %v638_v62, %v10711_v13  ;;  %v797_v47 = vmax.f32 %v10313_v7, 0.0  ;;  %v360_v24 = vadd.f32 1.0, %v336_v37  ;;  %v332_v34 = vmul.f32 0.23164189, %v16542_v27 }
  0xec   :  { %8984 = vmatprep.subr.bf16.mxu1 %v8983_v30  ;;  %v776_v52 = vmul.f32 %v9362_v59, %v656_v44  ;;  %9375 = vrcp.f32 %v354_v21  ;;  %v338_v17 = vmul.f32 0.23164189, %v16541_v29  ;;  %v16540_v54 = vand.u32 2147483647, %v16841_v61  ;;  %v9366_v39 = vpop.eup %9365 }
  0xed   :  { %v782_v35 = vmul.f32 %v9364_v3, %v662_v45  ;;  %9377 = vrcp.f32 %v360_v24  ;;  %v356_v63 = vadd.f32 1.0, %v332_v34  ;;  %v16538_v49 = vand.u32 2147483647, %v16842_v2 }
  0xee   :  { %v9368_v13 = vpop.eup %9367  ;;  %v16843_v22 = vand.u32 2147483647, %v16837_v48  ;;  %v389_v32 = vmul.f32 %v9366_v39, %v10756_v12  ;;  %v362_v11 = vadd.f32 1.0, %v338_v17  ;;  %v329_v5 = vmul.f32 0.23164189, %v16540_v54 }
  0xef   :  { %v16844_v14 = vand.u32 2147483647, %v16839_v1  ;;  %v395_v36 = vmul.f32 %v9368_v13, %v10758_v40  ;;  %9379 = vrcp.f32 %v356_v63  ;;  %v335_v31 = vmul.f32 0.23164189, %v16538_v49 }
  0xf0   :  { %v824_v18 = vmul.f32 %v776_v52, %v16843_v22  ;;  %v413_v20 = vsub.f32 2.0, %v389_v32  ;;  %v803_v59 = vmax.f32 %v10359_v42, 0.0  ;;  %v799_v48 = vmax.f32 %v10317_v9, 0.0  ;;  %v16845_v22 = vld [vmem:[#allocation10_spill] sm:$0xff] }
  0xf1   :  { %v830_v53 = vmul.f32 %v782_v35, %v16844_v14  ;;  %9381 = vrcp.f32 %v362_v11  ;;  %v9370_v12 = vpop.eup %9369  ;;  %v419_v0 = vsub.f32 2.0, %v395_v36  ;;  %v10826_v3 = vadd.f32 1.0, %v329_v5  ;;  %v16846_v5 = vld [vmem:[#allocation7_spill] sm:$0xff] }
  0xf2   :  { %v848_v30 = vsub.f32 %v800_v33, %v824_v18  ;;  %v9372_v62 = vpop.eup %9371  ;;  %v10828_v37 = vmul.f32 %v9366_v39, %v413_v20  ;;  %v391_v40 = vmul.f32 %v9370_v12, %v343_v4  ;;  %v805_v44 = vmax.f32 %v10366_v46, 0.0 }
  0xf3   :  { %v854_v16 = vsub.f32 %v806_v50, %v830_v53  ;;  %v10831_v1 = vadd.f32 1.0, %v335_v31  ;;  %v10833_v45 = vpop.eup %9373  ;;  %v10835_v52 = vmul.f32 %v9368_v13, %v419_v0  ;;  %v397_v17 = vmul.f32 %v9372_v62, %v10782_v38 }
  0xf4   :  { %v461_v50 = vmul.f32 0.5307027, %v10828_v37  ;;  %v415_v35 = vsub.f32 2.0, %v391_v40  ;;  %v16535_v4 = vand.u32 2147483647, %v16845_v22  ;;  %9383 = vrcp.f32 %v10826_v3 }
  0xf5   :  { %v8991_v34 = vpack.c.bf16 %v854_v16, %v848_v30  ;;  %v467_v18 = vmul.f32 0.5307027, %v10835_v52  ;;  %v421_v32 = vsub.f32 2.0, %v397_v17  ;;  %v16539_v13 = vand.u32 2147483647, %v16846_v5 }
  0xf6   :  { %v9376_v14 = vpop.eup %9375  ;;  %v485_v53 = vadd.f32 -0.72657603, %v461_v50  ;;  %v10845_v38 = vmul.f32 %v9370_v12, %v415_v35  ;;  %9385 = vrcp.f32 %v10831_v1  ;;  %v331_v36 = vmul.f32 0.23164189, %v16535_v4 }
  0xf7   :  { %8992 = vmatprep.subr.bf16.mxu0 %v8991_v34  ;;  %v9378_v31 = vpop.eup %9377  ;;  %v491_v20 = vadd.f32 -0.72657603, %v467_v18  ;;  %v10850_v30 = vmul.f32 %v9372_v62, %v421_v32  ;;  %v402_v16 = vmul.f32 %v9376_v14, %v354_v21  ;;  %v337_v0 = vmul.f32 0.23164189, %v16539_v13 }
  0xf8   :  { %v509_v40 = vmul.f32 %v485_v53, %v10828_v37  ;;  %v463_v34 = vmul.f32 0.5307027, %v10845_v38  ;;  %v408_v17 = vmul.f32 %v9378_v31, %v360_v24  ;;  %v10856_v12 = vadd.f32 1.0, %v331_v36 }
  0xf9   :  { %v9380_v50 = vpop.eup %9379  ;;  %v515_v35 = vmul.f32 %v491_v20, %v10835_v52  ;;  %v469_v4 = vmul.f32 0.5307027, %v10850_v30  ;;  %v426_v55 = vsub.f32 2.0, %v402_v16  ;;  %v10860_v18 = vadd.f32 1.0, %v337_v0 }
  0xfa   :  { %v533_v21 = vadd.f32 0.7107069, %v509_v40  ;;  %v487_v32 = vadd.f32 -0.72657603, %v463_v34  ;;  %v432_v49 = vsub.f32 2.0, %v408_v17  ;;  %v404_v13 = vmul.f32 %v9380_v50, %v356_v63 }
  0xfb   :  { %v9382_v62 = vpop.eup %9381  ;;  %v539_v54 = vadd.f32 0.7107069, %v515_v35  ;;  %v493_v53 = vadd.f32 -0.72657603, %v469_v4  ;;  %v10862_v29 = vmul.f32 %v9376_v14, %v426_v55  ;;  %9387 = vrcp.f32 %v10856_v12 }
  0xfc   :  { %v410_v24 = vmul.f32 %v9382_v62, %v362_v11  ;;  %v557_v36 = vmul.f32 %v533_v21, %v10828_v37  ;;  %v511_v27 = vmul.f32 %v487_v32, %v10845_v38  ;;  %v10866_v20 = vmul.f32 %v9378_v31, %v432_v49 }
  0xfd   :  { %v428_v39 = vsub.f32 2.0, %v404_v13  ;;  %v563_v16 = vmul.f32 %v539_v54, %v10835_v52  ;;  %v517_v0 = vmul.f32 %v493_v53, %v10850_v30  ;;  %v474_v40 = vmul.f32 0.5307027, %v10862_v29 }
  0xfe   :  { %v434_v34 = vsub.f32 2.0, %v410_v24  ;;  %v581_v63 = vadd.f32 -0.14224836, %v557_v36  ;;  %v535_v17 = vadd.f32 0.7107069, %v511_v27  ;;  %v10874_v11 = vpop.eup %9383  ;;  %9389 = vrcp.f32 %v10860_v18 }
  0xff   :  { %v480_v55 = vmul.f32 0.5307027, %v10866_v20  ;;  %v10872_v4 = vmul.f32 %v9380_v50, %v428_v39  ;;  %v587_v14 = vadd.f32 -0.14224836, %v563_v16  ;;  %v541_v35 = vadd.f32 0.7107069, %v517_v0 }
 0x100   :  { %v498_v49 = vadd.f32 -0.72657603, %v474_v40  ;;  %v10876_v31 = vmul.f32 %v9382_v62, %v434_v34  ;;  %v10878_v13 = vpop.eup %9385  ;;  %v605_v54 = vmul.f32 %v581_v63, %v10828_v37  ;;  %v559_v21 = vmul.f32 %v535_v17, %v10845_v38 }
 0x101   :  { %v504_v32 = vadd.f32 -0.72657603, %v480_v55  ;;  %v476_v27 = vmul.f32 0.5307027, %v10872_v4  ;;  %v611_v53 = vmul.f32 %v587_v14, %v10835_v52  ;;  %v565_v39 = vmul.f32 %v541_v35, %v10850_v30 }
 0x102   :  { %v522_v50 = vmul.f32 %v498_v49, %v10862_v29  ;;  %v482_v24 = vmul.f32 0.5307027, %v10876_v31  ;;  %v629_v36 = vadd.f32 0.1274148, %v605_v54  ;;  %v583_v62 = vadd.f32 -0.14224836, %v559_v21 }
 0x103   :  { %v528_v16 = vmul.f32 %v504_v32, %v10866_v20  ;;  %v500_v0 = vadd.f32 -0.72657603, %v476_v27  ;;  %v635_v40 = vadd.f32 0.1274148, %v611_v53  ;;  %v589_v34 = vadd.f32 -0.14224836, %v565_v39 }
 0x104   :  { %v546_v63 = vadd.f32 0.7107069, %v522_v50  ;;  %v401_v17 = vmul.f32 %v10874_v11, %v10826_v3  ;;  %v653_v55 = vmul.f32 %v629_v36, %v10828_v37  ;;  %v607_v14 = vmul.f32 %v583_v62, %v10845_v38  ;;  %v16847_v27 = vld [vmem:[#allocation15_spill] sm:$0xff]  ;;  %v16848_v37 = vld [vmem:[#allocation17_spill] sm:$0xff] }
 0x105   :  { %v552_v35 = vadd.f32 0.7107069, %v528_v16  ;;  %v506_v33 = vadd.f32 -0.72657603, %v482_v24  ;;  %v659_v49 = vmul.f32 %v635_v40, %v10835_v52  ;;  %v613_v54 = vmul.f32 %v589_v34, %v10850_v30 }
 0x106   :  { %v570_v21 = vmul.f32 %v546_v63, %v10862_v29  ;;  %v524_v32 = vmul.f32 %v500_v0, %v10872_v4  ;;  %v773_v53 = vmul.f32 %v16847_v27, %v653_v55  ;;  %v631_v39 = vadd.f32 0.1274148, %v607_v14 }
 0x107   :  { %v576_v50 = vmul.f32 %v552_v35, %v10866_v20  ;;  %v530_v3 = vmul.f32 %v506_v33, %v10876_v31  ;;  %v779_v36 = vmul.f32 %v16848_v37, %v659_v49  ;;  %v637_v62 = vadd.f32 0.1274148, %v613_v54  ;;  %v16849_v49 = vld [vmem:[#allocation16_spill] sm:$0xff] }
 0x108   :  { %v594_v16 = vadd.f32 -0.14224836, %v570_v21  ;;  %v548_v24 = vadd.f32 0.7107069, %v524_v32  ;;  %v821_v52 = vmul.f32 %v773_v53, %v293_v8  ;;  %v655_v40 = vmul.f32 %v631_v39, %v10845_v38  ;;  %v16850_v32 = vld [vmem:[#allocation18_spill] sm:$0xff] }
 0x109   :  { %v600_v34 = vadd.f32 -0.14224836, %v576_v50  ;;  %v554_v63 = vadd.f32 0.7107069, %v530_v3  ;;  %v827_v0 = vmul.f32 %v779_v36, %v299_v41  ;;  %v661_v55 = vmul.f32 %v637_v62, %v10850_v30 }
 0x10a   :  { %v618_v14 = vmul.f32 %v594_v16, %v10862_v29  ;;  %v572_v33 = vmul.f32 %v548_v24, %v10872_v4  ;;  %v845_v35 = vsub.f32 %v797_v47, %v821_v52  ;;  %v775_v54 = vmul.f32 %v16849_v49, %v655_v40  ;;  %v16851_v52 = vld [vmem:[#allocation19_spill] sm:$0xff] }
 0x10b   :  { %v624_v8 = vmul.f32 %v600_v34, %v10866_v20  ;;  %v578_v38 = vmul.f32 %v554_v63, %v10876_v31  ;;  %v851_v21 = vsub.f32 %v803_v59, %v827_v0  ;;  %v781_v41 = vmul.f32 %v16850_v32, %v661_v55 }
 0x10c   :  { %v642_v27 = vadd.f32 0.1274148, %v618_v14  ;;  %v596_v30 = vadd.f32 -0.14224836, %v572_v33  ;;  %v823_v53 = vmul.f32 %v775_v54, %v295_v6  ;;  %v407_v7 = vmul.f32 %v10878_v13, %v10831_v1  ;;  %v16855_v33 = vld [vmem:[#allocation20_spill] sm:$0xff] }
 0x10d   :  { %v648_v39 = vadd.f32 0.1274148, %v624_v8  ;;  %v602_v50 = vadd.f32 -0.14224836, %v578_v38  ;;  %v8985_v47 = vpack.c.bf16 %v851_v21, %v845_v35  ;;  %v829_v3 = vmul.f32 %v781_v41, %v301_v43 }
 0x10e   :  { %v666_v37 = vmul.f32 %v642_v27, %v10862_v29  ;;  %v620_v42 = vmul.f32 %v596_v30, %v10872_v4  ;;  %v847_v59 = vsub.f32 %v799_v48, %v823_v53  ;;  %v425_v62 = vsub.f32 2.0, %v401_v17 }
 0x10f   :  { %v672_v36 = vmul.f32 %v648_v39, %v10866_v20  ;;  %v626_v6 = vmul.f32 %v602_v50, %v10876_v31  ;;  %8986 = vmatpush1.bf16.msra.mxu1 %v8985_v47  ;;  %v853_v1 = vsub.f32 %v805_v44, %v829_v3  ;;  %v431_v43 = vsub.f32 2.0, %v407_v7  ;;  %v9388_v39 = vpop.eup %9387 }
 0x110   :  { %v786_v16 = vmul.f32 %v10789_v19, %v666_v37  ;;  %v644_v24 = vadd.f32 0.1274148, %v620_v42  ;;  %v449_v34 = vmul.f32 %v10874_v11, %v425_v62  ;;  %v16852_v11 = vmax.f32 %v10425_v15, 0.0  ;;  %v9390_v3 = vpop.eup %9389 }
 0x111   :  { %v792_v29 = vmul.f32 %v16851_v52, %v672_v36  ;;  %v650_v40 = vadd.f32 0.1274148, %v626_v6  ;;  %v8993_v9 = vpack.c.bf16 %v853_v1, %v847_v59  ;;  %v455_v46 = vmul.f32 %v10878_v13, %v431_v43 }
 0x112   :  { %v834_v48 = vmul.f32 %v786_v16, %v306_v58  ;;  %v668_v20 = vmul.f32 %v644_v24, %v10872_v4  ;;  %v473_v17 = vmul.f32 0.5307027, %v449_v34  ;;  %v16853_v58 = vld [vmem:[#allocation13_spill] sm:$0xff]  ;;  %v16854_v4 = vmax.f32 %v10377_v56, 0.0 }
 0x113   :  { %v840_v19 = vmul.f32 %v792_v29, %v312_v25  ;;  %v674_v44 = vmul.f32 %v650_v40, %v10876_v31  ;;  %8994 = vmatpush1.bf16.msra.mxu0 %v8993_v9  ;;  %v479_v55 = vmul.f32 0.5307027, %v455_v46  ;;  %v763_v14 = vmul.f32 1.442695, %v16853_v58 }
 0x114   :  { %v858_v63 = vsub.f32 %v16852_v11, %v834_v48  ;;  %v788_v0 = vmul.f32 %v10833_v45, %v668_v20  ;;  %v497_v25 = vadd.f32 -0.72657603, %v473_v17  ;;  %v751_v31 = vmul.f32 1.442695, %v10792_v60 }
 0x115   :  { %v864_v13 = vsub.f32 %v16854_v4, %v840_v19  ;;  %v794_v35 = vmul.f32 %v16855_v33, %v674_v44  ;;  %v812_v49 = vmax.f32 %v16838_v23, 0.0  ;;  %v16856_v54 = vand.u32 2147483647, %v16838_v23 }
 0x116   :  { %v503_v15 = vadd.f32 -0.72657603, %v479_v55  ;;  %v818_v45 = vmax.f32 %v16840_v10, 0.0  ;;  %v16857_v21 = vand.u32 2147483647, %v16840_v10  ;;  %v521_v41 = vmul.f32 %v497_v25, %v449_v34 }
 0x117   :  { %v836_v8 = vmul.f32 %v788_v0, %v16856_v54  ;;  %v8987_v38 = vpack.c.bf16 %v864_v13, %v858_v63  ;;  %9391 = vpow2.f32 %v751_v31  ;;  %v403_v47 = vmul.f32 %v9388_v39, %v10856_v12 }
 0x118   :  { %v842_v32 = vmul.f32 %v794_v35, %v16857_v21  ;;  %v527_v27 = vmul.f32 %v503_v15, %v455_v46  ;;  %v545_v53 = vadd.f32 0.7107069, %v521_v41  ;;  %9393 = vpow2.f32 %v763_v14 }
 0x119   :  { %v860_v56 = vsub.f32 %v812_v49, %v836_v8  ;;  %8988 = vmatprep.subr.bf16.mxu1 %v8987_v38  ;;  %v691_v10 = vmul.f32 %v16845_v22, %v16845_v22  ;;  %v409_v59 = vmul.f32 %v9390_v3, %v10860_v18  ;;  %v427_v36 = vsub.f32 2.0, %v403_v47 }
 0x11a   :  { %v866_v30 = vsub.f32 %v818_v45, %v842_v32  ;;  %v551_v60 = vadd.f32 0.7107069, %v527_v27  ;;  %v569_v23 = vmul.f32 %v545_v53, %v449_v34  ;;  %v697_v6 = vmul.f32 %v16846_v5, %v16846_v5 }
 0x11b   :  { %v433_v16 = vsub.f32 2.0, %v409_v59  ;;  %v451_v24 = vmul.f32 %v9388_v39, %v427_v36  ;;  %v715_v43 = vmul.f32 -0.5, %v691_v10  ;;  %v809_v4 = vmax.f32 %v16841_v61, 0.0 }
 0x11c   :  { %v8995_v50 = vpack.c.bf16 %v866_v30, %v860_v56  ;;  %v575_v7 = vmul.f32 %v551_v60, %v455_v46  ;;  %v593_v37 = vadd.f32 -0.14224836, %v569_v23  ;;  %v721_v9 = vmul.f32 -0.5, %v697_v6 }
 0x11d   :  { %v457_v29 = vmul.f32 %v9390_v3, %v433_v16  ;;  %v475_v40 = vmul.f32 0.5307027, %v451_v24  ;;  %v755_v11 = vmul.f32 1.442695, %v715_v43  ;;  %v16858_v13 = vand.u32 2147483647, %v16841_v61  ;;  %v11014_v43 = vpop.permute.xlu1 %874 }
 0x11e   :  { %8996 = vmatprep.subr.bf16.mxu0 %v8995_v50  ;;  %v599_v42 = vadd.f32 -0.14224836, %v575_v7  ;;  %v617_v62 = vmul.f32 %v593_v37, %v449_v34  ;;  %v767_v14 = vmul.f32 1.442695, %v721_v9  ;;  %v815_v35 = vmax.f32 %v16842_v2, 0.0 }
 0x11f   :  { %v481_v44 = vmul.f32 0.5307027, %v457_v29  ;;  %v499_v17 = vadd.f32 -0.72657603, %v475_v40  ;;  %9395 = vpow2.f32 %v755_v11  ;;  %v16860_v30 = vmov 0.0  }
 0x120   :  { %v623_v1 = vmul.f32 %v599_v42, %v455_v46  ;;  %v641_v52 = vadd.f32 0.1274148, %v617_v62  ;;  %9397 = vpow2.f32 %v767_v14  ;;  %v811_v7 = vmax.f32 %v16845_v22, 0.0 }
 0x121   :  { %v9392_v20 = vpop.eup %9391  ;;  %v505_v55 = vadd.f32 -0.72657603, %v481_v44  ;;  %v523_v58 = vmul.f32 %v499_v17, %v451_v24  ;;  %v16861_v47 = vand.u32 2147483647, %v16845_v22  ;;  %v817_v10 = vmax.f32 %v16846_v5, 0.0  ;;  %v10998_v22 = vpop.permute.xlu0 %869 }
 0x122   :  { %v647_v12 = vadd.f32 0.1274148, %v623_v1  ;;  %v665_v48 = vmul.f32 %v641_v52, %v449_v34  ;;  %v9394_v18 = vpop.eup %9393  ;;  %v16859_v34 = vand.u32 2147483647, %v16842_v2  ;;  %v16862_v37 = vand.u32 2147483647, %v16846_v5 }
 0x123   :  { %v547_v31 = vadd.f32 0.7107069, %v523_v58 }
 0x124   :  { %v671_v19 = vmul.f32 %v647_v12, %v455_v46  ;;  %v785_v63 = vmul.f32 %v9392_v20, %v665_v48  ;;  %v529_v46 = vmul.f32 %v505_v55, %v457_v29 }
 0x125   :  { %v571_v15 = vmul.f32 %v547_v31, %v451_v24 }
 0x126   :  { %v791_v0 = vmul.f32 %v9394_v18, %v671_v19  ;;  %v833_v33 = vmul.f32 %v785_v63, %v16858_v13  ;;  %v553_v8 = vadd.f32 0.7107069, %v529_v46 }
 0x127   :  { %v595_v21 = vadd.f32 -0.14224836, %v571_v15 }
 0x128   :  { %v839_v25 = vmul.f32 %v791_v0, %v16859_v34  ;;  %v857_v49 = vsub.f32 %v809_v4, %v833_v33  ;;  %v577_v45 = vmul.f32 %v553_v8, %v457_v29  ;;  %v11026_v0 = vpop.permute.xlu1 %884 }
 0x129   :  { %v619_v61 = vmul.f32 %v595_v21, %v451_v24  ;;  %v9396_v53 = vpop.eup %9395 }
 0x12a   :  { %v863_v54 = vsub.f32 %v815_v35, %v839_v25  ;;  %v601_v32 = vadd.f32 -0.14224836, %v577_v45  ;;  %v9398_v50 = vpop.eup %9397 }
 0x12b   :  { %v643_v56 = vadd.f32 0.1274148, %v619_v61 }
 0x12c   :  { %v8989_v38 = vpack.c.bf16 %v863_v54, %v857_v49  ;;  %v625_v41 = vmul.f32 %v601_v32, %v457_v29 }
 0x12d   :  { %v667_v27 = vmul.f32 %v643_v56, %v451_v24 }
 0x12e   :  { %8990 = vmatpush1.bf16.msra.mxu1 %v8989_v38  ;;  %v649_v2 = vadd.f32 0.1274148, %v625_v41 }
 0x12f   :  { %v787_v39 = vmul.f32 %v9396_v53, %v667_v27 }
 0x130   :  { %v673_v60 = vmul.f32 %v649_v2, %v457_v29 }
 0x131   :  { %8820 = vmatmul.mubr.msk.f32.vlgmr.msra.gmra.mrb[4].mxu1 %vm887_vm0, %v10720_v51  ;;  %v835_v3 = vmul.f32 %v787_v39, %v16861_v47 }
 0x132   :  { %1059 = vmatprep.mubr.f32.mxu1 %v16860_v30  ;;  %v793_v23 = vmul.f32 %v9398_v50, %v673_v60 }
 0x133   :  { %v859_v59 = vsub.f32 %v811_v7, %v835_v3 }
 0x134   :  { %v841_v42 = vmul.f32 %v793_v23, %v16862_v37 }
 0x135   :  { %8821 = vmatmul.mubr.msk.f32.gmra.mrb[6].mxu1 %vm887_vm0, %v10749_v26 }
 0x136   :  { %1065 = vmatprep.mubr.f32.mxu1 %v16860_v30  ;;  %v865_v36 = vsub.f32 %v817_v10, %v841_v42 }
 0x138   :  { %v8997_v6 = vpack.c.bf16 %v865_v36, %v859_v59 }
 0x139   :  { %8822 = vmatmul.mubr.msk.f32.gmra.mrb[8].mxu1 %vm887_vm0, %v10728_v57 }
 0x13a   :  { %1071 = vmatprep.mubr.f32.mxu1 %v16860_v30  ;;  %8998 = vmatpush1.bf16.msra.mxu0 %v8997_v6 }
 0x13d   :  { %8823 = vmatmul.mubr.msk.f32.gmra.mrb[10].mxu1 %vm887_vm0, %v10754_v28  ;;  %8824 = vmatmul.mubr.msk.f32.vlgmr.msra.gmra.mrb[4].mxu0 %vm887_vm0, %v10720_v51  ;;  %v11000_v51 = vpop.permute.xlu0 %879 }
 0x13e   :  { %1839 = vmatprep.mubr.f32.mxu1 %v16860_v30  ;;  %1148 = vmatprep.mubr.f32.mxu0 %v16860_v30 }
 0x141   :  { %8825 = vmatmul.mubr.msk.f32.gmra.mrb[6].mxu0 %vm887_vm0, %v10749_v26 }
 0x142   :  { %1154 = vmatprep.mubr.f32.mxu0 %v16860_v30 }
 0x145   :  { %8826 = vmatmul.mubr.msk.f32.gmra.mrb[8].mxu0 %vm887_vm0, %v10728_v57 }
 0x146   :  { %1160 = vmatprep.mubr.f32.mxu0 %v16860_v30 }
 0x149   :  { %8827 = vmatmul.mubr.msk.f32.gmra.mrb[10].mxu0 %vm887_vm0, %v10754_v28 }
 0x14a   :  { %1928 = vmatprep.mubr.f32.mxu0 %v16860_v30 }
 0x1b5   :  { %v966_v5 = vpop.f32.mrb[0].mxu0  ;;  %v978_v62 = vpop.f32.mrb[0].mxu1 }
 0x1b6   :  { %v11003_v26 = vadd.f32 %v966_v5, %v10998_v22  ;;  %v11006_v1 = vadd.f32 %v978_v62, %v11000_v51  ;;  %v968_v57 = vpop.f32.mrb[1].mxu0  ;;  %v980_v16 = vpop.f32.mrb[1].mxu1 }
 0x1b7   :  { %v11009_v24 = vadd.f32 %v968_v57, %v10998_v22  ;;  %v11012_v28 = vadd.f32 %v980_v16, %v11000_v51 }
 0x1b8   :  { %v1167_v52 = vand.u32 2147483647, %v11003_v26  ;;  %v1179_v12 = vand.u32 2147483647, %v11006_v1  ;;  %v1551_v33 = vmul.f32 %v11003_v26, %v11003_v26  ;;  %v1563_v46 = vmul.f32 %v11006_v1, %v11006_v1 }
 0x1b9   :  { %v1168_v29 = vand.u32 2147483647, %v11009_v24  ;;  %v972_v40 = vpop.f32.mrb[2].mxu0  ;;  %v984_v9 = vpop.f32.mrb[2].mxu1  ;;  %v1180_v44 = vand.u32 2147483647, %v11012_v28  ;;  %v1552_v38 = vmul.f32 %v11009_v24, %v11009_v24  ;;  %v1564_v41 = vmul.f32 %v11012_v28, %v11012_v28 }
 0x1ba   :  { %v1191_v48 = vmul.f32 0.23164189, %v1167_v52  ;;  %v1203_v20 = vmul.f32 0.23164189, %v1179_v12  ;;  %v974_v11 = vpop.f32.mrb[3].mxu0  ;;  %v986_v63 = vpop.f32.mrb[3].mxu1  ;;  %v11031_v14 = vadd.f32 %v972_v40, %v11014_v43  ;;  %v11034_v4 = vadd.f32 %v984_v9, %v11026_v0 }
 0x1bb   :  { %v1192_v19 = vmul.f32 0.23164189, %v1168_v29  ;;  %v1204_v58 = vmul.f32 0.23164189, %v1180_v44  ;;  %v11037_v13 = vadd.f32 %v974_v11, %v11014_v43  ;;  %v11051_v8 = vadd.f32 %v986_v63, %v11026_v0 }
 0x1bc   :  { %v1215_v17 = vadd.f32 1.0, %v1191_v48  ;;  %v1227_v18 = vadd.f32 1.0, %v1203_v20  ;;  %v1173_v34 = vand.u32 2147483647, %v11031_v14  ;;  %v1185_v25 = vand.u32 2147483647, %v11034_v4 }
 0x1bd   :  { %v1216_v55 = vadd.f32 1.0, %v1192_v19  ;;  %v1228_v35 = vadd.f32 1.0, %v1204_v58  ;;  %v1174_v54 = vand.u32 2147483647, %v11037_v13  ;;  %v1575_v15 = vmul.f32 -0.5, %v1551_v33 }
 0x1be   :  { %9399 = vrcp.f32 %v1215_v17  ;;  %v1197_v31 = vmul.f32 0.23164189, %v1173_v34  ;;  %v1209_v49 = vmul.f32 0.23164189, %v1185_v25  ;;  %v1587_v61 = vmul.f32 -0.5, %v1563_v46 }
 0x1bf   :  { %9401 = vrcp.f32 %v1227_v18  ;;  %v1198_v32 = vmul.f32 0.23164189, %v1174_v54  ;;  %v1186_v2 = vand.u32 2147483647, %v11051_v8  ;;  %v1599_v53 = vmul.f32 1.442695, %v1575_v15 }
 0x1c0   :  { %9403 = vrcp.f32 %v1216_v55  ;;  %v1221_v45 = vadd.f32 1.0, %v1197_v31  ;;  %v1233_v21 = vadd.f32 1.0, %v1209_v49  ;;  %v1576_v60 = vmul.f32 -0.5, %v1552_v38 }
 0x1c1   :  { %9405 = vrcp.f32 %v1228_v35  ;;  %v11059_v56 = vadd.f32 1.0, %v1198_v32  ;;  %v1557_v39 = vmul.f32 %v11031_v14, %v11031_v14  ;;  %v1210_v23 = vmul.f32 0.23164189, %v1186_v2 }
 0x1c2   :  { %9407 = vrcp.f32 %v1221_v45  ;;  %v1623_v47 = vmul.f32 1.442695, %v1587_v61  ;;  %v1588_v3 = vmul.f32 -0.5, %v1564_v41  ;;  %v1569_v10 = vmul.f32 %v11034_v4, %v11034_v4 }
 0x1c3   :  { %9409 = vrcp.f32 %v1233_v21  ;;  %v1234_v59 = vadd.f32 1.0, %v1210_v23  ;;  %v1601_v6 = vmul.f32 1.442695, %v1576_v60  ;;  %v1581_v5 = vmul.f32 -0.5, %v1557_v39 }
 0x1c4   :  { %9411 = vrcp.f32 %v11059_v56  ;;  %v1558_v62 = vmul.f32 %v11037_v13, %v11037_v13  ;;  %v1625_v48 = vmul.f32 1.442695, %v1588_v3  ;;  %v1593_v20 = vmul.f32 -0.5, %v1569_v10 }
 0x1c5   :  { %9413 = vpow2.f32 %v1599_v53  ;;  %v1611_v58 = vmul.f32 1.442695, %v1581_v5  ;;  %v1570_v61 = vmul.f32 %v11051_v8, %v11051_v8 }
 0x1c6   :  { %9415 = vrcp.f32 %v1234_v59  ;;  %v1582_v33 = vmul.f32 -0.5, %v1558_v62  ;;  %v1635_v32 = vmul.f32 1.442695, %v1593_v20 }
 0x1c7   :  { %9417 = vpow2.f32 %v1623_v47 }
 0x1c8   :  { %v9400_v27 = vpop.eup %9399  ;;  %9419 = vpow2.f32 %v1601_v6  ;;  %v11085_v23 = vmul.f32 1.442695, %v1582_v33  ;;  %v1594_v6 = vmul.f32 -0.5, %v1570_v61 }
 0x1c9   :  { %v1263_v50 = vmul.f32 %v9400_v27, %v1215_v17  ;;  %v9402_v7 = vpop.eup %9401  ;;  %9421 = vpow2.f32 %v1625_v48 }
 0x1ca   :  { %v1275_v42 = vmul.f32 %v9402_v7, %v1227_v18  ;;  %v9404_v36 = vpop.eup %9403  ;;  %9423 = vpow2.f32 %v1611_v58 }
 0x1cb   :  { %v1287_v37 = vsub.f32 2.0, %v1263_v50  ;;  %v1264_v40 = vmul.f32 %v9404_v36, %v1216_v55  ;;  %v9406_v9 = vpop.eup %9405  ;;  %9425 = vpow2.f32 %v1635_v32 }
 0x1cc   :  { %v1299_v16 = vsub.f32 2.0, %v1275_v42  ;;  %v1276_v11 = vmul.f32 %v9406_v9, %v1228_v35  ;;  %v9408_v63 = vpop.eup %9407  ;;  %9427 = vpow2.f32 %v11085_v23 }
 0x1cd   :  { %v11071_v57 = vmul.f32 %v9400_v27, %v1287_v37  ;;  %v1288_v18 = vsub.f32 2.0, %v1264_v40  ;;  %v9410_v15 = vpop.eup %9409  ;;  %v1269_v38 = vmul.f32 %v9408_v63, %v1221_v45 }
 0x1ce   :  { %v11074_v17 = vmul.f32 %v9402_v7, %v1299_v16  ;;  %v1300_v55 = vsub.f32 2.0, %v1276_v11  ;;  %v9412_v60 = vpop.eup %9411  ;;  %v1281_v50 = vmul.f32 %v9410_v15, %v1233_v21 }
 0x1cf   :  { %v1335_v19 = vmul.f32 0.5307027, %v11071_v57  ;;  %v11077_v49 = vmul.f32 %v9404_v36, %v1288_v18  ;;  %v1293_v39 = vsub.f32 2.0, %v1269_v38  ;;  %v11089_v10 = vpop.eup %9413  ;;  %v1270_v36 = vmul.f32 %v9412_v60, %v11059_v56 }
 0x1d0   :  { %v1347_v31 = vmul.f32 0.5307027, %v11074_v17  ;;  %v11083_v53 = vmul.f32 %v9406_v9, %v1300_v55  ;;  %v1305_v42 = vsub.f32 2.0, %v1281_v50  ;;  %v9416_v5 = vpop.eup %9415 }
 0x1d1   :  { %v1359_v46 = vadd.f32 -0.72657603, %v1335_v19  ;;  %v1336_v27 = vmul.f32 0.5307027, %v11077_v49  ;;  %v11091_v37 = vmul.f32 %v9408_v63, %v1293_v39  ;;  %v9418_v9 = vpop.eup %9417  ;;  %v1294_v19 = vsub.f32 2.0, %v1270_v36 }
 0x1d2   :  { %v1371_v35 = vadd.f32 -0.72657603, %v1347_v31  ;;  %v1348_v3 = vmul.f32 0.5307027, %v11083_v53  ;;  %v11097_v20 = vmul.f32 %v9410_v15, %v1305_v42  ;;  %v1282_v18 = vmul.f32 %v9416_v5, %v1234_v59  ;;  %v9420_v33 = vpop.eup %9419 }
 0x1d3   :  { %v1383_v41 = vmul.f32 %v1359_v46, %v11071_v57  ;;  %v1360_v47 = vadd.f32 -0.72657603, %v1336_v27  ;;  %v1341_v48 = vmul.f32 0.5307027, %v11091_v37  ;;  %v11102_v55 = vmul.f32 %v9412_v60, %v1294_v19  ;;  %v9422_v59 = vpop.eup %9421 }
 0x1d4   :  { %v1395_v45 = vmul.f32 %v1371_v35, %v11074_v17  ;;  %v1372_v40 = vadd.f32 -0.72657603, %v1348_v3  ;;  %v1353_v31 = vmul.f32 0.5307027, %v11097_v20  ;;  %v1306_v38 = vsub.f32 2.0, %v1282_v18  ;;  %v9424_v42 = vpop.eup %9423 }
 0x1d5   :  { %v1407_v7 = vadd.f32 0.7107069, %v1383_v41  ;;  %v1384_v16 = vmul.f32 %v1360_v47, %v11077_v49  ;;  %v1365_v46 = vadd.f32 -0.72657603, %v1341_v48  ;;  %v1342_v50 = vmul.f32 0.5307027, %v11102_v55 }
 0x1d6   :  { %v1419_v21 = vadd.f32 0.7107069, %v1395_v45  ;;  %v1396_v56 = vmul.f32 %v1372_v40, %v11083_v53  ;;  %v1377_v39 = vadd.f32 -0.72657603, %v1353_v31  ;;  %v1637_v31 = vmul.f32 1.442695, %v1594_v6 }
 0x1d7   :  { %v1431_v62 = vmul.f32 %v1407_v7, %v11071_v57  ;;  %v1408_v58 = vadd.f32 0.7107069, %v1384_v16  ;;  %v1389_v27 = vmul.f32 %v1365_v46, %v11091_v37  ;;  %v11108_v7 = vmul.f32 %v9416_v5, %v1306_v38 }
 0x1d8   :  { %v1443_v63 = vmul.f32 %v1419_v21, %v11074_v17  ;;  %v1420_v35 = vadd.f32 0.7107069, %v1396_v56  ;;  %v1366_v21 = vadd.f32 -0.72657603, %v1342_v50  ;;  %9429 = vpow2.f32 %v1637_v31 }
 0x1d9   :  { %v1455_v11 = vadd.f32 -0.14224836, %v1431_v62  ;;  %v1432_v15 = vmul.f32 %v1408_v58, %v11077_v49  ;;  %v1413_v36 = vadd.f32 0.7107069, %v1389_v27  ;;  %v1401_v62 = vmul.f32 %v1377_v39, %v11097_v20 }
 0x1da   :  { %v1467_v41 = vadd.f32 -0.14224836, %v1443_v63  ;;  %v1444_v3 = vmul.f32 %v1420_v35, %v11083_v53  ;;  %v1354_v16 = vmul.f32 0.5307027, %v11108_v7  ;;  %v1689_v31 = vmax.f32 %v11034_v4, 0.0 }
 0x1db   :  { %v1479_v61 = vmul.f32 %v1455_v11, %v11071_v57  ;;  %v1456_v60 = vadd.f32 -0.14224836, %v1432_v15  ;;  %v1437_v5 = vmul.f32 %v1413_v36, %v11091_v37  ;;  %v1425_v18 = vadd.f32 0.7107069, %v1401_v62 }
 0x1dc   :  { %v1491_v47 = vmul.f32 %v1467_v41, %v11074_v17  ;;  %v1468_v19 = vadd.f32 -0.14224836, %v1444_v3  ;;  %v1390_v11 = vmul.f32 %v1366_v21, %v11102_v55  ;;  %v1378_v63 = vadd.f32 -0.72657603, %v1354_v16 }
 0x1dd   :  { %v1503_v45 = vadd.f32 0.1274148, %v1479_v61  ;;  %v1480_v48 = vmul.f32 %v1456_v60, %v11077_v49  ;;  %v1461_v38 = vadd.f32 -0.14224836, %v1437_v5  ;;  %v1449_v61 = vmul.f32 %v1425_v18, %v11097_v20 }
 0x1de   :  { %v1515_v40 = vadd.f32 0.1274148, %v1491_v47  ;;  %v1492_v46 = vmul.f32 %v1468_v19, %v11083_v53  ;;  %v1414_v41 = vadd.f32 0.7107069, %v1390_v11  ;;  %v1402_v15 = vmul.f32 %v1378_v63, %v11108_v7 }
 0x1df   :  { %v1527_v58 = vmul.f32 %v1503_v45, %v11071_v57  ;;  %v1504_v56 = vadd.f32 0.1274148, %v1480_v48  ;;  %v1485_v27 = vmul.f32 %v1461_v38, %v11091_v37  ;;  %v1473_v39 = vadd.f32 -0.14224836, %v1449_v61  ;;  %v9426_v48 = vpop.eup %9425 }
 0x1e0   :  { %v1539_v32 = vmul.f32 %v1515_v40, %v11074_v17  ;;  %v1516_v35 = vadd.f32 0.1274148, %v1492_v46  ;;  %v1438_v57 = vmul.f32 %v1414_v41, %v11102_v55  ;;  %v1426_v50 = vadd.f32 0.7107069, %v1402_v15 }
 0x1e1   :  { %v1647_v45 = vmul.f32 %v11089_v10, %v1527_v58  ;;  %v1528_v6 = vmul.f32 %v1504_v56, %v11077_v49  ;;  %v1509_v47 = vadd.f32 0.1274148, %v1485_v27  ;;  %v1497_v60 = vmul.f32 %v1473_v39, %v11097_v20 }
 0x1e2   :  { %v1462_v3 = vadd.f32 -0.14224836, %v1438_v57  ;;  %v1450_v17 = vmul.f32 %v1426_v50, %v11108_v7  ;;  %v1659_v36 = vmul.f32 %v9418_v9, %v1539_v32  ;;  %v1540_v23 = vmul.f32 %v1516_v35, %v11083_v53 }
 0x1e3   :  { %v1533_v62 = vmul.f32 %v1509_v47, %v11091_v37  ;;  %v1521_v21 = vadd.f32 0.1274148, %v1497_v60  ;;  %v1695_v49 = vmul.f32 %v1647_v45, %v1167_v52  ;;  %v1648_v10 = vmul.f32 %v9420_v33, %v1528_v6  ;;  %v11193_v60 = vld [vmem:[%s16503_s1 + $0x38] sm:$0xff] }
 0x1e4   :  { %v1486_v16 = vmul.f32 %v1462_v3, %v11102_v55  ;;  %v1474_v40 = vadd.f32 -0.14224836, %v1450_v17  ;;  %v1671_v9 = vmax.f32 %v11003_v26, 0.0  ;;  %v1707_v53 = vmul.f32 %v1659_v36, %v1179_v12  ;;  %16866 = vst [vmem:[#allocation21_spill] sm:$0xff] %v11193_v60 }
 0x1e5   :  { %v1653_v19 = vmul.f32 %v9424_v42, %v1533_v62  ;;  %v1545_v5 = vmul.f32 %v1521_v21, %v11097_v20  ;;  %v1660_v37 = vmul.f32 %v9422_v59, %v1540_v23  ;;  %v1677_v63 = vmax.f32 %v11031_v14, 0.0  ;;  %v9428_v42 = vpop.eup %9427 }
 0x1e6   :  { %v1510_v18 = vadd.f32 0.1274148, %v1486_v16  ;;  %v1498_v11 = vmul.f32 %v1474_v40, %v11108_v7  ;;  %v1719_v20 = vsub.f32 %v1671_v9, %v1695_v49  ;;  %v1683_v46 = vmax.f32 %v11006_v1, 0.0 }
 0x1e7   :  { %v1701_v58 = vmul.f32 %v1653_v19, %v1173_v34  ;;  %v1665_v56 = vmul.f32 %v9426_v48, %v1545_v5  ;;  %v1696_v26 = vmul.f32 %v1648_v10, %v1168_v29  ;;  %v9430_v34 = vpop.eup %9429  ;;  %v1708_v41 = vmul.f32 %v1660_v37, %v1180_v44 }
 0x1e8   :  { %v1534_v52 = vmul.f32 %v1510_v18, %v11102_v55  ;;  %v1522_v33 = vadd.f32 0.1274148, %v1498_v11  ;;  %v1731_v61 = vsub.f32 %v1683_v46, %v1707_v53  ;;  %v1672_v55 = vmax.f32 %v11009_v24, 0.0 }
 0x1e9   :  { %v1725_v12 = vsub.f32 %v1677_v63, %v1701_v58  ;;  %v1713_v59 = vmul.f32 %v1665_v56, %v1185_v25  ;;  %v1678_v1 = vmax.f32 %v11037_v13, 0.0  ;;  %v1684_v4 = vmax.f32 %v11012_v28, 0.0  ;;  %v11163_v28 = vld [vmem:[%s16503_s1 + $0x20] sm:$0xff]  ;;  %v11171_v13 = vld [vmem:[%s16503_s1 + $0x28] sm:$0xff] }
 0x1ea   :  { %v1654_v38 = vmul.f32 %v9428_v42, %v1534_v52  ;;  %v1546_v14 = vmul.f32 %v1522_v33, %v11108_v7  ;;  %v1690_v25 = vmax.f32 %v11051_v8, 0.0  ;;  %v1720_v27 = vsub.f32 %v1672_v55, %v1696_v26  ;;  %16863 = vst [vmem:[#allocation14_spill] sm:$0xff] %v11163_v28  ;;  %16864 = vst [vmem:[#allocation12_spill] sm:$0xff] %v11171_v13 }
 0x1eb   :  { %v1737_v15 = vsub.f32 %v1689_v31, %v1713_v59  ;;  %v9001_v35 = vpack.c.bf16 %v1725_v12, %v1719_v20  ;;  %v1732_v44 = vsub.f32 %v1684_v4, %v1708_v41 }
 0x1ec   :  { %v1702_v29 = vmul.f32 %v1654_v38, %v1174_v54  ;;  %v1666_v32 = vmul.f32 %v9430_v34, %v1546_v14  ;;  %v11179_v54 = vld [vmem:[%s16503_s1 + $0x30] sm:$0xff] }
 0x1ed   :  { %v9005_v39 = vpack.c.bf16 %v1737_v15, %v1731_v61  ;;  %16865 = vst [vmem:[#allocation11_spill] sm:$0xff] %v11179_v54 }
 0x1ee   :  { %v1714_v7 = vmul.f32 %v1666_v32, %v1186_v2  ;;  %v1726_v24 = vsub.f32 %v1678_v1, %v1702_v29 }
 0x1f0   :  { %v8999_v57 = vpack.c.bf16 %v1726_v24, %v1720_v27  ;;  %v1738_v50 = vsub.f32 %v1690_v25, %v1714_v7 }
 0x1f2   :  { %9000 = vmatprep.subr.bf16.mxu1 %v8999_v57  ;;  %v9003_v45 = vpack.c.bf16 %v1738_v50, %v1732_v44 }
 0x1f3   :  { %9002 = vmatpush1.bf16.msra.mxu1 %v9001_v35 }
 0x1f4   :  { %9004 = vmatprep.subr.bf16.mxu1 %v9003_v45 }
 0x1f7   :  { %9006 = vmatpush1.bf16.msra.mxu1 %v9005_v39 }
 0x1fa   :  { %8828 = vmatmul.mubr.msk.f32.vlgmr.msra.gmra.mrb[12].mxu1 %vm887_vm0, %v11163_v28 }
 0x1fb   :  { %1845 = vmatprep.mubr.f32.mxu1 %v16860_v30 }
 0x1fe   :  { %8829 = vmatmul.mubr.msk.f32.gmra.mrb[14].mxu1 %vm887_vm0, %v11171_v13 }
 0x1ff   :  { %1851 = vmatprep.mubr.f32.mxu1 %v16860_v30 }
 0x202   :  { %8830 = vmatmul.mubr.msk.f32.gmra.mrb[16].mxu1 %vm887_vm0, %v11179_v54 }
 0x203   :  { %1857 = vmatprep.mubr.f32.mxu1 %v16860_v30 }
 0x204   :  { %v1055_v8 = vpop.f32.mrb[4].mxu1 }
 0x205   :  { %v11182_v2 = vadd.f32 %v1055_v8, %v10998_v22  ;;  %v1057_v6 = vpop.f32.mrb[5].mxu1 }
 0x206   :  { %v11187_v47 = vadd.f32 %v1057_v6, %v10998_v22  ;;  %8831 = vmatmul.mubr.msk.f32.gmra.mrb[18].mxu1 %vm887_vm0, %v11193_v60 }
 0x207   :  { %v16554_v3 = vand.u32 2147483647, %v11182_v2  ;;  %2017 = vmatprep.mubr.f32.mxu1 %v16860_v30  ;;  %v1553_v46 = vmul.f32 %v11182_v2, %v11182_v2 }
 0x208   :  { %v16551_v17 = vand.u32 2147483647, %v11187_v47  ;;  %v1061_v36 = vpop.f32.mrb[6].mxu1  ;;  %v1554_v31 = vmul.f32 %v11187_v47, %v11187_v47 }
 0x209   :  { %v1193_v23 = vmul.f32 0.23164189, %v16554_v3  ;;  %v11200_v62 = vadd.f32 %v1061_v36, %v11014_v43  ;;  %v1063_v21 = vpop.f32.mrb[7].mxu1  ;;  %v1577_v1 = vmul.f32 -0.5, %v1553_v46 }
 0x20a   :  { %v1194_v16 = vmul.f32 0.23164189, %v16551_v17  ;;  %v11207_v40 = vadd.f32 %v1063_v21, %v11014_v43  ;;  %v1578_v29 = vmul.f32 -0.5, %v1554_v31 }
 0x20b   :  { %v1217_v48 = vadd.f32 1.0, %v1193_v23  ;;  %v16553_v49 = vand.u32 2147483647, %v11200_v62  ;;  %v1559_v7 = vmul.f32 %v11200_v62, %v11200_v62  ;;  %v1603_v23 = vmul.f32 1.442695, %v1577_v1 }
 0x20c   :  { %v1218_v10 = vadd.f32 1.0, %v1194_v16  ;;  %v16549_v19 = vand.u32 2147483647, %v11207_v40  ;;  %v1067_v18 = vpop.f32.mrb[8].mxu1  ;;  %v1560_v8 = vmul.f32 %v11207_v40, %v11207_v40 }
 0x20d   :  { %9431 = vrcp.f32 %v1217_v48  ;;  %v1199_v5 = vmul.f32 0.23164189, %v16553_v49  ;;  %v11217_v9 = vadd.f32 %v1067_v18, %v11000_v51  ;;  %v11219_v53 = vpop.f32.mrb[9].mxu1 }
 0x20e   :  { %v1200_v11 = vmul.f32 0.23164189, %v16549_v19  ;;  %9433 = vrcp.f32 %v1218_v10 }
 0x20f   :  { %v1223_v37 = vadd.f32 1.0, %v1199_v5  ;;  %v16543_v58 = vand.u32 2147483647, %v11217_v9  ;;  %v1605_v5 = vmul.f32 1.442695, %v1578_v29 }
 0x210   :  { %v1224_v63 = vadd.f32 1.0, %v1200_v11  ;;  %v11222_v56 = vpop.f32.mrb[10].mxu1  ;;  %v1144_v42 = vpop.f32.mrb[4].mxu0  ;;  %v1583_v11 = vmul.f32 -0.5, %v1559_v7 }
 0x211   :  { %9435 = vrcp.f32 %v1223_v37  ;;  %v11224_v52 = vpop.f32.mrb[11].mxu1  ;;  %v1205_v33 = vmul.f32 0.23164189, %v16543_v58  ;;  %v11231_v26 = vadd.f32 %v1144_v42, %v10998_v22  ;;  %v1146_v12 = vpop.f32.mrb[5].mxu0 }
 0x212   :  { %9437 = vrcp.f32 %v1224_v63  ;;  %v11236_v59 = vadd.f32 %v1146_v12, %v10998_v22 }
 0x213   :  { %v1229_v20 = vadd.f32 1.0, %v1205_v33  ;;  %v16548_v14 = vand.u32 2147483647, %v11231_v26 }
 0x214   :  { %v16547_v61 = vand.u32 2147483647, %v11236_v59  ;;  %v1150_v55 = vpop.f32.mrb[6].mxu0 }
 0x215   :  { %9439 = vrcp.f32 %v1229_v20  ;;  %v1195_v15 = vmul.f32 0.23164189, %v16548_v14  ;;  %v11243_v32 = vadd.f32 %v1150_v55, %v11014_v43  ;;  %v1152_v35 = vpop.f32.mrb[7].mxu0 }
 0x216   :  { %v1196_v25 = vmul.f32 0.23164189, %v16547_v61 }
 0x217   :  { %v9432_v38 = vpop.eup %9431  ;;  %v1219_v39 = vadd.f32 1.0, %v1195_v15  ;;  %v16550_v57 = vand.u32 2147483647, %v11243_v32  ;;  %v11275_v15 = vadd.f32 %v1152_v35, %v11014_v43  ;;  %v11288_v43 = vadd.f32 %v11222_v56, %v11026_v0 }
 0x218   :  { %v1265_v34 = vmul.f32 %v9432_v38, %v1217_v48  ;;  %v9434_v41 = vpop.eup %9433  ;;  %v11253_v45 = vadd.f32 1.0, %v1196_v25  ;;  %v11257_v6 = vpop.f32.mrb[8].mxu0 }
 0x219   :  { %v1266_v4 = vmul.f32 %v9434_v41, %v1218_v10  ;;  %9441 = vrcp.f32 %v1219_v39  ;;  %v1201_v16 = vmul.f32 0.23164189, %v16550_v57  ;;  %v11261_v48 = vpop.f32.mrb[9].mxu0 }
 0x21a   :  { %v1289_v22 = vsub.f32 2.0, %v1265_v34  ;;  %9443 = vrcp.f32 %v11253_v45  ;;  %v1565_v34 = vmul.f32 %v11217_v9, %v11217_v9 }
 0x21b   :  { %v9436_v27 = vpop.eup %9435  ;;  %v1290_v50 = vsub.f32 2.0, %v1266_v4  ;;  %v1225_v46 = vadd.f32 1.0, %v1201_v16 }
 0x21c   :  { %v11251_v44 = vmul.f32 %v9432_v38, %v1289_v22  ;;  %v9438_v36 = vpop.eup %9437  ;;  %v1271_v21 = vmul.f32 %v9436_v27, %v1223_v37  ;;  %v1584_v38 = vmul.f32 -0.5, %v1560_v8  ;;  %v11270_v55 = vpop.f32.mrb[10].mxu0 }
 0x21d   :  { %v11265_v33 = vmul.f32 %v9434_v41, %v1290_v50  ;;  %v1272_v37 = vmul.f32 %v9438_v36, %v1224_v63  ;;  %9445 = vrcp.f32 %v1225_v46  ;;  %v11279_v41 = vadd.f32 %v11219_v53, %v11000_v51  ;;  %v11281_v29 = vpop.f32.mrb[11].mxu0 }
 0x21e   :  { %v1337_v10 = vmul.f32 0.5307027, %v11251_v44  ;;  %v1295_v42 = vsub.f32 2.0, %v1271_v21  ;;  %9447 = vpow2.f32 %v1603_v23  ;;  %v1615_v63 = vmul.f32 1.442695, %v1583_v11 }
 0x21f   :  { %v9440_v31 = vpop.eup %9439  ;;  %v1296_v22 = vsub.f32 2.0, %v1272_v37  ;;  %v1338_v25 = vmul.f32 0.5307027, %v11265_v33  ;;  %9449 = vpow2.f32 %v1605_v5  ;;  %v1617_v53 = vmul.f32 1.442695, %v1584_v38 }
 0x220   :  { %v1361_v12 = vadd.f32 -0.72657603, %v1337_v10  ;;  %v11272_v1 = vmul.f32 %v9436_v27, %v1295_v42  ;;  %v1277_v4 = vmul.f32 %v9440_v31, %v1229_v20  ;;  %v16545_v27 = vand.u32 2147483647, %v11275_v15 }
 0x221   :  { %v1589_v50 = vmul.f32 -0.5, %v1565_v34  ;;  %v11291_v23 = vmul.f32 %v9438_v36, %v1296_v22  ;;  %v16544_v21 = vand.u32 2147483647, %v11279_v41  ;;  %9451 = vpow2.f32 %v1615_v63 }
 0x222   :  { %v1343_v7 = vmul.f32 0.5307027, %v11272_v1  ;;  %v1385_v35 = vmul.f32 %v1361_v12, %v11251_v44  ;;  %v1202_v20 = vmul.f32 0.23164189, %v16545_v27  ;;  %v1301_v56 = vsub.f32 2.0, %v1277_v4 }
 0x223   :  { %v9442_v11 = vpop.eup %9441  ;;  %v1362_v42 = vadd.f32 -0.72657603, %v1338_v25  ;;  %v11302_v5 = vmul.f32 %v11279_v41, %v11279_v41  ;;  %v16546_v36 = vand.u32 2147483647, %v11288_v43  ;;  %9453 = vpow2.f32 %v1617_v53 }
 0x224   :  { %v1367_v8 = vadd.f32 -0.72657603, %v1343_v7  ;;  %v11298_v12 = vadd.f32 1.0, %v1202_v20  ;;  %v1409_v37 = vadd.f32 0.7107069, %v1385_v35  ;;  %v1267_v38 = vmul.f32 %v9442_v11, %v1219_v39  ;;  %v9444_v63 = vpop.eup %9443 }
 0x225   :  { %v1344_v22 = vmul.f32 0.5307027, %v11291_v23  ;;  %v1627_v4 = vmul.f32 1.442695, %v1589_v50  ;;  %v1206_v25 = vmul.f32 0.23164189, %v16544_v21  ;;  %v1268_v20 = vmul.f32 %v9444_v63, %v11253_v45 }
 0x226   :  { %v1391_v34 = vmul.f32 %v1367_v8, %v11272_v1  ;;  %9455 = vrcp.f32 %v11298_v12  ;;  %v1291_v7 = vsub.f32 2.0, %v1267_v38  ;;  %v11311_v58 = vmul.f32 %v9440_v31, %v1301_v56 }
 0x227   :  { %v11315_v39 = vadd.f32 %v11257_v6, %v11000_v51  ;;  %v9446_v35 = vpop.eup %9445  ;;  %v1555_v53 = vmul.f32 %v11231_v26, %v11231_v26  ;;  %v1386_v8 = vmul.f32 %v1362_v42, %v11265_v33  ;;  %v11322_v50 = vmul.f32 0.23164189, %v16546_v36 }
 0x228   :  { %v11326_v38 = vmul.f32 %v11288_v43, %v11288_v43  ;;  %v11328_v45 = vpop.eup %9447  ;;  %v1433_v31 = vmul.f32 %v1409_v37, %v11251_v44  ;;  %v11331_v6 = vmul.f32 %v9442_v11, %v1291_v7  ;;  %v1292_v56 = vsub.f32 2.0, %v1268_v20 }
 0x229   :  { %v1415_v21 = vadd.f32 0.7107069, %v1391_v34  ;;  %v1273_v18 = vmul.f32 %v9446_v35, %v1225_v46  ;;  %v1368_v42 = vadd.f32 -0.72657603, %v1344_v22  ;;  %9457 = vpow2.f32 %v1627_v4  ;;  %v11334_v27 = vpop.eup %9449 }
 0x22a   :  { %v1339_v36 = vmul.f32 0.5307027, %v11331_v6  ;;  %v11337_v61 = vmul.f32 %v9444_v63, %v1292_v56  ;;  %v1349_v14 = vmul.f32 0.5307027, %v11311_v58  ;;  %v16552_v19 = vand.u32 2147483647, %v11315_v39 }
 0x22b   :  { %v1410_v37 = vadd.f32 0.7107069, %v1386_v8  ;;  %v1556_v11 = vmul.f32 %v11236_v59, %v11236_v59  ;;  %v1297_v7 = vsub.f32 2.0, %v1273_v18  ;;  %v11344_v46 = vpop.eup %9451  ;;  %v1457_v22 = vadd.f32 -0.14224836, %v1433_v31 }
 0x22c   :  { %v1363_v4 = vadd.f32 -0.72657603, %v1339_v36  ;;  %v1340_v20 = vmul.f32 0.5307027, %v11337_v61  ;;  %v1439_v63 = vmul.f32 %v1415_v21, %v11272_v1  ;;  %v1579_v56 = vmul.f32 -0.5, %v1555_v53 }
 0x22d   :  { %v11348_v10 = vmul.f32 %v9446_v35, %v1297_v7  ;;  %v1392_v57 = vmul.f32 %v1368_v42, %v11291_v23  ;;  %v11351_v8 = vadd.f32 1.0, %v1206_v25  ;;  %v11353_v16 = vpop.eup %9453  ;;  %v1373_v17 = vadd.f32 -0.72657603, %v1349_v14 }
 0x22e   :  { %v1387_v34 = vmul.f32 %v1363_v4, %v11331_v6  ;;  %v1364_v18 = vadd.f32 -0.72657603, %v1340_v20  ;;  %v1207_v36 = vmul.f32 0.23164189, %v16552_v19  ;;  %v1434_v24 = vmul.f32 %v1410_v37, %v11265_v33 }
 0x22f   :  { %v1580_v21 = vmul.f32 -0.5, %v1556_v11  ;;  %v1345_v35 = vmul.f32 0.5307027, %v11348_v10  ;;  %v1561_v53 = vmul.f32 %v11243_v32, %v11243_v32  ;;  %v1481_v25 = vmul.f32 %v1457_v22, %v11251_v44 }
 0x230   :  { %v9456_v31 = vpop.eup %9455  ;;  %v1388_v42 = vmul.f32 %v1364_v18, %v11337_v61  ;;  %v1463_v7 = vadd.f32 -0.14224836, %v1439_v63  ;;  %v1562_v14 = vmul.f32 %v11275_v15, %v11275_v15  ;;  %v1607_v4 = vmul.f32 1.442695, %v1579_v56 }
 0x231   :  { %v1369_v20 = vadd.f32 -0.72657603, %v1345_v35  ;;  %v1416_v19 = vadd.f32 0.7107069, %v1392_v57  ;;  %v1274_v49 = vmul.f32 %v9456_v31, %v11298_v12  ;;  %v1411_v37 = vadd.f32 0.7107069, %v1387_v34 }
 0x232   :  { %v1412_v11 = vadd.f32 0.7107069, %v1388_v42  ;;  %v1397_v3 = vmul.f32 %v1373_v17, %v11311_v58  ;;  %v1231_v60 = vadd.f32 1.0, %v1207_v36  ;;  %v1458_v13 = vadd.f32 -0.14224836, %v1434_v24 }
 0x233   :  { %v11368_v54 = vpop.eup %9457  ;;  %v1393_v22 = vmul.f32 %v1369_v20, %v11348_v10  ;;  %v1585_v18 = vmul.f32 -0.5, %v1561_v53  ;;  %v1298_v63 = vsub.f32 2.0, %v1274_v49  ;;  %v1505_v30 = vadd.f32 0.1274148, %v1481_v25 }
 0x234   :  { %v1487_v28 = vmul.f32 %v1463_v7, %v11272_v1  ;;  %v1586_v56 = vmul.f32 -0.5, %v1562_v14  ;;  %9459 = vrcp.f32 %v1231_v60  ;;  %v1609_v57 = vmul.f32 1.442695, %v1580_v21 }
 0x235   :  { %v1417_v35 = vadd.f32 0.7107069, %v1393_v22  ;;  %v1440_v12 = vmul.f32 %v1416_v19, %v11291_v23  ;;  %v11373_v34 = vmul.f32 %v9456_v31, %v1298_v63  ;;  %v1435_v17 = vmul.f32 %v1411_v37, %v11331_v6 }
 0x236   :  { %9461 = vpow2.f32 %v1607_v4  ;;  %v1436_v24 = vmul.f32 %v1412_v11, %v11337_v61  ;;  %v1421_v36 = vadd.f32 0.7107069, %v1397_v3  ;;  %v1482_v53 = vmul.f32 %v1458_v13, %v11265_v33 }
 0x237   :  { %v1441_v49 = vmul.f32 %v1417_v35, %v11348_v10  ;;  %v1619_v25 = vmul.f32 1.442695, %v1585_v18  ;;  %v1346_v42 = vmul.f32 0.5307027, %v11373_v34  ;;  %v1529_v21 = vmul.f32 %v1505_v30, %v11251_v44 }
 0x238   :  { %v1511_v7 = vadd.f32 0.1274148, %v1487_v28  ;;  %v1681_v19 = vmax.f32 %v11243_v32, 0.0  ;;  %v1621_v31 = vmul.f32 1.442695, %v1586_v56  ;;  %9463 = vrcp.f32 %v11351_v8 }
 0x239   :  { %v1465_v14 = vadd.f32 -0.14224836, %v1441_v49  ;;  %v1464_v20 = vadd.f32 -0.14224836, %v1440_v12  ;;  %v1370_v37 = vadd.f32 -0.72657603, %v1346_v42  ;;  %9465 = vpow2.f32 %v1609_v57 }
 0x23a   :  { %v1459_v4 = vadd.f32 -0.14224836, %v1435_v17  ;;  %v1460_v3 = vadd.f32 -0.14224836, %v1436_v24  ;;  %v1445_v13 = vmul.f32 %v1421_v36, %v11311_v58  ;;  %v1506_v11 = vadd.f32 0.1274148, %v1482_v53 }
 0x23b   :  { %9467 = vpow2.f32 %v1619_v25  ;;  %v1394_v22 = vmul.f32 %v1370_v37, %v11373_v34  ;;  %v11387_v30 = vadd.f32 %v11261_v48, %v11000_v51  ;;  %v1649_v28 = vmul.f32 %v11328_v45, %v1529_v21 }
 0x23c   :  { %v1535_v44 = vmul.f32 %v1511_v7, %v11272_v1  ;;  %v1489_v18 = vmul.f32 %v1465_v14, %v11348_v10  ;;  %v1682_v63 = vmax.f32 %v11275_v15, 0.0  ;;  %v1488_v56 = vmul.f32 %v1464_v20, %v11291_v23 }
 0x23d   :  { %v1418_v57 = vadd.f32 0.7107069, %v1394_v22  ;;  %9469 = vpow2.f32 %v1621_v31  ;;  %v1184_v35 = vand.u32 2147483647, %v11387_v30  ;;  %v1483_v17 = vmul.f32 %v1459_v4, %v11331_v6 }
 0x23e   :  { %v9460_v12 = vpop.eup %9459  ;;  %v1484_v51 = vmul.f32 %v1460_v3, %v11337_v61  ;;  %v1469_v48 = vadd.f32 -0.14224836, %v1445_v13  ;;  %v1235_v45 = vadd.f32 1.0, %v11322_v50  ;;  %v1530_v1 = vmul.f32 %v1506_v11, %v11265_v33 }
 0x23f   :  { %v1442_v24 = vmul.f32 %v1418_v57, %v11373_v34  ;;  %v1279_v36 = vmul.f32 %v9460_v12, %v1231_v60  ;;  %v1208_v53 = vmul.f32 0.23164189, %v1184_v35  ;;  %v16867_v25 = vand.u32 2147483647, %v11182_v2 }
 0x240   :  { %v9462_v49 = vpop.eup %9461  ;;  %v1655_v21 = vmul.f32 %v11344_v46, %v1535_v44  ;;  %v1513_v7 = vadd.f32 0.1274148, %v1489_v18  ;;  %9471 = vrcp.f32 %v1235_v45  ;;  %v1512_v31 = vadd.f32 0.1274148, %v1488_v56 }
 0x241   :  { %v1697_v42 = vmul.f32 %v1649_v28, %v16867_v25  ;;  %v1466_v14 = vadd.f32 -0.14224836, %v1442_v24  ;;  %v1303_v20 = vsub.f32 2.0, %v1279_v36  ;;  %v1232_v50 = vadd.f32 1.0, %v1208_v53 }
 0x242   :  { %v1507_v37 = vadd.f32 0.1274148, %v1483_v17  ;;  %v1508_v33 = vadd.f32 0.1274148, %v1484_v51  ;;  %v1493_v4 = vmul.f32 %v1469_v48, %v11311_v58  ;;  %v11408_v60 = vadd.f32 %v11270_v55, %v11026_v0  ;;  %v9464_v3 = vpop.eup %9463 }
 0x243   :  { %v1490_v13 = vmul.f32 %v1466_v14, %v11373_v34  ;;  %v11411_v11 = vmul.f32 %v9460_v12, %v1303_v20  ;;  %9473 = vrcp.f32 %v1232_v50  ;;  %v11415_v46 = vadd.f32 %v11224_v52, %v11026_v0  ;;  %v9466_v22 = vpop.eup %9465 }
 0x244   :  { %v1650_v28 = vmul.f32 %v11334_v27, %v1530_v1  ;;  %v1537_v44 = vmul.f32 %v1513_v7, %v11348_v10  ;;  %v1278_v18 = vmul.f32 %v9464_v3, %v11351_v8  ;;  %v1189_v55 = vand.u32 2147483647, %v11408_v60 }
 0x245   :  { %v9468_v56 = vpop.eup %9467  ;;  %v16868_v57 = vand.u32 2147483647, %v11200_v62  ;;  %v1536_v12 = vmul.f32 %v1512_v31, %v11291_v23  ;;  %v1514_v51 = vadd.f32 0.1274148, %v1490_v13  ;;  %v1351_v48 = vmul.f32 0.5307027, %v11411_v11 }
 0x246   :  { %v16869_v52 = vmax.f32 %v11182_v2, 0.0  ;;  %v1531_v27 = vmul.f32 %v1507_v37, %v11331_v6  ;;  %v1302_v10 = vsub.f32 2.0, %v1278_v18  ;;  %v1213_v8 = vmul.f32 0.23164189, %v1189_v55 }
 0x247   :  { %v1703_v17 = vmul.f32 %v1655_v21, %v16868_v57  ;;  %v9470_v1 = vpop.eup %9469  ;;  %v1532_v36 = vmul.f32 %v1508_v33, %v11337_v61  ;;  %v1517_v53 = vadd.f32 0.1274148, %v1493_v4  ;;  %v1375_v25 = vadd.f32 -0.72657603, %v1351_v48 }
 0x248   :  { %v11427_v24 = vsub.f32 %v16869_v52, %v1697_v42  ;;  %v1188_v23 = vand.u32 2147483647, %v11415_v46  ;;  %v1657_v21 = vmul.f32 %v9468_v56, %v1537_v44  ;;  %v1538_v7 = vmul.f32 %v1514_v51, %v11373_v34 }
 0x249   :  { %v11435_v31 = vmul.f32 %v9464_v3, %v1302_v10  ;;  %v1237_v2 = vadd.f32 1.0, %v1213_v8  ;;  %v16870_v42 = vand.u32 2147483647, %v11187_v47  ;;  %v16871_v14 = vmax.f32 %v11200_v62, 0.0 }
 0x24a   :  { %v1656_v37 = vmul.f32 %v11353_v16, %v1536_v12  ;;  %v1212_v61 = vmul.f32 0.23164189, %v1188_v23  ;;  %v9472_v33 = vpop.eup %9471  ;;  %v1651_v4 = vmul.f32 %v9462_v49, %v1531_v27  ;;  %v11447_v34 = vadd.f32 %v11281_v29, %v11026_v0 }
 0x24b   :  { %v1698_v6 = vmul.f32 %v1650_v28, %v16870_v42  ;;  %v1727_v20 = vsub.f32 %v16871_v14, %v1703_v17  ;;  %v1350_v13 = vmul.f32 0.5307027, %v11435_v31  ;;  %9475 = vrcp.f32 %v1237_v2 }
 0x24c   :  { %v1652_v3 = vmul.f32 %v9466_v22, %v1532_v36  ;;  %v1541_v28 = vmul.f32 %v1517_v53, %v11311_v58  ;;  %v1399_v62 = vmul.f32 %v1375_v25, %v11411_v11  ;;  %v1283_v44 = vmul.f32 %v9472_v33, %v1235_v45 }
 0x24d   :  { %v16872_v16 = vand.u32 2147483647, %v11243_v32  ;;  %v1658_v56 = vmul.f32 %v9470_v1, %v1538_v7  ;;  %v1374_v57 = vadd.f32 -0.72657603, %v1350_v13  ;;  %v1236_v17 = vadd.f32 1.0, %v1212_v61  ;;  %v9474_v49 = vpop.eup %9473 }
 0x24e   :  { %v16873_v12 = vand.u32 2147483647, %v11207_v40  ;;  %v1567_v0 = vmul.f32 %v11315_v39, %v11315_v39  ;;  %v1307_v29 = vsub.f32 2.0, %v1283_v44  ;;  %v1190_v22 = vand.u32 2147483647, %v11447_v34 }
 0x24f   :  { %v1705_v18 = vmul.f32 %v1657_v21, %v16872_v16  ;;  %v16874_v58 = vand.u32 2147483647, %v11231_v26  ;;  %v1280_v45 = vmul.f32 %v9474_v49, %v1232_v50  ;;  %v1595_v52 = vmul.f32 -0.5, %v11326_v38 }
 0x250   :  { %v1704_v51 = vmul.f32 %v1656_v37, %v16873_v12  ;;  %9477 = vrcp.f32 %v1236_v17  ;;  %v16875_v27 = vand.u32 2147483647, %v11236_v59  ;;  %v1423_v8 = vadd.f32 0.7107069, %v1399_v62 }
 0x251   :  { %v1699_v48 = vmul.f32 %v1651_v4, %v16874_v58  ;;  %v11463_v1 = vmul.f32 %v9472_v33, %v1307_v29  ;;  %v1214_v36 = vmul.f32 0.23164189, %v1190_v22  ;;  %v1729_v53 = vsub.f32 %v1681_v19, %v1705_v18 }
 0x252   :  { %v1700_v10 = vmul.f32 %v1652_v3, %v16875_v27  ;;  %v16876_v25 = vand.u32 2147483647, %v11275_v15  ;;  %v1398_v50 = vmul.f32 %v1374_v57, %v11435_v31  ;;  %v1304_v7 = vsub.f32 2.0, %v1280_v45 }
 0x253   :  { %v1355_v38 = vmul.f32 0.5307027, %v11463_v1  ;;  %v1238_v42 = vadd.f32 1.0, %v1214_v36  ;;  %v16877_v14 = vmax.f32 %v11187_v47, 0.0  ;;  %v16878_v61 = vmax.f32 %v11207_v40, 0.0 }
 0x254   :  { %v1706_v21 = vmul.f32 %v1658_v56, %v16876_v25  ;;  %v16879_v4 = vmax.f32 %v11231_v26, 0.0  ;;  %v1591_v32 = vmul.f32 -0.5, %v1567_v0  ;;  %v11479_v19 = vmul.f32 %v9474_v49, %v1304_v7 }
 0x255   :  { %v1722_v37 = vsub.f32 %v16877_v14, %v1698_v6  ;;  %v1728_v33 = vsub.f32 %v16878_v61, %v1704_v51  ;;  %v1639_v3 = vmul.f32 1.442695, %v1595_v52  ;;  %v1447_v62 = vmul.f32 %v1423_v8, %v11411_v11  ;;  %v9476_v18 = vpop.eup %9475 }
 0x256   :  { %v1723_v13 = vsub.f32 %v16879_v4, %v1699_v48  ;;  %v1379_v44 = vadd.f32 -0.72657603, %v1355_v38  ;;  %9479 = vrcp.f32 %v1238_v42  ;;  %v1352_v56 = vmul.f32 0.5307027, %v11479_v19 }
 0x257   :  { %v9007_v16 = vpack.c.bf16 %v1728_v33, %v1722_v37  ;;  %v16880_v47 = vmax.f32 %v11236_v59, 0.0  ;;  %v1730_v40 = vsub.f32 %v1682_v63, %v1706_v21  ;;  %v9009_v26 = vpack.c.bf16 %v1727_v20, %v11427_v24 }
 0x258   :  { %v1422_v57 = vadd.f32 0.7107069, %v1398_v50  ;;  %v1403_v49 = vmul.f32 %v1379_v44, %v11463_v1  ;;  %v1285_v12 = vmul.f32 %v9476_v18, %v1237_v2  ;;  %v9017_v51 = vpack.c.bf16 %v1729_v53, %v1723_v13 }
 0x259   :  { %v1724_v6 = vsub.f32 %v16880_v47, %v1700_v10  ;;  %9008 = vmatprep.subr.bf16.mxu0 %v9007_v16  ;;  %v1590_v0 = vmul.f32 -0.5, %v11302_v5  ;;  %v1376_v29 = vadd.f32 -0.72657603, %v1352_v56  ;;  %v1573_v58 = vmul.f32 %v11408_v60, %v11408_v60 }
 0x25a   :  { %9010 = vmatpush1.bf16.msra.mxu0 %v9009_v26  ;;  %v1661_v59 = vmul.f32 %v11368_v54, %v1541_v28  ;;  %v1631_v15 = vmul.f32 1.442695, %v1591_v32  ;;  %v1427_v63 = vadd.f32 0.7107069, %v1403_v49  ;;  %v1309_v45 = vsub.f32 2.0, %v1285_v12  ;;  %v9478_v24 = vpop.eup %9477 }
 0x25b   :  { %v9015_v48 = vpack.c.bf16 %v1730_v40, %v1724_v6  ;;  %v1471_v20 = vadd.f32 -0.14224836, %v1447_v62  ;;  %v1400_v52 = vmul.f32 %v1376_v29, %v11479_v19  ;;  %v1568_v2 = vmul.f32 %v11387_v30, %v11387_v30 }
 0x25c   :  { %9481 = vpow2.f32 %v1639_v3  ;;  %v1446_v5 = vmul.f32 %v1422_v57, %v11435_v31  ;;  %v1451_v27 = vmul.f32 %v1427_v63, %v11463_v1  ;;  %v11498_v10 = vmul.f32 %v9476_v18, %v1309_v45 }
 0x25d   :  { %9016 = vmatprep.subr.bf16.mxu1 %v9015_v48  ;;  %v1284_v8 = vmul.f32 %v9478_v24, %v1236_v17  ;;  %v1629_v54 = vmul.f32 1.442695, %v1590_v0  ;;  %v1424_v28 = vadd.f32 0.7107069, %v1400_v52  ;;  %v1597_v36 = vmul.f32 -0.5, %v1573_v58 }
 0x25e   :  { %9018 = vmatpush1.bf16.msra.mxu1 %v9017_v51  ;;  %v1572_v53 = vmul.f32 %v11415_v46, %v11415_v46  ;;  %v1685_v25 = vmax.f32 %v11217_v9, 0.0  ;;  %v1475_v21 = vadd.f32 -0.14224836, %v1451_v27  ;;  %v1357_v50 = vmul.f32 0.5307027, %v11498_v10 }
 0x25f   :  { %v1308_v7 = vsub.f32 2.0, %v1284_v8  ;;  %v16881_v38 = vand.u32 2147483647, %v11217_v9  ;;  %v1495_v37 = vmul.f32 %v1471_v20, %v11411_v11  ;;  %9483 = vpow2.f32 %v1631_v15 }
 0x260   :  { %v1592_v17 = vmul.f32 -0.5, %v1568_v2  ;;  %v9480_v61 = vpop.eup %9479  ;;  %v1470_v33 = vadd.f32 -0.14224836, %v1446_v5  ;;  %v1499_v4 = vmul.f32 %v1475_v21, %v11463_v1  ;;  %v1381_v13 = vadd.f32 -0.72657603, %v1357_v50 }
 0x261   :  { %v1709_v14 = vmul.f32 %v1661_v59, %v16881_v38  ;;  %v11508_v32 = vmul.f32 %v9478_v24, %v1308_v7  ;;  %v1448_v3 = vmul.f32 %v1424_v28, %v11479_v19  ;;  %v1643_v62 = vmul.f32 1.442695, %v1597_v36 }
 0x262   :  { %v1596_v44 = vmul.f32 -0.5, %v1572_v53  ;;  %v1286_v16 = vmul.f32 %v9480_v61, %v1238_v42  ;;  %v1523_v18 = vadd.f32 0.1274148, %v1499_v4  ;;  %v1405_v9 = vmul.f32 %v1381_v13, %v11498_v10 }
 0x263   :  { %v1356_v56 = vmul.f32 0.5307027, %v11508_v32  ;;  %v1574_v47 = vmul.f32 %v11447_v34, %v11447_v34  ;;  %v1519_v6 = vadd.f32 0.1274148, %v1495_v37  ;;  %9485 = vpow2.f32 %v1629_v54 }
 0x264   :  { %v1633_v40 = vmul.f32 1.442695, %v1592_v17  ;;  %v1310_v26 = vsub.f32 2.0, %v1286_v16  ;;  %v1494_v57 = vmul.f32 %v1470_v33, %v11435_v31  ;;  %v1547_v49 = vmul.f32 %v1523_v18, %v11463_v1 }
 0x265   :  { %v1429_v12 = vadd.f32 0.7107069, %v1405_v9  ;;  %v1380_v51 = vadd.f32 -0.72657603, %v1356_v56  ;;  %v1472_v42 = vadd.f32 -0.14224836, %v1448_v3  ;;  %9487 = vpow2.f32 %v1643_v62 }
 0x266   :  { %v9482_v0 = vpop.eup %9481  ;;  %v1641_v29 = vmul.f32 1.442695, %v1596_v44  ;;  %v1334_v58 = vmul.f32 %v9480_v61, %v1310_v26  ;;  %v1598_v63 = vmul.f32 -0.5, %v1574_v47  ;;  %v1543_v45 = vmul.f32 %v1519_v6, %v11411_v11 }
 0x267   :  { %v1667_v48 = vmul.f32 %v9482_v0, %v1547_v49  ;;  %v1453_v59 = vmul.f32 %v1429_v12, %v11498_v10  ;;  %v1404_v15 = vmul.f32 %v1380_v51, %v11508_v32  ;;  %9489 = vpow2.f32 %v1633_v40  ;;  %v11540_v12 = vpop.permute.xlu0 %1745  ;;  %v11542_v0 = vpop.permute.xlu1 %1750 }
 0x268   :  { %v1691_v24 = vmax.f32 %v11288_v43, 0.0  ;;  %v1358_v20 = vmul.f32 0.5307027, %v1334_v58  ;;  %v1518_v1 = vadd.f32 0.1274148, %v1494_v57  ;;  %v11523_v54 = vsub.f32 %v1685_v25, %v1709_v14  ;;  %16884 = vst [vmem:[#allocation8_spill] sm:$0xff] %v11540_v12 }
 0x269   :  { %v16882_v52 = vand.u32 2147483647, %v11288_v43  ;;  %v1477_v5 = vadd.f32 -0.14224836, %v1453_v59  ;;  %v1428_v27 = vadd.f32 0.7107069, %v1404_v15  ;;  %v9484_v8 = vpop.eup %9483  ;;  %v1496_v28 = vmul.f32 %v1472_v42, %v11479_v19 }
 0x26a   :  { %9491 = vpow2.f32 %v1641_v29  ;;  %v1382_v36 = vadd.f32 -0.72657603, %v1358_v20  ;;  %v1645_v50 = vmul.f32 1.442695, %v1598_v63  ;;  %v1663_v7 = vmul.f32 %v9484_v8, %v1543_v45  ;;  %16885 = vst [vmem:[#allocation9_spill] sm:$0xff] %v11542_v0  ;;  %v16889_v8 = vld [vmem:[#allocation5_spill] sm:$0xff] }
 0x26b   :  { %v1715_v2 = vmul.f32 %v1667_v48, %v16882_v52  ;;  %v1501_v11 = vmul.f32 %v1477_v5, %v11498_v10  ;;  %v1452_v21 = vmul.f32 %v1428_v27, %v11508_v32  ;;  %v1542_v43 = vmul.f32 %v1518_v1, %v11435_v31  ;;  %v11550_v52 = vpop.permute.xlu0 %1755  ;;  %v11554_v27 = vpop.permute.xlu1 %1760 }
 0x26c   :  { %v1406_v38 = vmul.f32 %v1382_v36, %v1334_v58  ;;  %v1520_v14 = vadd.f32 0.1274148, %v1496_v28  ;;  %9493 = vpow2.f32 %v1645_v50  ;;  %v16883_v44 = vand.u32 2147483647, %v11315_v39  ;;  %16887 = vst [vmem:[#allocation6_spill] sm:$0xff] %v11550_v52  ;;  %16888 = vst [vmem:[#allocation10_spill] sm:$0xff] %v11554_v27 }
 0x26d   :  { %v1739_v53 = vsub.f32 %v1691_v24, %v1715_v2  ;;  %v1525_v37 = vadd.f32 0.1274148, %v1501_v11  ;;  %v1476_v17 = vadd.f32 -0.14224836, %v1452_v21  ;;  %v9486_v25 = vpop.eup %9485  ;;  %v1687_v40 = vmax.f32 %v11315_v39, 0.0 }
 0x26e   :  { %v1430_v33 = vadd.f32 0.7107069, %v1406_v38  ;;  %v1711_v16 = vmul.f32 %v1663_v7, %v16883_v44  ;;  %v1662_v18 = vmul.f32 %v9486_v25, %v1542_v43  ;;  %v1544_v47 = vmul.f32 %v1520_v14, %v11479_v19 }
 0x26f   :  { %v9013_v61 = vpack.c.bf16 %v1739_v53, %v11523_v54  ;;  %v1549_v4 = vmul.f32 %v1525_v37, %v11498_v10  ;;  %v1500_v13 = vmul.f32 %v1476_v17, %v11508_v32  ;;  %v9488_v3 = vpop.eup %9487  ;;  %v1693_v26 = vmax.f32 %v11408_v60, 0.0  ;;  %v10071_v53 = vld [vmem:[%s16502_s0] sm:$0xff]  ;;  %v11570_v21 = vpop.permute.xlu0 %2919 }
 0x270   :  { %v1454_v62 = vmul.f32 %v1430_v33, %v1334_v58  ;;  %v1735_v42 = vsub.f32 %v1687_v40, %v1711_v16  ;;  %v16886_v29 = vand.u32 2147483647, %v11279_v41  ;;  %v1686_v63 = vmax.f32 %v11279_v41, 0.0  ;;  %v11572_v50 = vpop.permute.xlu1 %2924  ;;  %v16892_v37 = vld [vmem:[#allocation12_spill] sm:$0xff] }
 0x271   :  { %v1669_v9 = vmul.f32 %v9488_v3, %v1549_v4  ;;  %v1524_v31 = vadd.f32 0.1274148, %v1500_v13  ;;  %v9490_v56 = vpop.eup %9489  ;;  %v1692_v60 = vmax.f32 %v11415_v46, 0.0  ;;  %v11557_v41 = vsub.s32 6, %v16889_v8  ;;  %v16893_v13 = vld [vmem:[#allocation11_spill] sm:$0xff] }
 0x272   :  { %v1478_v6 = vadd.f32 -0.14224836, %v1454_v62  ;;  %v1710_v19 = vmul.f32 %v1662_v18, %v16886_v29  ;;  %v1664_v39 = vmul.f32 %v9490_v56, %v1544_v47  ;;  %v1688_v46 = vmax.f32 %v11387_v30, 0.0 }
 0x273   :  { %v1717_v10 = vmul.f32 %v1669_v9, %v1189_v55  ;;  %v1548_v57 = vmul.f32 %v1524_v31, %v11508_v32  ;;  %v11564_v28 = vsub.s32 2, %v16889_v8  ;;  %v2944_v11 = vrot.slane %v10071_v53, %v11557_v41  ;;  %v11584_v17 = vpop.permute.xlu0 %3017  ;;  %v16894_v31 = vld [vmem:[#allocation21_spill] sm:$0xff] }
 0x274   :  { %v9492_v49 = vpop.eup %9491  ;;  %v1502_v51 = vmul.f32 %v1478_v6, %v1334_v58  ;;  %v1734_v20 = vsub.f32 %v1686_v63, %v1710_v19  ;;  %v1712_v2 = vmul.f32 %v1664_v39, %v1184_v35  ;;  %v16891_v7 = vmov 0.0   ;;  %v11590_v25 = vpop.permute.xlu1 %3022 }
 0x275   :  { %v1741_v48 = vsub.f32 %v1693_v26, %v1717_v10  ;;  %v1668_v59 = vmul.f32 %v9492_v49, %v1548_v57  ;;  %v2974_v38 = vrot.slane %v2944_v11, %v11564_v28  ;;  %v10072_v26 = vld [vmem:[%s16502_s0 + $0x8] sm:$0xff] }
 0x276   :  { %v1526_v15 = vadd.f32 0.1274148, %v1502_v51  ;;  %v9494_v24 = vpop.eup %9493  ;;  %v1736_v36 = vsub.f32 %v1688_v46, %v1712_v2  ;;  %v2948_v10 = vrot.slane %v10072_v26, %v11564_v28  ;;  %v2952_v49 = vrot.slane %v10072_v26, %v11557_v41  ;;  %v10073_v51 = vld [vmem:[%s16502_s0 + $0x10] sm:$0xff] }
 0x277   :  { %v1716_v55 = vmul.f32 %v1668_v59, %v1188_v23  ;;  %v9021_v32 = vpack.c.bf16 %v1741_v48, %v1735_v42  ;;  %v1694_v23 = vmax.f32 %v11447_v34, 0.0  ;;  %v2940_v34 = vrot.slane %v10071_v53, %v11564_v28  ;;  %v11616_v18 = vpop.permute.xlu0 %2929 }
 0x278   :  { %v1550_v45 = vmul.f32 %v1526_v15, %v1334_v58  ;;  %v2998_v14 = vmul.f32 %v2974_v38, %v11572_v50  ;;  %v11618_v9 = vpop.permute.xlu1 %2934  ;;  %v2956_v42 = vrot.slane %v10073_v51, %v11564_v28  ;;  %v3004_v48 = vmul.f32 %v2974_v38, %v11616_v18 }
 0x279   :  { %v1740_v1 = vsub.f32 %v1692_v60, %v1716_v55  ;;  %v11580_v43 = vrot.slane %v2940_v34, %v11564_v28  ;;  %v3010_v15 = vmul.f32 %v2974_v38, %v11618_v9  ;;  %v2960_v60 = vrot.slane %v10073_v51, %v11557_v41 }
 0x27a   :  { %v1670_v5 = vmul.f32 %v9494_v24, %v1550_v45  ;;  %v11604_v62 = vadd.f32 %v11590_v25, %v2998_v14  ;;  %v11658_v55 = vrot.slane %v2948_v10, %v11564_v28  ;;  %v11664_v24 = vrot.slane %v2952_v49, %v11564_v28 }
 0x27b   :  { %v9011_v54 = vpack.c.bf16 %v1740_v1, %v1734_v20  ;;  %v2991_v33 = vmul.f32 %v11580_v43, %v11570_v21  ;;  %v2997_v3 = vmul.f32 %v11580_v43, %v11572_v50  ;;  %v11641_v29 = vpop.permute.xlu0 %3027  ;;  %v11667_v20 = vrot.slane %v2956_v42, %v11564_v28 }
 0x27c   :  { %v1718_v58 = vmul.f32 %v1670_v5, %v1190_v22  ;;  %v16890_v22 = vld [vmem:[#allocation14_spill] sm:$0xff]  ;;  %v16568_v47 = vand.u32 2147483647, %v11604_v62  ;;  %v11648_v59 = vpop.permute.xlu1 %3032  ;;  %v11673_v41 = vrot.slane %v2960_v60, %v11564_v28  ;;  %v2999_v46 = vmul.f32 %v11658_v55, %v11572_v50 }
 0x27d   :  { %9012 = vmatprep.subr.bf16.mxu0 %v9011_v54  ;;  %v11610_v44 = vadd.f32 %v11584_v17, %v2991_v33  ;;  %v11614_v16 = vadd.f32 %v11590_v25, %v2997_v3  ;;  %v11670_v1 = vadd.f32 %v11648_v59, %v3010_v15  ;;  %v2993_v14 = vmul.f32 %v11658_v55, %v11570_v21 }
 0x27e   :  { %v1742_v35 = vsub.f32 %v1694_v23, %v1718_v58  ;;  %9014 = vmatpush1.bf16.msra.mxu0 %v9013_v61  ;;  %v2992_v61 = vmul.f32 %v2974_v38, %v11570_v21  ;;  %v3090_v19 = vmul.f32 0.23164189, %v16568_v47  ;;  %v3000_v58 = vmul.f32 %v11664_v24, %v11572_v50 }
 0x27f   :  { %v16567_v6 = vand.u32 2147483647, %v11610_v44  ;;  %v16566_v40 = vand.u32 2147483647, %v11614_v16  ;;  %v11684_v53 = vadd.f32 %v11590_v25, %v2999_v46  ;;  %v3449_v34 = vmul.f32 %v11614_v16, %v11614_v16 }
 0x280   :  { %v9019_v30 = vpack.c.bf16 %v1742_v35, %v1736_v36  ;;  %v11597_v4 = vadd.f32 %v11584_v17, %v2992_v61  ;;  %v3114_v2 = vadd.f32 1.0, %v3090_v19  ;;  %v3001_v36 = vmul.f32 %v11667_v20, %v11572_v50 }
 0x281   :  { %8832 = vmatmul.mubr.msk.f32.vlgmr.msra.gmra.mrb[12].mxu0 %vm887_vm0, %v16890_v22  ;;  %v3083_v39 = vmul.f32 0.23164189, %v16567_v6  ;;  %v3089_v63 = vmul.f32 0.23164189, %v16566_v40  ;;  %v16564_v35 = vand.u32 2147483647, %v11670_v1  ;;  %v11687_v28 = vadd.f32 %v11590_v25, %v3000_v58 }
 0x282   :  { %9020 = vmatprep.subr.bf16.mxu1 %v9019_v30  ;;  %1934 = vmatprep.mubr.f32.mxu0 %v16891_v7  ;;  %v16569_v56 = vand.u32 2147483647, %v11597_v4  ;;  %16895 = vst [vmem:[#allocation7_spill] sm:$0xff] %v11684_v53  ;;  %v11690_v11 = vadd.f32 %v11590_v25, %v3001_v36  ;;  %v3002_v30 = vmul.f32 %v11673_v41, %v11572_v50 }
 0x283   :  { %9022 = vmatpush1.bf16.msra.mxu1 %v9021_v32  ;;  %v11661_v32 = vadd.f32 %v11641_v29, %v3004_v48  ;;  %v3107_v5 = vadd.f32 1.0, %v3083_v39  ;;  %v3113_v54 = vadd.f32 1.0, %v3089_v63  ;;  %16896 = vst [vmem:[#allocation15_spill] sm:$0xff] %v11687_v28  ;;  %v3450_v38 = vmul.f32 %v11604_v62, %v11604_v62 }
 0x284   :  { %v3084_v57 = vmul.f32 0.23164189, %v16569_v56  ;;  %16897 = vst [vmem:[#allocation17_spill] sm:$0xff] %v11690_v11  ;;  %v11703_v61 = vadd.f32 %v11590_v25, %v3002_v30  ;;  %v3451_v50 = vmul.f32 %v11684_v53, %v11684_v53  ;;  %v3452_v33 = vmul.f32 %v11687_v28, %v11687_v28 }
 0x285   :  { %8833 = vmatmul.mubr.msk.f32.gmra.mrb[14].mxu0 %vm887_vm0, %v16892_v37  ;;  %v16565_v23 = vand.u32 2147483647, %v11661_v32  ;;  %v2994_v3 = vmul.f32 %v11664_v24, %v11570_v21  ;;  %v3473_v25 = vmul.f32 -0.5, %v3449_v34  ;;  %v2996_v10 = vmul.f32 %v11673_v41, %v11570_v21 }
 0x286   :  { %8836 = vmatmul.mubr.msk.f32.vlgmr.msra.gmra.mrb[20].mxu1 %vm887_vm0, %v16890_v22  ;;  %1940 = vmatprep.mubr.f32.mxu0 %v16891_v7  ;;  %v3108_v45 = vadd.f32 1.0, %v3084_v57  ;;  %16898 = vst [vmem:[#allocation16_spill] sm:$0xff] %v11703_v61  ;;  %v3474_v57 = vmul.f32 -0.5, %v3450_v38  ;;  %v11722_v49 = vadd.f32 %v11584_v17, %v2993_v14  ;;  %v3454_v19 = vmul.f32 %v11703_v61, %v11703_v61 }
 0x287   :  { %2023 = vmatprep.mubr.f32.mxu1 %v16891_v7  ;;  %v3096_v22 = vmul.f32 0.23164189, %v16565_v23  ;;  %v11729_v48 = vadd.f32 %v11584_v17, %v2994_v3  ;;  %v3475_v63 = vmul.f32 -0.5, %v3451_v50  ;;  %v3476_v60 = vmul.f32 -0.5, %v3452_v33 }
 0x288   :  { %9495 = vrcp.f32 %v3108_v45  ;;  %16899 = vst [vmem:[#allocation18_spill] sm:$0xff] %v11722_v49  ;;  %v11735_v46 = vadd.f32 %v11584_v17, %v2996_v10  ;;  %v3503_v36 = vmul.f32 1.442695, %v3473_v25  ;;  %v3443_v30 = vmul.f32 %v11610_v44, %v11610_v44 }
 0x289   :  { %8834 = vmatmul.mubr.msk.f32.gmra.mrb[16].mxu0 %vm887_vm0, %v16893_v13  ;;  %9497 = vrcp.f32 %v3114_v2  ;;  %v11717_v26 = vadd.f32 1.0, %v3096_v22  ;;  %16900 = vst [vmem:[#allocation19_spill] sm:$0xff] %v11729_v48  ;;  %v3444_v34 = vmul.f32 %v11597_v4, %v11597_v4  ;;  %v3505_v38 = vmul.f32 1.442695, %v3474_v57 }
 0x28a   :  { %8837 = vmatmul.mubr.msk.f32.gmra.mrb[22].mxu1 %vm887_vm0, %v16892_v37  ;;  %1946 = vmatprep.mubr.f32.mxu0 %v16891_v7  ;;  %9499 = vrcp.f32 %v3107_v5  ;;  %v3102_v37 = vmul.f32 0.23164189, %v16564_v35  ;;  %16902 = vst [vmem:[#allocation20_spill] sm:$0xff] %v11735_v46  ;;  %v3446_v50 = vmul.f32 %v11729_v48, %v11729_v48  ;;  %v3507_v3 = vmul.f32 1.442695, %v3475_v63 }
 0x28b   :  { %2029 = vmatprep.mubr.f32.mxu1 %v16891_v7  ;;  %9501 = vrcp.f32 %v3113_v54  ;;  %v3448_v25 = vmul.f32 %v11735_v46, %v11735_v46  ;;  %v3467_v57 = vmul.f32 -0.5, %v3443_v30  ;;  %v3468_v35 = vmul.f32 -0.5, %v3444_v34 }
 0x28c   :  { %v11724_v51 = vadd.f32 1.0, %v3102_v37  ;;  %9503 = vrcp.f32 %v11717_v26  ;;  %v3445_v37 = vmul.f32 %v11722_v49, %v11722_v49  ;;  %v3470_v6 = vmul.f32 -0.5, %v3446_v50 }
 0x28d   :  { %8835 = vmatmul.mubr.msk.f32.gmra.mrb[18].mxu0 %vm887_vm0, %v16894_v31  ;;  %v16573_v8 = vand.u32 2147483647, %v11729_v48  ;;  %v3472_v63 = vmul.f32 -0.5, %v3448_v25 }
 0x28e   :  { %8838 = vmatmul.mubr.msk.f32.gmra.mrb[24].mxu1 %vm887_vm0, %v16893_v13  ;;  %2714 = vmatprep.mubr.f32.mxu0 %v16891_v7  ;;  %v3453_v13 = vmul.f32 %v11690_v11, %v11690_v11  ;;  %9505 = vrcp.f32 %v11724_v51 }
 0x28f   :  { %2035 = vmatprep.mubr.f32.mxu1 %v16891_v7  ;;  %9507 = vpow2.f32 %v3503_v36 }
 0x290   :  { %9509 = vpow2.f32 %v3505_v38  ;;  %v3497_v38 = vmul.f32 1.442695, %v3470_v6  ;;  %v3011_v6 = vmul.f32 %v11658_v55, %v11618_v9 }
 0x291   :  { %9511 = vpow2.f32 %v3507_v3 }
 0x292   :  { %8839 = vmatmul.mubr.msk.f32.gmra.mrb[26].mxu1 %vm887_vm0, %v16894_v31  ;;  %v2995_v31 = vmul.f32 %v11667_v20, %v11570_v21  ;;  %v9496_v42 = vpop.eup %9495  ;;  %v3477_v21 = vmul.f32 -0.5, %v3453_v13 }
 0x293   :  { %2803 = vmatprep.mubr.f32.mxu1 %v16891_v7  ;;  %v9498_v15 = vpop.eup %9497  ;;  %v3156_v14 = vmul.f32 %v9496_v42, %v3108_v45  ;;  %v3491_v7 = vmul.f32 1.442695, %v3467_v57 }
 0x294   :  { %v11732_v39 = vadd.f32 %v11584_v17, %v2995_v31  ;;  %v9500_v58 = vpop.eup %9499  ;;  %v3478_v17 = vmul.f32 -0.5, %v3454_v19  ;;  %v3162_v13 = vmul.f32 %v9498_v15, %v3114_v2  ;;  %v3509_v31 = vmul.f32 1.442695, %v3476_v60 }
 0x295   :  { %v9502_v22 = vpop.eup %9501  ;;  %v3155_v10 = vmul.f32 %v9500_v58, %v3107_v5  ;;  %v3511_v23 = vmul.f32 1.442695, %v3477_v21  ;;  %v3469_v19 = vmul.f32 -0.5, %v3445_v37  ;;  %v3180_v40 = vsub.f32 2.0, %v3156_v14 }
 0x296   :  { %16901 = vst [vmem:[#allocation13_spill] sm:$0xff] %v11732_v39  ;;  %v3447_v33 = vmul.f32 %v11732_v39, %v11732_v39  ;;  %v3161_v45 = vmul.f32 %v9502_v22, %v3113_v54  ;;  %v3186_v56 = vsub.f32 2.0, %v3162_v13  ;;  %v3513_v2 = vmul.f32 1.442695, %v3478_v17  ;;  %v9504_v34 = vpop.eup %9503 }
 0x297   :  { %v3179_v60 = vsub.f32 2.0, %v3155_v10  ;;  %9513 = vpow2.f32 %v3509_v31  ;;  %v3493_v5 = vmul.f32 1.442695, %v3468_v35  ;;  %v3495_v30 = vmul.f32 1.442695, %v3469_v19 }
 0x298   :  { %v3471_v47 = vmul.f32 -0.5, %v3447_v33  ;;  %v3185_v36 = vsub.f32 2.0, %v3161_v45  ;;  %9515 = vpow2.f32 %v3511_v23  ;;  %v11752_v54 = vmul.f32 %v9496_v42, %v3180_v40  ;;  %v9506_v50 = vpop.eup %9505 }
 0x299   :  { %v16572_v21 = vand.u32 2147483647, %v11687_v28  ;;  %v11757_v14 = vmul.f32 %v9498_v15, %v3186_v56  ;;  %v3086_v17 = vmul.f32 0.23164189, %v16573_v8  ;;  %9517 = vpow2.f32 %v3513_v2  ;;  %v11779_v13 = vpop.eup %9507 }
 0x29a   :  { %v11755_v37 = vmul.f32 1.442695, %v3471_v47  ;;  %v11761_v33 = vmul.f32 1.442695, %v3472_v63  ;;  %v3009_v23 = vmul.f32 %v11580_v43, %v11618_v9  ;;  %v11765_v40 = vmul.f32 %v9500_v58, %v3179_v60  ;;  %v11788_v25 = vpop.eup %9509 }
 0x29b   :  { %9519 = vpow2.f32 %v3491_v7  ;;  %v3012_v56 = vmul.f32 %v11664_v24, %v11618_v9  ;;  %v11771_v47 = vmul.f32 %v9502_v22, %v3185_v36  ;;  %v3013_v35 = vmul.f32 %v11667_v20, %v11618_v9  ;;  %v11802_v2 = vpop.eup %9511 }
 0x29c   :  { %v3228_v42 = vmul.f32 0.5307027, %v11752_v54  ;;  %v3168_v15 = vmul.f32 %v9504_v34, %v11717_v26  ;;  %v3092_v58 = vmul.f32 0.23164189, %v16572_v21  ;;  %v11782_v7 = vadd.f32 %v11648_v59, %v3009_v23  ;;  %16906 = vst [vmem:[#allocation21_spill] sm:$0xff] %v11802_v2 }
 0x29d   :  { %v3234_v3 = vmul.f32 0.5307027, %v11757_v14  ;;  %v3174_v22 = vmul.f32 %v9506_v50, %v11724_v51  ;;  %v11786_v31 = vadd.f32 1.0, %v3086_v17  ;;  %9521 = vpow2.f32 %v3493_v5 }
 0x29e   :  { %16903 = vst [vmem:[#allocation14_spill] sm:$0xff] %v11782_v7  ;;  %v3014_v26 = vmul.f32 %v11673_v41, %v11618_v9  ;;  %v3003_v10 = vmul.f32 %v11580_v43, %v11616_v18  ;;  %v3227_v57 = vmul.f32 0.5307027, %v11765_v40  ;;  %9523 = vpow2.f32 %v3495_v30 }
 0x29f   :  { %v11796_v45 = vadd.f32 %v11648_v59, %v3011_v6  ;;  %v11799_v19 = vadd.f32 %v11648_v59, %v3012_v56  ;;  %v3233_v51 = vmul.f32 0.5307027, %v11771_v47  ;;  %v11805_v63 = vadd.f32 %v11648_v59, %v3013_v35 }
 0x2a0   :  { %v3252_v9 = vadd.f32 -0.72657603, %v3228_v42  ;;  %v3192_v60 = vsub.f32 2.0, %v3168_v15  ;;  %v11807_v5 = vadd.f32 1.0, %v3092_v58  ;;  %v3461_v36 = vmul.f32 %v11782_v7, %v11782_v7 }
 0x2a1   :  { %16904 = vst [vmem:[#allocation12_spill] sm:$0xff] %v11796_v45  ;;  %16905 = vst [vmem:[#allocation11_spill] sm:$0xff] %v11799_v19  ;;  %v11809_v43 = vpop.eup %9513  ;;  %v3258_v30 = vadd.f32 -0.72657603, %v3234_v3  ;;  %v3198_v17 = vsub.f32 2.0, %v3174_v22  ;;  %9525 = vrcp.f32 %v11786_v31  ;;  %v3005_v6 = vmul.f32 %v11658_v55, %v11616_v18 }
 0x2a2   :  { %16907 = vst [vmem:[#allocation22_spill] sm:$0xff] %v11805_v63  ;;  %16908 = vst [vmem:[#allocation23_spill] sm:$0xff] %v11809_v43  ;;  %v11814_v23 = vpop.eup %9515  ;;  %v3006_v56 = vmul.f32 %v11664_v24, %v11616_v18  ;;  %v11821_v35 = vadd.f32 %v11648_v59, %v3014_v26  ;;  %v3251_v42 = vadd.f32 -0.72657603, %v3227_v57  ;;  %v3462_v15 = vmul.f32 %v11670_v1, %v11670_v1 }
 0x2a3   :  { %16909 = vst [vmem:[#allocation24_spill] sm:$0xff] %v11814_v23  ;;  %v3463_v58 = vmul.f32 %v11796_v45, %v11796_v45  ;;  %v3464_v3 = vmul.f32 %v11799_v19, %v11799_v19  ;;  %v3257_v22 = vadd.f32 -0.72657603, %v3233_v51  ;;  %v11829_v21 = vpop.eup %9517  ;;  %v3465_v55 = vmul.f32 %v11805_v63, %v11805_v63 }
 0x2a4   :  { %16910 = vst [vmem:[#allocation25_spill] sm:$0xff] %v11821_v35  ;;  %16911 = vst [vmem:[#allocation26_spill] sm:$0xff] %v11829_v21  ;;  %v3276_v24 = vmul.f32 %v3252_v9, %v11752_v54  ;;  %v11834_v59 = vmul.f32 %v9504_v34, %v3192_v60  ;;  %9527 = vrcp.f32 %v11807_v5  ;;  %v3007_v57 = vmul.f32 %v11667_v20, %v11616_v18 }
 0x2a5   :  { %v11837_v26 = vpop.eup %9519  ;;  %v3485_v8 = vmul.f32 -0.5, %v3461_v36  ;;  %v3282_v23 = vmul.f32 %v3258_v30, %v11757_v14  ;;  %v11842_v51 = vmul.f32 %v9506_v50, %v3198_v17  ;;  %9529 = vpow2.f32 %v3497_v38 }
 0x2a6   :  { %v3008_v21 = vmul.f32 %v11673_v41, %v11616_v18  ;;  %v3466_v34 = vmul.f32 %v11821_v35, %v11821_v35  ;;  %v3275_v9 = vmul.f32 %v3251_v42, %v11765_v40  ;;  %9531 = vpow2.f32 %v11755_v37 }
 0x2a7   :  { %v3486_v60 = vmul.f32 -0.5, %v3462_v15  ;;  %v3487_v2 = vmul.f32 -0.5, %v3463_v58  ;;  %v3281_v20 = vmul.f32 %v3257_v22, %v11771_v47  ;;  %v11851_v36 = vpop.eup %9521  ;;  %v3488_v30 = vmul.f32 -0.5, %v3464_v3 }
 0x2a8   :  { %v3489_v50 = vmul.f32 -0.5, %v3465_v55  ;;  %v3300_v17 = vadd.f32 0.7107069, %v3276_v24  ;;  %v3240_v38 = vmul.f32 0.5307027, %v11834_v59  ;;  %v11854_v63 = vpop.eup %9523  ;;  %9533 = vpow2.f32 %v11761_v33 }
 0x2a9   :  { %16912 = vst [vmem:[#allocation27_spill] sm:$0xff] %v11854_v63  ;;  %v3527_v18 = vmul.f32 1.442695, %v3485_v8  ;;  %v3306_v41 = vadd.f32 0.7107069, %v3282_v23  ;;  %v3490_v37 = vmul.f32 -0.5, %v3466_v34  ;;  %v11859_v15 = vadd.f32 %v11641_v29, %v3003_v10 }
 0x2aa   :  { %v3246_v42 = vmul.f32 0.5307027, %v11842_v51  ;;  %v11862_v58 = vadd.f32 %v11641_v29, %v3005_v6  ;;  %v3299_v3 = vadd.f32 0.7107069, %v3275_v9  ;;  %v3529_v55 = vmul.f32 1.442695, %v3486_v60 }
 0x2ab   :  { %16913 = vst [vmem:[#allocation28_spill] sm:$0xff] %v11859_v15  ;;  %v9526_v22 = vpop.eup %9525  ;;  %v3531_v24 = vmul.f32 1.442695, %v3487_v2  ;;  %v11865_v35 = vadd.f32 %v11641_v29, %v3006_v56  ;;  %v3305_v63 = vadd.f32 0.7107069, %v3281_v20  ;;  %v3324_v23 = vmul.f32 %v3300_v17, %v11752_v54 }
 0x2ac   :  { %16914 = vst [vmem:[#allocation29_spill] sm:$0xff] %v11862_v58  ;;  %v3533_v33 = vmul.f32 1.442695, %v3488_v30  ;;  %v3535_v8 = vmul.f32 1.442695, %v3489_v50  ;;  %9535 = vpow2.f32 %v3527_v18  ;;  %v11869_v10 = vadd.f32 %v11641_v29, %v3007_v57 }
 0x2ad   :  { %16915 = vst [vmem:[#allocation30_spill] sm:$0xff] %v11865_v35  ;;  %v3264_v11 = vadd.f32 -0.72657603, %v3240_v38  ;;  %v3330_v6 = vmul.f32 %v3306_v41, %v11757_v14  ;;  %v3270_v34 = vadd.f32 -0.72657603, %v3246_v42  ;;  %v11873_v2 = vadd.f32 %v11641_v29, %v3008_v21 }
 0x2ae   :  { %16916 = vst [vmem:[#allocation31_spill] sm:$0xff] %v11869_v10  ;;  %v9528_v9 = vpop.eup %9527  ;;  %v3537_v39 = vmul.f32 1.442695, %v3490_v37  ;;  %v3323_v56 = vmul.f32 %v3299_v3, %v11765_v40  ;;  %v3158_v60 = vmul.f32 %v9526_v22, %v11786_v31  ;;  %9537 = vpow2.f32 %v3529_v55 }
 0x2af   :  { %16917 = vst [vmem:[#allocation32_spill] sm:$0xff] %v11873_v2  ;;  %v3455_v20 = vmul.f32 %v11859_v15, %v11859_v15  ;;  %v3456_v57 = vmul.f32 %v11661_v32, %v11661_v32  ;;  %v3329_v30 = vmul.f32 %v3305_v63, %v11771_v47  ;;  %v11882_v50 = vpop.eup %9529  ;;  %v3457_v17 = vmul.f32 %v11862_v58, %v11862_v58 }
 0x2b0   :  { %16918 = vst [vmem:[#allocation33_spill] sm:$0xff] %v11882_v50  ;;  %v3458_v29 = vmul.f32 %v11865_v35, %v11865_v35  ;;  %v3348_v21 = vadd.f32 -0.14224836, %v3324_v23  ;;  %v3288_v31 = vmul.f32 %v3264_v11, %v11834_v59  ;;  %v11889_v38 = vpop.eup %9531  ;;  %9539 = vpow2.f32 %v3531_v24 }
 0x2b1   :  { %16919 = vst [vmem:[#allocation34_spill] sm:$0xff] %v11889_v38  ;;  %v3354_v18 = vadd.f32 -0.14224836, %v3330_v6  ;;  %v3294_v41 = vmul.f32 %v3270_v34, %v11842_v51  ;;  %v3164_v42 = vmul.f32 %v9528_v9, %v11807_v5  ;;  %v3459_v63 = vmul.f32 %v11869_v10, %v11869_v10 }
 0x2b2   :  { %v3460_v37 = vmul.f32 %v11873_v2, %v11873_v2  ;;  %v3347_v3 = vadd.f32 -0.14224836, %v3323_v56  ;;  %v3182_v55 = vsub.f32 2.0, %v3158_v60  ;;  %v11897_v43 = vpop.eup %9533  ;;  %9541 = vpow2.f32 %v3533_v33 }
 0x2b3   :  { %16920 = vst [vmem:[#allocation35_spill] sm:$0xff] %v11897_v43  ;;  %v3479_v11 = vmul.f32 -0.5, %v3455_v20  ;;  %v3480_v23 = vmul.f32 -0.5, %v3456_v57  ;;  %v3353_v38 = vadd.f32 -0.14224836, %v3329_v30  ;;  %v3481_v24 = vmul.f32 -0.5, %v3457_v17 }
 0x2b4   :  { %v3482_v6 = vmul.f32 -0.5, %v3458_v29  ;;  %v3372_v34 = vmul.f32 %v3348_v21, %v11752_v54  ;;  %v3312_v50 = vadd.f32 0.7107069, %v3288_v31  ;;  %v3378_v5 = vmul.f32 %v3354_v18, %v11757_v14 }
 0x2b5   :  { %v3318_v45 = vadd.f32 0.7107069, %v3294_v41  ;;  %v3188_v10 = vsub.f32 2.0, %v3164_v42  ;;  %v16590_v58 = vand.u32 2147483647, %v11859_v15  ;;  %9543 = vpow2.f32 %v3535_v8 }
 0x2b6   :  { %v3483_v56 = vmul.f32 -0.5, %v3459_v63  ;;  %v3371_v60 = vmul.f32 %v3347_v3, %v11765_v40  ;;  %v11903_v43 = vmul.f32 %v9526_v22, %v3182_v55  ;;  %v11905_v33 = vpop.eup %9535  ;;  %v3515_v20 = vmul.f32 1.442695, %v3479_v11 }
 0x2b7   :  { %16921 = vst [vmem:[#allocation36_spill] sm:$0xff] %v11905_v33  ;;  %v3517_v57 = vmul.f32 1.442695, %v3480_v23  ;;  %v3377_v30 = vmul.f32 %v3353_v38, %v11771_v47  ;;  %v16588_v17 = vand.u32 2147483647, %v11782_v7  ;;  %v3336_v18 = vmul.f32 %v3312_v50, %v11834_v59 }
 0x2b8   :  { %v3519_v29 = vmul.f32 1.442695, %v3481_v24  ;;  %v3521_v21 = vmul.f32 1.442695, %v3482_v6  ;;  %v3396_v31 = vadd.f32 0.1274148, %v3372_v34  ;;  %v11910_v41 = vpop.eup %9537  ;;  %v3342_v42 = vmul.f32 %v3318_v45, %v11842_v51 }
 0x2b9   :  { %v3402_v8 = vadd.f32 0.1274148, %v3378_v5  ;;  %v11913_v22 = vmul.f32 %v9528_v9, %v3188_v10  ;;  %v3095_v63 = vmul.f32 0.23164189, %v16590_v58  ;;  %9545 = vpow2.f32 %v3537_v39 }
 0x2ba   :  { %v3395_v38 = vadd.f32 0.1274148, %v3371_v60  ;;  %v3230_v55 = vmul.f32 0.5307027, %v11903_v43  ;;  %v11920_v11 = vpop.eup %9539  ;;  %v3484_v23 = vmul.f32 -0.5, %v3460_v37  ;;  %9547 = vpow2.f32 %v3515_v20 }
 0x2bb   :  { %16922 = vst [vmem:[#allocation37_spill] sm:$0xff] %v11920_v11  ;;  %v3401_v24 = vadd.f32 0.1274148, %v3377_v30  ;;  %v3101_v45 = vmul.f32 0.23164189, %v16588_v17  ;;  %9549 = vpow2.f32 %v3517_v57  ;;  %v3420_v9 = vmul.f32 %v3396_v31, %v11752_v54 }
 0x2bc   :  { %v3523_v10 = vmul.f32 1.442695, %v3483_v56  ;;  %v3360_v39 = vadd.f32 -0.14224836, %v3336_v18  ;;  %v11927_v6 = vpop.eup %9541  ;;  %9551 = vpow2.f32 %v3519_v29  ;;  %v3366_v34 = vadd.f32 -0.14224836, %v3342_v42 }
 0x2bd   :  { %16923 = vst [vmem:[#allocation38_spill] sm:$0xff] %v11927_v6  ;;  %v3236_v5 = vmul.f32 0.5307027, %v11913_v22  ;;  %v11930_v60 = vadd.f32 1.0, %v3095_v63  ;;  %v3426_v20 = vmul.f32 %v3402_v8, %v11757_v14  ;;  %v3419_v30 = vmul.f32 %v3395_v38, %v11765_v40 }
 0x2be   :  { %v3254_v17 = vadd.f32 -0.72657603, %v3230_v55  ;;  %v16589_v56 = vand.u32 2147483647, %v11722_v49  ;;  %9553 = vpow2.f32 %v3521_v21  ;;  %v3425_v57 = vmul.f32 %v3401_v24, %v11771_v47 }
 0x2bf   :  { %v11940_v29 = vadd.f32 1.0, %v3101_v45  ;;  %v11942_v31 = vpop.eup %9543  ;;  %9555 = vpow2.f32 %v3523_v10  ;;  %v3525_v18 = vmul.f32 1.442695, %v3484_v23  ;;  %v3540_v42 = vmul.f32 %v11851_v36, %v3420_v9 }
 0x2c0   :  { %16924 = vst [vmem:[#allocation39_spill] sm:$0xff] %v11942_v31  ;;  %v3384_v14 = vmul.f32 %v3360_v39, %v11834_v59  ;;  %v3390_v40 = vmul.f32 %v3366_v34, %v11842_v51  ;;  %v3260_v8 = vadd.f32 -0.72657603, %v3236_v5  ;;  %9557 = vrcp.f32 %v11930_v60 }
 0x2c1   :  { %v3546_v21 = vmul.f32 %v11788_v25, %v3426_v20  ;;  %v3539_v63 = vmul.f32 %v11837_v26, %v3419_v30  ;;  %v3278_v47 = vmul.f32 %v3254_v17, %v11903_v43  ;;  %v3085_v38 = vmul.f32 0.23164189, %v16589_v56 }
 0x2c2   :  { %v3545_v36 = vmul.f32 %v11779_v13, %v3425_v57  ;;  %9559 = vrcp.f32 %v11940_v29  ;;  %v3564_v25 = vmax.f32 %v11597_v4, 0.0  ;;  %v3570_v26 = vmax.f32 %v11604_v62, 0.0 }
 0x2c3   :  { %v11958_v24 = vpop.eup %9545  ;;  %9561 = vpow2.f32 %v3525_v18  ;;  %v16927_v9 = vand.u32 2147483647, %v11597_v4  ;;  %v3408_v39 = vadd.f32 0.1274148, %v3384_v14  ;;  %v3414_v34 = vadd.f32 0.1274148, %v3390_v40 }
 0x2c4   :  { %16925 = vst [vmem:[#allocation40_spill] sm:$0xff] %v11958_v24  ;;  %v11965_v10 = vpop.eup %9547  ;;  %v3284_v5 = vmul.f32 %v3260_v8, %v11913_v22  ;;  %v16928_v57 = vand.u32 2147483647, %v11604_v62  ;;  %v16929_v56 = vand.u32 2147483647, %v11610_v44  ;;  %v11974_v31 = vadd.f32 1.0, %v3085_v38 }
 0x2c5   :  { %16926 = vst [vmem:[#allocation41_spill] sm:$0xff] %v11965_v10  ;;  %v3588_v13 = vmul.f32 %v3540_v42, %v16927_v9  ;;  %v9550_v20 = vpop.eup %9549  ;;  %v3302_v23 = vadd.f32 0.7107069, %v3278_v47  ;;  %v3563_v4 = vmax.f32 %v11610_v44, 0.0  ;;  %v16931_v42 = vand.u32 2147483647, %v11614_v16 }
 0x2c6   :  { %v3594_v18 = vmul.f32 %v3546_v21, %v16928_v57  ;;  %v3587_v58 = vmul.f32 %v3539_v63, %v16929_v56  ;;  %v11976_v17 = vpop.eup %9551  ;;  %v16932_v40 = vand.u32 2147483647, %v11684_v53  ;;  %v3569_v21 = vmax.f32 %v11614_v16, 0.0 }
 0x2c7   :  { %16930 = vst [vmem:[#allocation42_spill] sm:$0xff] %v11976_v17  ;;  %v3593_v14 = vmul.f32 %v3545_v36, %v16931_v42  ;;  %v3576_v56 = vmax.f32 %v11661_v32, 0.0  ;;  %v16933_v47 = vand.u32 2147483647, %v11865_v35  ;;  %v11993_v44 = vsub.f32 %v3564_v25, %v3588_v13 }
 0x2c8   :  { %v3091_v8 = vmul.f32 0.23164189, %v16932_v40  ;;  %v11991_v9 = vpop.eup %9553  ;;  %v3432_v36 = vmul.f32 %v3408_v39, %v11834_v59  ;;  %v3438_v57 = vmul.f32 %v3414_v34, %v11842_v51  ;;  %v3308_v42 = vadd.f32 0.7107069, %v3284_v5 }
 0x2c9   :  { %v3098_v38 = vmul.f32 0.23164189, %v16933_v47  ;;  %16934 = vst [vmem:[#allocation43_spill] sm:$0xff] %v11991_v9  ;;  %16935 = vst [vmem:[#allocation44_spill] sm:$0xff] %v11993_v44  ;;  %v11997_v40 = vpop.eup %9555  ;;  %v11999_v62 = vsub.f32 %v3570_v26, %v3594_v18  ;;  %v12001_v16 = vsub.f32 %v3563_v4, %v3587_v58  ;;  %v3326_v63 = vmul.f32 %v3302_v23, %v11903_v43 }
 0x2ca   :  { %16936 = vst [vmem:[#allocation45_spill] sm:$0xff] %v11997_v40  ;;  %9563 = vrcp.f32 %v11974_v31  ;;  %v9558_v47 = vpop.eup %9557  ;;  %v12009_v13 = vsub.f32 %v3569_v21, %v3593_v14  ;;  %v12011_v59 = vadd.f32 1.0, %v3091_v8  ;;  %v16940_v51 = vand.u32 2147483647, %v11799_v19 }
 0x2cb   :  { %16937 = vst [vmem:[#allocation46_spill] sm:$0xff] %v11999_v62  ;;  %16938 = vst [vmem:[#allocation47_spill] sm:$0xff] %v12001_v16  ;;  %v12021_v34 = vadd.f32 1.0, %v3098_v38  ;;  %v3552_v18 = vmul.f32 %v9550_v20, %v3432_v36  ;;  %v3558_v4 = vmul.f32 %v11910_v41, %v3438_v57  ;;  %v3332_v14 = vmul.f32 %v3308_v42, %v11913_v22 }
 0x2cc   :  { %16939 = vst [vmem:[#allocation48_spill] sm:$0xff] %v12009_v13  ;;  %v3104_v39 = vmul.f32 0.23164189, %v16940_v51  ;;  %v9560_v5 = vpop.eup %9559  ;;  %v3350_v38 = vadd.f32 -0.14224836, %v3326_v63  ;;  %v3167_v51 = vmul.f32 %v9558_v47, %v11930_v60  ;;  %9565 = vrcp.f32 %v12011_v59 }
 0x2cd   :  { %v11917_v3 = vpop.f32.mrb[12].mxu1  ;;  %v12029_v8 = vpop.eup %9561  ;;  %9567 = vrcp.f32 %v12021_v34  ;;  %v16942_v60 = vand.u32 2147483647, %v11661_v32  ;;  %v16943_v21 = vand.u32 2147483647, %v11670_v1 }
 0x2ce   :  { %v11922_v50 = vpop.f32.mrb[13].mxu1  ;;  %v12017_v58 = vadd.f32 %v11917_v3, %v11540_v12  ;;  %16941 = vst [vmem:[#allocation49_spill] sm:$0xff] %v12029_v8  ;;  %v12042_v41 = vadd.f32 1.0, %v3104_v39  ;;  %v3356_v26 = vadd.f32 -0.14224836, %v3332_v14  ;;  %v3374_v23 = vmul.f32 %v3350_v38, %v11903_v43 }
 0x2cf   :  { %v3600_v42 = vmul.f32 %v3552_v18, %v16942_v60  ;;  %v3606_v20 = vmul.f32 %v3558_v4, %v16943_v21  ;;  %v3191_v36 = vsub.f32 2.0, %v3167_v51 }
 0x2d0   :  { %9569 = vrcp.f32 %v12042_v41  ;;  %v16944_v4 = vand.u32 2147483647, %v12017_v58 }
 0x2d1   :  { %v11932_v37 = vpop.f32.mrb[14].mxu1  ;;  %v12085_v51 = vmul.f32 %v9558_v47, %v3191_v36 }
 0x2d2   :  { %v11937_v54 = vpop.f32.mrb[15].mxu1  ;;  %v12007_v25 = vadd.f32 %v11932_v37, %v11542_v0  ;;  %v12025_v37 = vadd.f32 %v11922_v50, %v11540_v12  ;;  %v2066_v14 = vmul.f32 0.23164189, %v16944_v4 }
 0x2d3   :  { %v12033_v3 = vadd.f32 %v11937_v54, %v11542_v0  ;;  %v3173_v54 = vmul.f32 %v9560_v5, %v11940_v29  ;;  %v12076_v29 = vsub.f32 %v3576_v56, %v3600_v42  ;;  %v16947_v56 = vand.u32 2147483647, %v11735_v46 }
 0x2d4   :  { %v16592_v50 = vand.u32 2147483647, %v12007_v25  ;;  %v16593_v63 = vand.u32 2147483647, %v12025_v37  ;;  %v9564_v18 = vpop.eup %9563 }
 0x2d5   :  { %v11953_v55 = vpop.f32.mrb[16].mxu1  ;;  %v16594_v39 = vand.u32 2147483647, %v12033_v3  ;;  %v3197_v38 = vsub.f32 2.0, %v3173_v54  ;;  %16946 = vst [vmem:[#allocation51_spill] sm:$0xff] %v12076_v29 }
 0x2d6   :  { %v11960_v45 = vpop.f32.mrb[17].mxu1  ;;  %v2072_v57 = vmul.f32 0.23164189, %v16592_v50  ;;  %v12067_v21 = vadd.f32 %v11953_v55, %v11550_v52  ;;  %v2067_v60 = vmul.f32 0.23164189, %v16593_v63  ;;  %v3380_v50 = vmul.f32 %v3356_v26, %v11913_v22  ;;  %v9566_v47 = vpop.eup %9565 }
 0x2d7   :  { %v2073_v4 = vmul.f32 0.23164189, %v16594_v39  ;;  %v3398_v54 = vadd.f32 0.1274148, %v3374_v23  ;;  %v3088_v42 = vmul.f32 0.23164189, %v16947_v56  ;;  %v12096_v13 = vmul.f32 %v9560_v5, %v3197_v38  ;;  %v9568_v40 = vpop.eup %9567 }
 0x2d8   :  { %16945 = vst [vmem:[#allocation50_spill] sm:$0xff] %v12067_v21  ;;  %v12087_v32 = vadd.f32 1.0, %v2072_v57  ;;  %v12093_v26 = vadd.f32 1.0, %v2066_v14  ;;  %v16598_v39 = vand.u32 2147483647, %v12067_v21  ;;  %v12100_v36 = vadd.f32 1.0, %v2067_v60 }
 0x2d9   :  { %v1859_v30 = vpop.f32.mrb[18].mxu1  ;;  %v3404_v63 = vadd.f32 0.1274148, %v3380_v50  ;;  %v12104_v44 = vadd.f32 1.0, %v2073_v4  ;;  %v16949_v56 = vmax.f32 %v11670_v1, 0.0  ;;  %v12115_v50 = vadd.f32 1.0, %v3088_v42 }
 0x2da   :  { %v11978_v24 = vpop.f32.mrb[19].mxu1  ;;  %v12059_v16 = vadd.f32 %v1859_v30, %v11554_v27  ;;  %v12074_v30 = vadd.f32 %v11960_v45, %v11550_v52  ;;  %v3157_v45 = vmul.f32 %v9564_v18, %v11974_v31  ;;  %v3239_v38 = vmul.f32 0.5307027, %v12085_v51 }
 0x2db   :  { %v12083_v55 = vadd.f32 %v11978_v24, %v11554_v27  ;;  %v16948_v24 = vand.u32 2147483647, %v11703_v61  ;;  %v12109_v5 = vsub.f32 %v16949_v56, %v3606_v20  ;;  %9571 = vrcp.f32 %v12087_v32  ;;  %v9570_v20 = vpop.eup %9569 }
 0x2dc   :  { %v16951_v60 = vand.u32 2147483647, %v12059_v16  ;;  %v3181_v57 = vsub.f32 2.0, %v3157_v45  ;;  %9573 = vrcp.f32 %v12093_v26  ;;  %v2078_v4 = vmul.f32 0.23164189, %v16598_v39 }
 0x2dd   :  { %v3094_v23 = vmul.f32 0.23164189, %v16948_v24  ;;  %16950 = vst [vmem:[#allocation52_spill] sm:$0xff] %v12109_v5  ;;  %v3245_v31 = vmul.f32 0.5307027, %v12096_v13  ;;  %9575 = vrcp.f32 %v12100_v36  ;;  %v3170_v45 = vmul.f32 %v9568_v40, %v12021_v34  ;;  %v16954_v34 = vld [vmem:[#allocation29_spill] sm:$0xff] }
 0x2de   :  { %v2084_v24 = vmul.f32 0.23164189, %v16951_v60  ;;  %v16952_v56 = vand.u32 2147483647, %v12074_v30  ;;  %v3163_v60 = vmul.f32 %v9566_v47, %v12011_v59  ;;  %9577 = vrcp.f32 %v12104_v44 }
 0x2df   :  { %v12121_v1 = vadd.f32 1.0, %v3094_v23  ;;  %v16953_v42 = vand.u32 2147483647, %v12083_v55  ;;  %v3422_v39 = vmul.f32 %v3398_v54, %v11903_v43  ;;  %v3263_v8 = vadd.f32 -0.72657603, %v3239_v38 }
 0x2e0   :  { %v2079_v14 = vmul.f32 0.23164189, %v16952_v56  ;;  %v12132_v23 = vadd.f32 1.0, %v2084_v24  ;;  %v3428_v27 = vmul.f32 %v3404_v63, %v11913_v22  ;;  %v12135_v52 = vmul.f32 %v9564_v18, %v3181_v57  ;;  %v16955_v18 = vld [vmem:[#allocation12_spill] sm:$0xff] }
 0x2e1   :  { %v2085_v62 = vmul.f32 0.23164189, %v16953_v42  ;;  %9579 = vrcp.f32 %v12115_v50  ;;  %v12138_v56 = vadd.f32 1.0, %v2078_v4  ;;  %v3176_v59 = vmul.f32 %v9570_v20, %v12042_v41  ;;  %v16956_v4 = vld [vmem:[#allocation33_spill] sm:$0xff] }
 0x2e2   :  { %9581 = vrcp.f32 %v12121_v1  ;;  %v12143_v42 = vadd.f32 1.0, %v2079_v14  ;;  %v3269_v43 = vadd.f32 -0.72657603, %v3245_v31  ;;  %v3187_v54 = vsub.f32 2.0, %v3163_v60  ;;  %v16957_v31 = vld [vmem:[#allocation23_spill] sm:$0xff] }
 0x2e3   :  { %v3194_v38 = vsub.f32 2.0, %v3170_v45  ;;  %v12145_v24 = vadd.f32 1.0, %v2085_v62  ;;  %v3287_v22 = vmul.f32 %v3263_v8, %v12085_v51  ;;  %9583 = vrcp.f32 %v12132_v23 }
 0x2e4   :  { %v3542_v11 = vmul.f32 %v16956_v4, %v3422_v39  ;;  %v3229_v14 = vmul.f32 0.5307027, %v12135_v52  ;;  %9585 = vrcp.f32 %v12138_v56  ;;  %v3548_v62 = vmul.f32 %v16957_v31, %v3428_v27 }
 0x2e5   :  { %v3200_v60 = vsub.f32 2.0, %v3176_v59  ;;  %v16958_v8 = vand.u32 2147483647, %v16954_v34  ;;  %v9572_v63 = vpop.eup %9571  ;;  %9587 = vrcp.f32 %v12143_v42  ;;  %v3293_v57 = vmul.f32 %v3269_v43, %v12096_v13  ;;  %v16960_v43 = vld [vmem:[#allocation13_spill] sm:$0xff] }
 0x2e6   :  { %v12161_v0 = vmul.f32 %v9566_v47, %v3187_v54  ;;  %v12163_v41 = vmul.f32 %v9568_v40, %v3194_v38  ;;  %v9574_v39 = vpop.eup %9573  ;;  %9589 = vrcp.f32 %v12145_v24  ;;  %v3311_v4 = vadd.f32 0.7107069, %v3287_v22 }
 0x2e7   :  { %v3097_v45 = vmul.f32 0.23164189, %v16958_v8  ;;  %v16959_v27 = vand.u32 2147483647, %v16955_v18  ;;  %v9576_v31 = vpop.eup %9575  ;;  %v3253_v8 = vadd.f32 -0.72657603, %v3229_v14  ;;  %v2144_v40 = vmul.f32 %v9572_v63, %v12087_v32 }
 0x2e8   :  { %v9578_v54 = vpop.eup %9577  ;;  %v16961_v38 = vand.u32 2147483647, %v11729_v48  ;;  %v12177_v22 = vmul.f32 %v9570_v20, %v3200_v60  ;;  %v16963_v14 = vand.u32 2147483647, %v11687_v28  ;;  %v3317_v5 = vadd.f32 0.7107069, %v3293_v57 }
 0x2e9   :  { %v3103_v59 = vmul.f32 0.23164189, %v16959_v27  ;;  %v12179_v29 = vadd.f32 1.0, %v3097_v45  ;;  %v3235_v17 = vmul.f32 0.5307027, %v12161_v0  ;;  %v2138_v32 = vmul.f32 %v9574_v39, %v12093_v26 }
 0x2ea   :  { %v12175_v12 = vmul.f32 %v3542_v11, %v16961_v38  ;;  %v12183_v18 = vmul.f32 %v3548_v62, %v16963_v14  ;;  %v3242_v47 = vmul.f32 0.5307027, %v12163_v41  ;;  %v2139_v11 = vmul.f32 %v9576_v31, %v12100_v36  ;;  %v16965_v62 = vld [vmem:[#allocation17_spill] sm:$0xff] }
 0x2eb   :  { %v9580_v27 = vpop.eup %9579  ;;  %v3335_v20 = vmul.f32 %v3311_v4, %v12085_v51  ;;  %v12190_v60 = vadd.f32 1.0, %v3103_v59  ;;  %v2145_v45 = vmul.f32 %v9578_v54, %v12104_v44  ;;  %v3277_v38 = vmul.f32 %v3253_v8, %v12135_v52 }
 0x2ec   :  { %16962 = vst [vmem:[#allocation33_spill] sm:$0xff] %v12175_v12  ;;  %16964 = vst [vmem:[#allocation23_spill] sm:$0xff] %v12183_v18  ;;  %v9582_v46 = vpop.eup %9581  ;;  %v16966_v57 = vand.u32 2147483647, %v16960_v43  ;;  %v2168_v35 = vsub.f32 2.0, %v2144_v40  ;;  %v3160_v26 = vmul.f32 %v9580_v27, %v12115_v50  ;;  %9591 = vrcp.f32 %v12179_v29 }
 0x2ed   :  { %v3248_v53 = vmul.f32 0.5307027, %v12177_v22  ;;  %v9584_v36 = vpop.eup %9583  ;;  %v3341_v4 = vmul.f32 %v3317_v5, %v12096_v13  ;;  %v3259_v59 = vadd.f32 -0.72657603, %v3235_v17  ;;  %v3266_v49 = vadd.f32 -0.72657603, %v3242_v47 }
 0x2ee   :  { %v3087_v19 = vmul.f32 0.23164189, %v16966_v57  ;;  %v3166_v44 = vmul.f32 %v9582_v46, %v12121_v1  ;;  %v9586_v8 = vpop.eup %9585  ;;  %v2162_v6 = vsub.f32 2.0, %v2138_v32  ;;  %v2163_v14 = vsub.f32 2.0, %v2139_v11 }
 0x2ef   :  { %v3359_v9 = vadd.f32 -0.14224836, %v3335_v20  ;;  %9593 = vrcp.f32 %v12190_v60  ;;  %v9588_v40 = vpop.eup %9587  ;;  %v2169_v57 = vsub.f32 2.0, %v2145_v45  ;;  %v3301_v43 = vadd.f32 0.7107069, %v3277_v38 }
 0x2f0   :  { %v16967_v50 = vand.u32 2147483647, %v16965_v62  ;;  %v12205_v7 = vadd.f32 1.0, %v3087_v19  ;;  %v9590_v15 = vpop.eup %9589  ;;  %v12207_v5 = vmul.f32 %v9572_v63, %v2168_v35  ;;  %v2156_v17 = vmul.f32 %v9584_v36, %v12132_v23 }
 0x2f1   :  { %v3272_v1 = vadd.f32 -0.72657603, %v3248_v53  ;;  %v3184_v47 = vsub.f32 2.0, %v3160_v26  ;;  %v3365_v32 = vadd.f32 -0.14224836, %v3341_v4  ;;  %v3283_v11 = vmul.f32 %v3259_v59, %v12161_v0 }
 0x2f2   :  { %v3093_v34 = vmul.f32 0.23164189, %v16967_v50  ;;  %v3290_v20 = vmul.f32 %v3266_v49, %v12163_v41  ;;  %v3190_v28 = vsub.f32 2.0, %v3166_v44  ;;  %v12212_v45 = vmul.f32 %v9574_v39, %v2162_v6 }
 0x2f3   :  { %v12214_v38 = vmul.f32 %v9576_v31, %v2163_v14  ;;  %v2150_v19 = vmul.f32 %v9586_v8, %v12138_v56  ;;  %v3383_v50 = vmul.f32 %v3359_v9, %v12085_v51  ;;  %v12218_v35 = vmul.f32 %v9578_v54, %v2169_v57 }
 0x2f4   :  { %v2151_v23 = vmul.f32 %v9588_v40, %v12143_v42  ;;  %v2157_v53 = vmul.f32 %v9590_v15, %v12145_v24  ;;  %v3325_v63 = vmul.f32 %v3301_v43, %v12135_v52  ;;  %v2216_v26 = vmul.f32 0.5307027, %v12207_v5 }
 0x2f5   :  { %v2180_v49 = vsub.f32 2.0, %v2156_v17  ;;  %v3296_v6 = vmul.f32 %v3272_v1, %v12177_v22  ;;  %v12225_v39 = vmul.f32 %v9580_v27, %v3184_v47  ;;  %v3389_v31 = vmul.f32 %v3365_v32, %v12096_v13 }
 0x2f6   :  { %v3307_v56 = vadd.f32 0.7107069, %v3283_v11  ;;  %v3314_v14 = vadd.f32 0.7107069, %v3290_v20  ;;  %v12228_v9 = vmul.f32 %v9582_v46, %v3190_v28  ;;  %v12230_v54 = vpop.eup %9591  ;;  %v2210_v42 = vmul.f32 0.5307027, %v12212_v45 }
 0x2f7   :  { %v2211_v24 = vmul.f32 0.5307027, %v12214_v38  ;;  %v2174_v43 = vsub.f32 2.0, %v2150_v19  ;;  %v12234_v4 = vadd.f32 1.0, %v3093_v34  ;;  %v2217_v59 = vmul.f32 0.5307027, %v12218_v35 }
 0x2f8   :  { %v2175_v44 = vsub.f32 2.0, %v2151_v23  ;;  %v2181_v27 = vsub.f32 2.0, %v2157_v53  ;;  %v3349_v57 = vadd.f32 -0.14224836, %v3325_v63  ;;  %v2240_v1 = vadd.f32 -0.72657603, %v2216_v26 }
 0x2f9   :  { %v12237_v17 = vpop.eup %9593  ;;  %v12239_v47 = vmul.f32 %v9584_v36, %v2180_v49  ;;  %v3320_v28 = vadd.f32 0.7107069, %v3296_v6  ;;  %v3232_v46 = vmul.f32 0.5307027, %v12225_v39  ;;  %v12242_v32 = vadd.f32 0.1274148, %v3383_v50 }
 0x2fa   :  { %v12244_v11 = vadd.f32 0.1274148, %v3389_v31  ;;  %v3331_v34 = vmul.f32 %v3307_v56, %v12161_v0  ;;  %v3238_v20 = vmul.f32 0.5307027, %v12228_v9  ;;  %v2234_v19 = vadd.f32 -0.72657603, %v2210_v42 }
 0x2fb   :  { %v2235_v23 = vadd.f32 -0.72657603, %v2211_v24  ;;  %v12248_v53 = vmul.f32 %v9586_v8, %v2174_v43  ;;  %v3338_v63 = vmul.f32 %v3314_v14, %v12163_v41  ;;  %v2241_v26 = vadd.f32 -0.72657603, %v2217_v59 }
 0x2fc   :  { %v12251_v36 = vmul.f32 %v9588_v40, %v2175_v44  ;;  %v12253_v49 = vmul.f32 %v9590_v15, %v2181_v27  ;;  %v3373_v50 = vmul.f32 %v3349_v57, %v12135_v52  ;;  %v2264_v6 = vmul.f32 %v2240_v1, %v12207_v5 }
 0x2fd   :  { %v2228_v31 = vmul.f32 0.5307027, %v12239_v47  ;;  %v3344_v56 = vmul.f32 %v3320_v28, %v12177_v22  ;;  %v3256_v62 = vadd.f32 -0.72657603, %v3232_v46  ;;  %v2426_v8 = vmul.f32 %v12017_v58, %v12017_v58 }
 0x2fe   :  { %v2427_v14 = vmul.f32 %v12025_v37, %v12025_v37  ;;  %v12263_v42 = vadd.f32 -0.14224836, %v3331_v34  ;;  %v12265_v40 = vadd.f32 -0.72657603, %v3238_v20  ;;  %v2258_v15 = vmul.f32 %v2234_v19, %v12212_v45 }
 0x2ff   :  { %v2259_v24 = vmul.f32 %v2235_v23, %v12214_v38  ;;  %v2222_v43 = vmul.f32 0.5307027, %v12248_v53  ;;  %v12270_v59 = vadd.f32 -0.14224836, %v3338_v63  ;;  %v2265_v44 = vmul.f32 %v2241_v26, %v12218_v35 }
 0x300   :  { %v2223_v27 = vmul.f32 0.5307027, %v12251_v36  ;;  %v2229_v57 = vmul.f32 0.5307027, %v12253_v49  ;;  %v12275_v1 = vadd.f32 0.1274148, %v3373_v50  ;;  %v3280_v20 = vmul.f32 %v3256_v62, %v12225_v39 }
 0x301   :  { %v2288_v28 = vadd.f32 0.7107069, %v2264_v6  ;;  %v2252_v46 = vadd.f32 -0.72657603, %v2228_v31  ;;  %v12277_v34 = vadd.f32 -0.14224836, %v3344_v56  ;;  %v2432_v63 = vmul.f32 %v12007_v25, %v12007_v25 }
 0x302   :  { %v2450_v19 = vmul.f32 -0.5, %v2426_v8  ;;  %v2451_v23 = vmul.f32 -0.5, %v2427_v14  ;;  %v12284_v26 = vmul.f32 %v12230_v54, %v12179_v29  ;;  %v2282_v18 = vadd.f32 0.7107069, %v2258_v15 }
 0x303   :  { %v2283_v33 = vadd.f32 0.7107069, %v2259_v24  ;;  %v2246_v10 = vadd.f32 -0.72657603, %v2222_v43  ;;  %9595 = vrcp.f32 %v12205_v7  ;;  %v2289_v50 = vadd.f32 0.7107069, %v2265_v44 }
 0x304   :  { %v2247_v6 = vadd.f32 -0.72657603, %v2223_v27  ;;  %v2253_v31 = vadd.f32 -0.72657603, %v2229_v57  ;;  %9597 = vrcp.f32 %v12234_v4  ;;  %v2312_v62 = vmul.f32 %v2288_v28, %v12207_v5 }
 0x305   :  { %v2433_v56 = vmul.f32 %v12033_v3, %v12033_v3  ;;  %v2276_v8 = vmul.f32 %v2252_v46, %v12239_v47  ;;  %v12294_v29 = vmul.f32 %v12237_v17, %v12190_v60  ;;  %v2456_v14 = vmul.f32 -0.5, %v2432_v63 }
 0x306   :  { %v2438_v15 = vmul.f32 %v12067_v21, %v12067_v21  ;;  %v12298_v24 = vadd.f32 0.7107069, %v3280_v20  ;;  %v2306_v44 = vmul.f32 %v2282_v18, %v12212_v45  ;;  %v2474_v27 = vmul.f32 1.442695, %v2450_v19 }
 0x307   :  { %v2307_v57 = vmul.f32 %v2283_v33, %v12214_v38  ;;  %v2270_v28 = vmul.f32 %v2246_v10, %v12248_v53  ;;  %v2476_v46 = vmul.f32 1.442695, %v2451_v23  ;;  %v2313_v48 = vmul.f32 %v2289_v50, %v12218_v35 }
 0x308   :  { %16968 = vst [vmem:[#allocation53_spill] sm:$0xff] %v12298_v24  ;;  %v2271_v60 = vmul.f32 %v2247_v6, %v12251_v36  ;;  %v2277_v63 = vmul.f32 %v2253_v31, %v12253_v49  ;;  %v2336_v12 = vadd.f32 -0.14224836, %v2312_v62  ;;  %v2457_v61 = vmul.f32 -0.5, %v2433_v56 }
 0x309   :  { %v2300_v20 = vadd.f32 0.7107069, %v2276_v8  ;;  %v3199_v21 = vsub.f32 2.0, %v12294_v29  ;;  %v2486_v43 = vmul.f32 1.442695, %v2456_v14  ;;  %v2462_v24 = vmul.f32 -0.5, %v2438_v15 }
 0x30a   :  { %v2439_v18 = vmul.f32 %v12074_v30, %v12074_v30  ;;  %v2444_v33 = vmul.f32 %v12059_v16, %v12059_v16  ;;  %v2330_v10 = vadd.f32 -0.14224836, %v2306_v44  ;;  %v2331_v19 = vadd.f32 -0.14224836, %v2307_v57 }
 0x30b   :  { %v2294_v23 = vadd.f32 0.7107069, %v2270_v28  ;;  %v12314_v50 = vmul.f32 %v12242_v32, %v12085_v51  ;;  %9599 = vpow2.f32 %v2474_v27  ;;  %v2337_v6 = vadd.f32 -0.14224836, %v2313_v48 }
 0x30c   :  { %v2295_v31 = vadd.f32 0.7107069, %v2271_v60  ;;  %v2301_v62 = vadd.f32 0.7107069, %v2277_v63  ;;  %v2360_v8 = vmul.f32 %v2336_v12, %v12207_v5  ;;  %v2488_v29 = vmul.f32 1.442695, %v2457_v61 }
 0x30d   :  { %16969 = vst [vmem:[#allocation54_spill] sm:$0xff] %v12314_v50  ;;  %v12316_v56 = vpop.eup %9595  ;;  %v2324_v14 = vmul.f32 %v2300_v20, %v12239_v47  ;;  %v2445_v15 = vmul.f32 %v12083_v55, %v12083_v55  ;;  %9601 = vpow2.f32 %v2486_v43  ;;  %v2463_v57 = vmul.f32 -0.5, %v2439_v18 }
 0x30e   :  { %v12322_v44 = vpop.eup %9597  ;;  %v2468_v51 = vmul.f32 -0.5, %v2444_v33  ;;  %v2354_v48 = vmul.f32 %v2330_v10, %v12212_v45  ;;  %v2355_v27 = vmul.f32 %v2331_v19, %v12214_v38  ;;  %9603 = vpow2.f32 %v2476_v46  ;;  %v16970_v46 = vld [vmem:[#allocation25_spill] sm:$0xff] }
 0x30f   :  { %v2318_v12 = vmul.f32 %v2294_v23, %v12248_v53  ;;  %v2361_v61 = vmul.f32 %v2337_v6, %v12218_v35  ;;  %v2498_v28 = vmul.f32 1.442695, %v2462_v24  ;;  %v2319_v60 = vmul.f32 %v2295_v31, %v12251_v36 }
 0x310   :  { %v2325_v63 = vmul.f32 %v2301_v62, %v12253_v49  ;;  %v2384_v20 = vadd.f32 0.1274148, %v2360_v8  ;;  %9605 = vpow2.f32 %v2488_v29  ;;  %v2348_v43 = vadd.f32 -0.14224836, %v2324_v14 }
 0x311   :  { %v2469_v18 = vmul.f32 -0.5, %v2445_v15  ;;  %v2500_v33 = vmul.f32 1.442695, %v2463_v57  ;;  %v2510_v32 = vmul.f32 1.442695, %v2468_v51  ;;  %v12333_v10 = vmul.f32 %v12244_v11, %v12096_v13 }
 0x312   :  { %v16635_v19 = vand.u32 2147483647, %v16970_v46  ;;  %v2378_v23 = vadd.f32 0.1274148, %v2354_v48  ;;  %v2379_v50 = vadd.f32 0.1274148, %v2355_v27  ;;  %v3379_v24 = vmul.f32 %v12263_v42, %v12161_v0 }
 0x313   :  { %v2342_v6 = vadd.f32 -0.14224836, %v2318_v12  ;;  %v2385_v31 = vadd.f32 0.1274148, %v2361_v61  ;;  %v2343_v62 = vadd.f32 -0.14224836, %v2319_v60  ;;  %v3286_v29 = vmul.f32 %v12265_v40, %v12228_v9 }
 0x314   :  { %v2349_v8 = vadd.f32 -0.14224836, %v2325_v63  ;;  %v2408_v14 = vmul.f32 %v2384_v20, %v12207_v5  ;;  %9607 = vpow2.f32 %v2498_v28  ;;  %v2372_v13 = vmul.f32 %v2348_v43, %v12239_v47 }
 0x315   :  { %v2512_v11 = vmul.f32 1.442695, %v2469_v18  ;;  %v9600_v15 = vpop.eup %9599  ;;  %9609 = vpow2.f32 %v2510_v32  ;;  %v16971_v57 = vsub.f32 2.0, %v12284_v26  ;;  %v12348_v42 = vmul.f32 %v12237_v17, %v3199_v21 }
 0x316   :  { %v16972_v48 = vand.u32 2147483647, %v11873_v2  ;;  %v2402_v40 = vmul.f32 %v2378_v23, %v12212_v45  ;;  %v2366_v5 = vmul.f32 %v2342_v6, %v12248_v53  ;;  %9611 = vpow2.f32 %v2500_v33 }
 0x317   :  { %v12345_v51 = vmul.f32 %v12230_v54, %v16971_v57  ;;  %v12354_v12 = vadd.f32 0.1274148, %v3379_v24  ;;  %v9602_v61 = vpop.eup %9601  ;;  %v2403_v32 = vmul.f32 %v2379_v50, %v12214_v38  ;;  %v2409_v26 = vmul.f32 %v2385_v31, %v12218_v35 }
 0x318   :  { %v3100_v27 = vmul.f32 0.23164189, %v16972_v48  ;;  %v2367_v54 = vmul.f32 %v2343_v62, %v12251_v36  ;;  %v2373_v21 = vmul.f32 %v2349_v8, %v12253_v49  ;;  %v9604_v17 = vpop.eup %9603  ;;  %v2528_v28 = vmul.f32 %v9602_v61, %v2408_v14 }
 0x319   :  { %v2396_v60 = vadd.f32 0.1274148, %v2372_v13  ;;  %9613 = vpow2.f32 %v2512_v11  ;;  %v3106_v45 = vmul.f32 0.23164189, %v16635_v19  ;;  %v3241_v63 = vmul.f32 0.5307027, %v12345_v51 }
 0x31a   :  { %v3247_v20 = vmul.f32 0.5307027, %v12348_v42  ;;  %v3159_v38 = vmul.f32 %v12316_v56, %v12205_v7  ;;  %v12366_v50 = vadd.f32 1.0, %v3100_v27  ;;  %v9606_v35 = vpop.eup %9605  ;;  %v2522_v43 = vmul.f32 %v9600_v15, %v2402_v40 }
 0x31b   :  { %v2390_v18 = vadd.f32 0.1274148, %v2366_v5  ;;  %v3386_v33 = vmul.f32 %v12270_v59, %v12163_v41  ;;  %v3310_v23 = vadd.f32 0.7107069, %v3286_v29  ;;  %v2523_v6 = vmul.f32 %v9604_v17, %v2403_v32 }
 0x31c   :  { %v2529_v24 = vmul.f32 %v9606_v35, %v2409_v26  ;;  %v2391_v31 = vadd.f32 0.1274148, %v2367_v54  ;;  %v2397_v62 = vadd.f32 0.1274148, %v2373_v21  ;;  %v16973_v8 = vand.u32 2147483647, %v12007_v25 }
 0x31d   :  { %v2420_v13 = vmul.f32 %v2396_v60, %v12239_v47  ;;  %v12375_v7 = vmul.f32 %v12275_v1, %v12135_v52  ;;  %v12377_v11 = vadd.f32 1.0, %v3106_v45  ;;  %v3265_v15 = vadd.f32 -0.72657603, %v3241_v63  ;;  %v16975_v47 = vld [vmem:[#allocation31_spill] sm:$0xff] }
 0x31e   :  { %v2576_v14 = vmul.f32 %v2528_v28, %v16973_v8  ;;  %v3271_v57 = vadd.f32 -0.72657603, %v3247_v20  ;;  %v3183_v48 = vsub.f32 2.0, %v3159_v38  ;;  %9615 = vrcp.f32 %v12366_v50  ;;  %v9608_v59 = vpop.eup %9607  ;;  %v16978_v38 = vld [vmem:[#allocation22_spill] sm:$0xff] }
 0x31f   :  { %v16974_v29 = vand.u32 2147483647, %v12017_v58  ;;  %v2552_v40 = vmax.f32 %v12007_v25, 0.0  ;;  %v2414_v5 = vmul.f32 %v2390_v18, %v12248_v53  ;;  %v16634_v61 = vand.u32 2147483647, %v16975_v47  ;;  %v9610_v32 = vpop.eup %9609 }
 0x320   :  { %v16976_v52 = vand.u32 2147483647, %v12025_v37  ;;  %v16977_v26 = vand.u32 2147483647, %v12033_v3  ;;  %v2415_v21 = vmul.f32 %v2391_v31, %v12251_v36  ;;  %v2421_v17 = vmul.f32 %v2397_v62, %v12253_v49  ;;  %v9612_v28 = vpop.eup %9611 }
 0x321   :  { %v2570_v27 = vmul.f32 %v2522_v43, %v16974_v29  ;;  %v2546_v60 = vmax.f32 %v12017_v58, 0.0  ;;  %v2600_v45 = vsub.f32 %v2552_v40, %v2576_v14  ;;  %v2540_v25 = vmul.f32 %v9610_v32, %v2420_v13  ;;  %v16980_v14 = vld [vmem:[#allocation53_spill] sm:$0xff] }
 0x322   :  { %v2571_v1 = vmul.f32 %v2523_v6, %v16976_v52  ;;  %v2577_v54 = vmul.f32 %v2529_v24, %v16977_v26  ;;  %9617 = vrcp.f32 %v12377_v11  ;;  %v2547_v53 = vmax.f32 %v12025_v37, 0.0 }
 0x323   :  { %v2553_v63 = vmax.f32 %v12033_v3, 0.0  ;;  %v3165_v20 = vmul.f32 %v12322_v44, %v12234_v4  ;;  %v16633_v35 = vand.u32 2147483647, %v16978_v38  ;;  %v9614_v43 = vpop.eup %9613  ;;  %v2594_v36 = vsub.f32 %v2546_v60, %v2570_v27  ;;  %v16981_v27 = vld [vmem:[#allocation50_spill] sm:$0xff] }
 0x324   :  { %v2534_v18 = vmul.f32 %v9608_v59, %v2414_v5  ;;  %v12399_v49 = vmul.f32 %v12316_v56, %v3183_v48  ;;  %v3099_v58 = vmul.f32 0.23164189, %v16634_v61  ;;  %v2535_v6 = vmul.f32 %v9612_v28, %v2415_v21 }
 0x325   :  { %v2541_v24 = vmul.f32 %v9614_v43, %v2421_v17  ;;  %v2595_v31 = vsub.f32 %v2547_v53, %v2571_v1  ;;  %v2601_v37 = vsub.f32 %v2553_v63, %v2577_v54  ;;  %v16979_v3 = vand.u32 2147483647, %v12059_v16 }
 0x326   :  { %v9025_v8 = vpack.c.bf16 %v2600_v45, %v2594_v36  ;;  %v3392_v4 = vmul.f32 %v12277_v34, %v12177_v22  ;;  %v3328_v13 = vmul.f32 %v16980_v14, %v12225_v39  ;;  %v3289_v56 = vmul.f32 %v3265_v15, %v12345_v51  ;;  %v16985_v14 = vld [vmem:[#allocation16_spill] sm:$0xff] }
 0x327   :  { %v2588_v62 = vmul.f32 %v2540_v25, %v16979_v3  ;;  %v9023_v59 = vpack.c.bf16 %v2601_v37, %v2595_v31  ;;  %v3189_v48 = vsub.f32 2.0, %v3165_v20  ;;  %v3105_v29 = vmul.f32 0.23164189, %v16633_v35 }
 0x328   :  { %v16982_v40 = vand.u32 2147483647, %v16981_v27  ;;  %v2564_v32 = vmax.f32 %v12059_v16, 0.0  ;;  %v3231_v52 = vmul.f32 0.5307027, %v12399_v49  ;;  %v12416_v1 = vadd.f32 1.0, %v3099_v58  ;;  %v12418_v34 = vpop.eup %9615 }
 0x329   :  { %v16983_v26 = vand.u32 2147483647, %v12074_v30  ;;  %v16984_v15 = vand.u32 2147483647, %v12083_v55  ;;  %9024 = vmatprep.subr.bf16.mxu0 %v9023_v59  ;;  %v3410_v17 = vadd.f32 0.1274148, %v3386_v33  ;;  %v3295_v28 = vmul.f32 %v3271_v57, %v12348_v42 }
 0x32a   :  { %v2582_v5 = vmul.f32 %v2534_v18, %v16982_v40  ;;  %v2558_v60 = vmax.f32 %v16981_v27, 0.0  ;;  %v2612_v45 = vsub.f32 %v2564_v32, %v2588_v62  ;;  %9026 = vmatpush1.bf16.msra.mxu0 %v9025_v8  ;;  %v3334_v16 = vmul.f32 %v3310_v23, %v12228_v9  ;;  %v16990_v27 = vld [vmem:[#allocation54_spill] sm:$0xff]  ;;  %v16991_v40 = vld [vmem:[#allocation41_spill] sm:$0xff] }
 0x32b   :  { %v2583_v54 = vmul.f32 %v2535_v6, %v16983_v26  ;;  %v2589_v21 = vmul.f32 %v2541_v24, %v16984_v15  ;;  %v3352_v25 = vadd.f32 -0.14224836, %v3328_v13  ;;  %v2559_v53 = vmax.f32 %v12074_v30, 0.0  ;;  %v16993_v15 = vld [vmem:[#allocation27_spill] sm:$0xff] }
 0x32c   :  { %v2565_v63 = vmax.f32 %v12083_v55, 0.0  ;;  %v12430_v20 = vmul.f32 %v12322_v44, %v3189_v48  ;;  %v12432_v43 = vadd.f32 1.0, %v3105_v29  ;;  %v9618_v36 = vpop.eup %9617  ;;  %v2606_v33 = vsub.f32 %v2558_v60, %v2582_v5  ;;  %v16987_v48 = vld [vmem:[#allocation19_spill] sm:$0xff]  ;;  %v16992_v5 = vld [vmem:[#allocation36_spill] sm:$0xff] }
 0x32d   :  { %v3313_v18 = vadd.f32 0.7107069, %v3289_v56  ;;  %v3255_v57 = vadd.f32 -0.72657603, %v3231_v52  ;;  %9619 = vrcp.f32 %v12416_v1  ;;  %v2607_v58 = vsub.f32 %v2559_v53, %v2583_v54  ;;  %v16986_v56 = vld [vmem:[#allocation33_spill] sm:$0xff] }
 0x32e   :  { %v2613_v6 = vsub.f32 %v2565_v63, %v2589_v21  ;;  %v3416_v24 = vadd.f32 0.1274148, %v3392_v4  ;;  %v3319_v23 = vadd.f32 0.7107069, %v3295_v28  ;;  %v9029_v31 = vpack.c.bf16 %v2612_v45, %v2606_v33 }
 0x32f   :  { %v3358_v37 = vadd.f32 -0.14224836, %v3334_v16  ;;  %v3376_v30 = vmul.f32 %v3352_v25, %v12225_v39  ;;  %v3172_v55 = vmul.f32 %v12418_v34, %v12366_v50  ;;  %v3237_v3 = vmul.f32 0.5307027, %v12430_v20  ;;  %v16994_v16 = vld [vmem:[#allocation23_spill] sm:$0xff] }
 0x330   :  { %v9027_v44 = vpack.c.bf16 %v2613_v6, %v2607_v58  ;;  %v3178_v62 = vmul.f32 %v9618_v36, %v12377_v11  ;;  %9621 = vrcp.f32 %v12432_v43  ;;  %v3427_v8 = vmul.f32 %v12354_v12, %v12161_v0  ;;  %v16995_v25 = vld [vmem:[#allocation15_spill] sm:$0xff]  ;;  %v17001_v58 = vld [vmem:[#allocation14_spill] sm:$0xff] }
 0x331   :  { %v3574_v4 = vmax.f32 %v16985_v14, 0.0  ;;  %v3337_v13 = vmul.f32 %v3313_v18, %v12345_v51  ;;  %v3279_v59 = vmul.f32 %v3255_v57, %v12399_v49  ;;  %v16988_v50 = vmax.f32 %v16987_v48, 0.0  ;;  %v16999_v18 = vld [vmem:[#allocation28_spill] sm:$0xff] }
 0x332   :  { %9028 = vmatprep.subr.bf16.mxu0 %v9027_v44  ;;  %v3551_v11 = vmul.f32 %v16991_v40, %v16990_v27  ;;  %v3557_v32 = vmul.f32 %v16992_v5, %v12333_v10  ;;  %v3343_v0 = vmul.f32 %v3319_v23, %v12348_v42  ;;  %v3434_v12 = vmul.f32 %v3410_v17, %v12163_v41  ;;  %v8727_v10 = vld [vmem:[%s16503_s1 + $0x40] sm:$0xff]  ;;  %v17005_v44 = vld [vmem:[#allocation43_spill] sm:$0xff]  ;;  %v8728_v5 = vld [vmem:[%s16503_s1 + $0x48] sm:$0xff] }
 0x333   :  { %v12449_v29 = vsub.f32 %v16988_v50, %v16986_v56  ;;  %9030 = vmatpush1.bf16.msra.mxu0 %v9029_v31  ;;  %v3440_v52 = vmul.f32 %v3416_v24, %v12177_v22  ;;  %v3382_v26 = vmul.f32 %v3358_v37, %v12228_v9  ;;  %v3196_v54 = vsub.f32 2.0, %v3172_v55  ;;  %v16998_v41 = vld [vmem:[#allocation21_spill] sm:$0xff]  ;;  %v17007_v56 = vld [vmem:[#allocation18_spill] sm:$0xff] }
 0x334   :  { %v3541_v21 = vmul.f32 %v16993_v15, %v12375_v7  ;;  %v3400_v28 = vadd.f32 0.1274148, %v3376_v30  ;;  %v3261_v60 = vadd.f32 -0.72657603, %v3237_v3  ;;  %v3202_v45 = vsub.f32 2.0, %v3178_v62  ;;  %v17003_v31 = vld [vmem:[#allocation29_spill] sm:$0xff] }
 0x335   :  { %16989 = vst [vmem:[#allocation53_spill] sm:$0xff] %v12449_v29  ;;  %v16996_v53 = vmax.f32 %v16995_v25, 0.0  ;;  %v3547_v22 = vmul.f32 %v16998_v41, %v3427_v8  ;;  %v3361_v17 = vadd.f32 -0.14224836, %v3337_v13  ;;  %v3303_v33 = vadd.f32 0.7107069, %v3279_v59 }
 0x336   :  { %8840 = vmatmul.mubr.msk.f32.vlgmr.msra.gmra.mrb[20].mxu0 %vm887_vm0, %v8727_v10  ;;  %v17000_v7 = vand.u32 2147483647, %v16999_v18  ;;  %v17002_v6 = vand.u32 2147483647, %v17001_v58  ;;  %v3367_v23 = vadd.f32 -0.14224836, %v3343_v0  ;;  %v3554_v3 = vmul.f32 %v17005_v44, %v3434_v12 }
 0x337   :  { %v12467_v63 = vsub.f32 %v16996_v53, %v16994_v16  ;;  %v3577_v37 = vmax.f32 %v17003_v31, 0.0  ;;  %v9620_v30 = vpop.eup %9619  ;;  %v17004_v55 = vmov 0.0   ;;  %v17006_v62 = vld [vmem:[#allocation38_spill] sm:$0xff]  ;;  %v3406_v13 = vadd.f32 0.1274148, %v3382_v26  ;;  %v17010_v0 = vld [vmem:[#allocation7_spill] sm:$0xff] }
 0x338   :  { %v3599_v57 = vmul.f32 %v3551_v11, %v17000_v7  ;;  %v3605_v24 = vmul.f32 %v3557_v32, %v17002_v6  ;;  %2720 = vmatprep.mubr.f32.mxu0 %v17004_v55  ;;  %v3560_v8 = vmul.f32 %v17006_v62, %v3440_v52  ;;  %v12480_v59 = vmul.f32 %v12418_v34, %v3196_v54  ;;  %v17016_v10 = vld [vmem:[#allocation30_spill] sm:$0xff]  ;;  %v17018_v53 = vld [vmem:[#allocation11_spill] sm:$0xff] }
 0x339   :  { %16997 = vst [vmem:[#allocation50_spill] sm:$0xff] %v12467_v63  ;;  %v17008_v48 = vand.u32 2147483647, %v17007_v56  ;;  %v3424_v27 = vmul.f32 %v3400_v28, %v12225_v39  ;;  %v3285_v40 = vmul.f32 %v3261_v60, %v12430_v20  ;;  %v12486_v11 = vmul.f32 %v9618_v36, %v3202_v45  ;;  %v8729_v45 = vld [vmem:[%s16503_s1 + $0x50] sm:$0xff] }
 0x33a   :  { %v17011_v12 = vand.u32 2147483647, %v17010_v0  ;;  %v3385_v52 = vmul.f32 %v3361_v17, %v12345_v51  ;;  %v3327_v26 = vmul.f32 %v3303_v33, %v12399_v49  ;;  %v9622_v54 = vpop.eup %9621  ;;  %8841 = vmatmul.mubr.msk.f32.gmra.mrb[22].mxu0 %vm887_vm0, %v8728_v5  ;;  %v17012_v39 = vmax.f32 %v16999_v18, 0.0 }
 0x33b   :  { %v3589_v50 = vmul.f32 %v3541_v21, %v17008_v48  ;;  %17009 = vst [vmem:[#allocation16_spill] sm:$0xff] %v12486_v11  ;;  %v17014_v15 = vmax.f32 %v17001_v58, 0.0  ;;  %v3391_v28 = vmul.f32 %v3367_v23, %v12348_v42  ;;  %v3171_v60 = vmul.f32 %v9620_v30, %v12416_v1  ;;  %2726 = vmatprep.mubr.f32.mxu0 %v17004_v55  ;;  %v17022_v1 = vld [vmem:[#allocation35_spill] sm:$0xff] }
 0x33c   :  { %v3595_v34 = vmul.f32 %v3547_v22, %v17011_v12  ;;  %v12500_v36 = vsub.f32 %v17012_v39, %v3599_v57  ;;  %v17017_v16 = vand.u32 2147483647, %v17016_v10  ;;  %v17019_v41 = vand.u32 2147483647, %v17018_v53  ;;  %v17031_v12 = vld [vmem:[#allocation26_spill] sm:$0xff]  ;;  %v17032_v39 = vld [vmem:[#allocation20_spill] sm:$0xff] }
 0x33d   :  { %v12504_v21 = vsub.f32 %v17014_v15, %v3605_v24  ;;  %v3430_v17 = vmul.f32 %v3406_v13, %v12228_v9  ;;  %v3244_v33 = vmul.f32 0.5307027, %v12480_v59  ;;  %v17020_v18 = vmax.f32 %v17007_v56, 0.0  ;;  %v17026_v56 = vld [vmem:[#allocation13_spill] sm:$0xff] }
 0x33e   :  { %17013 = vst [vmem:[#allocation33_spill] sm:$0xff] %v12500_v36  ;;  %v3602_v25 = vmul.f32 %v3554_v3, %v17017_v16  ;;  %v3608_v22 = vmul.f32 %v3560_v8, %v17019_v41  ;;  %v3544_v57 = vmul.f32 %v17022_v1, %v3424_v27  ;;  %v3309_v58 = vadd.f32 0.7107069, %v3285_v40  ;;  %8842 = vmatmul.mubr.msk.f32.gmra.mrb[24].mxu0 %vm887_vm0, %v8729_v45  ;;  %v17025_v8 = vld [vmem:[#allocation12_spill] sm:$0xff]  ;;  %v17035_v1 = vld [vmem:[#allocation17_spill] sm:$0xff] }
 0x33f   :  { %17015 = vst [vmem:[#allocation19_spill] sm:$0xff] %v12504_v21  ;;  %v12520_v7 = vsub.f32 %v17020_v18, %v3589_v50  ;;  %v3250_v6 = vmul.f32 0.5307027, %v12486_v11  ;;  %v17023_v24 = vmax.f32 %v17010_v0, 0.0  ;;  %v3409_v44 = vadd.f32 0.1274148, %v3385_v52  ;;  %2732 = vmatprep.mubr.f32.mxu0 %v17004_v55 }
 0x340   :  { %v3351_v3 = vadd.f32 -0.14224836, %v3327_v26  ;;  %v3177_v62 = vmul.f32 %v9622_v54, %v12432_v43  ;;  %v3415_v9 = vadd.f32 0.1274148, %v3391_v28  ;;  %v3583_v13 = vmax.f32 %v17025_v8, 0.0  ;;  %v8730_v27 = vld [vmem:[%s16503_s1 + $0x58] sm:$0xff] }
 0x341   :  { %17021 = vst [vmem:[#allocation54_spill] sm:$0xff] %v12520_v7  ;;  %v12526_v23 = vsub.f32 %v17023_v24, %v3595_v34  ;;  %v3195_v50 = vsub.f32 2.0, %v3171_v60  ;;  %v17027_v40 = vmax.f32 %v17016_v10, 0.0  ;;  %v17029_v43 = vmax.f32 %v17018_v53, 0.0 }
 0x342   :  { %v3550_v34 = vmul.f32 %v17031_v12, %v3430_v17  ;;  %v3268_v52 = vadd.f32 -0.72657603, %v3244_v33  ;;  %v17033_v15 = vand.u32 2147483647, %v17032_v39  ;;  %v3333_v60 = vmul.f32 %v3309_v58, %v12430_v20  ;;  %8843 = vmatmul.mubr.msk.f32.gmra.mrb[26].mxu0 %vm887_vm0, %v8730_v27 }
 0x343   :  { %17024 = vst [vmem:[#allocation41_spill] sm:$0xff] %v12526_v23  ;;  %v12538_v5 = vsub.f32 %v17027_v40, %v3602_v25  ;;  %v12542_v0 = vsub.f32 %v17029_v43, %v3608_v22  ;;  %v3274_v45 = vadd.f32 -0.72657603, %v3250_v6  ;;  %v3433_v25 = vmul.f32 %v3409_v44, %v12345_v51  ;;  %v17034_v22 = vld [vmem:[#allocation8_spill] sm:$0xff]  ;;  %2892 = vmatprep.mubr.f32.mxu0 %v17004_v55  ;;  %v17039_v43 = vld [vmem:[#allocation42_spill] sm:$0xff] }
 0x344   :  { %v3592_v28 = vmul.f32 %v3544_v57, %v17033_v15  ;;  %v3375_v53 = vmul.f32 %v3351_v3, %v12399_v49  ;;  %v3201_v41 = vsub.f32 2.0, %v3177_v62  ;;  %v3439_v18 = vmul.f32 %v3415_v9, %v12348_v42 }
 0x345   :  { %17028 = vst [vmem:[#allocation36_spill] sm:$0xff] %v12538_v5  ;;  %17030 = vst [vmem:[#allocation27_spill] sm:$0xff] %v12542_v0  ;;  %v12560_v58 = vmul.f32 %v9620_v30, %v3195_v50  ;;  %v17036_v24 = vand.u32 2147483647, %v16985_v14  ;;  %v3292_v3 = vmul.f32 %v3268_v52, %v12480_v59  ;;  %v17037_v42 = vmax.f32 %v17032_v39, 0.0  ;;  %v17041_v52 = vld [vmem:[#allocation9_spill] sm:$0xff] }
 0x346   :  { %v3357_v30 = vadd.f32 -0.14224836, %v3333_v60  ;;  %v3298_v50 = vmul.f32 %v3274_v45, %v12486_v11  ;;  %v3553_v12 = vmul.f32 %v17039_v43, %v3433_v25  ;;  %v3399_v15 = vadd.f32 0.1274148, %v3375_v53 }
 0x347   :  { %v3598_v44 = vmul.f32 %v3550_v34, %v17036_v24  ;;  %v12574_v9 = vsub.f32 %v17037_v42, %v3592_v28  ;;  %v17042_v24 = vld [vmem:[#allocation37_spill] sm:$0xff]  ;;  %v3243_v45 = vmul.f32 0.5307027, %v12560_v58  ;;  %v17043_v32 = vand.u32 2147483647, %v17003_v31 }
 0x348   :  { %v3559_v60 = vmul.f32 %v17042_v24, %v3439_v18  ;;  %v3381_v51 = vmul.f32 %v3357_v30, %v12430_v20  ;;  %v3322_v18 = vadd.f32 0.7107069, %v3298_v50 }
 0x349   :  { %17038 = vst [vmem:[#allocation23_spill] sm:$0xff] %v12574_v9  ;;  %v12611_v30 = vsub.f32 %v3574_v4, %v3598_v44  ;;  %v3267_v50 = vadd.f32 -0.72657603, %v3243_v45 }
 0x34a   :  { %v3405_v14 = vadd.f32 0.1274148, %v3381_v51 }
 0x34b   :  { %17044 = vst [vmem:[#allocation21_spill] sm:$0xff] %v12611_v30  ;;  %v3291_v19 = vmul.f32 %v3267_v50, %v12560_v58  ;;  %v17049_v50 = vld [vmem:[#allocation34_spill] sm:$0xff] }
 0x354   :  { %v1930_v16 = vpop.f32.mrb[12].mxu0 }
 0x355   :  { %v12555_v17 = vadd.f32 %v1930_v16, %v17034_v22  ;;  %v1932_v33 = vpop.f32.mrb[13].mxu0  ;;  %v12579_v16 = vmul.f32 %v9622_v54, %v3201_v41  ;;  %v3316_v41 = vadd.f32 0.7107069, %v3292_v3 }
 0x356   :  { %v12563_v6 = vadd.f32 %v1932_v33, %v17034_v22 }
 0x357   :  { %v16641_v62 = vand.u32 2147483647, %v12555_v17  ;;  %17040 = vst [vmem:[#allocation15_spill] sm:$0xff] %v12579_v16  ;;  %v3249_v35 = vmul.f32 0.5307027, %v12579_v16  ;;  %v3340_v4 = vmul.f32 %v3316_v41, %v12480_v59  ;;  %v2428_v0 = vmul.f32 %v12555_v17, %v12555_v17 }
 0x358   :  { %v16638_v27 = vand.u32 2147483647, %v12563_v6  ;;  %v1936_v40 = vpop.f32.mrb[14].mxu0 }
 0x359   :  { %v2068_v34 = vmul.f32 0.23164189, %v16641_v62  ;;  %v12584_v33 = vadd.f32 %v1936_v40, %v17041_v52  ;;  %v2019_v39 = vpop.f32.mrb[20].mxu1  ;;  %v1938_v28 = vpop.f32.mrb[15].mxu0  ;;  %v17050_v62 = vld [vmem:[#allocation24_spill] sm:$0xff] }
 0x35a   :  { %v2069_v42 = vmul.f32 0.23164189, %v16638_v27  ;;  %v12591_v25 = vadd.f32 %v2019_v39, %v17034_v22  ;;  %v12594_v54 = vadd.f32 %v1938_v28, %v17041_v52  ;;  %v2021_v53 = vpop.f32.mrb[21].mxu1  ;;  %v3601_v39 = vmul.f32 %v3553_v12, %v17043_v32  ;;  %v17047_v27 = vld [vmem:[#allocation6_spill] sm:$0xff] }
 0x35b   :  { %v12596_v43 = vadd.f32 1.0, %v2068_v34  ;;  %v16639_v40 = vand.u32 2147483647, %v12584_v33  ;;  %v17045_v12 = vand.u32 2147483647, %v17025_v8 }
 0x35c   :  { %v12600_v24 = vadd.f32 1.0, %v2069_v42  ;;  %v16636_v10 = vand.u32 2147483647, %v12591_v25  ;;  %v1942_v34 = vpop.f32.mrb[16].mxu0  ;;  %v16637_v26 = vand.u32 2147483647, %v12594_v54 }
 0x35d   :  { %9623 = vrcp.f32 %v12596_v43  ;;  %v2074_v3 = vmul.f32 0.23164189, %v16639_v40  ;;  %v2025_v28 = vpop.f32.mrb[22].mxu1  ;;  %v1944_v32 = vpop.f32.mrb[17].mxu0  ;;  %v3607_v61 = vmul.f32 %v3559_v60, %v17045_v12  ;;  %v12631_v60 = vsub.f32 %v3577_v37, %v3601_v39 }
 0x35e   :  { %v2070_v42 = vmul.f32 0.23164189, %v16636_v10  ;;  %9625 = vrcp.f32 %v12600_v24  ;;  %v2027_v48 = vpop.f32.mrb[23].mxu1  ;;  %v2075_v45 = vmul.f32 0.23164189, %v16637_v26  ;;  %v3423_v12 = vmul.f32 %v3399_v15, %v12399_v49 }
 0x35f   :  { %v12620_v57 = vadd.f32 1.0, %v2074_v3  ;;  %17046 = vst [vmem:[#allocation28_spill] sm:$0xff] %v12631_v60  ;;  %v12636_v3 = vadd.f32 %v2021_v53, %v17034_v22  ;;  %v12646_v31 = vadd.f32 %v1942_v34, %v17047_v27  ;;  %v12652_v49 = vsub.f32 %v3583_v13, %v3607_v61 }
 0x360   :  { %v12623_v44 = vadd.f32 1.0, %v2070_v42  ;;  %v12627_v10 = vpop.f32.mrb[18].mxu0  ;;  %v3273_v42 = vadd.f32 -0.72657603, %v3249_v35  ;;  %v12643_v26 = vadd.f32 1.0, %v2075_v45  ;;  %v3346_v22 = vmul.f32 %v3322_v18, %v12486_v11 }
 0x361   :  { %9627 = vrcp.f32 %v12620_v57  ;;  %v12638_v51 = vpop.f32.mrb[24].mxu1  ;;  %v12640_v41 = vpop.f32.mrb[19].mxu0  ;;  %17048 = vst [vmem:[#allocation14_spill] sm:$0xff] %v12652_v49  ;;  %v16640_v15 = vand.u32 2147483647, %v12636_v3  ;;  %v3429_v35 = vmul.f32 %v3405_v14, %v12430_v20  ;;  %v3543_v45 = vmul.f32 %v17049_v50, %v3423_v12 }
 0x362   :  { %v12648_v37 = vpop.f32.mrb[25].mxu1  ;;  %9629 = vrcp.f32 %v12623_v44  ;;  %v3364_v53 = vadd.f32 -0.14224836, %v3340_v4  ;;  %v16642_v39 = vand.u32 2147483647, %v12646_v31  ;;  %v3297_v18 = vmul.f32 %v3273_v42, %v12579_v16 }
 0x363   :  { %9631 = vrcp.f32 %v12643_v26  ;;  %v2071_v61 = vmul.f32 0.23164189, %v16640_v15  ;;  %v3315_v20 = vadd.f32 0.7107069, %v3291_v19  ;;  %v12672_v4 = vadd.f32 %v2025_v28, %v17041_v52 }
 0x364   :  { %v2080_v14 = vmul.f32 0.23164189, %v16642_v39  ;;  %v3370_v12 = vadd.f32 -0.14224836, %v3346_v22  ;;  %v12682_v42 = vmul.f32 %v17050_v62, %v3429_v35  ;;  %v3388_v19 = vmul.f32 %v3364_v53, %v12480_v59 }
 0x365   :  { %v12666_v13 = vpop.f32.mrb[26].mxu1  ;;  %v12677_v40 = vadd.f32 1.0, %v2071_v61  ;;  %v16646_v5 = vand.u32 2147483647, %v12672_v4  ;;  %v17051_v22 = vand.u32 2147483647, %v17026_v56  ;;  %v3339_v35 = vmul.f32 %v3315_v20, %v12560_v58 }
 0x366   :  { %v12674_v34 = vpop.f32.mrb[27].mxu1  ;;  %v12686_v28 = vadd.f32 1.0, %v2080_v14  ;;  %v3321_v62 = vadd.f32 0.7107069, %v3297_v18  ;;  %v12701_v15 = vmul.f32 %v3370_v12, %v12486_v11  ;;  %v12706_v60 = vadd.f32 %v1944_v32, %v17047_v27 }
 0x367   :  { %v9624_v8 = vpop.eup %9623  ;;  %v12691_v50 = vmul.f32 %v3543_v45, %v17051_v22  ;;  %9633 = vrcp.f32 %v12677_v40  ;;  %v2076_v14 = vmul.f32 0.23164189, %v16646_v5  ;;  %v2429_v22 = vmul.f32 %v12563_v6, %v12563_v6 }
 0x368   :  { %v2140_v39 = vmul.f32 %v9624_v8, %v12596_v43  ;;  %v9626_v61 = vpop.eup %9625  ;;  %17053 = vst [vmem:[#allocation43_spill] sm:$0xff] %v12706_v60  ;;  %v12709_v18 = vadd.f32 %v2027_v48, %v17041_v52  ;;  %v12711_v20 = vadd.f32 0.1274148, %v3388_v19  ;;  %9635 = vrcp.f32 %v12686_v28 }
 0x369   :  { %17052 = vst [vmem:[#allocation29_spill] sm:$0xff] %v12691_v50  ;;  %v2141_v43 = vmul.f32 %v9626_v61, %v12600_v24  ;;  %v2452_v49 = vmul.f32 -0.5, %v2428_v0  ;;  %v2100_v7 = vadd.f32 1.0, %v2076_v14  ;;  %v12718_v23 = vmul.f32 %v3321_v62, %v12579_v16 }
 0x36a   :  { %v2164_v53 = vsub.f32 2.0, %v2140_v39  ;;  %17054 = vst [vmem:[#allocation38_spill] sm:$0xff] %v12711_v20  ;;  %v12720_v32 = vadd.f32 -0.14224836, %v3339_v35  ;;  %v16656_v0 = vand.u32 2147483647, %v12709_v18 }
 0x36b   :  { %v9628_v45 = vpop.eup %9627  ;;  %v2165_v24 = vsub.f32 2.0, %v2141_v43  ;;  %v2453_v43 = vmul.f32 -0.5, %v2429_v22  ;;  %9637 = vrcp.f32 %v2100_v7  ;;  %v2478_v63 = vmul.f32 1.442695, %v2452_v49 }
 0x36c   :  { %v12713_v39 = vmul.f32 %v9624_v8, %v2164_v53  ;;  %v2146_v5 = vmul.f32 %v9628_v45, %v12620_v57  ;;  %v9630_v12 = vpop.eup %9629 }
 0x36d   :  { %v12723_v52 = vmul.f32 %v9626_v61, %v2165_v24  ;;  %v2142_v8 = vmul.f32 %v9630_v12, %v12623_v44  ;;  %v9632_v53 = vpop.eup %9631  ;;  %v2434_v61 = vmul.f32 %v12584_v33, %v12584_v33  ;;  %v2077_v44 = vmul.f32 0.23164189, %v16656_v0 }
 0x36e   :  { %v2212_v48 = vmul.f32 0.5307027, %v12713_v39  ;;  %v2170_v19 = vsub.f32 2.0, %v2146_v5  ;;  %v2147_v5 = vmul.f32 %v9632_v53, %v12643_v26  ;;  %v2480_v38 = vmul.f32 1.442695, %v2453_v43 }
 0x36f   :  { %v2213_v62 = vmul.f32 0.5307027, %v12723_v52  ;;  %v2166_v35 = vsub.f32 2.0, %v2142_v8  ;;  %v17055_v8 = vand.u32 2147483647, %v12706_v60  ;;  %9639 = vpow2.f32 %v2478_v63 }
 0x370   :  { %v2236_v14 = vadd.f32 -0.72657603, %v2212_v48  ;;  %v12729_v29 = vmul.f32 %v9628_v45, %v2170_v19  ;;  %v2171_v19 = vsub.f32 2.0, %v2147_v5  ;;  %v2458_v49 = vmul.f32 -0.5, %v2434_v61 }
 0x371   :  { %v2237_v24 = vadd.f32 -0.72657603, %v2213_v62  ;;  %v12738_v48 = vmul.f32 %v9630_v12, %v2166_v35  ;;  %v9634_v9 = vpop.eup %9633  ;;  %v2081_v30 = vmul.f32 0.23164189, %v17055_v8  ;;  %v12750_v35 = vadd.f32 1.0, %v2077_v44 }
 0x372   :  { %v2260_v22 = vmul.f32 %v2236_v14, %v12713_v39  ;;  %v2218_v57 = vmul.f32 0.5307027, %v12729_v29  ;;  %v2430_v14 = vmul.f32 %v12591_v25, %v12591_v25  ;;  %v12747_v0 = vmul.f32 %v9632_v53, %v2171_v19  ;;  %v9636_v45 = vpop.eup %9635 }
 0x373   :  { %v2214_v62 = vmul.f32 0.5307027, %v12738_v48  ;;  %v2143_v12 = vmul.f32 %v9634_v9, %v12677_v40  ;;  %v2261_v5 = vmul.f32 %v2237_v24, %v12723_v52  ;;  %v12756_v21 = vadd.f32 1.0, %v2081_v30 }
 0x374   :  { %v2284_v26 = vadd.f32 0.7107069, %v2260_v22  ;;  %v2242_v36 = vadd.f32 -0.72657603, %v2218_v57  ;;  %v2219_v57 = vmul.f32 0.5307027, %v12747_v0  ;;  %v2435_v63 = vmul.f32 %v12594_v54, %v12594_v54 }
 0x375   :  { %v2167_v8 = vsub.f32 2.0, %v2143_v12  ;;  %v2454_v19 = vmul.f32 -0.5, %v2430_v14  ;;  %v9638_v44 = vpop.eup %9637  ;;  %v2238_v24 = vadd.f32 -0.72657603, %v2214_v62  ;;  %v2152_v22 = vmul.f32 %v9636_v45, %v12686_v28 }
 0x376   :  { %v2266_v43 = vmul.f32 %v2242_v36, %v12729_v29  ;;  %v2308_v53 = vmul.f32 %v2284_v26, %v12713_v39  ;;  %9641 = vrcp.f32 %v12750_v35  ;;  %v2285_v36 = vadd.f32 0.7107069, %v2261_v5 }
 0x377   :  { %v12762_v61 = vmul.f32 %v9634_v9, %v2167_v8  ;;  %v2490_v12 = vmul.f32 1.442695, %v2458_v49  ;;  %v2243_v30 = vadd.f32 -0.72657603, %v2219_v57  ;;  %v2431_v26 = vmul.f32 %v12636_v3, %v12636_v3 }
 0x378   :  { %v2290_v14 = vadd.f32 0.7107069, %v2266_v43  ;;  %v2148_v47 = vmul.f32 %v9638_v44, %v2100_v7  ;;  %9643 = vrcp.f32 %v12756_v21  ;;  %v2482_v62 = vmul.f32 1.442695, %v2454_v19 }
 0x379   :  { %v2215_v40 = vmul.f32 0.5307027, %v12762_v61  ;;  %9645 = vpow2.f32 %v2480_v38  ;;  %v2459_v9 = vmul.f32 -0.5, %v2435_v63  ;;  %v2440_v28 = vmul.f32 %v12646_v31, %v12646_v31  ;;  %v9640_v63 = vpop.eup %9639 }
 0x37a   :  { %v2332_v8 = vadd.f32 -0.14224836, %v2308_v53  ;;  %v2262_v5 = vmul.f32 %v2238_v24, %v12738_v48  ;;  %v2176_v57 = vsub.f32 2.0, %v2152_v22  ;;  %v2309_v46 = vmul.f32 %v2285_v36, %v12723_v52 }
 0x37b   :  { %v2239_v49 = vadd.f32 -0.72657603, %v2215_v40  ;;  %v2267_v43 = vmul.f32 %v2243_v30, %v12747_v0  ;;  %v2455_v7 = vmul.f32 -0.5, %v2431_v26  ;;  %v2314_v2 = vmul.f32 %v2290_v14, %v12729_v29 }
 0x37c   :  { %9647 = vpow2.f32 %v2490_v12  ;;  %v2172_v19 = vsub.f32 2.0, %v2148_v47  ;;  %v2492_v56 = vmul.f32 1.442695, %v2459_v9  ;;  %v2464_v24 = vmul.f32 -0.5, %v2440_v28 }
 0x37d   :  { %v2263_v38 = vmul.f32 %v2239_v49, %v12762_v61  ;;  %v2436_v22 = vmul.f32 %v12672_v4, %v12672_v4  ;;  %v2356_v40 = vmul.f32 %v2332_v8, %v12713_v39  ;;  %v2286_v36 = vadd.f32 0.7107069, %v2262_v5 }
 0x37e   :  { %v12782_v30 = vmul.f32 %v9636_v45, %v2176_v57  ;;  %v12784_v26 = vmul.f32 %v9638_v44, %v2172_v19  ;;  %v2333_v14 = vadd.f32 -0.14224836, %v2309_v46  ;;  %v2291_v12 = vadd.f32 0.7107069, %v2267_v43 }
 0x37f   :  { %v2484_v55 = vmul.f32 1.442695, %v2455_v7  ;;  %v2437_v47 = vmul.f32 %v12709_v18, %v12709_v18  ;;  %v2338_v49 = vadd.f32 -0.14224836, %v2314_v2  ;;  %9649 = vpow2.f32 %v2482_v62 }
 0x380   :  { %v9642_v9 = vpop.eup %9641  ;;  %v2287_v28 = vadd.f32 0.7107069, %v2263_v38  ;;  %v2220_v53 = vmul.f32 0.5307027, %v12784_v26  ;;  %9651 = vpow2.f32 %v2492_v56  ;;  %v2502_v50 = vmul.f32 1.442695, %v2464_v24 }
 0x381   :  { %v2460_v8 = vmul.f32 -0.5, %v2436_v22  ;;  %v2380_v44 = vadd.f32 0.1274148, %v2356_v40  ;;  %v2310_v46 = vmul.f32 %v2286_v36, %v12738_v48  ;;  %v2224_v57 = vmul.f32 0.5307027, %v12782_v30 }
 0x382   :  { %v9644_v5 = vpop.eup %9643  ;;  %v2244_v43 = vadd.f32 -0.72657603, %v2220_v53  ;;  %v2315_v19 = vmul.f32 %v2291_v12, %v12747_v0  ;;  %9653 = vpow2.f32 %v2484_v55  ;;  %v2149_v2 = vmul.f32 %v9642_v9, %v12750_v35  ;;  %v17056_v53 = vld [vmem:[#allocation10_spill] sm:$0xff] }
 0x383   :  { %v9646_v7 = vpop.eup %9645  ;;  %v2461_v62 = vmul.f32 -0.5, %v2437_v47  ;;  %v2357_v56 = vmul.f32 %v2333_v14, %v12723_v52  ;;  %v2362_v38 = vmul.f32 %v2338_v49, %v12729_v29  ;;  %v2311_v24 = vmul.f32 %v2287_v28, %v12762_v61 }
 0x384   :  { %v2268_v22 = vmul.f32 %v2244_v43, %v12784_v26  ;;  %v2494_v40 = vmul.f32 1.442695, %v2460_v8  ;;  %v2153_v36 = vmul.f32 %v9644_v5, %v12756_v21  ;;  %v2173_v45 = vsub.f32 2.0, %v2149_v2 }
 0x385   :  { %v12801_v11 = vadd.f32 %v12627_v10, %v17056_v53  ;;  %v2404_v35 = vmul.f32 %v2380_v44, %v12713_v39  ;;  %v2334_v12 = vadd.f32 -0.14224836, %v2310_v46  ;;  %v2248_v47 = vadd.f32 -0.72657603, %v2224_v57 }
 0x386   :  { %v9648_v55 = vpop.eup %9647  ;;  %v2292_v14 = vadd.f32 0.7107069, %v2268_v22  ;;  %v2339_v16 = vadd.f32 -0.14224836, %v2315_v19  ;;  %v12806_v49 = vmul.f32 %v12706_v60, %v12706_v60  ;;  %v12808_v28 = vmul.f32 %v9642_v9, %v2173_v45 }
 0x387   :  { %v2496_v8 = vmul.f32 1.442695, %v2461_v62  ;;  %v2381_v21 = vadd.f32 0.1274148, %v2357_v56  ;;  %v2386_v43 = vadd.f32 0.1274148, %v2362_v38  ;;  %9655 = vpow2.f32 %v2494_v40 }
 0x388   :  { %v2335_v2 = vadd.f32 -0.14224836, %v2311_v24  ;;  %v2316_v10 = vmul.f32 %v2292_v14, %v12784_v26  ;;  %v2177_v20 = vsub.f32 2.0, %v2153_v36  ;;  %v2221_v39 = vmul.f32 0.5307027, %v12808_v28 }
 0x389   :  { %v16667_v44 = vand.u32 2147483647, %v12801_v11  ;;  %v9650_v46 = vpop.eup %9649  ;;  %v2524_v57 = vmul.f32 %v9640_v63, %v2404_v35  ;;  %v2358_v19 = vmul.f32 %v2334_v12, %v12738_v48  ;;  %v2272_v22 = vmul.f32 %v2248_v47, %v12782_v30 }
 0x38a   :  { %v2340_v9 = vadd.f32 -0.14224836, %v2316_v10  ;;  %v9652_v45 = vpop.eup %9651  ;;  %v2363_v62 = vmul.f32 %v2339_v16, %v12747_v0  ;;  %v2245_v56 = vadd.f32 -0.72657603, %v2221_v39  ;;  %v12820_v24 = vadd.f32 %v12638_v51, %v17047_v27 }
 0x38b   :  { %v2086_v38 = vmul.f32 0.23164189, %v16667_v44  ;;  %v2405_v40 = vmul.f32 %v2381_v21, %v12723_v52  ;;  %v2410_v63 = vmul.f32 %v2386_v43, %v12729_v29  ;;  %v2359_v36 = vmul.f32 %v2335_v2, %v12762_v61 }
 0x38c   :  { %v2364_v35 = vmul.f32 %v2340_v9, %v12784_v26  ;;  %v9654_v12 = vpop.eup %9653  ;;  %v12826_v47 = vmul.f32 %v9644_v5, %v2177_v20  ;;  %v2269_v16 = vmul.f32 %v2245_v56, %v12808_v28  ;;  %v2058_v10 = vand.u32 2147483647, %v12820_v24 }
 0x38d   :  { %v2110_v14 = vadd.f32 1.0, %v2086_v38  ;;  %v2382_v39 = vadd.f32 0.1274148, %v2358_v19  ;;  %v2296_v44 = vadd.f32 0.7107069, %v2272_v22  ;;  %9657 = vpow2.f32 %v2502_v50 }
 0x38e   :  { %v2388_v51 = vadd.f32 0.1274148, %v2364_v35  ;;  %v2387_v60 = vadd.f32 0.1274148, %v2363_v62  ;;  %v2293_v52 = vadd.f32 0.7107069, %v2269_v16  ;;  %v2530_v20 = vmul.f32 %v9648_v55, %v2410_v63 }
 0x38f   :  { %9659 = vrcp.f32 %v2110_v14  ;;  %v2082_v29 = vmul.f32 0.23164189, %v2058_v10  ;;  %v17057_v21 = vand.u32 2147483647, %v12555_v17  ;;  %v2383_v5 = vadd.f32 0.1274148, %v2359_v36 }
 0x390   :  { %9661 = vpow2.f32 %v2496_v8  ;;  %v2525_v2 = vmul.f32 %v9646_v7, %v2405_v40  ;;  %v2225_v9 = vmul.f32 0.5307027, %v12826_v47  ;;  %v2317_v19 = vmul.f32 %v2293_v52, %v12808_v28 }
 0x391   :  { %v2572_v43 = vmul.f32 %v2524_v57, %v17057_v21  ;;  %v2106_v22 = vadd.f32 1.0, %v2082_v29  ;;  %v2406_v50 = vmul.f32 %v2382_v39, %v12738_v48  ;;  %v2412_v62 = vmul.f32 %v2388_v51, %v12784_v26  ;;  %v9656_v55 = vpop.eup %9655 }
 0x392   :  { %v12840_v56 = vadd.f32 %v12640_v41, %v17056_v53  ;;  %v12844_v57 = vadd.f32 %v12648_v37, %v17047_v27  ;;  %v2411_v7 = vmul.f32 %v2387_v60, %v12747_v0  ;;  %v2320_v8 = vmul.f32 %v2296_v44, %v12782_v30 }
 0x393   :  { %v2341_v38 = vadd.f32 -0.14224836, %v2317_v19  ;;  %9663 = vrcp.f32 %v2106_v22  ;;  %v17058_v40 = vmax.f32 %v12555_v17, 0.0  ;;  %v17059_v26 = vand.u32 2147483647, %v12584_v33 }
 0x394   :  { %v2407_v41 = vmul.f32 %v2383_v5, %v12762_v61  ;;  %v2063_v36 = vand.u32 2147483647, %v12840_v56  ;;  %v2249_v27 = vadd.f32 -0.72657603, %v2225_v9  ;;  %v2059_v60 = vand.u32 2147483647, %v12844_v57 }
 0x395   :  { %v12850_v48 = vsub.f32 %v17058_v40, %v2572_v43  ;;  %v2578_v63 = vmul.f32 %v2530_v20, %v17059_v26  ;;  %v2365_v37 = vmul.f32 %v2341_v38, %v12808_v28  ;;  %v12860_v0 = vadd.f32 %v12666_v13, %v17056_v53 }
 0x396   :  { %v17060_v17 = vand.u32 2147483647, %v12563_v6  ;;  %v2526_v35 = vmul.f32 %v9650_v46, %v2406_v50  ;;  %v2532_v16 = vmul.f32 %v9656_v55, %v2412_v62  ;;  %v2087_v39 = vmul.f32 0.23164189, %v2063_v36 }
 0x397   :  { %v2531_v61 = vmul.f32 %v9652_v45, %v2411_v7  ;;  %v2344_v51 = vadd.f32 -0.14224836, %v2320_v8  ;;  %v2389_v52 = vadd.f32 0.1274148, %v2365_v37  ;;  %v2083_v29 = vmul.f32 0.23164189, %v2059_v60  ;;  %v12868_v21 = vpop.eup %9657 }
 0x398   :  { %v2573_v44 = vmul.f32 %v2525_v2, %v17060_v17  ;;  %v17061_v43 = vmax.f32 %v12584_v33, 0.0  ;;  %v2527_v20 = vmul.f32 %v9654_v12, %v2407_v41  ;;  %v2446_v5 = vmul.f32 %v12801_v11, %v12801_v11 }
 0x399   :  { %v2111_v46 = vadd.f32 1.0, %v2087_v39  ;;  %v9660_v2 = vpop.eup %9659  ;;  %v2273_v9 = vmul.f32 %v2249_v27, %v12826_v47  ;;  %v2413_v45 = vmul.f32 %v2389_v52, %v12808_v28  ;;  %v12876_v19 = vadd.f32 1.0, %v2083_v29 }
 0x39a   :  { %v2602_v13 = vsub.f32 %v17061_v43, %v2578_v63  ;;  %v2064_v50 = vand.u32 2147483647, %v12860_v0  ;;  %v9662_v62 = vpop.eup %9661  ;;  %v17062_v55 = vand.u32 2147483647, %v12591_v25  ;;  %v17063_v33 = vand.u32 2147483647, %v12672_v4 }
 0x39b   :  { %v2158_v8 = vmul.f32 %v9660_v2, %v2110_v14  ;;  %9665 = vrcp.f32 %v2111_v46  ;;  %v17064_v38 = vand.u32 2147483647, %v12594_v54  ;;  %v2368_v26 = vmul.f32 %v2344_v51, %v12782_v30 }
 0x39c   :  { %v2574_v7 = vmul.f32 %v2526_v35, %v17062_v55  ;;  %v2580_v12 = vmul.f32 %v2532_v16, %v17063_v33  ;;  %v2533_v63 = vmul.f32 %v9662_v62, %v2413_v45  ;;  %v2088_v28 = vmul.f32 0.23164189, %v2064_v50 }
 0x39d   :  { %v2579_v40 = vmul.f32 %v2531_v61, %v17064_v38  ;;  %v17065_v41 = vand.u32 2147483647, %v12636_v3  ;;  %v2557_v37 = vmax.f32 %v12709_v18, 0.0  ;;  %v2182_v17 = vsub.f32 2.0, %v2158_v8  ;;  %v9664_v35 = vpop.eup %9663 }
 0x39e   :  { %9667 = vrcp.f32 %v12876_v19  ;;  %v2297_v14 = vadd.f32 0.7107069, %v2273_v9  ;;  %v17066_v16 = vand.u32 2147483647, %v12709_v18  ;;  %v2470_v61 = vmul.f32 -0.5, %v2446_v5 }
 0x39f   :  { %v2575_v27 = vmul.f32 %v2527_v20, %v17065_v41  ;;  %v2112_v52 = vadd.f32 1.0, %v2088_v28  ;;  %v17067_v51 = vmax.f32 %v12672_v4, 0.0  ;;  %v12896_v43 = vmul.f32 %v9660_v2, %v2182_v17 }
 0x3a0   :  { %v2581_v39 = vmul.f32 %v2533_v63, %v17066_v16  ;;  %v2154_v45 = vmul.f32 %v9664_v35, %v2106_v22  ;;  %v12900_v20 = vadd.f32 %v12674_v34, %v17056_v53  ;;  %v17068_v62 = vmax.f32 %v12563_v6, 0.0 }
 0x3a1   :  { %v2604_v29 = vsub.f32 %v17067_v51, %v2580_v12  ;;  %9669 = vrcp.f32 %v2112_v52  ;;  %v17069_v9 = vmax.f32 %v12594_v54, 0.0  ;;  %v9033_v5 = vpack.c.bf16 %v2602_v13, %v12850_v48 }
 0x3a2   :  { %v2597_v55 = vsub.f32 %v17068_v62, %v2573_v44  ;;  %v17070_v33 = vmax.f32 %v12591_v25, 0.0  ;;  %v2230_v2 = vmul.f32 0.5307027, %v12896_v43  ;;  %v2178_v12 = vsub.f32 2.0, %v2154_v45 }
 0x3a3   :  { %v2603_v18 = vsub.f32 %v17069_v9, %v2579_v40  ;;  %v2065_v22 = vand.u32 2147483647, %v12900_v20  ;;  %v2392_v8 = vadd.f32 0.1274148, %v2368_v26  ;;  %v17071_v53 = vmax.f32 %v12636_v3, 0.0 }
 0x3a4   :  { %v2598_v4 = vsub.f32 %v17070_v33, %v2574_v7  ;;  %v2605_v6 = vsub.f32 %v2557_v37, %v2581_v39  ;;  %v2254_v44 = vadd.f32 -0.72657603, %v2230_v2  ;;  %v12913_v63 = vmul.f32 %v9664_v35, %v2178_v12 }
 0x3a5   :  { %v9031_v34 = vpack.c.bf16 %v2603_v18, %v2597_v55  ;;  %v2599_v38 = vsub.f32 %v17071_v53, %v2575_v27  ;;  %v2442_v54 = vmul.f32 %v12820_v24, %v12820_v24  ;;  %v2089_v25 = vmul.f32 0.23164189, %v2065_v22  ;;  %v9666_v26 = vpop.eup %9665 }
 0x3a6   :  { %v2321_v48 = vmul.f32 %v2297_v14, %v12826_v47  ;;  %v2514_v13 = vmul.f32 1.442695, %v2470_v61  ;;  %v9041_v40 = vpack.c.bf16 %v2604_v29, %v2598_v4  ;;  %v2465_v3 = vmul.f32 -0.5, %v12806_v49 }
 0x3a7   :  { %9032 = vmatprep.subr.bf16.mxu1 %v9031_v34  ;;  %v9039_v7 = vpack.c.bf16 %v2605_v6, %v2599_v38  ;;  %v2278_v28 = vmul.f32 %v2254_v44, %v12896_v43  ;;  %v2226_v41 = vmul.f32 0.5307027, %v12913_v63  ;;  %v2113_v27 = vadd.f32 1.0, %v2089_v25 }
 0x3a8   :  { %9034 = vmatpush1.bf16.msra.mxu1 %v9033_v5  ;;  %v2416_v37 = vmul.f32 %v2392_v8, %v12782_v30  ;;  %v2560_v17 = vmax.f32 %v12646_v31, 0.0  ;;  %v2159_v35 = vmul.f32 %v9666_v26, %v2111_v46  ;;  %v2447_v14 = vmul.f32 %v12840_v56, %v12840_v56  ;;  %v9668_v16 = vpop.eup %9667 }
 0x3a9   :  { %9040 = vmatprep.subr.bf16.mxu0 %v9039_v7  ;;  %v2302_v39 = vadd.f32 0.7107069, %v2278_v28  ;;  %v2250_v61 = vadd.f32 -0.72657603, %v2226_v41  ;;  %v2466_v51 = vmul.f32 -0.5, %v2442_v54  ;;  %9671 = vrcp.f32 %v2113_v27 }
 0x3aa   :  { %9042 = vmatpush1.bf16.msra.mxu0 %v9041_v40  ;;  %v2345_v49 = vadd.f32 -0.14224836, %v2321_v48  ;;  %9673 = vpow2.f32 %v2514_v13  ;;  %v2183_v29 = vsub.f32 2.0, %v2159_v35  ;;  %v2155_v45 = vmul.f32 %v9668_v16, %v12876_v19 }
 0x3ab   :  { %v2504_v62 = vmul.f32 1.442695, %v2465_v3  ;;  %v2326_v30 = vmul.f32 %v2302_v39, %v12896_v43  ;;  %v2566_v46 = vmax.f32 %v12801_v11, 0.0  ;;  %v2274_v55 = vmul.f32 %v2250_v61, %v12913_v63  ;;  %v9670_v9 = vpop.eup %9669 }
 0x3ac   :  { %v2536_v18 = vmul.f32 %v12868_v21, %v2416_v37  ;;  %v12932_v5 = vmul.f32 %v9666_v26, %v2183_v29  ;;  %v2471_v33 = vmul.f32 -0.5, %v2447_v14  ;;  %v2179_v4 = vsub.f32 2.0, %v2155_v45 }
 0x3ad   :  { %v2350_v2 = vadd.f32 -0.14224836, %v2326_v30  ;;  %v2298_v12 = vadd.f32 0.7107069, %v2274_v55  ;;  %v2506_v8 = vmul.f32 1.442695, %v2466_v51  ;;  %v2160_v34 = vmul.f32 %v9670_v9, %v2112_v52 }
 0x3ae   :  { %v2369_v19 = vmul.f32 %v2345_v49, %v12826_v47  ;;  %v2231_v53 = vmul.f32 0.5307027, %v12932_v5  ;;  %v12936_v38 = vmul.f32 %v9668_v16, %v2179_v4  ;;  %v2448_v6 = vmul.f32 %v12860_v0, %v12860_v0 }
 0x3af   :  { %v2374_v44 = vmul.f32 %v2350_v2, %v12896_v43  ;;  %v2322_v21 = vmul.f32 %v2298_v12, %v12913_v63  ;;  %v2443_v54 = vmul.f32 %v12844_v57, %v12844_v57  ;;  %v2184_v25 = vsub.f32 2.0, %v2160_v34 }
 0x3b0   :  { %9675 = vpow2.f32 %v2504_v62  ;;  %v2255_v48 = vadd.f32 -0.72657603, %v2231_v53  ;;  %v2516_v52 = vmul.f32 1.442695, %v2471_v33  ;;  %v2227_v13 = vmul.f32 0.5307027, %v12936_v38 }
 0x3b1   :  { %v17072_v7 = vand.u32 2147483647, %v12646_v31  ;;  %v2398_v26 = vadd.f32 0.1274148, %v2374_v44  ;;  %v2346_v3 = vadd.f32 -0.14224836, %v2322_v21  ;;  %v12947_v28 = vmul.f32 %v9670_v9, %v2184_v25 }
 0x3b2   :  { %9677 = vpow2.f32 %v2506_v8  ;;  %v2279_v41 = vmul.f32 %v2255_v48, %v12932_v5  ;;  %v2251_v37 = vadd.f32 -0.72657603, %v2227_v13  ;;  %v2472_v35 = vmul.f32 -0.5, %v2448_v6 }
 0x3b3   :  { %v2584_v40 = vmul.f32 %v2536_v18, %v17072_v7  ;;  %v9672_v14 = vpop.eup %9671  ;;  %v2393_v16 = vadd.f32 0.1274148, %v2369_v19  ;;  %v2422_v39 = vmul.f32 %v2398_v26, %v12896_v43  ;;  %v2467_v61 = vmul.f32 -0.5, %v2443_v54 }
 0x3b4   :  { %v2232_v51 = vmul.f32 0.5307027, %v12947_v28  ;;  %v9674_v49 = vpop.eup %9673  ;;  %v2303_v29 = vadd.f32 0.7107069, %v2279_v41  ;;  %9679 = vpow2.f32 %v2516_v52  ;;  %v2275_v45 = vmul.f32 %v2251_v37, %v12936_v38 }
 0x3b5   :  { %v2161_v62 = vmul.f32 %v9672_v14, %v2113_v27  ;;  %v2542_v30 = vmul.f32 %v9674_v49, %v2422_v39  ;;  %v2370_v55 = vmul.f32 %v2346_v3, %v12913_v63  ;;  %v2449_v18 = vmul.f32 %v12900_v20, %v12900_v20 }
 0x3b6   :  { %v2256_v9 = vadd.f32 -0.72657603, %v2232_v51  ;;  %v2327_v33 = vmul.f32 %v2303_v29, %v12932_v5  ;;  %v2299_v4 = vadd.f32 0.7107069, %v2275_v45  ;;  %v2518_v43 = vmul.f32 1.442695, %v2472_v35 }
 0x3b7   :  { %v2185_v2 = vsub.f32 2.0, %v2161_v62  ;;  %v12959_v12 = vsub.f32 %v2560_v17, %v2584_v40  ;;  %v2417_v8 = vmul.f32 %v2393_v16, %v12826_v47  ;;  %v17073_v27 = vand.u32 2147483647, %v12801_v11  ;;  %v17075_v62 = vld [vmem:[#allocation38_spill] sm:$0xff] }
 0x3b8   :  { %v2280_v19 = vmul.f32 %v2256_v9, %v12947_v28  ;;  %v2351_v53 = vadd.f32 -0.14224836, %v2327_v33  ;;  %v2323_v6 = vmul.f32 %v2299_v4, %v12936_v38  ;;  %v2508_v44 = vmul.f32 1.442695, %v2467_v61  ;;  %v10074_v9 = vld [vmem:[%s16502_s0] sm:$0xff] }
 0x3b9   :  { %v2590_v34 = vmul.f32 %v2542_v30, %v17073_v27  ;;  %v12966_v21 = vmul.f32 %v9672_v14, %v2185_v2  ;;  %v2394_v25 = vadd.f32 0.1274148, %v2370_v55  ;;  %v2473_v31 = vmul.f32 -0.5, %v2449_v18  ;;  %v17077_v18 = vld [vmem:[#allocation43_spill] sm:$0xff] }
 0x3ba   :  { %v2304_v48 = vadd.f32 0.7107069, %v2280_v19  ;;  %v9676_v17 = vpop.eup %9675  ;;  %v2375_v52 = vmul.f32 %v2351_v53, %v12932_v5  ;;  %v2347_v47 = vadd.f32 -0.14224836, %v2323_v6  ;;  %9681 = vpow2.f32 %v2518_v43 }
 0x3bb   :  { %v12968_v54 = vsub.f32 %v2566_v46, %v2590_v34  ;;  %v2233_v11 = vmul.f32 0.5307027, %v12966_v21  ;;  %v3369_v40 = vadd.f32 -0.14224836, %v12718_v23  ;;  %v3387_v46 = vmul.f32 %v12720_v32, %v12560_v58 }
 0x3bc   :  { %v2328_v13 = vmul.f32 %v2304_v48, %v12947_v28  ;;  %v9678_v26 = vpop.eup %9677  ;;  %v2537_v3 = vmul.f32 %v9676_v17, %v2417_v8  ;;  %v2399_v41 = vadd.f32 0.1274148, %v2375_v52  ;;  %v2371_v37 = vmul.f32 %v2347_v47, %v12936_v38 }
 0x3bd   :  { %v9037_v7 = vpack.c.bf16 %v12968_v54, %v12959_v12  ;;  %v2257_v35 = vadd.f32 -0.72657603, %v2233_v11  ;;  %v2418_v14 = vmul.f32 %v2394_v25, %v12913_v63  ;;  %9683 = vpow2.f32 %v2508_v44  ;;  %v17076_v63 = vld [vmem:[#allocation15_spill] sm:$0xff]  ;;  %v17079_v44 = vld [vmem:[#allocation16_spill] sm:$0xff] }
 0x3be   :  { %v2352_v16 = vadd.f32 -0.14224836, %v2328_v13  ;;  %v2520_v39 = vmul.f32 1.442695, %v2473_v31  ;;  %v9680_v61 = vpop.eup %9679  ;;  %v2423_v51 = vmul.f32 %v2399_v41, %v12932_v5  ;;  %v17074_v23 = vand.u32 2147483647, %v17035_v1 }
 0x3bf   :  { %v2281_v49 = vmul.f32 %v2257_v35, %v12966_v21  ;;  %v3418_v29 = vadd.f32 0.1274148, %v12701_v15  ;;  %v3436_v30 = vmul.f32 %v17075_v62, %v12480_v59  ;;  %v3393_v55 = vmul.f32 %v3369_v40, %v17076_v63  ;;  %v17080_v31 = vld [vmem:[#allocation5_spill] sm:$0xff] }
 0x3c0   :  { %v3597_v32 = vmul.f32 %v12682_v42, %v17074_v23  ;;  %v2376_v45 = vmul.f32 %v2352_v16, %v12947_v28  ;;  %v9291_v5 = vtrunc.f32 %v10074_v9  ;;  %v17078_v33 = vand.u32 2147483647, %v17077_v18 }
 0x3c1   :  { %v2543_v43 = vmul.f32 %v9680_v61, %v2423_v51  ;;  %v2395_v2 = vadd.f32 0.1274148, %v2371_v37  ;;  %v2305_v42 = vadd.f32 0.7107069, %v2281_v49  ;;  %v2538_v8 = vmul.f32 %v9678_v26, %v2418_v14  ;;  %v17082_v49 = vld [vmem:[#allocation13_spill] sm:$0xff] }
 0x3c2   :  { %v2585_v4 = vmul.f32 %v2537_v3, %v17078_v33  ;;  %v2400_v15 = vadd.f32 0.1274148, %v2376_v45  ;;  %9685 = vpow2.f32 %v2520_v39  ;;  %v3411_v27 = vadd.f32 0.1274148, %v3387_v46  ;;  %v17086_v33 = vld [vmem:[#allocation44_spill] sm:$0xff] }
 0x3c3   :  { %v2561_v34 = vmax.f32 %v17077_v18, 0.0  ;;  %v2567_v59 = vmax.f32 %v12840_v56, 0.0  ;;  %v2591_v19 = vmul.f32 %v2543_v43, %v2063_v36  ;;  %v2329_v53 = vmul.f32 %v2305_v42, %v12966_v21  ;;  %v17085_v18 = vld [vmem:[#allocation46_spill] sm:$0xff] }
 0x3c4   :  { %v2424_v6 = vmul.f32 %v2400_v15, %v12947_v28  ;;  %v3442_v25 = vmul.f32 %v3418_v29, %v17079_v44  ;;  %v13002_v48 = vcvt.f32.s32 %v9291_v5  ;;  %v13005_v17 = vsub.s32 5, %v17080_v31  ;;  %v9682_v52 = vpop.eup %9681  ;;  %v10075_v28 = vld [vmem:[%s16502_s0 + $0x8] sm:$0xff]  ;;  %v17093_v44 = vld [vmem:[#allocation48_spill] sm:$0xff] }
 0x3c5   :  { %v2419_v47 = vmul.f32 %v2395_v2, %v12936_v38  ;;  %v2353_v11 = vadd.f32 -0.14224836, %v2329_v53  ;;  %v2609_v13 = vsub.f32 %v2561_v34, %v2585_v4  ;;  %v2615_v40 = vsub.f32 %v2567_v59, %v2591_v19 }
 0x3c6   :  { %v2586_v56 = vmul.f32 %v2538_v8, %v2058_v10  ;;  %v2544_v36 = vmul.f32 %v9682_v52, %v2424_v6  ;;  %v3417_v46 = vadd.f32 0.1274148, %v3393_v55  ;;  %v9293_v26 = vtrunc.f32 %v10075_v28 }
 0x3c7   :  { %v2562_v3 = vmax.f32 %v12820_v24, 0.0  ;;  %v2377_v41 = vmul.f32 %v2353_v11, %v12966_v21  ;;  %v9035_v37 = vpack.c.bf16 %v2615_v40, %v2609_v13  ;;  %v3435_v38 = vmul.f32 %v3411_v27, %v12560_v58  ;;  %v9684_v35 = vpop.eup %9683  ;;  %v17081_v24 = vld [vmem:[#allocation29_spill] sm:$0xff]  ;;  %v17091_v27 = vld [vmem:[#allocation32_spill] sm:$0xff] }
 0x3c8   :  { %v2568_v14 = vmax.f32 %v12860_v0, 0.0  ;;  %v2592_v10 = vmul.f32 %v2544_v36, %v2064_v50  ;;  %v13020_v16 = vsub.s32 1, %v17080_v31  ;;  %v3946_v39 = vrot.slane %v13002_v48, %v13005_v17  ;;  %v17084_v58 = vld [vmem:[#allocation49_spill] sm:$0xff]  ;;  %v17099_v36 = vld [vmem:[#allocation51_spill] sm:$0xff] }
 0x3c9   :  { %v2539_v61 = vmul.f32 %v9684_v35, %v2419_v47  ;;  %v2401_v51 = vadd.f32 0.1274148, %v2377_v41  ;;  %9036 = vmatprep.subr.bf16.mxu1 %v9035_v37  ;;  %v17083_v23 = vmax.f32 %v17082_v49, 0.0  ;;  %v3556_v45 = vmul.f32 %v17084_v58, %v3436_v30  ;;  %v17097_v47 = vld [vmem:[#allocation39_spill] sm:$0xff]  ;;  %v17101_v41 = vld [vmem:[#allocation25_spill] sm:$0xff] }
 0x3ca   :  { %v13030_v62 = vsub.f32 %v2562_v3, %v2586_v56  ;;  %v13032_v0 = vsub.f32 %v2568_v14, %v2592_v10  ;;  %9038 = vmatpush1.bf16.msra.mxu1 %v9037_v7  ;;  %v3441_v50 = vmul.f32 %v3417_v46, %v17076_v63  ;;  %v13038_v55 = vcvt.f32.s32 %v9293_v26  ;;  %v17089_v7 = vld [vmem:[#allocation40_spill] sm:$0xff]  ;;  %v17103_v35 = vld [vmem:[#allocation31_spill] sm:$0xff] }
 0x3cb   :  { %v13027_v29 = vsub.f32 %v17083_v23, %v17081_v24  ;;  %v2425_v5 = vmul.f32 %v2401_v51, %v12966_v21  ;;  %v17087_v4 = vpack.c.bf16 %v17085_v18, %v17086_v33  ;;  %v17088_v30 = vmax.f32 %v17035_v1, 0.0  ;;  %v17090_v21 = vld [vmem:[#allocation45_spill] sm:$0xff]  ;;  %v17098_v56 = vld [vmem:[#allocation52_spill] sm:$0xff] }
 0x3cc   :  { %v13048_v2 = vadd.f32 -1.0, %v10074_v9  ;;  %v13051_v42 = vsub.s32 7, %v17080_v31  ;;  %v9686_v12 = vpop.eup %9685  ;;  %v9045_v54 = vpack.c.bf16 %v13032_v0, %v13030_v62  ;;  %v3562_v63 = vmul.f32 %v17089_v7, %v3442_v25  ;;  %v10076_v9 = vld [vmem:[%s16503_s1 + $0x40] sm:$0xff]  ;;  %v17094_v25 = vld [vmem:[#allocation47_spill] sm:$0xff] }
 0x3cd   :  { %9048 = vmatprep.subr.bf16.mxu1 %v17087_v4  ;;  %v13046_v43 = vsub.f32 %v17088_v30, %v3597_v32  ;;  %v3555_v8 = vmul.f32 %v17090_v21, %v3435_v38  ;;  %v13058_v15 = vrot.slane %v3946_v39, %v13020_v16  ;;  %v2587_v1 = vmul.f32 %v2539_v61, %v2059_v60  ;;  %v13103_v61 = vld [vmem:[%s16503_s1 + $0x48] sm:$0xff]  ;;  %v17112_v4 = vld [vmem:[#allocation23_spill] sm:$0xff] }
 0x3ce   :  { %v2545_v32 = vmul.f32 %v9686_v12, %v2425_v5  ;;  %8844 = vmatmul.mubr.msk.f32.vlgmr.msra.gmra.mrb[28].mxu1 %vm887_vm0, %v10076_v9  ;;  %v17092_v34 = vand.u32 2147483647, %v17091_v27  ;;  %v13069_v19 = vadd.s32 8, %v17080_v31  ;;  %v2563_v53 = vmax.f32 %v12844_v57, 0.0  ;;  %v17106_v24 = vld [vmem:[#allocation33_spill] sm:$0xff] }
 0x3cf   :  { %v2569_v6 = vmax.f32 %v12900_v20, 0.0  ;;  %v17095_v60 = vpack.c.bf16 %v17093_v44, %v17094_v25  ;;  %v17096_v52 = vmov 0.0   ;;  %v3561_v11 = vmul.f32 %v17097_v47, %v3441_v50  ;;  %v17111_v33 = vld [vmem:[#allocation21_spill] sm:$0xff]  ;;  %v17116_v47 = vld [vmem:[#allocation50_spill] sm:$0xff] }
 0x3d0   :  { %v3604_v59 = vmul.f32 %v3556_v45, %v17092_v34  ;;  %2809 = vmatprep.mubr.f32.mxu1 %v17096_v52  ;;  %v3954_v13 = vrot.slane %v13038_v55, %v13005_v17  ;;  %v2593_v40 = vmul.f32 %v2545_v32, %v2065_v22  ;;  %v17100_v46 = vpack.c.bf16 %v17098_v56, %v17099_v36  ;;  %v17109_v45 = vld [vmem:[#allocation22_spill] sm:$0xff]  ;;  %v13190_v36 = vld [vmem:[%s16503_s1 + $0x58] sm:$0xff] }
 0x3d1   :  { %9050 = vmatpush1.bf16.msra.mxu1 %v17095_v60  ;;  %v13086_v57 = vsub.s32 3, %v17080_v31  ;;  %v4072_v26 = vrot.slane %v13048_v2, %v13051_v42  ;;  %v3942_v3 = vrot.slane %v13002_v48, %v13020_v16  ;;  %v17102_v37 = vand.u32 2147483647, %v17101_v41  ;;  %v10078_v48 = vld [vmem:[%s16502_s0 + $0x10] sm:$0xff] }
 0x3d2   :  { %9052 = vmatprep.subr.bf16.mxu1 %v17100_v46  ;;  %v17104_v14 = vand.u32 2147483647, %v17103_v35  ;;  %vm3988_vm1 = vcmp.eq.s32.totalorder %v17080_v31, %v13058_v15  ;;  %v13098_v22 = vadd.f32 -1.0, %v10075_v28  ;;  %v2611_v10 = vsub.f32 %v2563_v53, %v2587_v1  ;;  %8845 = vmatmul.mubr.msk.f32.gmra.mrb[30].mxu1 %vm887_vm0, %v13103_v61  ;;  %v17105_v28 = vld [vmem:[#allocation19_spill] sm:$0xff] }
 0x3d3   :  { %v3610_v38 = vmul.f32 %v3562_v63, %v17102_v37  ;;  %v2617_v39 = vsub.f32 %v2569_v6, %v2593_v40  ;;  %vm3994_vm2 = vcmp.eq.s32.totalorder %v13069_v19, %v13058_v15  ;;  %v9295_v51 = vtrunc.f32 %v10078_v48  ;;  %2815 = vmatprep.mubr.f32.mxu1 %v17096_v52 }
 0x3d4   :  { %v3603_v20 = vmul.f32 %v3555_v8, %v17104_v14  ;;  %v17107_v49 = vpack.c.bf16 %v17105_v28, %v17106_v24  ;;  %v17108_v23 = vmax.f32 %v17091_v27, 0.0  ;;  %v3585_v62 = vmax.f32 %v17109_v45, 0.0  ;;  %v13149_v27 = vld [vmem:[%s16503_s1 + $0x50] sm:$0xff] }
 0x3d5   :  { %v17110_v0 = vand.u32 2147483647, %v17109_v45  ;;  %v13124_v5 = vrot.slane %v3954_v13, %v13020_v16  ;;  %v9043_v18 = vpack.c.bf16 %v2617_v39, %v2611_v10  ;;  %v17113_v30 = vpack.c.bf16 %v17111_v33, %v17112_v4  ;;  %v17122_v10 = vld [vmem:[#allocation27_spill] sm:$0xff]  ;;  %v17123_v39 = vld [vmem:[#allocation36_spill] sm:$0xff] }
 0x3d6   :  { %9054 = vmatpush1.bf16.msra.mxu1 %v17107_v49  ;;  %v13118_v58 = vsub.f32 %v17108_v23, %v3604_v59  ;;  %v8865_v12 = vsel %vm3988_vm1, 1.0, %v17096_v52  ;;  %v4102_v7 = vrot.slane %v4072_v26, %v13086_v57  ;;  %v13135_v63 = vrot.slane %v3942_v3, %v13020_v16 }
 0x3d7   :  { %v3609_v50 = vmul.f32 %v3561_v11, %v17110_v0  ;;  %9064 = vmatprep.subr.bf16.mxu1 %v17113_v30  ;;  %v8871_v21 = vsel %vm3994_vm2, 1.0, %v17096_v52  ;;  %v13139_v8 = vadd.s32 16, %v17080_v31  ;;  %v13142_v1 = vadd.s32 24, %v17080_v31  ;;  %9044 = vmatprep.subr.bf16.mxu0 %v9043_v18  ;;  %v17117_v11 = vld [vmem:[#allocation53_spill] sm:$0xff]  ;;  %v17125_v0 = vld [vmem:[#allocation14_spill] sm:$0xff] }
 0x3d8   :  { %v4080_v32 = vrot.slane %v13098_v22, %v13051_v42  ;;  %8846 = vmatmul.mubr.msk.f32.gmra.mrb[32].mxu1 %vm887_vm0, %v13149_v27  ;;  %v17114_v34 = vmax.f32 %v17101_v41, 0.0  ;;  %v17115_v53 = vmax.f32 %v17103_v35, 0.0  ;;  %v4068_v44 = vrot.slane %v13048_v2, %v13086_v57  ;;  %9046 = vmatpush1.bf16.msra.mxu0 %v9045_v54  ;;  %v17119_v41 = vld [vmem:[#allocation41_spill] sm:$0xff] }
 0x3d9   :  { %v13161_v25 = vcvt.f32.s32 %v9295_v51  ;;  %2821 = vmatprep.mubr.f32.mxu1 %v17096_v52  ;;  %v13164_v60 = vsub.f32 %v3585_v62, %v3609_v50  ;;  %vm3990_vm3 = vcmp.eq.s32.totalorder %v17080_v31, %v13124_v5  ;;  %vm3996_vm4 = vcmp.eq.s32.totalorder %v13069_v19, %v13124_v5  ;;  %v17126_v50 = vld [vmem:[#allocation28_spill] sm:$0xff] }
 0x3da   :  { %v3634_v59 = vsub.f32 %v17114_v34, %v3610_v38  ;;  %v13157_v6 = vsub.f32 %v17115_v53, %v3603_v20  ;;  %v17118_v13 = vpack.c.bf16 %v17116_v47, %v17117_v11  ;;  %v4120_v40 = vmul.f32 %v8865_v12, %v4102_v7  ;;  %v13208_v38 = vld [vmem:[%s16503_s1 + $0x60] sm:$0xff] }
 0x3db   :  { %v4126_v56 = vmul.f32 %v8871_v21, %v4102_v7  ;;  %vm3987_vm5 = vcmp.eq.s32.totalorder %v17080_v31, %v13135_v63  ;;  %vm3993_vm6 = vcmp.eq.s32.totalorder %v13069_v19, %v13135_v63  ;;  %vm4000_vm7 = vcmp.eq.s32.totalorder %v13139_v8, %v13058_v15  ;;  %8848 = vmatmul.mubr.msk.f32.vlgmr.msra.gmra.mrb[28].mxu0 %vm887_vm0, %v10076_v9  ;;  %v17120_v9 = vld [vmem:[#allocation54_spill] sm:$0xff] }
 0x3dc   :  { %9056 = vmatprep.subr.bf16.mxu0 %v17118_v13  ;;  %vm4006_vm8 = vcmp.eq.s32.totalorder %v13142_v1, %v13058_v15  ;;  %v13182_v2 = vrot.slane %v4080_v32, %v13086_v57  ;;  %v3950_v54 = vrot.slane %v13038_v55, %v13020_v16  ;;  %8847 = vmatmul.mubr.msk.f32.gmra.mrb[34].mxu1 %vm887_vm0, %v13190_v36  ;;  %v8867_v26 = vsel %vm3990_vm3, 1.0, %v17096_v52 }
 0x3dd   :  { %v13195_v46 = vrot.slane %v4068_v44, %v13086_v57  ;;  %v8873_v3 = vsel %vm3996_vm4, 1.0, %v17096_v52  ;;  %v3962_v55 = vrot.slane %v13161_v25, %v13005_v17  ;;  %v17121_v37 = vpack.c.bf16 %v17119_v41, %v17120_v9  ;;  %2898 = vmatprep.mubr.f32.mxu0 %v17096_v52  ;;  %3731 = vmatprep.mubr.f32.mxu1 %v17096_v52 }
 0x3de   :  { %v9065_v35 = vpack.c.bf16 %v13046_v43, %v13027_v29  ;;  %v9067_v14 = vpack.c.bf16 %v3634_v59, %v13118_v58  ;;  %v8864_v17 = vsel %vm3987_vm5, 1.0, %v17096_v52  ;;  %v8870_v20 = vsel %vm3993_vm6, 1.0, %v17096_v52 }
 0x3df   :  { %9058 = vmatpush1.bf16.msra.mxu0 %v17121_v37  ;;  %v17124_v51 = vpack.c.bf16 %v17122_v10, %v17123_v39  ;;  %v9069_v29 = vpack.c.bf16 %v13164_v60, %v13157_v6  ;;  %v8877_v43 = vsel %vm4000_vm7, 1.0, %v17096_v52  ;;  %v8883_v28 = vsel %vm4006_vm8, 1.0, %v17096_v52 }
 0x3e0   :  { %v13235_v24 = vadd.f32 -1.0, %v10078_v48  ;;  %v9071_v49 = vpack.c.bf16 %v4126_v56, %v4120_v40  ;;  %v4122_v23 = vmul.f32 %v8867_v26, %v13182_v2  ;;  %v4128_v58 = vmul.f32 %v8873_v3, %v13182_v2  ;;  %8849 = vmatmul.mubr.msk.f32.gmra.mrb[30].mxu0 %vm887_vm0, %v13103_v61  ;;  %8852 = vmatmul.mubr.msk.f32.vlgmr.msra.gmra.mrb[36].mxu1 %vm887_vm0, %v13208_v38  ;;  %v13262_v61 = vld [vmem:[%s16503_s1 + $0x68] sm:$0xff] }
 0x3e1   :  { %9060 = vmatprep.subr.bf16.mxu0 %v17124_v51  ;;  %v13240_v45 = vrot.slane %v3950_v54, %v13020_v16  ;;  %v13247_v62 = vmul.f32 %v8864_v17, %v13195_v46  ;;  %v13250_v15 = vmul.f32 %v8870_v20, %v13195_v46  ;;  %v13253_v48 = vrot.slane %v3962_v55, %v13020_v16 }
 0x3e2   :  { %v17127_v18 = vpack.c.bf16 %v17125_v0, %v17126_v50  ;;  %2904 = vmatprep.mubr.f32.mxu0 %v17096_v52  ;;  %v4132_v33 = vmul.f32 %v8877_v43, %v4102_v7  ;;  %v4138_v4 = vmul.f32 %v8883_v28, %v4102_v7  ;;  %v4076_v30 = vrot.slane %v13098_v22, %v13086_v57  ;;  %v8738_v0 = vld [vmem:[%s16503_s1 + $0x98] sm:$0xff]  ;;  %v13429_v50 = vpop.permute.xlu1 %4150 }
 0x3e3   :  { %9066 = vmatpush1.bf16.msra.mxu1 %v9065_v35  ;;  %3737 = vmatprep.mubr.f32.mxu1 %v17096_v52  ;;  %vm3999_vm9 = vcmp.eq.s32.totalorder %v13139_v8, %v13135_v63  ;;  %vm4005_vm10 = vcmp.eq.s32.totalorder %v13142_v1, %v13135_v63  ;;  %v4088_v12 = vrot.slane %v13235_v24, %v13051_v42  ;;  %v13292_v42 = vld [vmem:[%s16503_s1 + $0x70] sm:$0xff] }
 0x3e4   :  { %9062 = vmatpush1.bf16.msra.mxu0 %v17127_v18  ;;  %9068 = vmatprep.subr.bf16.mxu1 %v9067_v14  ;;  %v9079_v21 = vpack.c.bf16 %v4128_v58, %v4122_v23  ;;  %vm3989_vm11 = vcmp.eq.s32.totalorder %v17080_v31, %v13240_v45  ;;  %vm3995_vm12 = vcmp.eq.s32.totalorder %v13069_v19, %v13240_v45  ;;  %v8876_v7 = vsel %vm3999_vm9, 1.0, %v17096_v52  ;;  %v13431_v18 = vpop.permute.xlu0 %4145 }
 0x3e5   :  { %9072 = vmatprep.subr.bf16.mxu0 %v9071_v49  ;;  %8850 = vmatmul.mubr.msk.f32.gmra.mrb[32].mxu0 %vm887_vm0, %v13149_v27  ;;  %vm4002_vm13 = vcmp.eq.s32.totalorder %v13139_v8, %v13124_v5  ;;  %vm4008_vm14 = vcmp.eq.s32.totalorder %v13142_v1, %v13124_v5  ;;  %vm3992_vm15 = vcmp.eq.s32.totalorder %v17080_v31, %v13253_v48  ;;  %v8882_v27 = vsel %vm4005_vm10, 1.0, %v17096_v52  ;;  %v13346_v5 = vld [vmem:[%s16503_s1 + $0x78] sm:$0xff] }
 0x3e6   :  { %8853 = vmatmul.mubr.msk.f32.gmra.mrb[38].mxu1 %vm887_vm0, %v13262_v61  ;;  %2910 = vmatprep.mubr.f32.mxu0 %v17096_v52  ;;  %v9073_v22 = vpack.c.bf16 %v13250_v15, %v13247_v62  ;;  %v4106_v32 = vrot.slane %v4076_v30, %v13086_v57  ;;  %vm3998_vm1 = vcmp.eq.s32.totalorder %v13069_v19, %v13253_v48  ;;  %v8866_v34 = vsel %vm3989_vm11, 1.0, %v17096_v52  ;;  %v8736_v62 = vld [vmem:[%s16503_s1 + $0x88] sm:$0xff] }
 0x3e7   :  { %3743 = vmatprep.mubr.f32.mxu1 %v17096_v52  ;;  %9070 = vmatpush1.bf16.msra.mxu1 %v9069_v29  ;;  %v13312_v59 = vrot.slane %v4088_v12, %v13086_v57  ;;  %v3958_v53 = vrot.slane %v13161_v25, %v13020_v16  ;;  %v8872_v6 = vsel %vm3995_vm12, 1.0, %v17096_v52  ;;  %v8879_v63 = vsel %vm4002_vm13, 1.0, %v17096_v52 }
 0x3e8   :  { %9080 = vmatprep.subr.bf16.mxu1 %v9079_v21  ;;  %v8885_v44 = vsel %vm4008_vm14, 1.0, %v17096_v52  ;;  %v8869_v25 = vsel %vm3992_vm15, 1.0, %v17096_v52  ;;  %v9075_v60 = vpack.c.bf16 %v4138_v4, %v4132_v33  ;;  %v8875_v47 = vsel %vm3998_vm1, 1.0, %v17096_v52  ;;  %v13441_v33 = vpop.permute.xlu0 %4155 }
 0x3e9   :  { %8851 = vmatmul.mubr.msk.f32.gmra.mrb[34].mxu0 %vm887_vm0, %v13190_v36  ;;  %vm4001_vm2 = vcmp.eq.s32.totalorder %v13139_v8, %v13240_v45  ;;  %vm4007_vm3 = vcmp.eq.s32.totalorder %v13142_v1, %v13240_v45  ;;  %v4131_v11 = vmul.f32 %v8876_v7, %v13195_v46  ;;  %v4137_v13 = vmul.f32 %v8882_v27, %v13195_v46 }
 0x3ea   :  { %8854 = vmatmul.mubr.msk.f32.gmra.mrb[40].mxu1 %vm887_vm0, %v13292_v42  ;;  %3820 = vmatprep.mubr.f32.mxu0 %v17096_v52  ;;  %v4121_v40 = vmul.f32 %v8866_v34, %v4106_v32  ;;  %v4127_v56 = vmul.f32 %v8872_v6, %v4106_v32  ;;  %v4134_v54 = vmul.f32 %v8879_v63, %v13182_v2  ;;  %v8878_v55 = vsel %vm4001_vm2, 1.0, %v17096_v52 }
 0x3eb   :  { %3749 = vmatprep.mubr.f32.mxu1 %v17096_v52  ;;  %v4140_v36 = vmul.f32 %v8885_v44, %v13182_v2  ;;  %v4124_v26 = vmul.f32 %v8869_v25, %v13312_v59  ;;  %v4130_v3 = vmul.f32 %v8875_v47, %v13312_v59  ;;  %v8884_v41 = vsel %vm4007_vm3, 1.0, %v17096_v52 }
 0x3ec   :  { %v3982_v9 = vrot.slane %v3958_v53, %v13020_v16  ;;  %v9077_v2 = vpack.c.bf16 %v4137_v13, %v4131_v11  ;;  %v4084_v46 = vrot.slane %v13235_v24, %v13086_v57  ;;  %v9081_v37 = vpack.c.bf16 %v4127_v56, %v4121_v40  ;;  %v8735_v24 = vld [vmem:[%s16503_s1 + $0x80] sm:$0xff]  ;;  %v13447_v30 = vpop.permute.xlu0 %3637 }
 0x3ed   :  { %8856 = vmatmul.mubr.msk.f32.vlgmr.msra.gmra.mrb[36].mxu0 %vm887_vm0, %v13208_v38  ;;  %v4133_v35 = vmul.f32 %v8878_v55, %v4106_v32  ;;  %v4139_v14 = vmul.f32 %v8884_v41, %v4106_v32  ;;  %v9083_v16 = vpack.c.bf16 %v4140_v36, %v4134_v54  ;;  %v9087_v17 = vpack.c.bf16 %v4130_v3, %v4124_v26 }
 0x3ee   :  { %8855 = vmatmul.mubr.msk.f32.gmra.mrb[42].mxu1 %vm887_vm0, %v13346_v5  ;;  %3826 = vmatprep.mubr.f32.mxu0 %v17096_v52  ;;  %vm3991_vm4 = vcmp.eq.s32.totalorder %v17080_v31, %v3982_v9  ;;  %vm3997_vm5 = vcmp.eq.s32.totalorder %v13069_v19, %v3982_v9  ;;  %vm4004_vm6 = vcmp.eq.s32.totalorder %v13139_v8, %v13253_v48 }
 0x3ef   :  { %9074 = vmatpush1.bf16.msra.mxu0 %v9073_v22  ;;  %3909 = vmatprep.mubr.f32.mxu1 %v17096_v52  ;;  %vm4010_vm7 = vcmp.eq.s32.totalorder %v13142_v1, %v13253_v48  ;;  %v4114_v20 = vrot.slane %v4084_v46, %v13086_v57  ;;  %v9085_v19 = vpack.c.bf16 %v4139_v14, %v4133_v35  ;;  %v8868_v10 = vsel %vm3991_vm4, 1.0, %v17096_v52  ;;  %v8737_v48 = vld [vmem:[%s16503_s1 + $0x90] sm:$0xff] }
 0x3f0   :  { %9076 = vmatprep.subr.bf16.mxu0 %v9075_v60  ;;  %v8874_v39 = vsel %vm3997_vm5, 1.0, %v17096_v52  ;;  %v8887_v51 = vsel %vm4010_vm7, 1.0, %v17096_v52  ;;  %vm4003_vm8 = vcmp.eq.s32.totalorder %v13139_v8, %v3982_v9  ;;  %vm4009_vm9 = vcmp.eq.s32.totalorder %v13142_v1, %v3982_v9  ;;  %v13453_v21 = vpop.permute.xlu0 %3647 }
 0x3f1   :  { %8857 = vmatmul.mubr.msk.f32.gmra.mrb[38].mxu0 %vm887_vm0, %v13262_v61  ;;  %v4123_v57 = vmul.f32 %v8868_v10, %v4114_v20  ;;  %v4129_v29 = vmul.f32 %v8874_v39, %v4114_v20  ;;  %v4142_v28 = vmul.f32 %v8887_v51, %v13312_v59  ;;  %v8880_v8 = vsel %vm4003_vm8, 1.0, %v17096_v52 }
 0x3f2   :  { %8860 = vmatmul.mubr.msk.f32.vlgmr.msra.gmra.mrb[44].mxu1 %vm887_vm0, %v13208_v38  ;;  %3832 = vmatprep.mubr.f32.mxu0 %v17096_v52  ;;  %v8881_v38 = vsel %vm4004_vm6, 1.0, %v17096_v52  ;;  %v8886_v1 = vsel %vm4009_vm9, 1.0, %v17096_v52  ;;  %v4135_v23 = vmul.f32 %v8880_v8, %v4114_v20 }
 0x3f3   :  { %9078 = vmatpush1.bf16.msra.mxu0 %v9077_v2  ;;  %3915 = vmatprep.mubr.f32.mxu1 %v17096_v52  ;;  %v4136_v43 = vmul.f32 %v8881_v38, %v13312_v59  ;;  %v9089_v49 = vpack.c.bf16 %v4129_v29, %v4123_v57  ;;  %v4141_v58 = vmul.f32 %v8886_v1, %v4114_v20 }
 0x3f4   :  { %9082 = vmatpush1.bf16.msra.mxu1 %v9081_v37  ;;  %9088 = vmatprep.subr.bf16.mxu0 %v9087_v17  ;;  %v2621_v32 = vpop.permute.xlu0 %2620 }
 0x3f5   :  { %9084 = vmatprep.subr.bf16.mxu1 %v9083_v16  ;;  %8858 = vmatmul.mubr.msk.f32.gmra.mrb[40].mxu0 %vm887_vm0, %v13292_v42  ;;  %v9091_v45 = vpack.c.bf16 %v4142_v28, %v4136_v43  ;;  %v9093_v15 = vpack.c.bf16 %v4141_v58, %v4135_v23 }
 0x3f6   :  { %8861 = vmatmul.mubr.msk.f32.gmra.mrb[46].mxu1 %vm887_vm0, %v13262_v61  ;;  %3838 = vmatprep.mubr.f32.mxu0 %v17096_v52  ;;  %v13438_v61 = vpop.permute.xlu1 %4160 }
 0x3f7   :  { %3921 = vmatprep.mubr.f32.mxu1 %v17096_v52 }
 0x3f8   :  { %9086 = vmatpush1.bf16.msra.mxu1 %v9085_v19  ;;  %v2631_v11 = vpop.permute.xlu0 %2630 }
 0x3f9   :  { %8859 = vmatmul.mubr.msk.f32.gmra.mrb[42].mxu0 %vm887_vm0, %v13346_v5 }
 0x3fa   :  { %8862 = vmatmul.mubr.msk.f32.gmra.mrb[48].mxu1 %vm887_vm0, %v13292_v42  ;;  %4239 = vmatprep.mubr.f32.mxu0 %v17096_v52  ;;  %v13445_v4 = vpop.permute.xlu1 %3642 }
 0x3fb   :  { %3927 = vmatprep.mubr.f32.mxu1 %v17096_v52 }
 0x3fd   :  { %8891 = vmatmul.mubr.msk.f32.vlgmr.msra.gmra.mrb[44].mxu0 %vm887_vm0, %v8735_v24 }
 0x3fe   :  { %8863 = vmatmul.mubr.msk.f32.gmra.mrb[50].mxu1 %vm887_vm0, %v13346_v5  ;;  %4245 = vmatprep.mubr.f32.mxu0 %v17096_v52  ;;  %v13451_v12 = vpop.permute.xlu1 %3652 }
 0x3ff   :  { %9090 = vmatpush1.bf16.msra.mxu0 %v9089_v49  ;;  %4328 = vmatprep.mubr.f32.mxu1 %v17096_v52 }
 0x400   :  { %9092 = vmatprep.subr.bf16.mxu0 %v9091_v45 }
 0x401   :  { %8892 = vmatmul.mubr.msk.f32.gmra.mrb[46].mxu0 %vm887_vm0, %v8736_v62 }
 0x402   :  { %8895 = vmatmul.mubr.msk.f32.vlgmr.msra.gmra.mrb[52].mxu1 %vm887_vm0, %v8735_v24  ;;  %4251 = vmatprep.mubr.f32.mxu0 %v17096_v52  ;;  %v2626_v7 = vpop.permute.xlu1 %2625 }
 0x403   :  { %9094 = vmatpush1.bf16.msra.mxu0 %v9093_v15  ;;  %4334 = vmatprep.mubr.f32.mxu1 %v17096_v52 }
 0x405   :  { %8893 = vmatmul.mubr.msk.f32.gmra.mrb[48].mxu0 %vm887_vm0, %v8737_v48 }
 0x406   :  { %8896 = vmatmul.mubr.msk.f32.gmra.mrb[54].mxu1 %vm887_vm0, %v8736_v62  ;;  %4257 = vmatprep.mubr.f32.mxu0 %v17096_v52  ;;  %v2636_v5 = vpop.permute.xlu1 %2635 }
 0x407   :  { %4340 = vmatprep.mubr.f32.mxu1 %v17096_v52 }
 0x409   :  { %8894 = vmatmul.mubr.msk.f32.gmra.mrb[50].mxu0 %vm887_vm0, %v8738_v0  ;;  %v2716_v42 = vpop.f32.mrb[20].mxu0 }
 0x40a   :  { %8897 = vmatmul.mubr.msk.f32.gmra.mrb[56].mxu1 %vm887_vm0, %v8737_v48  ;;  %4417 = vmatprep.mubr.f32.mxu0 %v17096_v52  ;;  %v2718_v22 = vpop.f32.mrb[21].mxu0  ;;  %v13455_v34 = vadd.f32 %v2716_v42, %v2621_v32 }
 0x40b   :  { %4346 = vmatprep.mubr.f32.mxu1 %v17096_v52  ;;  %v13459_v6 = vadd.f32 %v2718_v22, %v2621_v32 }
 0x40c   :  { %17128 = vst [vmem:[#allocation18_spill] sm:$0xff] %v13455_v34 }
 0x40d   :  { %8899 = vmatmul.mubr.msk.f32.vlgmr.msra.gmra.mrb[52].mxu0 %vm887_vm0, %v8735_v24  ;;  %v2722_v27 = vpop.f32.mrb[22].mxu0  ;;  %17130 = vst [vmem:[#allocation30_spill] sm:$0xff] %v13459_v6 }
 0x40e   :  { %8898 = vmatmul.mubr.msk.f32.gmra.mrb[58].mxu1 %vm887_vm0, %v8738_v0  ;;  %4423 = vmatprep.mubr.f32.mxu0 %v17096_v52  ;;  %v13457_v59 = vadd.f32 %v2722_v27, %v2626_v7  ;;  %v2724_v53 = vpop.f32.mrb[23].mxu0 }
 0x40f   :  { %5114 = vmatprep.mubr.f32.mxu1 %v17096_v52  ;;  %v13461_v63 = vadd.f32 %v2724_v53, %v2626_v7 }
 0x410   :  { %17129 = vst [vmem:[#allocation7_spill] sm:$0xff] %v13457_v59 }
 0x411   :  { %8900 = vmatmul.mubr.msk.f32.gmra.mrb[54].mxu0 %vm887_vm0, %v8736_v62  ;;  %17131 = vst [vmem:[#allocation11_spill] sm:$0xff] %v13461_v63  ;;  %v2728_v60 = vpop.f32.mrb[24].mxu0 }
 0x412   :  { %4429 = vmatprep.mubr.f32.mxu0 %v17096_v52  ;;  %v2730_v47 = vpop.f32.mrb[25].mxu0  ;;  %v13467_v40 = vadd.f32 %v2728_v60, %v2631_v11 }
 0x413   :  { %v13471_v36 = vadd.f32 %v2730_v47, %v2631_v11 }
 0x414   :  { %17132 = vst [vmem:[#allocation35_spill] sm:$0xff] %v13467_v40 }
 0x415   :  { %8901 = vmatmul.mubr.msk.f32.gmra.mrb[56].mxu0 %vm887_vm0, %v8737_v48  ;;  %v2734_v13 = vpop.f32.mrb[26].mxu0  ;;  %17134 = vst [vmem:[#allocation26_spill] sm:$0xff] %v13471_v36 }
 0x416   :  { %4435 = vmatprep.mubr.f32.mxu0 %v17096_v52  ;;  %v13469_v56 = vadd.f32 %v2734_v13, %v2636_v5  ;;  %v2736_v54 = vpop.f32.mrb[27].mxu0 }
 0x417   :  { %v13473_v26 = vadd.f32 %v2736_v54, %v2636_v5 }
 0x418   :  { %17133 = vst [vmem:[#allocation12_spill] sm:$0xff] %v13469_v56 }
 0x419   :  { %8902 = vmatmul.mubr.msk.f32.gmra.mrb[58].mxu0 %vm887_vm0, %v8738_v0  ;;  %17135 = vst [vmem:[#allocation20_spill] sm:$0xff] %v13473_v26 }
 0x41a   :  { %5203 = vmatprep.mubr.f32.mxu0 %v17096_v52 }
 0x4a1   :  { %v2805_v41 = vpop.f32.mrb[28].mxu1 }
 0x4a2   :  { %v2807_v9 = vpop.f32.mrb[29].mxu1  ;;  %v13479_v46 = vadd.f32 %v2805_v41, %v2621_v32 }
 0x4a3   :  { %v13483_v14 = vadd.f32 %v2807_v9, %v2621_v32 }
 0x4a4   :  { %17136 = vst [vmem:[#allocation8_spill] sm:$0xff] %v13479_v46 }
 0x4a5   :  { %v2811_v2 = vpop.f32.mrb[30].mxu1  ;;  %17138 = vst [vmem:[#allocation42_spill] sm:$0xff] %v13483_v14 }
 0x4a6   :  { %v13481_v37 = vadd.f32 %v2811_v2, %v2626_v7  ;;  %v2813_v35 = vpop.f32.mrb[31].mxu1 }
 0x4a7   :  { %v13485_v16 = vadd.f32 %v2813_v35, %v2626_v7 }
 0x4a8   :  { %17137 = vst [vmem:[#allocation17_spill] sm:$0xff] %v13481_v37 }
 0x4a9   :  { %17139 = vst [vmem:[#allocation9_spill] sm:$0xff] %v13485_v16 }
 0x4ab   :  { %v2817_v19 = vpop.f32.mrb[32].mxu1 }
 0x4ac   :  { %v2819_v10 = vpop.f32.mrb[33].mxu1  ;;  %v13491_v57 = vadd.f32 %v2817_v19, %v2631_v11 }
 0x4ad   :  { %v13495_v28 = vadd.f32 %v2819_v10, %v2631_v11 }
 0x4ae   :  { %v2894_v39 = vpop.f32.mrb[28].mxu0  ;;  %17140 = vst [vmem:[#allocation37_spill] sm:$0xff] %v13491_v57 }
 0x4af   :  { %v2823_v38 = vpop.f32.mrb[34].mxu1  ;;  %v2896_v51 = vpop.f32.mrb[29].mxu0  ;;  %17142 = vst [vmem:[#allocation34_spill] sm:$0xff] %v13495_v28  ;;  %v13503_v58 = vadd.f32 %v2894_v39, %v2621_v32 }
 0x4b0   :  { %v13493_v29 = vadd.f32 %v2823_v38, %v2636_v5  ;;  %v2825_v43 = vpop.f32.mrb[35].mxu1  ;;  %v13507_v48 = vadd.f32 %v2896_v51, %v2621_v32 }
 0x4b1   :  { %v13497_v8 = vadd.f32 %v2825_v43, %v2636_v5  ;;  %17144 = vst [vmem:[#allocation10_spill] sm:$0xff] %v13503_v58 }
 0x4b2   :  { %17141 = vst [vmem:[#allocation6_spill] sm:$0xff] %v13493_v29  ;;  %17146 = vst [vmem:[#allocation15_spill] sm:$0xff] %v13507_v48 }
 0x4b3   :  { %17143 = vst [vmem:[#allocation24_spill] sm:$0xff] %v13497_v8  ;;  %v2900_v24 = vpop.f32.mrb[30].mxu0  ;;  %v3733_v23 = vpop.f32.mrb[36].mxu1 }
 0x4b4   :  { %v13505_v45 = vadd.f32 %v2900_v24, %v2626_v7  ;;  %v2902_v62 = vpop.f32.mrb[31].mxu0  ;;  %v3735_v15 = vpop.f32.mrb[37].mxu1  ;;  %v13516_v47 = vadd.f32 %v3733_v23, %v13447_v30 }
 0x4b5   :  { %v13509_v0 = vadd.f32 %v2902_v62, %v2626_v7  ;;  %v13522_v32 = vadd.f32 %v3735_v15, %v13447_v30 }
 0x4b6   :  { %17145 = vst [vmem:[#allocation38_spill] sm:$0xff] %v13505_v45  ;;  %17148 = vst [vmem:[#allocation16_spill] sm:$0xff] %v13516_v47 }
 0x4b7   :  { %17147 = vst [vmem:[#allocation43_spill] sm:$0xff] %v13509_v0  ;;  %17150 = vst [vmem:[#allocation13_spill] sm:$0xff] %v13522_v32 }
 0x4b8   :  { %v2906_v27 = vpop.f32.mrb[32].mxu0 }
 0x4b9   :  { %v3739_v53 = vpop.f32.mrb[38].mxu1  ;;  %v2908_v60 = vpop.f32.mrb[33].mxu0  ;;  %v13531_v19 = vadd.f32 %v2906_v27, %v2631_v11 }
 0x4ba   :  { %v13519_v13 = vadd.f32 %v3739_v53, %v13445_v4  ;;  %v3741_v54 = vpop.f32.mrb[39].mxu1  ;;  %v13535_v51 = vadd.f32 %v2908_v60, %v2631_v11 }
 0x4bb   :  { %v13525_v7 = vadd.f32 %v3741_v54, %v13445_v4  ;;  %17152 = vst [vmem:[#allocation46_spill] sm:$0xff] %v13531_v19 }
 0x4bc   :  { %17149 = vst [vmem:[#allocation29_spill] sm:$0xff] %v13519_v13  ;;  %v2912_v9 = vpop.f32.mrb[34].mxu0  ;;  %17154 = vst [vmem:[#allocation40_spill] sm:$0xff] %v13535_v51 }
 0x4bd   :  { %17151 = vst [vmem:[#allocation49_spill] sm:$0xff] %v13525_v7  ;;  %v3745_v35 = vpop.f32.mrb[40].mxu1  ;;  %v13533_v10 = vadd.f32 %v2912_v9, %v2636_v5  ;;  %v2914_v39 = vpop.f32.mrb[35].mxu0 }
 0x4be   :  { %v3747_v38 = vpop.f32.mrb[41].mxu1  ;;  %v13537_v43 = vadd.f32 %v2914_v39, %v2636_v5  ;;  %v13544_v27 = vadd.f32 %v3745_v35, %v13453_v21 }
 0x4bf   :  { %17153 = vst [vmem:[#allocation44_spill] sm:$0xff] %v13533_v10  ;;  %v13550_v11 = vadd.f32 %v3747_v38, %v13453_v21 }
 0x4c0   :  { %17155 = vst [vmem:[#allocation45_spill] sm:$0xff] %v13537_v43  ;;  %v3822_v62 = vpop.f32.mrb[36].mxu0  ;;  %17156 = vst [vmem:[#allocation32_spill] sm:$0xff] %v13544_v27 }
 0x4c1   :  { %v3751_v15 = vpop.f32.mrb[42].mxu1  ;;  %v3824_v53 = vpop.f32.mrb[37].mxu0  ;;  %17158 = vst [vmem:[#allocation47_spill] sm:$0xff] %v13550_v11  ;;  %v13560_v35 = vadd.f32 %v3822_v62, %v13447_v30 }
 0x4c2   :  { %v13547_v54 = vadd.f32 %v3751_v15, %v13451_v12  ;;  %v3753_v9 = vpop.f32.mrb[43].mxu1  ;;  %v13566_v22 = vadd.f32 %v3824_v53, %v13447_v30 }
 0x4c3   :  { %v13553_v5 = vadd.f32 %v3753_v9, %v13451_v12  ;;  %17160 = vst [vmem:[#allocation52_spill] sm:$0xff] %v13560_v35 }
 0x4c4   :  { %17157 = vst [vmem:[#allocation48_spill] sm:$0xff] %v13547_v54  ;;  %v3828_v39 = vpop.f32.mrb[38].mxu0  ;;  %17162 = vst [vmem:[#allocation25_spill] sm:$0xff] %v13566_v22 }
 0x4c5   :  { %17159 = vst [vmem:[#allocation39_spill] sm:$0xff] %v13553_v5  ;;  %v3911_v23 = vpop.f32.mrb[44].mxu1  ;;  %v13563_v15 = vadd.f32 %v3828_v39, %v13445_v4  ;;  %v3830_v42 = vpop.f32.mrb[39].mxu0 }
 0x4c6   :  { %v3913_v38 = vpop.f32.mrb[45].mxu1  ;;  %v13569_v9 = vadd.f32 %v3830_v42, %v13445_v4  ;;  %v13576_v39 = vadd.f32 %v3911_v23, %v13447_v30 }
 0x4c7   :  { %17161 = vst [vmem:[#allocation51_spill] sm:$0xff] %v13563_v15  ;;  %v13582_v17 = vadd.f32 %v3913_v38, %v13447_v30 }
 0x4c8   :  { %17163 = vst [vmem:[#allocation31_spill] sm:$0xff] %v13569_v9  ;;  %v3834_v44 = vpop.f32.mrb[40].mxu0  ;;  %17164 = vst [vmem:[#allocation19_spill] sm:$0xff] %v13576_v39 }
 0x4c9   :  { %v3917_v62 = vpop.f32.mrb[46].mxu1  ;;  %v3836_v1 = vpop.f32.mrb[41].mxu0  ;;  %17166 = vst [vmem:[#allocation22_spill] sm:$0xff] %v13582_v17  ;;  %v13592_v23 = vadd.f32 %v3834_v44, %v13453_v21 }
 0x4ca   :  { %v13579_v49 = vadd.f32 %v3917_v62, %v13445_v4  ;;  %v3919_v53 = vpop.f32.mrb[47].mxu1  ;;  %v13598_v38 = vadd.f32 %v3836_v1, %v13453_v21 }
 0x4cb   :  { %v13585_v42 = vadd.f32 %v3919_v53, %v13445_v4  ;;  %17168 = vst [vmem:[#allocation23_spill] sm:$0xff] %v13592_v23 }
 0x4cc   :  { %17165 = vst [vmem:[#allocation33_spill] sm:$0xff] %v13579_v49  ;;  %v3840_v20 = vpop.f32.mrb[42].mxu0  ;;  %17170 = vst [vmem:[#allocation53_spill] sm:$0xff] %v13598_v38 }
 0x4cd   :  { %17167 = vst [vmem:[#allocation21_spill] sm:$0xff] %v13585_v42  ;;  %v3923_v55 = vpop.f32.mrb[48].mxu1  ;;  %v13595_v62 = vadd.f32 %v3840_v20, %v13451_v12  ;;  %v3842_v60 = vpop.f32.mrb[43].mxu0 }
 0x4ce   :  { %v3925_v30 = vpop.f32.mrb[49].mxu1  ;;  %v13601_v4 = vadd.f32 %v3842_v60, %v13451_v12  ;;  %v13611_v41 = vadd.f32 %v3923_v55, %v13453_v21 }
 0x4cf   :  { %17169 = vst [vmem:[#allocation50_spill] sm:$0xff] %v13595_v62  ;;  %v13620_v53 = vadd.f32 %v3925_v30, %v13453_v21 }
 0x4d0   :  { %17171 = vst [vmem:[#allocation41_spill] sm:$0xff] %v13601_v4  ;;  %v4241_v3 = vpop.f32.mrb[44].mxu0  ;;  %17172 = vst [vmem:[#allocation54_spill] sm:$0xff] %v13611_v41 }
 0x4d1   :  { %v3929_v44 = vpop.f32.mrb[50].mxu1  ;;  %v13608_v24 = vadd.f32 %v4241_v3, %v13431_v18  ;;  %v4243_v20 = vpop.f32.mrb[45].mxu0  ;;  %17174 = vst [vmem:[#allocation36_spill] sm:$0xff] %v13620_v53 }
 0x4d2   :  { %v13614_v1 = vadd.f32 %v3929_v44, %v13451_v12  ;;  %v3931_v60 = vpop.f32.mrb[51].mxu1  ;;  %v13617_v2 = vadd.f32 %v4243_v20, %v13431_v18 }
 0x4d3   :  { %v13623_v25 = vadd.f32 %v3931_v60, %v13451_v12  ;;  %v16676_v3 = vand.u32 2147483647, %v13608_v24  ;;  %v4826_v29 = vmul.f32 %v13608_v24, %v13608_v24 }
 0x4d4   :  { %17173 = vst [vmem:[#allocation27_spill] sm:$0xff] %v13614_v1  ;;  %v16679_v55 = vand.u32 2147483647, %v13617_v2  ;;  %v4247_v19 = vpop.f32.mrb[46].mxu0 }
 0x4d5   :  { %17175 = vst [vmem:[#allocation14_spill] sm:$0xff] %v13623_v25  ;;  %v4330_v10 = vpop.f32.mrb[52].mxu1  ;;  %v4466_v20 = vmul.f32 0.23164189, %v16676_v3  ;;  %v13634_v21 = vadd.f32 %v4247_v19, %v13429_v50  ;;  %v4249_v12 = vpop.f32.mrb[47].mxu0  ;;  %v4850_v25 = vmul.f32 -0.5, %v4826_v29 }
 0x4d6   :  { %v4332_v30 = vpop.f32.mrb[53].mxu1  ;;  %v4467_v60 = vmul.f32 0.23164189, %v16679_v55  ;;  %v13639_v31 = vadd.f32 %v4249_v12, %v13429_v50 }
 0x4d7   :  { %v4490_v51 = vadd.f32 1.0, %v4466_v20  ;;  %v16684_v43 = vand.u32 2147483647, %v13634_v21  ;;  %v13711_v29 = vadd.f32 %v4332_v30, %v13431_v18  ;;  %v4874_v49 = vmul.f32 1.442695, %v4850_v25 }
 0x4d8   :  { %v4491_v58 = vadd.f32 1.0, %v4467_v60  ;;  %v16686_v44 = vand.u32 2147483647, %v13639_v31  ;;  %v4253_v19 = vpop.f32.mrb[48].mxu0  ;;  %v4833_v4 = vmul.f32 %v13639_v31, %v13639_v31 }
 0x4d9   :  { %9687 = vrcp.f32 %v4490_v51  ;;  %v4472_v3 = vmul.f32 0.23164189, %v16684_v43  ;;  %v13645_v45 = vpop.f32.mrb[54].mxu1  ;;  %v13650_v55 = vadd.f32 %v4253_v19, %v13441_v33  ;;  %v4255_v12 = vpop.f32.mrb[49].mxu0 }
 0x4da   :  { %v4473_v48 = vmul.f32 0.23164189, %v16686_v44  ;;  %v13652_v20 = vpop.f32.mrb[55].mxu1  ;;  %9689 = vrcp.f32 %v4491_v58  ;;  %v13658_v43 = vadd.f32 %v4255_v12, %v13441_v33 }
 0x4db   :  { %v4496_v60 = vadd.f32 1.0, %v4472_v3  ;;  %v16691_v40 = vand.u32 2147483647, %v13650_v55 }
 0x4dc   :  { %v4497_v0 = vadd.f32 1.0, %v4473_v48  ;;  %v4259_v56 = vpop.f32.mrb[50].mxu0  ;;  %v13668_v48 = vadd.f32 %v4330_v10, %v13431_v18  ;;  %v16699_v3 = vand.u32 2147483647, %v13658_v43 }
 0x4dd   :  { %v13655_v36 = vpop.f32.mrb[56].mxu1  ;;  %9691 = vrcp.f32 %v4496_v60  ;;  %v4261_v26 = vpop.f32.mrb[51].mxu0  ;;  %v4478_v19 = vmul.f32 0.23164189, %v16691_v40  ;;  %v13665_v34 = vadd.f32 %v4259_v56, %v13438_v61  ;;  %v4827_v40 = vmul.f32 %v13617_v2, %v13617_v2 }
 0x4de   :  { %v13660_v44 = vpop.f32.mrb[57].mxu1  ;;  %9693 = vrcp.f32 %v4497_v0  ;;  %v4479_v56 = vmul.f32 0.23164189, %v16699_v3  ;;  %v16708_v8 = vand.u32 2147483647, %v13668_v48 }
 0x4df   :  { %v4502_v59 = vadd.f32 1.0, %v4478_v19  ;;  %v16704_v57 = vand.u32 2147483647, %v13665_v34  ;;  %v4851_v14 = vmul.f32 -0.5, %v4827_v40 }
 0x4e0   :  { %v13672_v12 = vpop.f32.mrb[52].mxu0  ;;  %v13689_v6 = vadd.f32 1.0, %v4479_v56  ;;  %v4468_v3 = vmul.f32 0.23164189, %v16708_v8  ;;  %v4832_v8 = vmul.f32 %v13634_v21, %v13634_v21 }
 0x4e1   :  { %v13680_v28 = vpop.f32.mrb[53].mxu0  ;;  %v13682_v10 = vpop.f32.mrb[58].mxu1  ;;  %9695 = vrcp.f32 %v4502_v59  ;;  %v4484_v19 = vmul.f32 0.23164189, %v16704_v57  ;;  %v13699_v57 = vadd.f32 %v4261_v26, %v13438_v61  ;;  %v4876_v38 = vmul.f32 1.442695, %v4851_v14 }
 0x4e2   :  { %v13687_v46 = vpop.f32.mrb[59].mxu1  ;;  %9697 = vrcp.f32 %v13689_v6  ;;  %v13704_v23 = vadd.f32 1.0, %v4468_v3  ;;  %v16721_v14 = vand.u32 2147483647, %v13711_v29 }
 0x4e3   :  { %17176 = vst [vmem:[#allocation28_spill] sm:$0xff] %v13687_v46  ;;  %v9688_v37 = vpop.eup %9687  ;;  %v13691_v41 = vadd.f32 1.0, %v4484_v19  ;;  %v17179_v35 = vand.u32 2147483647, %v13699_v57 }
 0x4e4   :  { %v4538_v63 = vmul.f32 %v9688_v37, %v4490_v51  ;;  %v13695_v1 = vpop.f32.mrb[54].mxu0  ;;  %v9690_v53 = vpop.eup %9689 }
 0x4e5   :  { %v13701_v16 = vpop.f32.mrb[55].mxu0  ;;  %v4539_v19 = vmul.f32 %v9690_v53, %v4491_v58  ;;  %9699 = vrcp.f32 %v13691_v41  ;;  %v4485_v25 = vmul.f32 0.23164189, %v17179_v35 }
 0x4e6   :  { %v4562_v56 = vsub.f32 2.0, %v4538_v63  ;;  %9701 = vrcp.f32 %v13704_v23  ;;  %v4856_v63 = vmul.f32 -0.5, %v4832_v8  ;;  %v4469_v8 = vmul.f32 0.23164189, %v16721_v14 }
 0x4e7   :  { %v9692_v62 = vpop.eup %9691  ;;  %v4563_v39 = vsub.f32 2.0, %v4539_v19  ;;  %9703 = vpow2.f32 %v4874_v49  ;;  %v13744_v49 = vadd.f32 1.0, %v4485_v25 }
 0x4e8   :  { %v13713_v26 = vmul.f32 %v9688_v37, %v4562_v56  ;;  %v4544_v51 = vmul.f32 %v9692_v62, %v4496_v60  ;;  %v13716_v58 = vpop.f32.mrb[56].mxu0  ;;  %v9694_v3 = vpop.eup %9693  ;;  %9705 = vpow2.f32 %v4876_v38  ;;  %v13747_v14 = vadd.f32 1.0, %v4469_v8 }
 0x4e9   :  { %17177 = vst [vmem:[#allocation55_spill] sm:$0xff] %v13716_v58  ;;  %v13721_v40 = vpop.f32.mrb[57].mxu0  ;;  %v13724_v37 = vmul.f32 %v9690_v53, %v4563_v39  ;;  %v4545_v19 = vmul.f32 %v9694_v3, %v4497_v0  ;;  %v4857_v39 = vmul.f32 -0.5, %v4833_v4  ;;  %9707 = vrcp.f32 %v13744_v49 }
 0x4ea   :  { %17178 = vst [vmem:[#allocation56_spill] sm:$0xff] %v13721_v40  ;;  %v4610_v30 = vmul.f32 0.5307027, %v13713_v26  ;;  %v4568_v56 = vsub.f32 2.0, %v4544_v51  ;;  %9709 = vrcp.f32 %v13747_v14 }
 0x4eb   :  { %v9696_v15 = vpop.eup %9695  ;;  %v4611_v9 = vmul.f32 0.5307027, %v13724_v37  ;;  %v4569_v42 = vsub.f32 2.0, %v4545_v19 }
 0x4ec   :  { %v4634_v22 = vadd.f32 -0.72657603, %v4610_v30  ;;  %v13731_v17 = vmul.f32 %v9692_v62, %v4568_v56  ;;  %v13733_v27 = vpop.f32.mrb[58].mxu0  ;;  %v4550_v0 = vmul.f32 %v9696_v15, %v4502_v59  ;;  %v9698_v62 = vpop.eup %9697  ;;  %v4886_v56 = vmul.f32 1.442695, %v4856_v63 }
 0x4ed   :  { %17180 = vst [vmem:[#allocation57_spill] sm:$0xff] %v13733_v27  ;;  %v13737_v53 = vpop.f32.mrb[59].mxu0  ;;  %v4635_v51 = vadd.f32 -0.72657603, %v4611_v9  ;;  %v13741_v60 = vmul.f32 %v9694_v3, %v4569_v42  ;;  %v4838_v42 = vmul.f32 %v13650_v55, %v13650_v55  ;;  %v4551_v63 = vmul.f32 %v9698_v62, %v13689_v6 }
 0x4ee   :  { %17181 = vst [vmem:[#allocation58_spill] sm:$0xff] %v13737_v53  ;;  %v4658_v35 = vmul.f32 %v4634_v22, %v13713_v26  ;;  %v4616_v30 = vmul.f32 0.5307027, %v13731_v17  ;;  %v4574_v54 = vsub.f32 2.0, %v4550_v0  ;;  %v4888_v22 = vmul.f32 1.442695, %v4857_v39 }
 0x4ef   :  { %v4617_v4 = vmul.f32 0.5307027, %v13741_v60  ;;  %v9700_v11 = vpop.eup %9699  ;;  %v4659_v0 = vmul.f32 %v4635_v51, %v13724_v37  ;;  %v4575_v8 = vsub.f32 2.0, %v4551_v63  ;;  %v4862_v47 = vmul.f32 -0.5, %v4838_v42 }
 0x4f0   :  { %v4640_v59 = vadd.f32 -0.72657603, %v4616_v30  ;;  %v13749_v9 = vmul.f32 %v9696_v15, %v4574_v54  ;;  %v4682_v3 = vadd.f32 0.7107069, %v4658_v35  ;;  %v9702_v30 = vpop.eup %9701  ;;  %v4556_v5 = vmul.f32 %v9700_v11, %v13691_v41 }
 0x4f1   :  { %v4641_v38 = vadd.f32 -0.72657603, %v4617_v4  ;;  %v13762_v35 = vmul.f32 %v9698_v62, %v4575_v8  ;;  %v4683_v63 = vadd.f32 0.7107069, %v4659_v0  ;;  %v4839_v41 = vmul.f32 %v13658_v43, %v13658_v43 }
 0x4f2   :  { %v4664_v25 = vmul.f32 %v4640_v59, %v13731_v17  ;;  %v4622_v19 = vmul.f32 0.5307027, %v13749_v9  ;;  %v4580_v51 = vsub.f32 2.0, %v4556_v5  ;;  %v4540_v59 = vmul.f32 %v9702_v30, %v13704_v23 }
 0x4f3   :  { %v4665_v15 = vmul.f32 %v4641_v38, %v13741_v60  ;;  %v4706_v4 = vmul.f32 %v4682_v3, %v13713_v26  ;;  %v4623_v39 = vmul.f32 0.5307027, %v13762_v35  ;;  %9711 = vpow2.f32 %v4886_v56 }
 0x4f4   :  { %v4688_v54 = vadd.f32 0.7107069, %v4664_v25  ;;  %v4646_v6 = vadd.f32 -0.72657603, %v4622_v19  ;;  %v13768_v25 = vpop.eup %9703  ;;  %v13772_v13 = vmul.f32 %v9700_v11, %v4580_v51  ;;  %v4564_v62 = vsub.f32 2.0, %v4540_v59 }
 0x4f5   :  { %v4689_v23 = vadd.f32 0.7107069, %v4665_v15  ;;  %v4844_v19 = vmul.f32 %v13665_v34, %v13665_v34  ;;  %v4647_v3 = vadd.f32 -0.72657603, %v4623_v39  ;;  %v13780_v32 = vpop.eup %9705  ;;  %9713 = vpow2.f32 %v4888_v22 }
 0x4f6   :  { %v4670_v38 = vmul.f32 %v4646_v6, %v13749_v9  ;;  %v4712_v5 = vmul.f32 %v4688_v54, %v13731_v17  ;;  %v4628_v0 = vmul.f32 0.5307027, %v13772_v13  ;;  %v13778_v8 = vmul.f32 %v9702_v30, %v4564_v62  ;;  %v9708_v62 = vpop.eup %9707 }
 0x4f7   :  { %v4730_v6 = vadd.f32 -0.14224836, %v4706_v4  ;;  %v4898_v11 = vmul.f32 1.442695, %v4862_v47  ;;  %v4863_v51 = vmul.f32 -0.5, %v4839_v41  ;;  %v4707_v59 = vmul.f32 %v4683_v63, %v13724_v37  ;;  %v9710_v63 = vpop.eup %9709 }
 0x4f8   :  { %v4694_v42 = vadd.f32 0.7107069, %v4670_v38  ;;  %v4671_v56 = vmul.f32 %v4647_v3, %v13762_v35  ;;  %v4652_v54 = vadd.f32 -0.72657603, %v4628_v0  ;;  %v4612_v15 = vmul.f32 0.5307027, %v13778_v8 }
 0x4f9   :  { %v4736_v7 = vadd.f32 -0.14224836, %v4712_v5  ;;  %v4868_v38 = vmul.f32 -0.5, %v4844_v19  ;;  %v4828_v30 = vmul.f32 %v13668_v48, %v13668_v48  ;;  %v4713_v4 = vmul.f32 %v4689_v23, %v13741_v60 }
 0x4fa   :  { %v4718_v39 = vmul.f32 %v4694_v42, %v13749_v9  ;;  %v4695_v22 = vadd.f32 0.7107069, %v4671_v56  ;;  %v4676_v47 = vmul.f32 %v4652_v54, %v13772_v13  ;;  %v4636_v41 = vadd.f32 -0.72657603, %v4612_v15 }
 0x4fb   :  { %9715 = vpow2.f32 %v4898_v11  ;;  %v4900_v3 = vmul.f32 1.442695, %v4863_v51  ;;  %v4754_v42 = vmul.f32 %v4730_v6, %v13713_v26  ;;  %v4731_v19 = vadd.f32 -0.14224836, %v4707_v59 }
 0x4fc   :  { %v4700_v52 = vadd.f32 0.7107069, %v4676_v47  ;;  %v4660_v53 = vmul.f32 %v4636_v41, %v13778_v8  ;;  %v4760_v27 = vmul.f32 %v4736_v7, %v13731_v17  ;;  %v4742_v23 = vadd.f32 -0.14224836, %v4718_v39 }
 0x4fd   :  { %v4910_v56 = vmul.f32 1.442695, %v4868_v38  ;;  %v4852_v40 = vmul.f32 -0.5, %v4828_v30  ;;  %v4737_v54 = vadd.f32 -0.14224836, %v4713_v4  ;;  %v4719_v15 = vmul.f32 %v4695_v22, %v13762_v35  ;;  %v9712_v0 = vpop.eup %9711 }
 0x4fe   :  { %v4845_v51 = vmul.f32 %v13699_v57, %v13699_v57  ;;  %v4724_v6 = vmul.f32 %v4700_v52, %v13772_v13  ;;  %v4684_v59 = vadd.f32 0.7107069, %v4660_v53  ;;  %v4557_v47 = vmul.f32 %v9708_v62, %v13744_v49 }
 0x4ff   :  { %v4541_v41 = vmul.f32 %v9710_v63, %v13747_v14  ;;  %v4778_v7 = vadd.f32 0.1274148, %v4754_v42  ;;  %v4755_v39 = vmul.f32 %v4731_v19, %v13724_v37  ;;  %9717 = vpow2.f32 %v4900_v3  ;;  %v9714_v30 = vpop.eup %9713 }
 0x500   :  { %v4829_v38 = vmul.f32 %v13711_v29, %v13711_v29  ;;  %v4784_v4 = vadd.f32 0.1274148, %v4760_v27  ;;  %v4766_v22 = vmul.f32 %v4742_v23, %v13749_v9  ;;  %v4581_v11 = vsub.f32 2.0, %v4557_v47 }
 0x501   :  { %v4565_v5 = vsub.f32 2.0, %v4541_v41  ;;  %v4761_v52 = vmul.f32 %v4737_v54, %v13741_v60  ;;  %v4743_v53 = vadd.f32 -0.14224836, %v4719_v15  ;;  %v4878_v46 = vmul.f32 1.442695, %v4852_v40 }
 0x502   :  { %v4869_v49 = vmul.f32 -0.5, %v4845_v51  ;;  %v4748_v58 = vadd.f32 -0.14224836, %v4724_v6  ;;  %v4708_v14 = vmul.f32 %v4684_v59, %v13778_v8  ;;  %v13808_v42 = vmul.f32 %v9708_v62, %v4581_v11 }
 0x503   :  { %v13812_v3 = vadd.f32 %v13645_v45, %v13429_v50  ;;  %v4802_v27 = vmul.f32 %v4778_v7, %v13713_v26  ;;  %9719 = vpow2.f32 %v4910_v56  ;;  %v13815_v19 = vmul.f32 %v9710_v63, %v4565_v5 }
 0x504   :  { %v4853_v23 = vmul.f32 -0.5, %v4829_v38  ;;  %v4779_v54 = vadd.f32 0.1274148, %v4755_v39  ;;  %v4808_v40 = vmul.f32 %v4784_v4, %v13731_v17  ;;  %v4790_v15 = vadd.f32 0.1274148, %v4766_v22 }
 0x505   :  { %v9716_v47 = vpop.eup %9715  ;;  %v16738_v51 = vand.u32 2147483647, %v13812_v3  ;;  %v4785_v6 = vadd.f32 0.1274148, %v4761_v52  ;;  %v4767_v62 = vmul.f32 %v4743_v53, %v13762_v35  ;;  %v4629_v11 = vmul.f32 0.5307027, %v13808_v42 }
 0x506   :  { %v4912_v45 = vmul.f32 1.442695, %v4869_v49  ;;  %v4772_v59 = vmul.f32 %v4748_v58, %v13772_v13  ;;  %v4732_v26 = vadd.f32 -0.14224836, %v4708_v14  ;;  %v13826_v5 = vadd.f32 %v13672_v12, %v13431_v18 }
 0x507   :  { %v4474_v63 = vmul.f32 0.23164189, %v16738_v51  ;;  %v4922_v17 = vmul.f32 %v13768_v25, %v4802_v27  ;;  %9721 = vpow2.f32 %v4878_v46  ;;  %v4613_v56 = vmul.f32 0.5307027, %v13815_v19 }
 0x508   :  { %v4880_v41 = vmul.f32 1.442695, %v4853_v23  ;;  %v4803_v7 = vmul.f32 %v4779_v54, %v13724_v37  ;;  %v4928_v39 = vmul.f32 %v9712_v0, %v4808_v40  ;;  %v4814_v38 = vmul.f32 %v4790_v15, %v13749_v9 }
 0x509   :  { %v4498_v58 = vadd.f32 1.0, %v4474_v63  ;;  %v9718_v4 = vpop.eup %9717  ;;  %v4809_v22 = vmul.f32 %v4785_v6, %v13741_v60  ;;  %v4653_v52 = vadd.f32 -0.72657603, %v4629_v11  ;;  %9723 = vpow2.f32 %v4912_v45 }
 0x50a   :  { %v16736_v12 = vand.u32 2147483647, %v13826_v5  ;;  %v4791_v53 = vadd.f32 0.1274148, %v4767_v62  ;;  %v4796_v49 = vadd.f32 0.1274148, %v4772_v59  ;;  %v4756_v46 = vmul.f32 %v4732_v26, %v13778_v8 }
 0x50b   :  { %9725 = vrcp.f32 %v4498_v58  ;;  %v4637_v14 = vadd.f32 -0.72657603, %v4613_v56  ;;  %v17182_v9 = vand.u32 2147483647, %v13608_v24  ;;  %v4923_v60 = vmul.f32 %v13780_v32, %v4803_v7 }
 0x50c   :  { %9727 = vpow2.f32 %v4880_v41  ;;  %v4470_v37 = vmul.f32 0.23164189, %v16736_v12  ;;  %v17183_v27 = vand.u32 2147483647, %v13634_v21  ;;  %v4934_v54 = vmul.f32 %v9716_v47, %v4814_v38 }
 0x50d   :  { %v4970_v0 = vmul.f32 %v4922_v17, %v17182_v9  ;;  %v9720_v40 = vpop.eup %9719  ;;  %v4677_v15 = vmul.f32 %v4653_v52, %v13808_v42  ;;  %v13846_v62 = vadd.f32 %v13652_v20, %v13429_v50  ;;  %v13850_v11 = vadd.f32 %v13680_v28, %v13431_v18 }
 0x50e   :  { %v4976_v23 = vmul.f32 %v4928_v39, %v17183_v27  ;;  %v4494_v6 = vadd.f32 1.0, %v4470_v37  ;;  %v4929_v45 = vmul.f32 %v9714_v30, %v4809_v22  ;;  %v4815_v59 = vmul.f32 %v4791_v53, %v13762_v35 }
 0x50f   :  { %v4820_v32 = vmul.f32 %v4796_v49, %v13772_v13  ;;  %v4780_v26 = vadd.f32 0.1274148, %v4756_v46  ;;  %v4661_v47 = vmul.f32 %v4637_v14, %v13815_v19  ;;  %v16734_v63 = vand.u32 2147483647, %v13846_v62 }
 0x510   :  { %9729 = vrcp.f32 %v4494_v6  ;;  %v13858_v17 = vadd.f32 %v13655_v36, %v13441_v33  ;;  %v17184_v20 = vmax.f32 %v13608_v24, 0.0  ;;  %v17185_v18 = vand.u32 2147483647, %v13617_v2 }
 0x511   :  { %v4834_v13 = vmul.f32 %v13812_v3, %v13812_v3  ;;  %v16733_v35 = vand.u32 2147483647, %v13850_v11  ;;  %v9722_v30 = vpop.eup %9721  ;;  %v17186_v41 = vmax.f32 %v13634_v21, 0.0  ;;  %v17187_v36 = vand.u32 2147483647, %v13650_v55 }
 0x512   :  { %v13862_v56 = vsub.f32 %v17184_v20, %v4970_v0  ;;  %v13866_v28 = vmul.f32 %v4923_v60, %v17185_v18  ;;  %v4701_v24 = vadd.f32 0.7107069, %v4677_v15  ;;  %v4475_v38 = vmul.f32 0.23164189, %v16734_v63 }
 0x513   :  { %v13873_v7 = vsub.f32 %v17186_v41, %v4976_v23  ;;  %v4982_v39 = vmul.f32 %v4934_v54, %v17187_v36  ;;  %v4935_v22 = vmul.f32 %v9718_v4, %v4815_v59  ;;  %v4940_v52 = vmul.f32 %v9720_v40, %v4820_v32  ;;  %v13882_v46 = vpop.eup %9723 }
 0x514   :  { %v4804_v53 = vmul.f32 %v4780_v26, %v13778_v8  ;;  %v4471_v49 = vmul.f32 0.23164189, %v16733_v35  ;;  %v17188_v21 = vand.u32 2147483647, %v13639_v31  ;;  %v4685_v37 = vadd.f32 0.7107069, %v4661_v47 }
 0x515   :  { %v4499_v9 = vadd.f32 1.0, %v4475_v38  ;;  %v16731_v0 = vand.u32 2147483647, %v13858_v17  ;;  %v9726_v60 = vpop.eup %9725  ;;  %v4858_v4 = vmul.f32 -0.5, %v4834_v13  ;;  %v4830_v8 = vmul.f32 %v13826_v5, %v13826_v5 }
 0x516   :  { %v13886_v14 = vmul.f32 %v4929_v45, %v17188_v21  ;;  %v4495_v23 = vadd.f32 1.0, %v4471_v49  ;;  %v13892_v54 = vpop.eup %9727  ;;  %v4725_v40 = vmul.f32 %v4701_v24, %v13808_v42  ;;  %v4546_v15 = vmul.f32 %v9726_v60, %v4498_v58 }
 0x517   :  { %9731 = vrcp.f32 %v4499_v9  ;;  %v4480_v45 = vmul.f32 0.23164189, %v16731_v0  ;;  %v17189_v59 = vmax.f32 %v13650_v55, 0.0  ;;  %v17190_v26 = vand.u32 2147483647, %v13658_v43 }
 0x518   :  { %v17191_v20 = vand.u32 2147483647, %v13665_v34  ;;  %v4924_v13 = vmul.f32 %v9722_v30, %v4804_v53  ;;  %v4709_v41 = vmul.f32 %v4685_v37, %v13815_v19  ;;  %v4570_v36 = vsub.f32 2.0, %v4546_v15 }
 0x519   :  { %v13899_v32 = vsub.f32 %v17189_v59, %v4982_v39  ;;  %v13903_v47 = vmul.f32 %v4935_v22, %v17190_v26  ;;  %9733 = vrcp.f32 %v4495_v23  ;;  %v4504_v58 = vadd.f32 1.0, %v4480_v45 }
 0x51a   :  { %v4988_v18 = vmul.f32 %v4940_v52, %v17191_v20  ;;  %v4890_v24 = vmul.f32 1.442695, %v4858_v4  ;;  %v4854_v49 = vmul.f32 -0.5, %v4830_v8  ;;  %v13911_v55 = vadd.f32 %v13695_v1, %v13429_v50  ;;  %v9730_v39 = vpop.eup %9729 }
 0x51b   :  { %v4749_v22 = vadd.f32 -0.14224836, %v4725_v40  ;;  %v13913_v21 = vmul.f32 %v9726_v60, %v4570_v36  ;;  %9735 = vrcp.f32 %v4504_v58  ;;  %v13917_v30 = vadd.f32 %v13660_v44, %v13441_v33 }
 0x51c   :  { %v17193_v52 = vand.u32 2147483647, %v13668_v48  ;;  %v4542_v37 = vmul.f32 %v9730_v39, %v4494_v6  ;;  %v16732_v4 = vand.u32 2147483647, %v13911_v55  ;;  %v13924_v8 = vadd.f32 %v13701_v16, %v13429_v50 }
 0x51d   :  { %17192 = vst [vmem:[#allocation59_spill] sm:$0xff] %v13917_v30  ;;  %v17194_v1 = vmax.f32 %v13665_v34, 0.0  ;;  %v4733_v60 = vadd.f32 -0.14224836, %v4709_v41  ;;  %v4835_v15 = vmul.f32 %v13846_v62, %v13846_v62  ;;  %v16729_v44 = vand.u32 2147483647, %v13917_v30 }
 0x51e   :  { %v4972_v53 = vmul.f32 %v4924_v13, %v17193_v52  ;;  %9737 = vpow2.f32 %v4890_v24  ;;  %v4566_v45 = vsub.f32 2.0, %v4542_v37  ;;  %v4476_v59 = vmul.f32 0.23164189, %v16732_v4 }
 0x51f   :  { %v13928_v40 = vsub.f32 %v17194_v1, %v4988_v18  ;;  %v4773_v50 = vmul.f32 %v4749_v22, %v13808_v42  ;;  %v4618_v16 = vmul.f32 0.5307027, %v13913_v21  ;;  %v4882_v34 = vmul.f32 1.442695, %v4854_v49 }
 0x520   :  { %v4481_v26 = vmul.f32 0.23164189, %v16729_v44  ;;  %v17195_v20 = vmax.f32 %v13668_v48, 0.0  ;;  %v13944_v13 = vmul.f32 %v9730_v39, %v4566_v45  ;;  %v4500_v41 = vadd.f32 1.0, %v4476_v59 }
 0x521   :  { %v16730_v36 = vand.u32 2147483647, %v13924_v8  ;;  %v9732_v24 = vpop.eup %9731  ;;  %v4757_v52 = vmul.f32 %v4733_v60, %v13815_v19  ;;  %v4859_v37 = vmul.f32 -0.5, %v4835_v15  ;;  %v4797_v39 = vadd.f32 0.1274148, %v4773_v50 }
 0x522   :  { %v13942_v18 = vsub.f32 %v17195_v20, %v4972_v53  ;;  %v4505_v1 = vadd.f32 1.0, %v4481_v26  ;;  %v4614_v49 = vmul.f32 0.5307027, %v13944_v13  ;;  %v4547_v27 = vmul.f32 %v9732_v24, %v4499_v9 }
 0x523   :  { %9739 = vrcp.f32 %v4500_v41  ;;  %v4477_v48 = vmul.f32 0.23164189, %v16730_v36  ;;  %v9734_v53 = vpop.eup %9733  ;;  %v4642_v45 = vadd.f32 -0.72657603, %v4618_v16  ;;  %v4831_v59 = vmul.f32 %v13850_v11, %v13850_v11 }
 0x524   :  { %17196 = vst [vmem:[#allocation60_spill] sm:$0xff] %v13942_v18  ;;  %9741 = vpow2.f32 %v4882_v34  ;;  %v4638_v20 = vadd.f32 -0.72657603, %v4614_v49  ;;  %v4571_v60 = vsub.f32 2.0, %v4547_v27  ;;  %v4543_v15 = vmul.f32 %v9734_v53, %v4495_v23 }
 0x525   :  { %9743 = vrcp.f32 %v4505_v1  ;;  %v9736_v44 = vpop.eup %9735  ;;  %v4781_v26 = vadd.f32 0.1274148, %v4757_v52  ;;  %v4840_v9 = vmul.f32 %v13858_v17, %v13858_v17  ;;  %v4501_v22 = vadd.f32 1.0, %v4477_v48 }
 0x526   :  { %v13958_v25 = vadd.f32 %v13682_v10, %v13438_v61  ;;  %v13960_v50 = vmul.f32 %v9732_v24, %v4571_v60  ;;  %v4892_v16 = vmul.f32 1.442695, %v4859_v37  ;;  %v4567_v34 = vsub.f32 2.0, %v4543_v15 }
 0x527   :  { %v4552_v36 = vmul.f32 %v9736_v44, %v4504_v58  ;;  %v4666_v49 = vmul.f32 %v4642_v45, %v13913_v21  ;;  %v4855_v27 = vmul.f32 -0.5, %v4831_v59  ;;  %9745 = vrcp.f32 %v4501_v22 }
 0x528   :  { %v16735_v23 = vand.u32 2147483647, %v13958_v25  ;;  %v13964_v52 = vpop.eup %9737  ;;  %v4662_v0 = vmul.f32 %v4638_v20, %v13944_v13  ;;  %v4619_v48 = vmul.f32 0.5307027, %v13960_v50  ;;  %v13968_v4 = vmul.f32 %v9734_v53, %v4567_v34 }
 0x529   :  { %v4576_v10 = vsub.f32 2.0, %v4552_v36  ;;  %v4821_v24 = vmul.f32 %v4797_v39, %v13808_v42  ;;  %v4805_v37 = vmul.f32 %v4781_v26, %v13815_v19  ;;  %v4864_v20 = vmul.f32 -0.5, %v4840_v9 }
 0x52a   :  { %v4486_v45 = vmul.f32 0.23164189, %v16735_v23  ;;  %v4643_v59 = vadd.f32 -0.72657603, %v4619_v48  ;;  %v4615_v60 = vmul.f32 0.5307027, %v13968_v4  ;;  %9747 = vpow2.f32 %v4892_v16 }
 0x52b   :  { %v13976_v15 = vmul.f32 %v9736_v44, %v4576_v10  ;;  %v4690_v35 = vadd.f32 0.7107069, %v4666_v49  ;;  %v4884_v53 = vmul.f32 1.442695, %v4855_v27  ;;  %v4686_v63 = vadd.f32 0.7107069, %v4662_v0 }
 0x52c   :  { %v4510_v34 = vadd.f32 1.0, %v4486_v45  ;;  %v4667_v42 = vmul.f32 %v4643_v59, %v13960_v50  ;;  %v4639_v19 = vadd.f32 -0.72657603, %v4615_v60  ;;  %v4941_v48 = vmul.f32 %v13882_v46, %v4821_v24  ;;  %v17197_v60 = vld [vmem:[#allocation55_spill] sm:$0xff] }
 0x52d   :  { %v9740_v36 = vpop.eup %9739  ;;  %v4624_v39 = vmul.f32 0.5307027, %v13976_v15  ;;  %v4925_v58 = vmul.f32 %v13892_v54, %v4805_v37  ;;  %v4902_v27 = vmul.f32 1.442695, %v4864_v20  ;;  %v4836_v0 = vmul.f32 %v13911_v55, %v13911_v55 }
 0x52e   :  { %v13980_v26 = vpop.eup %9741  ;;  %v4548_v44 = vmul.f32 %v9740_v36, %v4500_v41  ;;  %9749 = vrcp.f32 %v4510_v34  ;;  %v4663_v16 = vmul.f32 %v4639_v19, %v13968_v4  ;;  %v4714_v10 = vmul.f32 %v4690_v35, %v13913_v21 }
 0x52f   :  { %v9744_v9 = vpop.eup %9743  ;;  %v4648_v49 = vadd.f32 -0.72657603, %v4624_v39  ;;  %v13990_v23 = vadd.f32 %v17197_v60, %v13441_v33  ;;  %v4710_v46 = vmul.f32 %v4686_v63, %v13944_v13  ;;  %v4691_v54 = vadd.f32 0.7107069, %v4667_v42 }
 0x530   :  { %v4572_v45 = vsub.f32 2.0, %v4548_v44  ;;  %v4553_v59 = vmul.f32 %v9744_v9, %v4505_v1  ;;  %v4841_v24 = vmul.f32 %v13917_v30, %v13917_v30  ;;  %v17199_v20 = vand.u32 2147483647, %v13699_v57 }
 0x531   :  { %17198 = vst [vmem:[#allocation55_spill] sm:$0xff] %v13990_v23  ;;  %v9746_v37 = vpop.eup %9745  ;;  %v17200_v35 = vand.u32 2147483647, %v13711_v29  ;;  %v4672_v39 = vmul.f32 %v4648_v49, %v13976_v15  ;;  %v4687_v63 = vadd.f32 0.7107069, %v4663_v16  ;;  %9751 = vpow2.f32 %v4884_v53 }
 0x532   :  { %v13998_v19 = vmul.f32 %v4941_v48, %v17199_v20  ;;  %v14005_v44 = vmul.f32 %v9740_v36, %v4572_v45  ;;  %v4860_v42 = vmul.f32 -0.5, %v4836_v0  ;;  %v4577_v60 = vsub.f32 2.0, %v4553_v59 }
 0x533   :  { %v14002_v1 = vmul.f32 %v4925_v58, %v17200_v35  ;;  %v4738_v41 = vadd.f32 -0.14224836, %v4714_v10  ;;  %v4549_v38 = vmul.f32 %v9746_v37, %v4501_v22  ;;  %v16737_v12 = vand.u32 2147483647, %v13990_v23 }
 0x534   :  { %v4620_v6 = vmul.f32 0.5307027, %v14005_v44  ;;  %v4734_v48 = vadd.f32 -0.14224836, %v4710_v46  ;;  %v4715_v20 = vmul.f32 %v4691_v54, %v13960_v50  ;;  %9753 = vpow2.f32 %v4902_v27  ;;  %v14010_v35 = vpop.eup %9747 }
 0x535   :  { %v4865_v58 = vmul.f32 -0.5, %v4841_v24  ;;  %v4696_v49 = vadd.f32 0.7107069, %v4672_v39  ;;  %v4573_v53 = vsub.f32 2.0, %v4549_v38  ;;  %v4711_v0 = vmul.f32 %v4687_v63, %v13968_v4 }
 0x536   :  { %v4644_v36 = vadd.f32 -0.72657603, %v4620_v6  ;;  %v4894_v10 = vmul.f32 1.442695, %v4860_v42  ;;  %v14014_v45 = vmul.f32 %v9744_v9, %v4577_v60  ;;  %v4837_v22 = vmul.f32 %v13924_v8, %v13924_v8 }
 0x537   :  { %v4762_v46 = vmul.f32 %v4738_v41, %v13913_v21  ;;  %v14020_v54 = vmul.f32 %v9746_v37, %v4573_v53  ;;  %v4482_v6 = vmul.f32 0.23164189, %v16737_v12  ;;  %v4758_v38 = vmul.f32 %v4734_v48, %v13944_v13 }
 0x538   :  { %v9750_v59 = vpop.eup %9749  ;;  %v4668_v27 = vmul.f32 %v4644_v36, %v14005_v44  ;;  %v4739_v24 = vadd.f32 -0.14224836, %v4715_v20  ;;  %v14025_v39 = vmul.f32 1.442695, %v4865_v58  ;;  %v4846_v9 = vmul.f32 %v13958_v25, %v13958_v25 }
 0x539   :  { %v4720_v63 = vmul.f32 %v4696_v49, %v13976_v15  ;;  %v4621_v41 = vmul.f32 0.5307027, %v14020_v54  ;;  %v4558_v60 = vmul.f32 %v9750_v59, %v4510_v34  ;;  %v4735_v36 = vadd.f32 -0.14224836, %v4711_v0 }
 0x53a   :  { %17201 = vst [vmem:[#allocation61_spill] sm:$0xff] %v14025_v39  ;;  %v4692_v42 = vadd.f32 0.7107069, %v4668_v27  ;;  %v4625_v37 = vmul.f32 0.5307027, %v14014_v45  ;;  %v4861_v53 = vmul.f32 -0.5, %v4837_v22  ;;  %v4763_v39 = vmul.f32 %v4739_v24, %v13960_v50 }
 0x53b   :  { %v4506_v16 = vadd.f32 1.0, %v4482_v6  ;;  %v4786_v12 = vadd.f32 0.1274148, %v4762_v46  ;;  %v4645_v20 = vadd.f32 -0.72657603, %v4621_v41  ;;  %v4582_v58 = vsub.f32 2.0, %v4558_v60  ;;  %v9752_v51 = vpop.eup %9751 }
 0x53c   :  { %v4716_v48 = vmul.f32 %v4692_v42, %v14005_v44  ;;  %v4782_v30 = vadd.f32 0.1274148, %v4758_v38  ;;  %v4870_v23 = vmul.f32 -0.5, %v4846_v9  ;;  %v4744_v49 = vadd.f32 -0.14224836, %v4720_v63 }
 0x53d   :  { %9755 = vrcp.f32 %v4506_v16  ;;  %v4669_v34 = vmul.f32 %v4645_v20, %v14020_v54  ;;  %v14035_v0 = vmul.f32 %v9750_v59, %v4582_v58  ;;  %v4759_v22 = vmul.f32 %v4735_v36, %v13968_v4  ;;  %v17202_v59 = vld [vmem:[#allocation28_spill] sm:$0xff] }
 0x53e   :  { %v4740_v27 = vadd.f32 -0.14224836, %v4716_v48  ;;  %v14037_v18 = vpop.eup %9753  ;;  %9757 = vpow2.f32 %v4894_v10  ;;  %v4649_v46 = vadd.f32 -0.72657603, %v4625_v37  ;;  %v4896_v6 = vmul.f32 1.442695, %v4861_v53 }
 0x53f   :  { %v4810_v42 = vmul.f32 %v4786_v12, %v13913_v21  ;;  %v4693_v24 = vadd.f32 0.7107069, %v4669_v34  ;;  %v4630_v9 = vmul.f32 0.5307027, %v14035_v0  ;;  %v4806_v63 = vmul.f32 %v4782_v30, %v13944_v13  ;;  %v17203_v48 = vld [vmem:[#allocation56_spill] sm:$0xff] }
 0x540   :  { %v4764_v38 = vmul.f32 %v4740_v27, %v14005_v44  ;;  %v4914_v41 = vmul.f32 1.442695, %v4870_v23  ;;  %v14046_v60 = vadd.f32 %v17202_v59, %v13438_v61  ;;  %v14050_v36 = vadd.f32 %v17203_v48, %v13441_v33 }
 0x541   :  { %v4787_v10 = vadd.f32 0.1274148, %v4763_v39  ;;  %v4768_v37 = vmul.f32 %v4744_v49, %v13976_v15  ;;  %v4717_v12 = vmul.f32 %v4693_v24, %v14020_v54  ;;  %v4654_v21 = vadd.f32 -0.72657603, %v4630_v9 }
 0x542   :  { %v4783_v53 = vadd.f32 0.1274148, %v4759_v22  ;;  %v4673_v20 = vmul.f32 %v4649_v46, %v14014_v45  ;;  %9759 = vpow2.f32 %v4896_v6  ;;  %v4463_v30 = vand.u32 2147483647, %v14046_v60 }
 0x543   :  { %v4930_v13 = vmul.f32 %v13964_v52, %v4810_v42  ;;  %v4788_v23 = vadd.f32 0.1274148, %v4764_v38  ;;  %v4741_v58 = vadd.f32 -0.14224836, %v4717_v12  ;;  %v4678_v27 = vmul.f32 %v4654_v21, %v14035_v0 }
 0x544   :  { %v4926_v33 = vmul.f32 %v13980_v26, %v4806_v63  ;;  %9761 = vpow2.f32 %v4914_v41  ;;  %v4487_v39 = vmul.f32 0.23164189, %v4463_v30  ;;  %v4459_v49 = vand.u32 2147483647, %v14050_v36 }
 0x545   :  { %v4811_v34 = vmul.f32 %v4787_v10, %v13960_v50  ;;  %v4792_v22 = vadd.f32 0.1274148, %v4768_v37  ;;  %v4765_v46 = vmul.f32 %v4741_v58, %v14020_v54  ;;  %v4702_v6 = vadd.f32 0.7107069, %v4678_v27 }
 0x546   :  { %v4807_v52 = vmul.f32 %v4783_v53, %v13968_v4  ;;  %v4697_v42 = vadd.f32 0.7107069, %v4673_v20  ;;  %v4511_v38 = vadd.f32 1.0, %v4487_v39  ;;  %v4483_v26 = vmul.f32 0.23164189, %v4459_v49 }
 0x547   :  { %v9756_v24 = vpop.eup %9755  ;;  %v17204_v9 = vand.u32 2147483647, %v13812_v3  ;;  %v4812_v41 = vmul.f32 %v4788_v23, %v14005_v44  ;;  %v4957_v59 = vmax.f32 %v13924_v8, 0.0  ;;  %v4726_v50 = vmul.f32 %v4702_v6, %v14035_v0 }
 0x548   :  { %v9758_v48 = vpop.eup %9757  ;;  %v4789_v10 = vadd.f32 0.1274148, %v4765_v46  ;;  %v4554_v37 = vmul.f32 %v9756_v24, %v4506_v16  ;;  %9763 = vrcp.f32 %v4511_v38  ;;  %v4507_v12 = vadd.f32 1.0, %v4483_v26  ;;  %v17206_v16 = vld [vmem:[#allocation57_spill] sm:$0xff] }
 0x549   :  { %v4978_v63 = vmul.f32 %v4930_v13, %v17204_v9  ;;  %v17205_v4 = vand.u32 2147483647, %v13826_v5  ;;  %v4816_v53 = vmul.f32 %v4792_v22, %v13976_v15  ;;  %v4750_v20 = vadd.f32 -0.14224836, %v4726_v50 }
 0x54a   :  { %v4966_v58 = vmax.f32 %v13958_v25, 0.0  ;;  %v4931_v13 = vmul.f32 %v14010_v35, %v4811_v34  ;;  %v4927_v44 = vmul.f32 %v9752_v51, %v4807_v52  ;;  %v4721_v23 = vmul.f32 %v4697_v42, %v14014_v45  ;;  %v17208_v51 = vld [vmem:[#allocation58_spill] sm:$0xff] }
 0x54b   :  { %v4974_v21 = vmul.f32 %v4926_v33, %v17205_v4  ;;  %v4578_v27 = vsub.f32 2.0, %v4554_v37  ;;  %v4932_v39 = vmul.f32 %v9758_v48, %v4812_v41  ;;  %v4774_v46 = vmul.f32 %v4750_v20, %v14035_v0 }
 0x54c   :  { %9765 = vrcp.f32 %v4507_v12  ;;  %v14081_v6 = vadd.f32 %v17206_v16, %v13438_v61  ;;  %v9760_v33 = vpop.eup %9759  ;;  %v17207_v15 = vmax.f32 %v13812_v3, 0.0  ;;  %v4813_v26 = vmul.f32 %v4789_v10, %v14020_v54 }
 0x54d   :  { %v14088_v35 = vmul.f32 %v9756_v24, %v4578_v27  ;;  %v14092_v34 = vadd.f32 %v17208_v51, %v13438_v61  ;;  %v17209_v52 = vmax.f32 %v13826_v5, 0.0  ;;  %v4936_v9 = vmul.f32 %v14037_v18, %v4816_v53 }
 0x54e   :  { %v14085_v22 = vsub.f32 %v17207_v15, %v4978_v63  ;;  %v4798_v41 = vadd.f32 0.1274148, %v4774_v46  ;;  %v4464_v50 = vand.u32 2147483647, %v14081_v6  ;;  %v9762_v3 = vpop.eup %9761  ;;  %v17210_v63 = vand.u32 2147483647, %v13846_v62 }
 0x54f   :  { %v14096_v42 = vsub.f32 %v17209_v52, %v4974_v21  ;;  %v17211_v54 = vand.u32 2147483647, %v13850_v11  ;;  %v4626_v10 = vmul.f32 0.5307027, %v14088_v35  ;;  %v4465_v61 = vand.u32 2147483647, %v14092_v34 }
 0x550   :  { %v4979_v48 = vmul.f32 %v4931_v13, %v17210_v63  ;;  %v17212_v5 = vand.u32 2147483647, %v13911_v55  ;;  %v4745_v4 = vadd.f32 -0.14224836, %v4721_v23  ;;  %v4822_v18 = vmul.f32 %v4798_v41, %v14035_v0 }
 0x551   :  { %v4975_v24 = vmul.f32 %v4927_v44, %v17211_v54  ;;  %v4488_v21 = vmul.f32 0.23164189, %v4464_v50  ;;  %v4933_v53 = vmul.f32 %v9760_v33, %v4813_v26  ;;  %v4489_v20 = vmul.f32 0.23164189, %v4465_v61 }
 0x552   :  { %v4980_v37 = vmul.f32 %v4932_v39, %v17212_v5  ;;  %v17213_v13 = vmax.f32 %v13617_v2, 0.0  ;;  %v17214_v27 = vmax.f32 %v13639_v31, 0.0  ;;  %v17215_v39 = vand.u32 2147483647, %v13858_v17  ;;  %v9764_v33 = vpop.eup %9763 }
 0x553   :  { %v4942_v16 = vmul.f32 %v9762_v3, %v4822_v18  ;;  %v4512_v0 = vadd.f32 1.0, %v4488_v21  ;;  %v9097_v15 = vpack.c.bf16 %v13873_v7, %v13862_v56  ;;  %v4650_v26 = vadd.f32 -0.72657603, %v4626_v10 }
 0x554   :  { %v4995_v44 = vsub.f32 %v17213_v13, %v13866_v28  ;;  %v5001_v46 = vsub.f32 %v17214_v27, %v13886_v14  ;;  %v4984_v23 = vmul.f32 %v4936_v9, %v17215_v39  ;;  %v4847_v51 = vmul.f32 %v14046_v60, %v14046_v60 }
 0x555   :  { %v14125_v52 = vadd.f32 1.0, %v4489_v20  ;;  %v17216_v28 = vmax.f32 %v13911_v55, 0.0  ;;  %v17217_v14 = vand.u32 2147483647, %v13958_v25  ;;  %v4559_v9 = vmul.f32 %v9764_v33, %v4511_v38 }
 0x556   :  { %v9095_v2 = vpack.c.bf16 %v5001_v46, %v4995_v44  ;;  %9767 = vrcp.f32 %v4512_v0  ;;  %v17218_v3 = vand.u32 2147483647, %v13924_v8  ;;  %v17219_v56 = vmax.f32 %v13658_v43, 0.0  ;;  %v9766_v5 = vpop.eup %9765 }
 0x557   :  { %v5004_v31 = vsub.f32 %v17216_v28, %v4980_v37  ;;  %v4990_v41 = vmul.f32 %v4942_v16, %v17217_v14  ;;  %v17220_v54 = vmax.f32 %v13699_v57, 0.0  ;;  %v9101_v55 = vpack.c.bf16 %v13928_v40, %v13899_v32 }
 0x558   :  { %v4981_v63 = vmul.f32 %v4933_v53, %v17218_v3  ;;  %9096 = vmatprep.subr.bf16.mxu1 %v9095_v2  ;;  %v5007_v7 = vsub.f32 %v17219_v56, %v13903_v47  ;;  %v17221_v25 = vmax.f32 %v13858_v17, 0.0  ;;  %v4583_v18 = vsub.f32 2.0, %v4559_v9  ;;  %v14187_v2 = vld [vmem:[%s16503_s1 + $0xa8] sm:$0xff] }
 0x559   :  { %v5013_v10 = vsub.f32 %v17220_v54, %v13998_v19  ;;  %v14145_v37 = vsub.f32 %v4966_v58, %v4990_v41  ;;  %9769 = vrcp.f32 %v14125_v52  ;;  %9098 = vmatpush1.bf16.msra.mxu1 %v9097_v15  ;;  %v4674_v43 = vmul.f32 %v4650_v26, %v14088_v35  ;;  %v17224_v58 = vld [vmem:[#allocation60_spill] sm:$0xff] }
 0x55a   :  { %v14143_v38 = vsub.f32 %v17221_v25, %v4984_v23  ;;  %v4871_v47 = vmul.f32 -0.5, %v4847_v51  ;;  %v4555_v21 = vmul.f32 %v9766_v5, %v4507_v12  ;;  %v14149_v19 = vmul.f32 %v9764_v33, %v4583_v18  ;;  %v17227_v23 = vld [vmem:[#allocation61_spill] sm:$0xff]  ;;  %v14203_v25 = vld [vmem:[%s16503_s1 + $0xb0] sm:$0xff] }
 0x55b   :  { %v9099_v57 = vpack.c.bf16 %v5013_v10, %v5007_v7  ;;  %v17222_v32 = vmax.f32 %v13711_v29, 0.0  ;;  %v17223_v17 = vmax.f32 %v13846_v62, 0.0  ;;  %v9105_v20 = vpack.c.bf16 %v14085_v22, %v17224_v58  ;;  %v14167_v29 = vld [vmem:[%s16503_s1 + $0xa0] sm:$0xff] }
 0x55c   :  { %v4579_v13 = vsub.f32 2.0, %v4555_v21  ;;  %v17225_v44 = vmax.f32 %v13850_v11, 0.0  ;;  %v5005_v12 = vsub.f32 %v4957_v59, %v4981_v63  ;;  %v9113_v46 = vpack.c.bf16 %v5004_v31, %v14096_v42  ;;  %v17226_v59 = vld [vmem:[#allocation55_spill] sm:$0xff] }
 0x55d   :  { %v4997_v40 = vsub.f32 %v17222_v32, %v14002_v1  ;;  %v5003_v53 = vsub.f32 %v17223_v17, %v4979_v48  ;;  %9100 = vmatprep.subr.bf16.mxu1 %v9099_v57  ;;  %v4631_v39 = vmul.f32 0.5307027, %v14149_v19  ;;  %v9109_v1 = vpack.c.bf16 %v14145_v37, %v14143_v38 }
 0x55e   :  { %v4999_v27 = vsub.f32 %v17225_v44, %v4975_v24  ;;  %9102 = vmatpush1.bf16.msra.mxu1 %v9101_v55  ;;  %v4698_v22 = vadd.f32 0.7107069, %v4674_v43  ;;  %v14171_v11 = vmul.f32 %v9766_v5, %v4579_v13  ;;  %v4769_v8 = vmul.f32 %v4745_v4, %v14014_v45 }
 0x55f   :  { %v9103_v62 = vpack.c.bf16 %v5003_v53, %v4997_v40  ;;  %v4842_v42 = vmul.f32 %v17226_v59, %v17226_v59  ;;  %v4655_v24 = vadd.f32 -0.72657603, %v4631_v39  ;;  %9771 = vpow2.f32 %v17227_v23 }
 0x560   :  { %v9111_v48 = vpack.c.bf16 %v5005_v12, %v4999_v27  ;;  %v4916_v16 = vmul.f32 1.442695, %v4871_v47  ;;  %v4627_v15 = vmul.f32 0.5307027, %v14171_v11  ;;  %v9768_v33 = vpop.eup %9767  ;;  %v4843_v4 = vmul.f32 %v14050_v36, %v14050_v36 }
 0x561   :  { %9104 = vmatprep.subr.bf16.mxu0 %v9103_v62  ;;  %8903 = vmatmul.mubr.msk.f32.vlgmr.msra.gmra.mrb[60].mxu1 %vm887_vm0, %v14167_v29  ;;  %v4679_v26 = vmul.f32 %v4655_v24, %v14149_v19  ;;  %v17228_v51 = vmov 0.0   ;;  %v4722_v28 = vmul.f32 %v4698_v22, %v14088_v35  ;;  %v4560_v14 = vmul.f32 %v9768_v33, %v4512_v0 }
 0x562   :  { %9106 = vmatpush1.bf16.msra.mxu0 %v9105_v20  ;;  %5120 = vmatprep.mubr.f32.mxu1 %v17228_v51  ;;  %v4651_v31 = vadd.f32 -0.72657603, %v4627_v15  ;;  %v4793_v9 = vadd.f32 0.1274148, %v4769_v8  ;;  %v4866_v3 = vmul.f32 -0.5, %v4842_v42  ;;  %v4848_v56 = vmul.f32 %v14081_v6, %v14081_v6 }
 0x563   :  { %9112 = vmatprep.subr.bf16.mxu1 %v9111_v48  ;;  %v9770_v41 = vpop.eup %9769  ;;  %v4703_v63 = vadd.f32 0.7107069, %v4679_v26  ;;  %9773 = vpow2.f32 %v4916_v16  ;;  %v4584_v54 = vsub.f32 2.0, %v4560_v14  ;;  %v4867_v0 = vmul.f32 -0.5, %v4843_v4 }
 0x564   :  { %9114 = vmatpush1.bf16.msra.mxu1 %v9113_v46  ;;  %v4675_v7 = vmul.f32 %v4651_v31, %v14171_v11  ;;  %v4561_v10 = vmul.f32 %v9770_v41, %v14125_v52  ;;  %v4849_v5 = vmul.f32 %v14092_v34, %v14092_v34  ;;  %v4746_v18 = vadd.f32 -0.14224836, %v4722_v28  ;;  %v17229_v31 = vld [vmem:[#allocation59_spill] sm:$0xff] }
 0x565   :  { %8904 = vmatmul.mubr.msk.f32.gmra.mrb[62].mxu1 %vm887_vm0, %v14187_v2  ;;  %v4727_v55 = vmul.f32 %v4703_v63, %v14149_v19  ;;  %v4608_v47 = vmul.f32 %v9768_v33, %v4584_v54  ;;  %v4817_v21 = vmul.f32 %v4793_v9, %v14014_v45  ;;  %v4906_v57 = vmul.f32 1.442695, %v4866_v3  ;;  %v14214_v45 = vld [vmem:[%s16503_s1 + $0xb8] sm:$0xff] }
 0x566   :  { %5126 = vmatprep.mubr.f32.mxu1 %v17228_v51  ;;  %v4699_v43 = vadd.f32 0.7107069, %v4675_v7  ;;  %v4585_v52 = vsub.f32 2.0, %v4561_v10  ;;  %v4872_v40 = vmul.f32 -0.5, %v4848_v56  ;;  %v4908_v13 = vmul.f32 1.442695, %v4867_v0 }
 0x567   :  { %v4751_v32 = vadd.f32 -0.14224836, %v4727_v55  ;;  %v4632_v53 = vmul.f32 0.5307027, %v4608_v47  ;;  %v4873_v44 = vmul.f32 -0.5, %v4849_v5  ;;  %v4770_v12 = vmul.f32 %v4746_v18, %v14088_v35 }
 0x568   :  { %v4723_v17 = vmul.f32 %v4699_v43, %v14171_v11  ;;  %v4609_v58 = vmul.f32 %v9770_v41, %v4585_v52  ;;  %9775 = vpow2.f32 %v4906_v57  ;;  %v4918_v8 = vmul.f32 1.442695, %v4872_v40 }
 0x569   :  { %8905 = vmatmul.mubr.msk.f32.gmra.mrb[64].mxu1 %vm887_vm0, %v14203_v25  ;;  %v4775_v20 = vmul.f32 %v4751_v32, %v14149_v19  ;;  %v9772_v27 = vpop.eup %9771  ;;  %v4656_v39 = vadd.f32 -0.72657603, %v4632_v53  ;;  %9777 = vpow2.f32 %v4908_v13  ;;  %v4920_v15 = vmul.f32 1.442695, %v4873_v44  ;;  %v17231_v44 = vld [vmem:[#allocation49_spill] sm:$0xff] }
 0x56a   :  { %5132 = vmatprep.mubr.f32.mxu1 %v17228_v51  ;;  %v4747_v46 = vadd.f32 -0.14224836, %v4723_v17  ;;  %v4633_v62 = vmul.f32 0.5307027, %v4609_v58  ;;  %v4937_v22 = vmul.f32 %v9772_v27, %v4817_v21  ;;  %v4794_v26 = vadd.f32 0.1274148, %v4770_v12 }
 0x56b   :  { %v4799_v48 = vadd.f32 0.1274148, %v4775_v20  ;;  %v4680_v24 = vmul.f32 %v4656_v39, %v4608_v47  ;;  %v17230_v14 = vand.u32 2147483647, %v17229_v31  ;;  %9779 = vpow2.f32 %v4918_v8  ;;  %v17232_v27 = vld [vmem:[#allocation13_spill] sm:$0xff] }
 0x56c   :  { %v4771_v42 = vmul.f32 %v4747_v46, %v14171_v11  ;;  %v4657_v23 = vadd.f32 -0.72657603, %v4633_v62  ;;  %v4961_v7 = vmax.f32 %v17229_v31, 0.0  ;;  %9781 = vpow2.f32 %v4920_v15  ;;  %v17235_v8 = vld [vmem:[#allocation29_spill] sm:$0xff]  ;;  %v17242_v31 = vld [vmem:[#allocation32_spill] sm:$0xff] }
 0x56d   :  { %8906 = vmatmul.mubr.msk.f32.gmra.mrb[66].mxu1 %vm887_vm0, %v14214_v45  ;;  %v4823_v16 = vmul.f32 %v4799_v48, %v14149_v19  ;;  %v9774_v33 = vpop.eup %9773  ;;  %v4704_v4 = vadd.f32 0.7107069, %v4680_v24  ;;  %v4985_v41 = vmul.f32 %v4937_v22, %v17230_v14  ;;  %v4967_v19 = vmax.f32 %v14046_v60, 0.0  ;;  %v17244_v14 = vld [vmem:[#allocation21_spill] sm:$0xff] }
 0x56e   :  { %5292 = vmatprep.mubr.f32.mxu1 %v17228_v51  ;;  %v4681_v28 = vmul.f32 %v4657_v23, %v4609_v58  ;;  %v4795_v3 = vadd.f32 0.1274148, %v4771_v42  ;;  %v4818_v10 = vmul.f32 %v4794_v26, %v14088_v35  ;;  %v17234_v12 = vand.u32 2147483647, %v17226_v59  ;;  %v17236_v42 = vld [vmem:[#allocation16_spill] sm:$0xff]  ;;  %v17239_v23 = vld [vmem:[#allocation47_spill] sm:$0xff] }
 0x56f   :  { %v4943_v9 = vmul.f32 %v9774_v33, %v4823_v16  ;;  %v4728_v63 = vmul.f32 %v4704_v4, %v4608_v47  ;;  %v5009_v5 = vsub.f32 %v4961_v7, %v4985_v41  ;;  %v4962_v48 = vmax.f32 %v17226_v59, 0.0  ;;  %v17245_v41 = vld [vmem:[#allocation22_spill] sm:$0xff]  ;;  %v17250_v7 = vld [vmem:[#allocation51_spill] sm:$0xff] }
 0x570   :  { %v4705_v56 = vadd.f32 0.7107069, %v4681_v28  ;;  %v4819_v43 = vmul.f32 %v4795_v3, %v14171_v11  ;;  %v17233_v11 = vpack.c.bf16 %v17231_v44, %v17232_v27  ;;  %v4968_v37 = vmax.f32 %v14081_v6, 0.0  ;;  %v17241_v28 = vld [vmem:[#allocation48_spill] sm:$0xff]  ;;  %v17271_v44 = vld [vmem:[#allocation11_spill] sm:$0xff]  ;;  %v17272_v27 = vld [vmem:[#allocation30_spill] sm:$0xff] }
 0x571   :  { %v4991_v54 = vmul.f32 %v4943_v9, %v4463_v30  ;;  %v4752_v55 = vadd.f32 -0.14224836, %v4728_v63  ;;  %v17237_v24 = vpack.c.bf16 %v17235_v8, %v17236_v42  ;;  %v4963_v59 = vmax.f32 %v14050_v36, 0.0  ;;  %v17286_v42 = vld [vmem:[#allocation20_spill] sm:$0xff] }
 0x572   :  { %v4729_v0 = vmul.f32 %v4705_v56, %v4609_v58  ;;  %v9776_v57 = vpop.eup %9775  ;;  %v4969_v33 = vmax.f32 %v14092_v34, 0.0  ;;  %v17243_v36 = vpack.c.bf16 %v17241_v28, %v17242_v31  ;;  %v17246_v9 = vpack.c.bf16 %v17244_v14, %v17245_v41  ;;  %v17247_v34 = vld [vmem:[#allocation31_spill] sm:$0xff]  ;;  %v8747_v56 = vld [vmem:[%s16503_s1 + $0xe0] sm:$0xff] }
 0x573   :  { %v5015_v18 = vsub.f32 %v4967_v19, %v4991_v54  ;;  %v4776_v52 = vmul.f32 %v4752_v55, %v4608_v47  ;;  %v4938_v40 = vmul.f32 %v9776_v57, %v4818_v10  ;;  %v9778_v20 = vpop.eup %9777  ;;  %v17251_v19 = vld [vmem:[#allocation52_spill] sm:$0xff]  ;;  %v17253_v10 = vld [vmem:[#allocation41_spill] sm:$0xff]  ;;  %v8745_v41 = vld [vmem:[%s16503_s1 + $0xd0] sm:$0xff] }
 0x574   :  { %v4753_v21 = vadd.f32 -0.14224836, %v4729_v0  ;;  %v4939_v60 = vmul.f32 %v9778_v20, %v4819_v43  ;;  %v17252_v54 = vpack.c.bf16 %v17250_v7, %v17251_v19  ;;  %v17254_v55 = vld [vmem:[#allocation53_spill] sm:$0xff]  ;;  %v17259_v43 = vld [vmem:[#allocation50_spill] sm:$0xff]  ;;  %v14413_v7 = vpop.permute.xlu1 %5025  ;;  %v14415_v19 = vpop.permute.xlu0 %5020 }
 0x575   :  { %v9107_v32 = vpack.c.bf16 %v5015_v18, %v5009_v5  ;;  %v4800_v17 = vadd.f32 0.1274148, %v4776_v52  ;;  %v9780_v35 = vpop.eup %9779  ;;  %v4986_v46 = vmul.f32 %v4938_v40, %v17234_v12  ;;  %v17255_v0 = vpack.c.bf16 %v17253_v10, %v17254_v55  ;;  %v17257_v5 = vld [vmem:[#allocation19_spill] sm:$0xff]  ;;  %v8748_v57 = vld [vmem:[%s16503_s1 + $0xe8] sm:$0xff] }
 0x576   :  { %v4777_v53 = vmul.f32 %v4753_v21, %v4609_v58  ;;  %v9782_v22 = vpop.eup %9781  ;;  %v4987_v38 = vmul.f32 %v4939_v60, %v4459_v49  ;;  %v17260_v52 = vld [vmem:[#allocation23_spill] sm:$0xff]  ;;  %v17263_v40 = vld [vmem:[#allocation42_spill] sm:$0xff]  ;;  %v17274_v12 = vld [vmem:[#allocation17_spill] sm:$0xff] }
 0x577   :  { %9108 = vmatprep.subr.bf16.mxu0 %v9107_v32  ;;  %v4824_v30 = vmul.f32 %v4800_v17, %v4608_v47  ;;  %v5010_v15 = vsub.f32 %v4962_v48, %v4986_v46  ;;  %v17261_v21 = vpack.c.bf16 %v17259_v43, %v17260_v52  ;;  %v17262_v32 = vld [vmem:[#allocation9_spill] sm:$0xff]  ;;  %v17268_v60 = vld [vmem:[#allocation27_spill] sm:$0xff]  ;;  %v17275_v46 = vld [vmem:[#allocation8_spill] sm:$0xff] }
 0x578   :  { %v4801_v13 = vadd.f32 0.1274148, %v4777_v53  ;;  %9110 = vmatpush1.bf16.msra.mxu0 %v9109_v1  ;;  %v17264_v17 = vpack.c.bf16 %v17262_v32, %v17263_v40  ;;  %v17265_v53 = vld [vmem:[#allocation14_spill] sm:$0xff]  ;;  %v17298_v31 = vld [vmem:[#allocation45_spill] sm:$0xff]  ;;  %v14423_v32 = vpop.permute.xlu0 %5030 }
 0x579   :  { %9120 = vmatprep.subr.bf16.mxu0 %v17233_v11  ;;  %v4944_v39 = vmul.f32 %v9780_v35, %v4824_v30  ;;  %v17269_v30 = vld [vmem:[#allocation54_spill] sm:$0xff]  ;;  %v17273_v11 = vpack.c.bf16 %v17271_v44, %v17272_v27 }
 0x57a   :  { %v4825_v62 = vmul.f32 %v4801_v13, %v4609_v58  ;;  %v17238_v58 = vld [vmem:[#allocation39_spill] sm:$0xff]  ;;  %v17270_v13 = vpack.c.bf16 %v17268_v60, %v17269_v30  ;;  %v17280_v48 = vld [vmem:[#allocation6_spill] sm:$0xff] }
 0x57b   :  { %8907 = vmatmul.mubr.msk.f32.vlgmr.msra.gmra.mrb[60].mxu0 %vm887_vm0, %v14167_v29  ;;  %v4992_v1 = vmul.f32 %v4944_v39, %v4464_v50  ;;  %v17240_v16 = vpack.c.bf16 %v17238_v58, %v17239_v23  ;;  %v5011_v50 = vsub.f32 %v4963_v59, %v4987_v38  ;;  %v8749_v35 = vld [vmem:[%s16503_s1 + $0xf0] sm:$0xff]  ;;  %v17276_v39 = vpack.c.bf16 %v17274_v12, %v17275_v46  ;;  %v17281_v38 = vld [vmem:[#allocation37_spill] sm:$0xff]  ;;  %v17289_v58 = vld [vmem:[#allocation12_spill] sm:$0xff] }
 0x57c   :  { %v4945_v47 = vmul.f32 %v9782_v22, %v4825_v62  ;;  %9122 = vmatpush1.bf16.msra.mxu0 %v17237_v24  ;;  %5209 = vmatprep.mubr.f32.mxu0 %v17228_v51  ;;  %v17278_v62 = vld [vmem:[#allocation34_spill] sm:$0xff]  ;;  %v17290_v23 = vld [vmem:[#allocation35_spill] sm:$0xff] }
 0x57d   :  { %9124 = vmatprep.subr.bf16.mxu0 %v17240_v16  ;;  %v5016_v49 = vsub.f32 %v4968_v37, %v4992_v1  ;;  %v17282_v37 = vpack.c.bf16 %v17280_v48, %v17281_v38  ;;  %v17283_v1 = vld [vmem:[#allocation7_spill] sm:$0xff]  ;;  %v17287_v24 = vld [vmem:[#allocation26_spill] sm:$0xff]  ;;  %v17291_v16 = vpack.c.bf16 %v17289_v58, %v17290_v23 }
 0x57e   :  { %v4993_v6 = vmul.f32 %v4945_v47, %v4465_v61  ;;  %v17248_v61 = vld [vmem:[#allocation25_spill] sm:$0xff]  ;;  %v17284_v47 = vld [vmem:[#allocation18_spill] sm:$0xff]  ;;  %v17288_v59 = vpack.c.bf16 %v17286_v42, %v17287_v24  ;;  %v8754_v46 = vld [vmem:[%s16503_s1 + $0x118] sm:$0xff] }
 0x57f   :  { %8908 = vmatmul.mubr.msk.f32.gmra.mrb[62].mxu0 %vm887_vm0, %v14187_v2  ;;  %v9117_v4 = vpack.c.bf16 %v5016_v49, %v5010_v15  ;;  %v17249_v63 = vpack.c.bf16 %v17247_v34, %v17248_v61  ;;  %v17285_v8 = vpack.c.bf16 %v17283_v1, %v17284_v47  ;;  %v17292_v15 = vld [vmem:[#allocation43_spill] sm:$0xff]  ;;  %v14440_v44 = vld [vmem:[%s16503_s1 + $0x108] sm:$0xff] }
 0x580   :  { %v5017_v26 = vsub.f32 %v4969_v33, %v4993_v6  ;;  %9126 = vmatpush1.bf16.msra.mxu0 %v17243_v36  ;;  %5215 = vmatprep.mubr.f32.mxu0 %v17228_v51  ;;  %v17293_v49 = vld [vmem:[#allocation15_spill] sm:$0xff]  ;;  %v8743_v6 = vld [vmem:[%s16503_s1 + $0xc0] sm:$0xff] }
 0x581   :  { %9136 = vmatprep.subr.bf16.mxu0 %v17246_v9  ;;  %v17294_v33 = vpack.c.bf16 %v17292_v15, %v17293_v49  ;;  %v17299_v36 = vld [vmem:[#allocation40_spill] sm:$0xff] }
 0x582   :  { %v9115_v3 = vpack.c.bf16 %v5017_v26, %v5011_v50  ;;  %v8744_v50 = vld [vmem:[%s16503_s1 + $0xc8] sm:$0xff]  ;;  %v17300_v14 = vpack.c.bf16 %v17298_v31, %v17299_v36  ;;  %v17301_v9 = vld [vmem:[#allocation44_spill] sm:$0xff] }
 0x583   :  { %8909 = vmatmul.mubr.msk.f32.gmra.mrb[64].mxu0 %vm887_vm0, %v14203_v25  ;;  %v17295_v26 = vld [vmem:[#allocation38_spill] sm:$0xff]  ;;  %v8746_v61 = vld [vmem:[%s16503_s1 + $0xd8] sm:$0xff] }
 0x584   :  { %9116 = vmatprep.subr.bf16.mxu1 %v9115_v3  ;;  %5221 = vmatprep.mubr.f32.mxu0 %v17228_v51  ;;  %v17302_v3 = vld [vmem:[#allocation46_spill] sm:$0xff] }
 0x585   :  { %9118 = vmatpush1.bf16.msra.mxu1 %v9117_v4  ;;  %v17296_v4 = vld [vmem:[#allocation10_spill] sm:$0xff]  ;;  %v17303_v34 = vpack.c.bf16 %v17301_v9, %v17302_v3 }
 0x586   :  { %9128 = vmatprep.subr.bf16.mxu1 %v17249_v63  ;;  %v17297_v28 = vpack.c.bf16 %v17295_v26, %v17296_v4 }
 0x587   :  { %8910 = vmatmul.mubr.msk.f32.gmra.mrb[66].mxu0 %vm887_vm0, %v14214_v45 }
 0x588   :  { %8911 = vmatmul.mubr.msk.f32.vlgmr.msra.gmra.mrb[68].mxu1 %vm887_vm0, %v14167_v29  ;;  %5393 = vmatprep.mubr.f32.mxu0 %v17228_v51  ;;  %v17256_v29 = vld [vmem:[#allocation33_spill] sm:$0xff] }
 0x589   :  { %9130 = vmatpush1.bf16.msra.mxu1 %v17252_v54  ;;  %5298 = vmatprep.mubr.f32.mxu1 %v17228_v51  ;;  %v17258_v18 = vpack.c.bf16 %v17256_v29, %v17257_v5 }
 0x58a   :  { %9132 = vmatprep.subr.bf16.mxu1 %v17255_v0 }
 0x58b   :  { %8915 = vmatmul.mubr.msk.f32.vlgmr.msra.gmra.mrb[68].mxu0 %vm887_vm0, %v8747_v56 }
 0x58c   :  { %8912 = vmatmul.mubr.msk.f32.gmra.mrb[70].mxu1 %vm887_vm0, %v14187_v2  ;;  %9138 = vmatpush1.bf16.msra.mxu0 %v17258_v18  ;;  %v17266_v2 = vld [vmem:[#allocation36_spill] sm:$0xff] }
 0x58d   :  { %9134 = vmatpush1.bf16.msra.mxu1 %v17261_v21  ;;  %5304 = vmatprep.mubr.f32.mxu1 %v17228_v51  ;;  %v17267_v20 = vpack.c.bf16 %v17265_v53, %v17266_v2 }
 0x58e   :  { %9152 = vmatprep.subr.bf16.mxu1 %v17264_v17  ;;  %5399 = vmatprep.mubr.f32.mxu0 %v17228_v51 }
 0x58f   :  { %9140 = vmatprep.subr.bf16.mxu0 %v17267_v20  ;;  %8916 = vmatmul.mubr.msk.f32.gmra.mrb[70].mxu0 %vm887_vm0, %v8748_v57 }
 0x590   :  { %8913 = vmatmul.mubr.msk.f32.gmra.mrb[72].mxu1 %vm887_vm0, %v14203_v25  ;;  %9142 = vmatpush1.bf16.msra.mxu0 %v17270_v13  ;;  %v8750_v25 = vld [vmem:[%s16503_s1 + $0xf8] sm:$0xff] }
 0x591   :  { %5310 = vmatprep.mubr.f32.mxu1 %v17228_v51  ;;  %9144 = vmatprep.subr.bf16.mxu0 %v17273_v11  ;;  %v14448_v11 = vld [vmem:[%s16503_s1 + $0x110] sm:$0xff] }
 0x592   :  { %5405 = vmatprep.mubr.f32.mxu0 %v17228_v51 }
 0x593   :  { %8917 = vmatmul.mubr.msk.f32.gmra.mrb[72].mxu0 %vm887_vm0, %v8749_v35 }
 0x594   :  { %8914 = vmatmul.mubr.msk.f32.gmra.mrb[74].mxu1 %vm887_vm0, %v14214_v45  ;;  %5411 = vmatprep.mubr.f32.mxu0 %v17228_v51  ;;  %v17277_v45 = vld [vmem:[#allocation24_spill] sm:$0xff] }
 0x595   :  { %5482 = vmatprep.mubr.f32.mxu1 %v17228_v51  ;;  %v17279_v22 = vpack.c.bf16 %v17277_v45, %v17278_v62 }
 0x597   :  { %8918 = vmatmul.mubr.msk.f32.gmra.mrb[74].mxu0 %vm887_vm0, %v8750_v25 }
 0x598   :  { %8919 = vmatmul.mubr.msk.f32.vlgmr.msra.gmra.mrb[76].mxu1 %vm887_vm0, %v8747_v56  ;;  %5571 = vmatprep.mubr.f32.mxu0 %v17228_v51 }
 0x599   :  { %9154 = vmatpush1.bf16.msra.mxu1 %v17276_v39  ;;  %5488 = vmatprep.mubr.f32.mxu1 %v17228_v51 }
 0x59a   :  { %9156 = vmatprep.subr.bf16.mxu1 %v17279_v22 }
 0x59b   :  { %8923 = vmatmul.mubr.msk.f32.vlgmr.msra.gmra.mrb[76].mxu0 %vm887_vm0, %v8747_v56 }
 0x59c   :  { %8920 = vmatmul.mubr.msk.f32.gmra.mrb[78].mxu1 %vm887_vm0, %v8748_v57  ;;  %9146 = vmatpush1.bf16.msra.mxu0 %v17285_v8 }
 0x59d   :  { %9158 = vmatpush1.bf16.msra.mxu1 %v17282_v37  ;;  %9148 = vmatprep.subr.bf16.mxu0 %v17288_v59 }
 0x59e   :  { %5577 = vmatprep.mubr.f32.mxu0 %v17228_v51  ;;  %5494 = vmatprep.mubr.f32.mxu1 %v17228_v51 }
 0x59f   :  { %8924 = vmatmul.mubr.msk.f32.gmra.mrb[78].mxu0 %vm887_vm0, %v8748_v57  ;;  %v14421_v57 = vpop.permute.xlu1 %5035 }
 0x5a0   :  { %8921 = vmatmul.mubr.msk.f32.gmra.mrb[80].mxu1 %vm887_vm0, %v8749_v35  ;;  %9150 = vmatpush1.bf16.msra.mxu0 %v17291_v16 }
 0x5a1   :  { %5583 = vmatprep.mubr.f32.mxu0 %v17228_v51  ;;  %9160 = vmatprep.subr.bf16.mxu0 %v17294_v33 }
 0x5a2   :  { %5500 = vmatprep.mubr.f32.mxu1 %v17228_v51 }
 0x5a3   :  { %8925 = vmatmul.mubr.msk.f32.gmra.mrb[80].mxu0 %vm887_vm0, %v8749_v35  ;;  %v14432_v35 = vld [vmem:[%s16503_s1 + $0x100] sm:$0xff] }
 0x5a4   :  { %8922 = vmatmul.mubr.msk.f32.gmra.mrb[82].mxu1 %vm887_vm0, %v8750_v25  ;;  %5589 = vmatprep.mubr.f32.mxu0 %v17228_v51 }
 0x5a5   :  { %5761 = vmatprep.mubr.f32.mxu1 %v17228_v51 }
 0x5a7   :  { %8926 = vmatmul.mubr.msk.f32.gmra.mrb[82].mxu0 %vm887_vm0, %v8750_v25 }
 0x5a8   :  { %8931 = vmatmul.mubr.msk.f32.vlgmr.msra.gmra.mrb[76].mxu1 %vm887_vm0, %v8743_v6  ;;  %5672 = vmatprep.mubr.f32.mxu0 %v17228_v51 }
 0x5a9   :  { %5767 = vmatprep.mubr.f32.mxu1 %v17228_v51 }
 0x5ab   :  { %8927 = vmatmul.mubr.msk.f32.vlgmr.msra.gmra.mrb[68].mxu0 %vm887_vm0, %v8743_v6 }
 0x5ac   :  { %8932 = vmatmul.mubr.msk.f32.gmra.mrb[78].mxu1 %vm887_vm0, %v8744_v50  ;;  %9162 = vmatpush1.bf16.msra.mxu0 %v17297_v28 }
 0x5ad   :  { %5678 = vmatprep.mubr.f32.mxu0 %v17228_v51  ;;  %9164 = vmatprep.subr.bf16.mxu0 %v17300_v14 }
 0x5ae   :  { %5773 = vmatprep.mubr.f32.mxu1 %v17228_v51 }
 0x5af   :  { %8928 = vmatmul.mubr.msk.f32.gmra.mrb[70].mxu0 %vm887_vm0, %v8744_v50 }
 0x5b0   :  { %8933 = vmatmul.mubr.msk.f32.gmra.mrb[80].mxu1 %vm887_vm0, %v8745_v41  ;;  %9166 = vmatpush1.bf16.msra.mxu0 %v17303_v34 }
 0x5b1   :  { %5684 = vmatprep.mubr.f32.mxu0 %v17228_v51  ;;  %5779 = vmatprep.mubr.f32.mxu1 %v17228_v51 }
 0x5b3   :  { %8929 = vmatmul.mubr.msk.f32.gmra.mrb[72].mxu0 %vm887_vm0, %v8745_v41 }
 0x5b4   :  { %5690 = vmatprep.mubr.f32.mxu0 %v17228_v51  ;;  %8934 = vmatmul.mubr.msk.f32.gmra.mrb[82].mxu1 %vm887_vm0, %v8746_v61 }
 0x5b5   :  { %6040 = vmatprep.mubr.f32.mxu1 %v17228_v51 }
 0x5b7   :  { %8930 = vmatmul.mubr.msk.f32.gmra.mrb[74].mxu0 %vm887_vm0, %v8746_v61 }
 0x5b8   :  { %5850 = vmatprep.mubr.f32.mxu0 %v17228_v51 }
 0x5bb   :  { %8935 = vmatmul.mubr.msk.f32.vlgmr.msra.gmra.mrb[76].mxu0 %vm887_vm0, %v8743_v6 }
 0x5bc   :  { %5856 = vmatprep.mubr.f32.mxu0 %v17228_v51 }
 0x5bf   :  { %8936 = vmatmul.mubr.msk.f32.gmra.mrb[78].mxu0 %vm887_vm0, %v8744_v50 }
 0x5c0   :  { %5862 = vmatprep.mubr.f32.mxu0 %v17228_v51 }
 0x5c3   :  { %8937 = vmatmul.mubr.msk.f32.gmra.mrb[80].mxu0 %vm887_vm0, %v8745_v41 }
 0x5c4   :  { %5868 = vmatprep.mubr.f32.mxu0 %v17228_v51 }
 0x5c7   :  { %8938 = vmatmul.mubr.msk.f32.gmra.mrb[82].mxu0 %vm887_vm0, %v8746_v61 }
 0x5c8   :  { %5951 = vmatprep.mubr.f32.mxu0 %v17228_v51 }
 0x634   :  { %v5116_v63 = vpop.f32.mrb[60].mxu1 }
 0x635   :  { %v5118_v56 = vpop.f32.mrb[61].mxu1  ;;  %v5117_v10 = vadd.f32 %v5116_v63, %v14415_v19 }
 0x636   :  { %v5119_v29 = vadd.f32 %v5118_v56, %v14415_v19 }
 0x638   :  { %v5122_v54 = vpop.f32.mrb[62].mxu1 }
 0x639   :  { %v5123_v55 = vadd.f32 %v5122_v54, %v14413_v7  ;;  %v5124_v0 = vpop.f32.mrb[63].mxu1 }
 0x63a   :  { %v5125_v5 = vadd.f32 %v5124_v0, %v14413_v7 }
 0x63b   :  { %v9169_v18 = vpack.c.bf16 %v5123_v55, %v5117_v10  ;;  %v14496_v10 = vpop.permute.xlu0 %6180 }
 0x63c   :  { %v9167_v43 = vpack.c.bf16 %v5125_v5, %v5119_v29  ;;  %v5128_v52 = vpop.f32.mrb[64].mxu1 }
 0x63d   :  { %v5130_v21 = vpop.f32.mrb[65].mxu1  ;;  %v5129_v17 = vadd.f32 %v5128_v52, %v14423_v32 }
 0x63e   :  { %9168 = vmatprep.subr.bf16.mxu0 %v9167_v43  ;;  %v5131_v20 = vadd.f32 %v5130_v21, %v14423_v32  ;;  %v14505_v43 = vpop.permute.xlu1 %6185 }
 0x63f   :  { %9170 = vmatpush1.bf16.msra.mxu0 %v9169_v18 }
 0x640   :  { %v5134_v40 = vpop.f32.mrb[66].mxu1 }
 0x641   :  { %v5135_v53 = vadd.f32 %v5134_v40, %v14421_v57  ;;  %v5136_v2 = vpop.f32.mrb[67].mxu1 }
 0x642   :  { %v5137_v60 = vadd.f32 %v5136_v2, %v14421_v57 }
 0x643   :  { %v9173_v30 = vpack.c.bf16 %v5135_v53, %v5129_v17 }
 0x644   :  { %v9171_v13 = vpack.c.bf16 %v5137_v60, %v5131_v20 }
 0x646   :  { %9172 = vmatprep.subr.bf16.mxu0 %v9171_v13  ;;  %v14520_v13 = vpop.permute.xlu0 %6190 }
 0x647   :  { %9174 = vmatpush1.bf16.msra.mxu0 %v9173_v30 }
 0x64a   :  { %8939 = vmatmul.mubr.msk.f32.vlgmr.msra.gmra.mrb[68].mxu0 %vm887_vm0, %v14432_v35 }
 0x64b   :  { %5957 = vmatprep.mubr.f32.mxu0 %v17228_v51 }
 0x64e   :  { %8940 = vmatmul.mubr.msk.f32.gmra.mrb[70].mxu0 %vm887_vm0, %v14440_v44  ;;  %v5205_v27 = vpop.f32.mrb[60].mxu0 }
 0x64f   :  { %5963 = vmatprep.mubr.f32.mxu0 %v17228_v51  ;;  %v5207_v25 = vpop.f32.mrb[61].mxu0  ;;  %v5206_v39 = vadd.f32 %v5205_v27, %v14415_v19 }
 0x650   :  { %v5208_v22 = vadd.f32 %v5207_v25, %v14415_v19 }
 0x652   :  { %8941 = vmatmul.mubr.msk.f32.gmra.mrb[72].mxu0 %vm887_vm0, %v14448_v11  ;;  %v5211_v12 = vpop.f32.mrb[62].mxu0 }
 0x653   :  { %5969 = vmatprep.mubr.f32.mxu0 %v17228_v51  ;;  %v5212_v45 = vadd.f32 %v5211_v12, %v14413_v7  ;;  %v5213_v62 = vpop.f32.mrb[63].mxu0 }
 0x654   :  { %v5214_v48 = vadd.f32 %v5213_v62, %v14413_v7  ;;  %v14530_v62 = vpop.permute.xlu1 %6195 }
 0x655   :  { %v9177_v38 = vpack.c.bf16 %v5212_v45, %v5206_v39 }
 0x656   :  { %8942 = vmatmul.mubr.msk.f32.gmra.mrb[74].mxu0 %vm887_vm0, %v8754_v46  ;;  %v9175_v37 = vpack.c.bf16 %v5214_v48, %v5208_v22  ;;  %v5217_v1 = vpop.f32.mrb[64].mxu0 }
 0x657   :  { %6129 = vmatprep.mubr.f32.mxu0 %v17228_v51  ;;  %v5219_v47 = vpop.f32.mrb[65].mxu0  ;;  %v5218_v24 = vadd.f32 %v5217_v1, %v14423_v32 }
 0x658   :  { %9176 = vmatprep.subr.bf16.mxu1 %v9175_v37  ;;  %v5220_v16 = vadd.f32 %v5219_v47, %v14423_v32 }
 0x659   :  { %9178 = vmatpush1.bf16.msra.mxu1 %v9177_v38 }
 0x65a   :  { %v5223_v8 = vpop.f32.mrb[66].mxu0 }
 0x65b   :  { %v5294_v42 = vpop.f32.mrb[68].mxu1  ;;  %v5224_v59 = vadd.f32 %v5223_v8, %v14421_v57  ;;  %v5225_v58 = vpop.f32.mrb[67].mxu0 }
 0x65c   :  { %v5296_v23 = vpop.f32.mrb[69].mxu1  ;;  %v5226_v15 = vadd.f32 %v5225_v58, %v14421_v57  ;;  %v5295_v50 = vadd.f32 %v5294_v42, %v14415_v19 }
 0x65d   :  { %v9181_v49 = vpack.c.bf16 %v5224_v59, %v5218_v24  ;;  %v5297_v28 = vadd.f32 %v5296_v23, %v14415_v19 }
 0x65e   :  { %v9179_v33 = vpack.c.bf16 %v5226_v15, %v5220_v16 }
 0x65f   :  { %v5300_v6 = vpop.f32.mrb[70].mxu1 }
 0x660   :  { %v5301_v26 = vadd.f32 %v5300_v6, %v14413_v7  ;;  %v5302_v4 = vpop.f32.mrb[71].mxu1  ;;  %9180 = vmatprep.subr.bf16.mxu1 %v9179_v33 }
 0x661   :  { %v5303_v31 = vadd.f32 %v5302_v4, %v14413_v7  ;;  %9182 = vmatpush1.bf16.msra.mxu1 %v9181_v49 }
 0x662   :  { %v9185_v36 = vpack.c.bf16 %v5301_v26, %v5295_v50 }
 0x663   :  { %v9183_v14 = vpack.c.bf16 %v5303_v31, %v5297_v28  ;;  %v5306_v41 = vpop.f32.mrb[72].mxu1 }
 0x664   :  { %v5308_v9 = vpop.f32.mrb[73].mxu1  ;;  %8943 = vmatmul.mubr.msk.f32.vlgmr.msra.gmra.mrb[76].mxu1 %vm887_vm0, %v14432_v35  ;;  %v5307_v34 = vadd.f32 %v5306_v41, %v14423_v32 }
 0x665   :  { %9184 = vmatprep.subr.bf16.mxu0 %v9183_v14  ;;  %6046 = vmatprep.mubr.f32.mxu1 %v17228_v51  ;;  %v5309_v56 = vadd.f32 %v5308_v9, %v14423_v32 }
 0x666   :  { %9186 = vmatpush1.bf16.msra.mxu0 %v9185_v36 }
 0x667   :  { %v5312_v3 = vpop.f32.mrb[74].mxu1 }
 0x668   :  { %v5313_v61 = vadd.f32 %v5312_v3, %v14421_v57  ;;  %v5314_v63 = vpop.f32.mrb[75].mxu1  ;;  %8944 = vmatmul.mubr.msk.f32.gmra.mrb[78].mxu1 %vm887_vm0, %v14440_v44 }
 0x669   :  { %v5315_v7 = vadd.f32 %v5314_v63, %v14421_v57  ;;  %6052 = vmatprep.mubr.f32.mxu1 %v17228_v51 }
 0x66a   :  { %v9189_v19 = vpack.c.bf16 %v5313_v61, %v5307_v34 }
 0x66b   :  { %v9187_v54 = vpack.c.bf16 %v5315_v7, %v5309_v56 }
 0x66c   :  { %8945 = vmatmul.mubr.msk.f32.gmra.mrb[80].mxu1 %vm887_vm0, %v14448_v11 }
 0x66d   :  { %9188 = vmatprep.subr.bf16.mxu0 %v9187_v54  ;;  %6058 = vmatprep.mubr.f32.mxu1 %v17228_v51 }
 0x66e   :  { %9190 = vmatpush1.bf16.msra.mxu0 %v9189_v19 }
 0x670   :  { %8946 = vmatmul.mubr.msk.f32.gmra.mrb[82].mxu1 %vm887_vm0, %v8754_v46 }
 0x671   :  { %8947 = vmatmul.mubr.msk.f32.vlgmr.msra.gmra.mrb[76].mxu0 %vm887_vm0, %v14432_v35  ;;  %6894 = vmatprep.mubr.f32.mxu1 %v17228_v51 }
 0x672   :  { %6135 = vmatprep.mubr.f32.mxu0 %v17228_v51 }
 0x675   :  { %8948 = vmatmul.mubr.msk.f32.gmra.mrb[78].mxu0 %vm887_vm0, %v14440_v44 }
 0x676   :  { %6141 = vmatprep.mubr.f32.mxu0 %v17228_v51 }
 0x679   :  { %8949 = vmatmul.mubr.msk.f32.gmra.mrb[80].mxu0 %vm887_vm0, %v14448_v11 }
 0x67a   :  { %6147 = vmatprep.mubr.f32.mxu0 %v17228_v51 }
 0x67d   :  { %8950 = vmatmul.mubr.msk.f32.gmra.mrb[82].mxu0 %vm887_vm0, %v8754_v46 }
 0x67e   :  { %7769 = vmatprep.mubr.f32.mxu0 %v17228_v51 }
 0x71d   :  { %v5953_v55 = vpop.f32.mrb[68].mxu0 }
 0x71e   :  { %v14499_v0 = vadd.f32 %v14496_v10, %v5953_v55  ;;  %v5955_v29 = vpop.f32.mrb[69].mxu0 }
 0x71f   :  { %v14502_v5 = vadd.f32 %v14496_v10, %v5955_v29 }
 0x720   :  { %v16751_v18 = vand.u32 2147483647, %v14499_v0  ;;  %v6606_v23 = vmul.f32 %v14499_v0, %v14499_v0 }
 0x721   :  { %v16749_v52 = vand.u32 2147483647, %v14502_v5  ;;  %v5959_v21 = vpop.f32.mrb[70].mxu0  ;;  %v6607_v16 = vmul.f32 %v14502_v5, %v14502_v5 }
 0x722   :  { %v6246_v57 = vmul.f32 0.23164189, %v16751_v18  ;;  %v14511_v32 = vadd.f32 %v14505_v43, %v5959_v21  ;;  %v5961_v40 = vpop.f32.mrb[71].mxu0  ;;  %v6630_v36 = vmul.f32 -0.5, %v6606_v23 }
 0x723   :  { %v6247_v17 = vmul.f32 0.23164189, %v16749_v52  ;;  %v14516_v53 = vadd.f32 %v14505_v43, %v5961_v40  ;;  %v6631_v14 = vmul.f32 -0.5, %v6607_v16 }
 0x724   :  { %v6270_v2 = vadd.f32 1.0, %v6246_v57  ;;  %v16750_v20 = vand.u32 2147483647, %v14511_v32  ;;  %v6612_v41 = vmul.f32 %v14511_v32, %v14511_v32  ;;  %v6654_v29 = vmul.f32 1.442695, %v6630_v36 }
 0x725   :  { %v6271_v60 = vadd.f32 1.0, %v6247_v17  ;;  %v16748_v30 = vand.u32 2147483647, %v14516_v53  ;;  %v5965_v44 = vpop.f32.mrb[72].mxu0  ;;  %v6656_v21 = vmul.f32 1.442695, %v6631_v14 }
 0x726   :  { %9783 = vrcp.f32 %v6270_v2  ;;  %v6252_v35 = vmul.f32 0.23164189, %v16750_v20  ;;  %v14527_v11 = vadd.f32 %v14520_v13, %v5965_v44  ;;  %v5967_v25 = vpop.f32.mrb[73].mxu0  ;;  %v6636_v57 = vmul.f32 -0.5, %v6612_v41 }
 0x727   :  { %v6253_v27 = vmul.f32 0.23164189, %v16748_v30  ;;  %9785 = vrcp.f32 %v6271_v60  ;;  %v14533_v22 = vadd.f32 %v14520_v13, %v5967_v25  ;;  %v6613_v25 = vmul.f32 %v14516_v53, %v14516_v53 }
 0x728   :  { %v6276_v12 = vadd.f32 1.0, %v6252_v35  ;;  %v16747_v39 = vand.u32 2147483647, %v14527_v11 }
 0x729   :  { %v6277_v46 = vadd.f32 1.0, %v6253_v27  ;;  %v5971_v45 = vpop.f32.mrb[74].mxu0  ;;  %17304 = vst [vmem:[#allocation28_spill] sm:$0xff] %v14533_v22  ;;  %v16745_v1 = vand.u32 2147483647, %v14533_v22 }
 0x72a   :  { %9787 = vrcp.f32 %v6276_v12  ;;  %v5973_v48 = vpop.f32.mrb[75].mxu0  ;;  %v6258_v38 = vmul.f32 0.23164189, %v16747_v39  ;;  %v14538_v37 = vadd.f32 %v14530_v62, %v5971_v45 }
 0x72b   :  { %9789 = vrcp.f32 %v6277_v46  ;;  %v6259_v42 = vmul.f32 0.23164189, %v16745_v1  ;;  %v14547_v59 = vadd.f32 %v14530_v62, %v5973_v48 }
 0x72c   :  { %v6282_v47 = vadd.f32 1.0, %v6258_v38  ;;  %v16746_v8 = vand.u32 2147483647, %v14538_v37 }
 0x72d   :  { %17305 = vst [vmem:[#allocation56_spill] sm:$0xff] %v14547_v59  ;;  %v6283_v15 = vadd.f32 1.0, %v6259_v42  ;;  %v16744_v6 = vand.u32 2147483647, %v14547_v59 }
 0x72e   :  { %9791 = vrcp.f32 %v6282_v47  ;;  %v6264_v24 = vmul.f32 0.23164189, %v16746_v8 }
 0x72f   :  { %9793 = vrcp.f32 %v6283_v15  ;;  %v6265_v28 = vmul.f32 0.23164189, %v16744_v6 }
 0x730   :  { %v9784_v58 = vpop.eup %9783  ;;  %v6288_v33 = vadd.f32 1.0, %v6264_v24 }
 0x731   :  { %v6318_v49 = vmul.f32 %v9784_v58, %v6270_v2  ;;  %v9786_v50 = vpop.eup %9785  ;;  %v14561_v56 = vadd.f32 1.0, %v6265_v28 }
 0x732   :  { %v6319_v4 = vmul.f32 %v9786_v50, %v6271_v60  ;;  %9795 = vrcp.f32 %v6288_v33 }
 0x733   :  { %v6342_v26 = vsub.f32 2.0, %v6318_v49  ;;  %9797 = vrcp.f32 %v14561_v56 }
 0x734   :  { %v9788_v31 = vpop.eup %9787  ;;  %v6343_v3 = vsub.f32 2.0, %v6319_v4  ;;  %9799 = vpow2.f32 %v6654_v29 }
 0x735   :  { %v14558_v9 = vmul.f32 %v9784_v58, %v6342_v26  ;;  %v6324_v34 = vmul.f32 %v9788_v31, %v6276_v12  ;;  %v9790_v61 = vpop.eup %9789 }
 0x736   :  { %v14564_v19 = vmul.f32 %v9786_v50, %v6343_v3  ;;  %v6325_v55 = vmul.f32 %v9790_v61, %v6277_v46 }
 0x737   :  { %v6390_v7 = vmul.f32 0.5307027, %v14558_v9  ;;  %v6348_v54 = vsub.f32 2.0, %v6324_v34  ;;  %v6042_v40 = vpop.f32.mrb[76].mxu1 }
 0x738   :  { %v9792_v17 = vpop.eup %9791  ;;  %v6391_v60 = vmul.f32 0.5307027, %v14564_v19  ;;  %v6349_v44 = vsub.f32 2.0, %v6325_v55  ;;  %v14569_v27 = vpop.f32.mrb[77].mxu1  ;;  %v14574_v45 = vadd.f32 %v14496_v10, %v6042_v40 }
 0x739   :  { %v6414_v2 = vadd.f32 -0.72657603, %v6390_v7  ;;  %v14567_v35 = vmul.f32 %v9788_v31, %v6348_v54  ;;  %v6330_v12 = vmul.f32 %v9792_v17, %v6282_v47  ;;  %v9794_v24 = vpop.eup %9793  ;;  %v6666_v31 = vmul.f32 1.442695, %v6636_v57 }
 0x73a   :  { %v6415_v48 = vadd.f32 -0.72657603, %v6391_v60  ;;  %v14579_v42 = vmul.f32 %v9790_v61, %v6349_v44  ;;  %v16743_v47 = vand.u32 2147483647, %v14574_v45  ;;  %v6331_v14 = vmul.f32 %v9794_v24, %v6283_v15 }
 0x73b   :  { %v6438_v46 = vmul.f32 %v6414_v2, %v14558_v9  ;;  %v6396_v38 = vmul.f32 0.5307027, %v14567_v35  ;;  %v6354_v16 = vsub.f32 2.0, %v6330_v12  ;;  %v14584_v49 = vpop.f32.mrb[78].mxu1  ;;  %v6637_v54 = vmul.f32 -0.5, %v6613_v25 }
 0x73c   :  { %v6397_v4 = vmul.f32 0.5307027, %v14579_v42  ;;  %v9796_v28 = vpop.eup %9795  ;;  %v6248_v41 = vmul.f32 0.23164189, %v16743_v47  ;;  %v14591_v3 = vpop.f32.mrb[79].mxu1  ;;  %v6439_v34 = vmul.f32 %v6415_v48, %v14564_v19  ;;  %v6355_v29 = vsub.f32 2.0, %v6331_v14 }
 0x73d   :  { %v6462_v50 = vadd.f32 0.7107069, %v6438_v46  ;;  %v6420_v26 = vadd.f32 -0.72657603, %v6396_v38  ;;  %v14587_v36 = vmul.f32 %v9792_v17, %v6354_v16  ;;  %v6336_v40 = vmul.f32 %v9796_v28, %v6288_v33 }
 0x73e   :  { %v6421_v7 = vadd.f32 -0.72657603, %v6397_v4  ;;  %v14596_v2 = vadd.f32 1.0, %v6248_v41  ;;  %v6618_v44 = vmul.f32 %v14527_v11, %v14527_v11  ;;  %v14606_v25 = vmul.f32 %v9794_v24, %v6355_v29 }
 0x73f   :  { %v6444_v61 = vmul.f32 %v6420_v26, %v14567_v35  ;;  %v6402_v55 = vmul.f32 0.5307027, %v14587_v36  ;;  %v14598_v57 = vpop.f32.mrb[80].mxu1  ;;  %v6486_v15 = vmul.f32 %v6462_v50, %v14558_v9  ;;  %v6360_v48 = vsub.f32 2.0, %v6336_v40  ;;  %v9798_v50 = vpop.eup %9797 }
 0x740   :  { %v6445_v60 = vmul.f32 %v6421_v7, %v14579_v42  ;;  %v14604_v12 = vpop.f32.mrb[81].mxu1  ;;  %9801 = vrcp.f32 %v14596_v2  ;;  %v6668_v33 = vmul.f32 1.442695, %v6637_v54  ;;  %v6463_v26 = vadd.f32 0.7107069, %v6439_v34 }
 0x741   :  { %v6468_v17 = vadd.f32 0.7107069, %v6444_v61  ;;  %v6426_v46 = vadd.f32 -0.72657603, %v6402_v55  ;;  %9803 = vpow2.f32 %v6656_v21  ;;  %v6403_v14 = vmul.f32 0.5307027, %v14606_v25 }
 0x742   :  { %v14613_v41 = vmul.f32 %v9796_v28, %v6360_v48  ;;  %v6510_v24 = vadd.f32 -0.14224836, %v6486_v15  ;;  %9805 = vpow2.f32 %v6666_v31  ;;  %v6642_v7 = vmul.f32 -0.5, %v6618_v44  ;;  %v14625_v28 = vpop.eup %9799 }
 0x743   :  { %v6450_v4 = vmul.f32 %v6426_v46, %v14587_v36  ;;  %v14615_v61 = vpop.f32.mrb[82].mxu1  ;;  %v6619_v21 = vmul.f32 %v14533_v22, %v14533_v22  ;;  %v6492_v34 = vmul.f32 %v6468_v17, %v14567_v35  ;;  %v6469_v29 = vadd.f32 0.7107069, %v6445_v60 }
 0x744   :  { %v14619_v54 = vpop.f32.mrb[76].mxu0  ;;  %v14621_v55 = vpop.f32.mrb[83].mxu1  ;;  %v6427_v40 = vadd.f32 -0.72657603, %v6403_v14  ;;  %v6408_v46 = vmul.f32 0.5307027, %v14613_v41  ;;  %9807 = vpow2.f32 %v6668_v33  ;;  %v6624_v15 = vmul.f32 %v14538_v37, %v14538_v37 }
 0x745   :  { %17306 = vst [vmem:[#allocation57_spill] sm:$0xff] %v14621_v55  ;;  %v6474_v48 = vadd.f32 0.7107069, %v6450_v4  ;;  %v14630_v44 = vpop.f32.mrb[77].mxu0  ;;  %v6487_v38 = vmul.f32 %v6463_v26, %v14564_v19  ;;  %v6337_v60 = vmul.f32 %v9798_v50, %v14561_v56  ;;  %v6534_v14 = vmul.f32 %v6510_v24, %v14558_v9 }
 0x746   :  { %v6451_v58 = vmul.f32 %v6427_v40, %v14606_v25  ;;  %v6432_v17 = vadd.f32 -0.72657603, %v6408_v46  ;;  %v6678_v47 = vmul.f32 1.442695, %v6642_v7  ;;  %v6643_v6 = vmul.f32 -0.5, %v6619_v21 }
 0x747   :  { %v6516_v31 = vadd.f32 -0.14224836, %v6492_v34  ;;  %v6493_v1 = vmul.f32 %v6469_v29, %v14579_v42  ;;  %v6361_v8 = vsub.f32 2.0, %v6337_v60  ;;  %v6498_v40 = vmul.f32 %v6474_v48, %v14587_v36 }
 0x748   :  { %v14637_v4 = vpop.f32.mrb[78].mxu0  ;;  %v6456_v16 = vmul.f32 %v6432_v17, %v14613_v41  ;;  %v6475_v46 = vadd.f32 0.7107069, %v6451_v58  ;;  %v6648_v56 = vmul.f32 -0.5, %v6624_v15  ;;  %v14646_v24 = vadd.f32 %v14496_v10, %v14569_v27 }
 0x749   :  { %v14641_v26 = vpop.f32.mrb[79].mxu0  ;;  %v6511_v21 = vadd.f32 -0.14224836, %v6487_v38  ;;  %v14648_v39 = vmul.f32 %v9798_v50, %v6361_v8  ;;  %v6625_v34 = vmul.f32 %v14547_v59, %v14547_v59  ;;  %v6558_v17 = vadd.f32 0.1274148, %v6534_v14 }
 0x74a   :  { %v9802_v7 = vpop.eup %9801  ;;  %v6480_v33 = vadd.f32 0.7107069, %v6456_v16  ;;  %9809 = vpow2.f32 %v6678_v47  ;;  %v6680_v60 = vmul.f32 1.442695, %v6643_v6  ;;  %v6608_v58 = vmul.f32 %v14574_v45, %v14574_v45 }
 0x74b   :  { %v14652_v29 = vpop.eup %9803  ;;  %v6540_v27 = vmul.f32 %v6516_v31, %v14567_v35  ;;  %v6517_v15 = vadd.f32 -0.14224836, %v6493_v1  ;;  %v6320_v8 = vmul.f32 %v9802_v7, %v14596_v2  ;;  %v6522_v30 = vadd.f32 -0.14224836, %v6498_v40 }
 0x74c   :  { %v14656_v48 = vpop.f32.mrb[80].mxu0  ;;  %v6504_v38 = vmul.f32 %v6480_v33, %v14613_v41  ;;  %v9806_v50 = vpop.eup %9805  ;;  %v6499_v14 = vmul.f32 %v6475_v46, %v14606_v25  ;;  %v6409_v6 = vmul.f32 0.5307027, %v14648_v39  ;;  %v16757_v47 = vand.u32 2147483647, %v14646_v24 }
 0x74d   :  { %v14661_v16 = vpop.f32.mrb[81].mxu0  ;;  %v6535_v23 = vmul.f32 %v6511_v21, %v14564_v19  ;;  %v6690_v52 = vmul.f32 1.442695, %v6648_v56  ;;  %v6344_v20 = vsub.f32 2.0, %v6320_v8  ;;  %v6649_v31 = vmul.f32 -0.5, %v6625_v34 }
 0x74e   :  { %17307 = vst [vmem:[#allocation58_spill] sm:$0xff] %v14661_v16  ;;  %v9808_v1 = vpop.eup %9807  ;;  %v6582_v33 = vmul.f32 %v6558_v17, %v14558_v9  ;;  %v6632_v63 = vmul.f32 -0.5, %v6608_v58  ;;  %v6433_v2 = vadd.f32 -0.72657603, %v6409_v6  ;;  %v6249_v18 = vmul.f32 0.23164189, %v16757_v47 }
 0x74f   :  { %v6564_v46 = vadd.f32 0.1274148, %v6540_v27  ;;  %9811 = vpow2.f32 %v6680_v60  ;;  %v6528_v51 = vadd.f32 -0.14224836, %v6504_v38  ;;  %v14672_v16 = vmul.f32 %v9802_v7, %v6344_v20 }
 0x750   :  { %v14670_v40 = vpop.f32.mrb[82].mxu0  ;;  %v6541_v56 = vmul.f32 %v6517_v15, %v14579_v42  ;;  %v6546_v21 = vmul.f32 %v6522_v30, %v14587_v36  ;;  %v6523_v34 = vadd.f32 -0.14224836, %v6499_v14  ;;  %v6273_v9 = vadd.f32 1.0, %v6249_v18 }
 0x751   :  { %v14674_v55 = vpop.f32.mrb[83].mxu0  ;;  %v6559_v17 = vadd.f32 0.1274148, %v6535_v23  ;;  %v6392_v58 = vmul.f32 0.5307027, %v14672_v16  ;;  %v6457_v8 = vmul.f32 %v6433_v2, %v14648_v39  ;;  %v6702_v27 = vmul.f32 %v14625_v28, %v6582_v33 }
 0x752   :  { %v6692_v6 = vmul.f32 1.442695, %v6649_v31  ;;  %v6658_v60 = vmul.f32 1.442695, %v6632_v63  ;;  %9813 = vrcp.f32 %v6273_v9  ;;  %v14683_v20 = vadd.f32 %v14505_v43, %v14584_v49 }
 0x753   :  { %v6588_v7 = vmul.f32 %v6564_v46, %v14567_v35  ;;  %v6552_v30 = vmul.f32 %v6528_v51, %v14613_v41  ;;  %9815 = vpow2.f32 %v6690_v52  ;;  %v6565_v15 = vadd.f32 0.1274148, %v6541_v56 }
 0x754   :  { %v9810_v23 = vpop.eup %9809  ;;  %v6570_v38 = vadd.f32 0.1274148, %v6546_v21  ;;  %v6547_v14 = vmul.f32 %v6523_v34, %v14606_v25  ;;  %v16760_v28 = vand.u32 2147483647, %v14683_v20  ;;  %v6583_v63 = vmul.f32 %v6559_v17, %v14564_v19 }
 0x755   :  { %v6416_v31 = vadd.f32 -0.72657603, %v6392_v58  ;;  %v6481_v33 = vadd.f32 0.7107069, %v6457_v8  ;;  %9817 = vpow2.f32 %v6692_v6  ;;  %v17308_v49 = vand.u32 2147483647, %v14499_v0 }
 0x756   :  { %9819 = vpow2.f32 %v6658_v60  ;;  %v6254_v52 = vmul.f32 0.23164189, %v16760_v28  ;;  %v6708_v2 = vmul.f32 %v9806_v50, %v6588_v7  ;;  %v6576_v46 = vadd.f32 0.1274148, %v6552_v30 }
 0x757   :  { %v6750_v35 = vmul.f32 %v6702_v27, %v17308_v49  ;;  %v14698_v56 = vadd.f32 %v14496_v10, %v14619_v54  ;;  %v14702_v19 = vadd.f32 %v14505_v43, %v14591_v3  ;;  %v6589_v21 = vmul.f32 %v6565_v15, %v14579_v42 }
 0x758   :  { %v6594_v34 = vmul.f32 %v6570_v38, %v14587_v36  ;;  %v6571_v17 = vadd.f32 0.1274148, %v6547_v14  ;;  %v6278_v58 = vadd.f32 1.0, %v6254_v52  ;;  %v6703_v6 = vmul.f32 %v14652_v29, %v6583_v63 }
 0x759   :  { %v9812_v8 = vpop.eup %9811  ;;  %v6440_v50 = vmul.f32 %v6416_v31, %v14672_v16  ;;  %v6505_v27 = vmul.f32 %v6481_v33, %v14648_v39  ;;  %v16759_v54 = vand.u32 2147483647, %v14698_v56  ;;  %v6609_v60 = vmul.f32 %v14646_v24, %v14646_v24 }
 0x75a   :  { %9821 = vrcp.f32 %v6278_v58  ;;  %v16756_v3 = vand.u32 2147483647, %v14702_v19  ;;  %v14715_v42 = vadd.f32 %v14496_v10, %v14630_v44  ;;  %v17309_v36 = vmax.f32 %v14499_v0, 0.0 }
 0x75b   :  { %v17310_v29 = vand.u32 2147483647, %v14511_v32  ;;  %v6600_v15 = vmul.f32 %v6576_v46, %v14613_v41  ;;  %v6250_v38 = vmul.f32 0.23164189, %v16759_v54  ;;  %v6709_v63 = vmul.f32 %v9808_v1, %v6589_v21 }
 0x75c   :  { %v14719_v7 = vsub.f32 %v17309_v36, %v6750_v35  ;;  %v9814_v14 = vpop.eup %9813  ;;  %v6714_v31 = vmul.f32 %v9810_v23, %v6594_v34  ;;  %v6595_v33 = vmul.f32 %v6571_v17, %v14606_v25  ;;  %v6255_v10 = vmul.f32 0.23164189, %v16756_v3 }
 0x75d   :  { %v6756_v30 = vmul.f32 %v6708_v2, %v17310_v29  ;;  %v9816_v44 = vpop.eup %9815  ;;  %v6464_v0 = vadd.f32 0.7107069, %v6440_v50  ;;  %v6529_v49 = vadd.f32 -0.14224836, %v6505_v27  ;;  %v6321_v35 = vmul.f32 %v9814_v14, %v6273_v9 }
 0x75e   :  { %v6274_v52 = vadd.f32 1.0, %v6250_v38  ;;  %v17311_v2 = vand.u32 2147483647, %v14502_v5  ;;  %v6633_v41 = vmul.f32 -0.5, %v6609_v60  ;;  %v6279_v46 = vadd.f32 1.0, %v6255_v10 }
 0x75f   :  { %v16754_v29 = vand.u32 2147483647, %v14715_v42  ;;  %v14734_v1 = vpop.eup %9817  ;;  %v6720_v23 = vmul.f32 %v9816_v44, %v6600_v15  ;;  %v6345_v25 = vsub.f32 2.0, %v6321_v35  ;;  %v6614_v21 = vmul.f32 %v14683_v20, %v14683_v20 }
 0x760   :  { %v14731_v36 = vmul.f32 %v6703_v6, %v17311_v2  ;;  %9823 = vrcp.f32 %v6274_v52  ;;  %v14738_v34 = vpop.eup %9819  ;;  %v17312_v9 = vmax.f32 %v14511_v32, 0.0  ;;  %v17313_v6 = vand.u32 2147483647, %v14516_v53 }
 0x761   :  { %v17314_v27 = vand.u32 2147483647, %v14527_v11  ;;  %v6251_v15 = vmul.f32 0.23164189, %v16754_v29  ;;  %v6715_v38 = vmul.f32 %v9812_v8, %v6595_v33  ;;  %v6488_v10 = vmul.f32 %v6464_v0, %v14672_v16 }
 0x762   :  { %v14742_v17 = vsub.f32 %v17312_v9, %v6756_v30  ;;  %v14746_v50 = vmul.f32 %v6709_v63, %v17313_v6  ;;  %v6553_v44 = vmul.f32 %v6529_v49, %v14648_v39  ;;  %9825 = vrcp.f32 %v6279_v46 }
 0x763   :  { %v6762_v60 = vmul.f32 %v6714_v31, %v17314_v27  ;;  %v6660_v35 = vmul.f32 1.442695, %v6633_v41  ;;  %v6275_v30 = vadd.f32 1.0, %v6251_v15  ;;  %v14757_v63 = vadd.f32 %v14520_v13, %v14598_v57 }
 0x764   :  { %v17316_v2 = vand.u32 2147483647, %v14538_v37  ;;  %v14761_v9 = vmul.f32 %v9814_v14, %v6345_v25  ;;  %v6638_v6 = vmul.f32 -0.5, %v6614_v21  ;;  %v14765_v8 = vadd.f32 %v14505_v43, %v14637_v4  ;;  %v9822_v33 = vpop.eup %9821 }
 0x765   :  { %17315 = vst [vmem:[#allocation60_spill] sm:$0xff] %v14757_v63  ;;  %v17317_v0 = vmax.f32 %v14527_v11, 0.0  ;;  %v6610_v41 = vmul.f32 %v14698_v56, %v14698_v56  ;;  %9827 = vrcp.f32 %v6275_v30  ;;  %v16753_v57 = vand.u32 2147483647, %v14757_v63 }
 0x766   :  { %v6768_v31 = vmul.f32 %v6720_v23, %v17316_v2  ;;  %v17319_v23 = vand.u32 2147483647, %v14533_v22  ;;  %v6512_v25 = vadd.f32 -0.14224836, %v6488_v10  ;;  %v6577_v21 = vadd.f32 0.1274148, %v6553_v44 }
 0x767   :  { %v14769_v49 = vsub.f32 %v17317_v0, %v6762_v60  ;;  %v6326_v27 = vmul.f32 %v9822_v33, %v6278_v58  ;;  %9829 = vpow2.f32 %v6660_v35  ;;  %v6260_v11 = vmul.f32 0.23164189, %v16753_v57 }
 0x768   :  { %v14776_v14 = vmul.f32 %v6715_v38, %v17319_v23  ;;  %v16755_v60 = vand.u32 2147483647, %v14765_v8  ;;  %v17320_v15 = vmax.f32 %v14538_v37, 0.0  ;;  %v6393_v0 = vmul.f32 0.5307027, %v14761_v9 }
 0x769   :  { %17318 = vst [vmem:[#allocation55_spill] sm:$0xff] %v14769_v49  ;;  %v6350_v32 = vsub.f32 2.0, %v6326_v27  ;;  %v6670_v38 = vmul.f32 1.442695, %v6638_v6  ;;  %v6634_v23 = vmul.f32 -0.5, %v6610_v41  ;;  %v6284_v58 = vadd.f32 1.0, %v6260_v11 }
 0x76a   :  { %v14784_v2 = vsub.f32 %v17320_v15, %v6768_v31  ;;  %v6256_v44 = vmul.f32 0.23164189, %v16755_v60  ;;  %v9824_v35 = vpop.eup %9823  ;;  %v6536_v57 = vmul.f32 %v6512_v25, %v14672_v16  ;;  %v6601_v18 = vmul.f32 %v6577_v21, %v14648_v39 }
 0x76b   :  { %v14792_v29 = vmul.f32 %v9822_v33, %v6350_v32  ;;  %v14796_v37 = vadd.f32 %v14520_v13, %v14604_v12  ;;  %v6322_v31 = vmul.f32 %v9824_v35, %v6274_v52  ;;  %9831 = vrcp.f32 %v6284_v58 }
 0x76c   :  { %17321 = vst [vmem:[#allocation61_spill] sm:$0xff] %v14784_v2  ;;  %v6280_v41 = vadd.f32 1.0, %v6256_v44  ;;  %v9826_v27 = vpop.eup %9825  ;;  %v6417_v11 = vadd.f32 -0.72657603, %v6393_v0  ;;  %v6615_v25 = vmul.f32 %v14702_v19, %v14702_v19  ;;  %v14805_v12 = vadd.f32 %v14505_v43, %v14641_v26 }
 0x76d   :  { %17322 = vst [vmem:[#allocation59_spill] sm:$0xff] %v14796_v37  ;;  %v6398_v15 = vmul.f32 0.5307027, %v14792_v29  ;;  %v16758_v39 = vand.u32 2147483647, %v14796_v37  ;;  %v6346_v32 = vsub.f32 2.0, %v6322_v31  ;;  %v6327_v33 = vmul.f32 %v9826_v27, %v6279_v46 }
 0x76e   :  { %9833 = vrcp.f32 %v6280_v41  ;;  %v6560_v52 = vadd.f32 0.1274148, %v6536_v57  ;;  %v6721_v6 = vmul.f32 %v14734_v1, %v6601_v18  ;;  %v6662_v3 = vmul.f32 1.442695, %v6634_v23 }
 0x76f   :  { %v6422_v21 = vadd.f32 -0.72657603, %v6398_v15  ;;  %9835 = vpow2.f32 %v6670_v38  ;;  %v6261_v0 = vmul.f32 0.23164189, %v16758_v39  ;;  %v9828_v44 = vpop.eup %9827  ;;  %v14810_v60 = vmul.f32 %v9824_v35, %v6346_v32 }
 0x770   :  { %v6351_v10 = vsub.f32 2.0, %v6327_v33  ;;  %v6441_v46 = vmul.f32 %v6417_v11, %v14761_v9  ;;  %v6639_v31 = vmul.f32 -0.5, %v6615_v25  ;;  %v6323_v4 = vmul.f32 %v9828_v44, %v6275_v30 }
 0x771   :  { %v6285_v47 = vadd.f32 1.0, %v6261_v0  ;;  %v14813_v43 = vpop.eup %9829  ;;  %v6446_v26 = vmul.f32 %v6422_v21, %v14792_v29  ;;  %v6394_v57 = vmul.f32 0.5307027, %v14810_v60  ;;  %v16761_v15 = vand.u32 2147483647, %v14805_v12 }
 0x772   :  { %v14817_v38 = vmul.f32 %v9826_v27, %v6351_v10  ;;  %v6584_v18 = vmul.f32 %v6560_v52, %v14672_v16  ;;  %v6347_v1 = vsub.f32 2.0, %v6323_v4  ;;  %v6611_v23 = vmul.f32 %v14715_v42, %v14715_v42 }
 0x773   :  { %9837 = vrcp.f32 %v6285_v47  ;;  %v17323_v30 = vand.u32 2147483647, %v14547_v59  ;;  %v6418_v11 = vadd.f32 -0.72657603, %v6394_v57  ;;  %v6257_v10 = vmul.f32 0.23164189, %v16761_v15 }
 0x774   :  { %v6399_v25 = vmul.f32 0.5307027, %v14817_v38  ;;  %v6465_v27 = vadd.f32 0.7107069, %v6441_v46  ;;  %9839 = vpow2.f32 %v6662_v3  ;;  %v6672_v32 = vmul.f32 1.442695, %v6639_v31 }
 0x775   :  { %v14825_v35 = vmul.f32 %v6721_v6, %v17323_v30  ;;  %v14830_v33 = vmul.f32 %v9828_v44, %v6347_v1  ;;  %v9832_v16 = vpop.eup %9831  ;;  %v6470_v4 = vadd.f32 0.7107069, %v6446_v26  ;;  %v6442_v52 = vmul.f32 %v6418_v11, %v14810_v60 }
 0x776   :  { %v6423_v21 = vadd.f32 -0.72657603, %v6399_v25  ;;  %v6281_v0 = vadd.f32 1.0, %v6257_v10  ;;  %v6704_v6 = vmul.f32 %v14738_v34, %v6584_v18  ;;  %v6635_v30 = vmul.f32 -0.5, %v6611_v23 }
 0x777   :  { %17324 = vst [vmem:[#allocation49_spill] sm:$0xff] %v14825_v35  ;;  %v6395_v57 = vmul.f32 0.5307027, %v14830_v33  ;;  %v6332_v39 = vmul.f32 %v9832_v16, %v6284_v58  ;;  %v6466_v28 = vadd.f32 0.7107069, %v6442_v52  ;;  %v6620_v3 = vmul.f32 %v14757_v63, %v14757_v63 }
 0x778   :  { %v9834_v54 = vpop.eup %9833  ;;  %v6447_v46 = vmul.f32 %v6423_v21, %v14817_v38  ;;  %9841 = vrcp.f32 %v6281_v0  ;;  %v6489_v31 = vmul.f32 %v6465_v27, %v14761_v9  ;;  %v6494_v34 = vmul.f32 %v6470_v4, %v14792_v29 }
 0x779   :  { %v14838_v44 = vpop.eup %9835  ;;  %9843 = vpow2.f32 %v6672_v32  ;;  %v6419_v26 = vadd.f32 -0.72657603, %v6395_v57  ;;  %v6356_v1 = vsub.f32 2.0, %v6332_v39  ;;  %v6490_v18 = vmul.f32 %v6466_v28, %v14810_v60 }
 0x77a   :  { %v6328_v23 = vmul.f32 %v9834_v54, %v6280_v41  ;;  %v6664_v25 = vmul.f32 1.442695, %v6635_v30  ;;  %v14849_v52 = vadd.f32 %v14530_v62, %v14615_v61  ;;  %v17325_v27 = vand.u32 2147483647, %v14574_v45 }
 0x77b   :  { %v6443_v11 = vmul.f32 %v6419_v26, %v14830_v33  ;;  %v14845_v10 = vmul.f32 %v9832_v16, %v6356_v1  ;;  %v6471_v39 = vadd.f32 0.7107069, %v6447_v46  ;;  %v6644_v21 = vmul.f32 -0.5, %v6620_v3 }
 0x77c   :  { %v6752_v32 = vmul.f32 %v6704_v6, %v17325_v27  ;;  %v6352_v4 = vsub.f32 2.0, %v6328_v23  ;;  %v6513_v28 = vadd.f32 -0.14224836, %v6489_v31  ;;  %v6616_v41 = vmul.f32 %v14765_v8, %v14765_v8 }
 0x77d   :  { %v9838_v57 = vpop.eup %9837  ;;  %v6404_v58 = vmul.f32 0.5307027, %v14845_v10  ;;  %v16762_v16 = vand.u32 2147483647, %v14849_v52  ;;  %v6518_v30 = vadd.f32 -0.14224836, %v6494_v34  ;;  %9845 = vpow2.f32 %v6664_v25 }
 0x77e   :  { %v6514_v26 = vadd.f32 -0.14224836, %v6490_v18  ;;  %v14857_v1 = vmul.f32 %v9834_v54, %v6352_v4  ;;  %v6333_v61 = vmul.f32 %v9838_v57, %v6285_v47  ;;  %v14859_v15 = vpop.eup %9839  ;;  %v6467_v6 = vadd.f32 0.7107069, %v6443_v11 }
 0x77f   :  { %v6428_v46 = vadd.f32 -0.72657603, %v6404_v58  ;;  %v6266_v3 = vmul.f32 0.23164189, %v16762_v16  ;;  %v6495_v31 = vmul.f32 %v6471_v39, %v14817_v38  ;;  %v6621_v34 = vmul.f32 %v14796_v37, %v14796_v37 }
 0x780   :  { %v6400_v23 = vmul.f32 0.5307027, %v14857_v1  ;;  %v6357_v27 = vsub.f32 2.0, %v6333_v61  ;;  %v6537_v54 = vmul.f32 %v6513_v28, %v14761_v9  ;;  %v6617_v18 = vmul.f32 %v14805_v12, %v14805_v12 }
 0x781   :  { %v14871_v11 = vadd.f32 1.0, %v6266_v3  ;;  %v6452_v25 = vmul.f32 %v6428_v46, %v14845_v10  ;;  %v6682_v4 = vmul.f32 1.442695, %v6644_v21  ;;  %v6640_v16 = vmul.f32 -0.5, %v6616_v41 }
 0x782   :  { %v9842_v58 = vpop.eup %9841  ;;  %v6424_v39 = vadd.f32 -0.72657603, %v6400_v23  ;;  %v6542_v61 = vmul.f32 %v6518_v30, %v14792_v29  ;;  %v6538_v37 = vmul.f32 %v6514_v26, %v14810_v60  ;;  %v6491_v28 = vmul.f32 %v6467_v6, %v14830_v33 }
 0x783   :  { %v14874_v51 = vpop.eup %9843  ;;  %v6329_v47 = vmul.f32 %v9842_v58, %v6281_v0  ;;  %v6519_v63 = vadd.f32 -0.14224836, %v6495_v31  ;;  %v14880_v3 = vmul.f32 %v9838_v57, %v6357_v27  ;;  %v6645_v49 = vmul.f32 -0.5, %v6621_v34 }
 0x784   :  { %v6448_v2 = vmul.f32 %v6424_v39, %v14857_v1  ;;  %v6561_v59 = vadd.f32 0.1274148, %v6537_v54  ;;  %v6641_v21 = vmul.f32 -0.5, %v6617_v18  ;;  %9847 = vrcp.f32 %v14871_v11 }
 0x785   :  { %v6353_v46 = vsub.f32 2.0, %v6329_v47  ;;  %v17326_v41 = vmax.f32 %v14574_v45, 0.0  ;;  %v6476_v30 = vadd.f32 0.7107069, %v6452_v25  ;;  %v6674_v35 = vmul.f32 1.442695, %v6640_v16 }
 0x786   :  { %v6472_v26 = vadd.f32 0.7107069, %v6448_v2  ;;  %v6566_v6 = vadd.f32 0.1274148, %v6542_v61  ;;  %v6562_v0 = vadd.f32 0.1274148, %v6538_v37  ;;  %v6543_v57 = vmul.f32 %v6519_v63, %v14817_v38 }
 0x787   :  { %v14885_v23 = vsub.f32 %v17326_v41, %v6752_v32  ;;  %v6515_v31 = vadd.f32 -0.14224836, %v6491_v28  ;;  %v14887_v22 = vmul.f32 %v9842_v58, %v6353_v46  ;;  %v6405_v34 = vmul.f32 0.5307027, %v14880_v3  ;;  %v14892_v47 = vpop.eup %9845  ;;  %v17327_v28 = vld [vmem:[#allocation57_spill] sm:$0xff] }
 0x788   :  { %v6496_v27 = vmul.f32 %v6472_v26, %v14857_v1  ;;  %v6684_v54 = vmul.f32 1.442695, %v6645_v49  ;;  %v6585_v45 = vmul.f32 %v6561_v59, %v14761_v9  ;;  %9849 = vpow2.f32 %v6682_v4 }
 0x789   :  { %v6401_v2 = vmul.f32 0.5307027, %v14887_v22  ;;  %v6676_v32 = vmul.f32 1.442695, %v6641_v21  ;;  %v6500_v37 = vmul.f32 %v6476_v30, %v14845_v10  ;;  %9851 = vpow2.f32 %v6674_v35 }
 0x78a   :  { %v6520_v16 = vadd.f32 -0.14224836, %v6496_v27  ;;  %v14899_v63 = vadd.f32 %v14520_v13, %v14656_v48  ;;  %v6590_v18 = vmul.f32 %v6566_v6, %v14792_v29  ;;  %v6586_v49 = vmul.f32 %v6562_v0, %v14810_v60 }
 0x78b   :  { %v6539_v58 = vmul.f32 %v6515_v31, %v14830_v33  ;;  %v6425_v25 = vadd.f32 -0.72657603, %v6401_v2  ;;  %v6567_v59 = vadd.f32 0.1274148, %v6543_v57  ;;  %v6429_v9 = vadd.f32 -0.72657603, %v6405_v34 }
 0x78c   :  { %9853 = vpow2.f32 %v6684_v54  ;;  %v6238_v4 = vand.u32 2147483647, %v14899_v63  ;;  %v6705_v39 = vmul.f32 %v14813_v43, %v6585_v45  ;;  %v6737_v48 = vmax.f32 %v14805_v12, 0.0  ;;  %v17328_v45 = vld [vmem:[#allocation58_spill] sm:$0xff] }
 0x78d   :  { %v6449_v35 = vmul.f32 %v6425_v25, %v14887_v22  ;;  %9855 = vpow2.f32 %v6676_v32  ;;  %v6524_v61 = vadd.f32 -0.14224836, %v6500_v37  ;;  %v6544_v29 = vmul.f32 %v6520_v16, %v14857_v1 }
 0x78e   :  { %v6262_v60 = vmul.f32 0.23164189, %v6238_v4  ;;  %v14913_v46 = vadd.f32 %v14530_v62, %v17327_v28  ;;  %v9848_v21 = vpop.eup %9847  ;;  %v6710_v41 = vmul.f32 %v14838_v44, %v6590_v18  ;;  %v6706_v43 = vmul.f32 %v14859_v15, %v6586_v49 }
 0x78f   :  { %v6563_v30 = vadd.f32 0.1274148, %v6539_v58  ;;  %v6473_v26 = vadd.f32 0.7107069, %v6449_v35  ;;  %v6591_v6 = vmul.f32 %v6567_v59, %v14817_v38  ;;  %v6453_v0 = vmul.f32 %v6429_v9, %v14880_v3 }
 0x790   :  { %v6338_v31 = vmul.f32 %v9848_v21, %v14871_v11  ;;  %v6286_v57 = vadd.f32 1.0, %v6262_v60  ;;  %v6626_v34 = vmul.f32 %v14849_v52, %v14849_v52  ;;  %v6243_v54 = vand.u32 2147483647, %v14913_v46 }
 0x791   :  { %v6497_v27 = vmul.f32 %v6473_v26, %v14887_v22  ;;  %v14926_v44 = vadd.f32 %v14520_v13, %v17328_v45  ;;  %v6548_v15 = vmul.f32 %v6524_v61, %v14845_v10  ;;  %v6568_v2 = vadd.f32 0.1274148, %v6544_v29 }
 0x792   :  { %v6362_v38 = vsub.f32 2.0, %v6338_v31  ;;  %9857 = vrcp.f32 %v6286_v57  ;;  %v9850_v32 = vpop.eup %9849  ;;  %v17329_v11 = vand.u32 2147483647, %v14683_v20  ;;  %v6587_v16 = vmul.f32 %v6563_v30, %v14830_v33 }
 0x793   :  { %v6521_v18 = vadd.f32 -0.14224836, %v6497_v27  ;;  %v6267_v49 = vmul.f32 0.23164189, %v6243_v54  ;;  %v9852_v58 = vpop.eup %9851  ;;  %v17330_v25 = vand.u32 2147483647, %v14698_v56  ;;  %v6711_v59 = vmul.f32 %v14874_v51, %v6591_v6 }
 0x794   :  { %v6758_v37 = vmul.f32 %v6710_v41, %v17329_v11  ;;  %v6477_v9 = vadd.f32 0.7107069, %v6453_v0  ;;  %v14937_v35 = vmul.f32 %v9848_v21, %v6362_v38  ;;  %v6650_v29 = vmul.f32 -0.5, %v6626_v34 }
 0x795   :  { %v6754_v13 = vmul.f32 %v6706_v43, %v17330_v25  ;;  %v6545_v61 = vmul.f32 %v6521_v18, %v14887_v22  ;;  %v6291_v60 = vadd.f32 1.0, %v6267_v49  ;;  %v6239_v28 = vand.u32 2147483647, %v14926_v44 }
 0x796   :  { %v14941_v33 = vpop.eup %9853  ;;  %v17331_v41 = vand.u32 2147483647, %v14646_v24  ;;  %v6572_v26 = vadd.f32 0.1274148, %v6548_v15  ;;  %v6592_v43 = vmul.f32 %v6568_v2, %v14857_v1  ;;  %v6410_v51 = vmul.f32 0.5307027, %v14937_v35 }
 0x797   :  { %v9856_v6 = vpop.eup %9855  ;;  %v17332_v21 = vmax.f32 %v14683_v20, 0.0  ;;  %v6707_v31 = vmul.f32 %v14892_v47, %v6587_v16  ;;  %9859 = vrcp.f32 %v6291_v60  ;;  %v6263_v27 = vmul.f32 0.23164189, %v6239_v28 }
 0x798   :  { %v14945_v30 = vmul.f32 %v6705_v39, %v17331_v41  ;;  %v17333_v34 = vmax.f32 %v14698_v56, 0.0  ;;  %v6501_v45 = vmul.f32 %v6477_v9, %v14880_v3  ;;  %v6569_v1 = vadd.f32 0.1274148, %v6545_v61 }
 0x799   :  { %v14951_v0 = vsub.f32 %v17332_v21, %v6758_v37  ;;  %v6434_v15 = vadd.f32 -0.72657603, %v6410_v51  ;;  %v17334_v2 = vand.u32 2147483647, %v14702_v19  ;;  %v6694_v20 = vmul.f32 1.442695, %v6650_v29 }
 0x79a   :  { %v14958_v39 = vsub.f32 %v17333_v34, %v6754_v13  ;;  %v6287_v11 = vadd.f32 1.0, %v6263_v27  ;;  %v14965_v47 = vadd.f32 %v14530_v62, %v14670_v40  ;;  %v6596_v37 = vmul.f32 %v6572_v26, %v14845_v10 }
 0x79b   :  { %v6759_v38 = vmul.f32 %v6711_v59, %v17334_v2  ;;  %v6712_v16 = vmul.f32 %v9852_v58, %v6592_v43  ;;  %v6458_v56 = vmul.f32 %v6434_v15, %v14937_v35  ;;  %v14971_v18 = vadd.f32 %v14530_v62, %v14674_v55 }
 0x79c   :  { %v17335_v49 = vand.u32 2147483647, %v14715_v42  ;;  %v6746_v13 = vmax.f32 %v14849_v52, 0.0  ;;  %9861 = vrcp.f32 %v6287_v11  ;;  %v6244_v59 = vand.u32 2147483647, %v14965_v47  ;;  %v9858_v9 = vpop.eup %9857 }
 0x79d   :  { %v6525_v40 = vadd.f32 -0.14224836, %v6501_v45  ;;  %v6593_v61 = vmul.f32 %v6569_v1, %v14887_v22  ;;  %v6482_v10 = vadd.f32 0.7107069, %v6458_v56  ;;  %v6245_v58 = vand.u32 2147483647, %v14971_v18 }
 0x79e   :  { %v6755_v25 = vmul.f32 %v6707_v31, %v17335_v49  ;;  %9863 = vpow2.f32 %v6694_v20  ;;  %v6334_v29 = vmul.f32 %v9858_v9, %v6286_v57  ;;  %v14981_v62 = vmul.f32 %v14899_v63, %v14899_v63 }
 0x79f   :  { %v6268_v55 = vmul.f32 0.23164189, %v6244_v59  ;;  %v6716_v41 = vmul.f32 %v9850_v32, %v6596_v37  ;;  %v17336_v26 = vand.u32 2147483647, %v14765_v8  ;;  %v6506_v51 = vmul.f32 %v6482_v10, %v14937_v35 }
 0x7a0   :  { %v6269_v22 = vmul.f32 0.23164189, %v6245_v58  ;;  %v6358_v21 = vsub.f32 2.0, %v6334_v29  ;;  %v17337_v57 = vmax.f32 %v14502_v5, 0.0  ;;  %v17338_v34 = vmax.f32 %v14516_v53, 0.0 }
 0x7a1   :  { %v6760_v43 = vmul.f32 %v6712_v16, %v17336_v26  ;;  %v14990_v31 = vadd.f32 1.0, %v6268_v55  ;;  %v14999_v32 = vmul.f32 %v6525_v40, %v14880_v3  ;;  %v6713_v1 = vmul.f32 %v9856_v6, %v6593_v61  ;;  %v9860_v20 = vpop.eup %9859 }
 0x7a2   :  { %v6775_v27 = vsub.f32 %v17337_v57, %v14731_v36  ;;  %v6781_v45 = vsub.f32 %v17338_v34, %v14746_v50  ;;  %v6530_v15 = vadd.f32 -0.14224836, %v6506_v51  ;;  %v15001_v2 = vadd.f32 1.0, %v6269_v22  ;;  %v17347_v51 = vld [vmem:[#allocation61_spill] sm:$0xff] }
 0x7a3   :  { %v15003_v37 = vmul.f32 %v9858_v9, %v6358_v21  ;;  %9865 = vrcp.f32 %v14990_v31  ;;  %v9193_v5 = vpack.c.bf16 %v14742_v17, %v14719_v7  ;;  %v17339_v36 = vmax.f32 %v14765_v8, 0.0  ;;  %v17340_v9 = vld [vmem:[#allocation28_spill] sm:$0xff]  ;;  %v17342_v7 = vld [vmem:[#allocation49_spill] sm:$0xff] }
 0x7a4   :  { %v9191_v16 = vpack.c.bf16 %v6781_v45, %v6775_v27  ;;  %v6554_v50 = vmul.f32 %v6530_v15, %v14937_v35  ;;  %v6339_v56 = vmul.f32 %v9860_v20, %v6291_v60  ;;  %v6627_v6 = vmul.f32 %v14913_v46, %v14913_v46  ;;  %v17343_v17 = vld [vmem:[#allocation56_spill] sm:$0xff] }
 0x7a5   :  { %v15010_v53 = vsub.f32 %v17339_v36, %v6760_v43  ;;  %v6406_v49 = vmul.f32 0.5307027, %v15003_v37  ;;  %9867 = vrcp.f32 %v15001_v2  ;;  %v17341_v40 = vmax.f32 %v17340_v9, 0.0  ;;  %v17346_v43 = vld [vmem:[#allocation55_spill] sm:$0xff] }
 0x7a6   :  { %9192 = vmatprep.subr.bf16.mxu1 %v9191_v16  ;;  %v17344_v8 = vmax.f32 %v17343_v17, 0.0  ;;  %v17345_v29 = vand.u32 2147483647, %v14805_v12  ;;  %v6578_v60 = vadd.f32 0.1274148, %v6554_v50  ;;  %v6363_v26 = vsub.f32 2.0, %v6339_v56  ;;  %v9862_v21 = vpop.eup %9861 }
 0x7a7   :  { %v6787_v61 = vsub.f32 %v17341_v40, %v14776_v14  ;;  %9194 = vmatpush1.bf16.msra.mxu1 %v9193_v5  ;;  %v9197_v22 = vpack.c.bf16 %v17347_v51, %v17346_v43  ;;  %v6430_v57 = vadd.f32 -0.72657603, %v6406_v49  ;;  %v17348_v34 = vmax.f32 %v14646_v24, 0.0 }
 0x7a8   :  { %v6793_v10 = vsub.f32 %v17344_v8, %v17342_v7  ;;  %v6761_v55 = vmul.f32 %v6713_v1, %v17345_v29  ;;  %v17349_v45 = vmax.f32 %v14702_v19, 0.0  ;;  %v6602_v16 = vmul.f32 %v6578_v60, %v14937_v35  ;;  %v9864_v50 = vpop.eup %9863 }
 0x7a9   :  { %v6777_v14 = vsub.f32 %v17348_v34, %v14945_v30  ;;  %v15033_v36 = vmul.f32 %v9860_v20, %v6363_v26  ;;  %v6335_v1 = vmul.f32 %v9862_v21, %v6287_v11  ;;  %v9201_v5 = vpack.c.bf16 %v14951_v0, %v14885_v23  ;;  %v15046_v11 = vld [vmem:[%s16503_s1 + $0x120] sm:$0xff] }
 0x7aa   :  { %v9195_v27 = vpack.c.bf16 %v6793_v10, %v6787_v61  ;;  %v6783_v15 = vsub.f32 %v17349_v45, %v6759_v38  ;;  %v6454_v56 = vmul.f32 %v6430_v57, %v15003_v37  ;;  %v6651_v49 = vmul.f32 -0.5, %v6627_v6  ;;  %v17351_v0 = vld [vmem:[#allocation60_spill] sm:$0xff] }
 0x7ab   :  { %v17350_v24 = vmax.f32 %v14715_v42, 0.0  ;;  %v6722_v19 = vmul.f32 %v9864_v50, %v6602_v16  ;;  %v6411_v38 = vmul.f32 0.5307027, %v15033_v36  ;;  %v6359_v35 = vsub.f32 2.0, %v6335_v1 }
 0x7ac   :  { %9196 = vmatprep.subr.bf16.mxu1 %v9195_v27  ;;  %v9199_v9 = vpack.c.bf16 %v6783_v15, %v6777_v14  ;;  %v15050_v23 = vsub.f32 %v6737_v48, %v6761_v55  ;;  %v17352_v20 = vand.u32 2147483647, %v17351_v0  ;;  %v6478_v42 = vadd.f32 0.7107069, %v6454_v56 }
 0x7ad   :  { %v15040_v30 = vsub.f32 %v17350_v24, %v6755_v25  ;;  %9198 = vmatpush1.bf16.msra.mxu1 %v9197_v22  ;;  %v6623_v25 = vmul.f32 %v14926_v44, %v14926_v44  ;;  %v9209_v40 = vpack.c.bf16 %v15010_v53, %v14958_v39  ;;  %v17353_v61 = vand.u32 2147483647, %v14849_v52  ;;  %v9866_v48 = vpop.eup %9865  ;;  %v15180_v39 = vpop.permute.xlu0 %6800 }
 0x7ae   :  { %v6764_v6 = vmul.f32 %v6716_v41, %v17352_v20  ;;  %9200 = vmatprep.subr.bf16.mxu1 %v9199_v9  ;;  %v6435_v17 = vadd.f32 -0.72657603, %v6411_v38  ;;  %v15060_v8 = vmul.f32 %v9862_v21, %v6359_v35  ;;  %v6740_v41 = vmax.f32 %v17351_v0, 0.0 }
 0x7af   :  { %v6770_v7 = vmul.f32 %v6722_v19, %v17353_v61  ;;  %v9207_v12 = vpack.c.bf16 %v15050_v23, %v15040_v30  ;;  %v6502_v10 = vmul.f32 %v6478_v42, %v15003_v37  ;;  %v6646_v29 = vmul.f32 -0.5, %v14981_v62  ;;  %v15080_v62 = vld [vmem:[%s16503_s1 + $0x128] sm:$0xff]  ;;  %v9868_v21 = vpop.eup %9867 }
 0x7b0   :  { %v6696_v55 = vmul.f32 1.442695, %v6651_v49  ;;  %8951 = vmatmul.mubr.msk.f32.vlgmr.msra.gmra.mrb[84].mxu1 %vm887_vm0, %v15046_v11  ;;  %v6459_v26 = vmul.f32 %v6435_v17, %v15033_v36  ;;  %v6407_v43 = vmul.f32 0.5307027, %v15060_v8  ;;  %v6340_v51 = vmul.f32 %v9866_v48, %v14990_v31  ;;  %v15115_v17 = vld [vmem:[%s16503_s1 + $0x138] sm:$0xff] }
 0x7b1   :  { %v15071_v60 = vsub.f32 %v6746_v13, %v6770_v7  ;;  %9202 = vmatpush1.bf16.msra.mxu1 %v9201_v5  ;;  %v17354_v22 = vmov 0.0   ;;  %v15082_v57 = vsub.f32 %v6740_v41, %v6764_v6  ;;  %v6573_v52 = vadd.f32 0.1274148, %v14999_v32 }
 0x7b2   :  { %6900 = vmatprep.mubr.f32.mxu1 %v17354_v22  ;;  %v6647_v13 = vmul.f32 -0.5, %v6623_v25  ;;  %v6628_v27 = vmul.f32 %v14965_v47, %v14965_v47  ;;  %v6483_v34 = vadd.f32 0.7107069, %v6459_v26  ;;  %v6431_v14 = vadd.f32 -0.72657603, %v6407_v43 }
 0x7b3   :  { %v6364_v31 = vsub.f32 2.0, %v6340_v51  ;;  %v6341_v45 = vmul.f32 %v9868_v21, %v15001_v2  ;;  %v6526_v15 = vadd.f32 -0.14224836, %v6502_v10  ;;  %9869 = vpow2.f32 %v6696_v55  ;;  %v15102_v2 = vld [vmem:[%s16503_s1 + $0x130] sm:$0xff] }
 0x7b4   :  { %v6629_v16 = vmul.f32 %v14971_v18, %v14971_v18  ;;  %8952 = vmatmul.mubr.msk.f32.gmra.mrb[86].mxu1 %vm887_vm0, %v15080_v62  ;;  %v9205_v32 = vpack.c.bf16 %v15071_v60, %v15082_v57  ;;  %v6507_v1 = vmul.f32 %v6483_v34, %v15033_v36  ;;  %v6455_v5 = vmul.f32 %v6431_v14, %v15060_v8  ;;  %v17355_v34 = vld [vmem:[#allocation59_spill] sm:$0xff] }
 0x7b5   :  { %v15096_v50 = vmul.f32 %v9866_v48, %v6364_v31  ;;  %v6365_v56 = vsub.f32 2.0, %v6341_v45  ;;  %6906 = vmatprep.mubr.f32.mxu1 %v17354_v22  ;;  %v6597_v49 = vmul.f32 %v6573_v52, %v14880_v3  ;;  %v6686_v9 = vmul.f32 1.442695, %v6646_v29 }
 0x7b6   :  { %v6652_v24 = vmul.f32 -0.5, %v6628_v27  ;;  %v6531_v19 = vadd.f32 -0.14224836, %v6507_v1  ;;  %v6479_v38 = vadd.f32 0.7107069, %v6455_v5  ;;  %v6550_v20 = vmul.f32 %v6526_v15, %v15003_v37 }
 0x7b7   :  { %v6412_v35 = vmul.f32 0.5307027, %v15096_v50  ;;  %v6389_v0 = vmul.f32 %v9868_v21, %v6365_v56  ;;  %v6688_v6 = vmul.f32 1.442695, %v6647_v13  ;;  %v6653_v42 = vmul.f32 -0.5, %v6629_v16 }
 0x7b8   :  { %8953 = vmatmul.mubr.msk.f32.gmra.mrb[88].mxu1 %vm887_vm0, %v15102_v2  ;;  %v6555_v25 = vmul.f32 %v6531_v19, %v15033_v36  ;;  %v6503_v61 = vmul.f32 %v6479_v38, %v15060_v8  ;;  %v6717_v48 = vmul.f32 %v14941_v33, %v6597_v49  ;;  %9871 = vpow2.f32 %v6686_v9 }
 0x7b9   :  { %v6436_v7 = vadd.f32 -0.72657603, %v6412_v35  ;;  %v6413_v3 = vmul.f32 0.5307027, %v6389_v0  ;;  %6912 = vmatprep.mubr.f32.mxu1 %v17354_v22  ;;  %v6698_v41 = vmul.f32 1.442695, %v6652_v24  ;;  %9873 = vpow2.f32 %v6688_v6 }
 0x7ba   :  { %v6579_v10 = vadd.f32 0.1274148, %v6555_v25  ;;  %v6527_v29 = vadd.f32 -0.14224836, %v6503_v61  ;;  %v6574_v43 = vadd.f32 0.1274148, %v6550_v20 }
 0x7bb   :  { %v6460_v55 = vmul.f32 %v6436_v7, %v15096_v50  ;;  %v6437_v26 = vadd.f32 -0.72657603, %v6413_v3  ;;  %v6700_v51 = vmul.f32 1.442695, %v6653_v42  ;;  %v17356_v14 = vand.u32 2147483647, %v17355_v34 }
 0x7bc   :  { %8954 = vmatmul.mubr.msk.f32.gmra.mrb[90].mxu1 %vm887_vm0, %v15115_v17  ;;  %v6603_v21 = vmul.f32 %v6579_v10, %v15033_v36  ;;  %v6551_v52 = vmul.f32 %v6527_v29, %v15060_v8  ;;  %9875 = vpow2.f32 %v6698_v41  ;;  %v6741_v5 = vmax.f32 %v17355_v34, 0.0 }
 0x7bd   :  { %v6484_v13 = vadd.f32 0.7107069, %v6460_v55  ;;  %v6461_v27 = vmul.f32 %v6437_v26, %v6389_v0  ;;  %6983 = vmatprep.mubr.f32.mxu1 %v17354_v22  ;;  %v9870_v33 = vpop.eup %9869  ;;  %v6765_v31 = vmul.f32 %v6717_v48, %v17356_v14  ;;  %v6747_v36 = vmax.f32 %v14913_v46, 0.0  ;;  %v15204_v14 = vpop.permute.xlu0 %6810 }
 0x7be   :  { %v6723_v45 = vmul.f32 %v9870_v33, %v6603_v21  ;;  %v6575_v15 = vadd.f32 0.1274148, %v6551_v52  ;;  %9877 = vpow2.f32 %v6700_v51  ;;  %v6598_v56 = vmul.f32 %v6574_v43, %v15003_v37 }
 0x7bf   :  { %v6508_v16 = vmul.f32 %v6484_v13, %v15096_v50  ;;  %v6485_v1 = vadd.f32 0.7107069, %v6461_v27  ;;  %v6789_v19 = vsub.f32 %v6741_v5, %v6765_v31  ;;  %v6742_v26 = vmax.f32 %v14899_v63, 0.0 }
 0x7c0   :  { %v6771_v49 = vmul.f32 %v6723_v45, %v6243_v54  ;;  %v6599_v38 = vmul.f32 %v6575_v15, %v15060_v8  ;;  %v6748_v43 = vmax.f32 %v14965_v47, 0.0 }
 0x7c1   :  { %v6532_v9 = vadd.f32 -0.14224836, %v6508_v16  ;;  %v6509_v24 = vmul.f32 %v6485_v1, %v6389_v0 }
 0x7c2   :  { %v6795_v6 = vsub.f32 %v6747_v36, %v6771_v49  ;;  %v9872_v42 = vpop.eup %9871 }
 0x7c3   :  { %v6556_v35 = vmul.f32 %v6532_v9, %v15096_v50  ;;  %v6533_v20 = vadd.f32 -0.14224836, %v6509_v24  ;;  %v6718_v25 = vmul.f32 %v9872_v42, %v6598_v56  ;;  %v9874_v48 = vpop.eup %9873 }
 0x7c4   :  { %v9203_v3 = vpack.c.bf16 %v6795_v6, %v6789_v19  ;;  %v6719_v41 = vmul.f32 %v9874_v48, %v6599_v38 }
 0x7c5   :  { %v6580_v61 = vadd.f32 0.1274148, %v6556_v35  ;;  %v6557_v7 = vmul.f32 %v6533_v20, %v6389_v0  ;;  %v6766_v8 = vmul.f32 %v6718_v25, %v6238_v4  ;;  %v6743_v4 = vmax.f32 %v14926_v44, 0.0 }
 0x7c6   :  { %9204 = vmatprep.subr.bf16.mxu1 %v9203_v3  ;;  %v9876_v54 = vpop.eup %9875 }
 0x7c7   :  { %v6604_v37 = vmul.f32 %v6580_v61, %v15096_v50  ;;  %v6581_v46 = vadd.f32 0.1274148, %v6557_v7  ;;  %9206 = vmatpush1.bf16.msra.mxu1 %v9205_v32  ;;  %v6767_v50 = vmul.f32 %v6719_v41, %v6239_v28  ;;  %v6790_v63 = vsub.f32 %v6742_v26, %v6766_v8 }
 0x7c8   :  { %9208 = vmatprep.subr.bf16.mxu1 %v9207_v12  ;;  %v9878_v55 = vpop.eup %9877  ;;  %v6749_v28 = vmax.f32 %v14971_v18, 0.0 }
 0x7c9   :  { %v6724_v10 = vmul.f32 %v9876_v54, %v6604_v37  ;;  %v6605_v29 = vmul.f32 %v6581_v46, %v6389_v0 }
 0x7ca   :  { %8955 = vmatmul.mubr.msk.f32.vlgmr.msra.gmra.mrb[92].mxu1 %vm887_vm0, %v15046_v11 }
 0x7cb   :  { %v6772_v60 = vmul.f32 %v6724_v10, %v6244_v59  ;;  %v6725_v57 = vmul.f32 %v9878_v55, %v6605_v29  ;;  %9210 = vmatpush1.bf16.msra.mxu1 %v9209_v40  ;;  %6989 = vmatprep.mubr.f32.mxu1 %v17354_v22  ;;  %v6791_v59 = vsub.f32 %v6743_v4, %v6767_v50 }
 0x7cd   :  { %v6796_v30 = vsub.f32 %v6748_v43, %v6772_v60  ;;  %v6773_v47 = vmul.f32 %v6725_v57, %v6245_v58 }
 0x7ce   :  { %8956 = vmatmul.mubr.msk.f32.gmra.mrb[94].mxu1 %vm887_vm0, %v15080_v62 }
 0x7cf   :  { %v6797_v23 = vsub.f32 %v6749_v28, %v6773_v47  ;;  %v9213_v12 = vpack.c.bf16 %v6796_v30, %v6790_v63  ;;  %6995 = vmatprep.mubr.f32.mxu1 %v17354_v22 }
 0x7d1   :  { %v9211_v44 = vpack.c.bf16 %v6797_v23, %v6791_v59 }
 0x7d2   :  { %8957 = vmatmul.mubr.msk.f32.gmra.mrb[96].mxu1 %vm887_vm0, %v15102_v2 }
 0x7d3   :  { %9212 = vmatprep.subr.bf16.mxu1 %v9211_v44  ;;  %7001 = vmatprep.mubr.f32.mxu1 %v17354_v22 }
 0x7d4   :  { %9214 = vmatpush1.bf16.msra.mxu1 %v9213_v12 }
 0x7d6   :  { %8958 = vmatmul.mubr.msk.f32.gmra.mrb[98].mxu1 %vm887_vm0, %v15115_v17 }
 0x7d7   :  { %7072 = vmatprep.mubr.f32.mxu1 %v17354_v22 }
 0x7da   :  { %8959 = vmatmul.mubr.msk.f32.vlgmr.msra.gmra.mrb[100].mxu1 %vm887_vm0, %v15046_v11 }
 0x7db   :  { %7078 = vmatprep.mubr.f32.mxu1 %v17354_v22 }
 0x7de   :  { %8960 = vmatmul.mubr.msk.f32.gmra.mrb[102].mxu1 %vm887_vm0, %v15080_v62  ;;  %v15189_v62 = vpop.permute.xlu1 %6805 }
 0x7df   :  { %7084 = vmatprep.mubr.f32.mxu1 %v17354_v22 }
 0x7e2   :  { %8961 = vmatmul.mubr.msk.f32.gmra.mrb[104].mxu1 %vm887_vm0, %v15102_v2  ;;  %v15214_v9 = vpop.permute.xlu1 %6815 }
 0x7e3   :  { %7090 = vmatprep.mubr.f32.mxu1 %v17354_v22 }
 0x7e6   :  { %8962 = vmatmul.mubr.msk.f32.gmra.mrb[106].mxu1 %vm887_vm0, %v15115_v17 }
 0x7e7   :  { %7858 = vmatprep.mubr.f32.mxu1 %v17354_v22 }
 0x883   :  { %v6896_v18 = vpop.f32.mrb[84].mxu1 }
 0x884   :  { %v15183_v58 = vadd.f32 %v6896_v18, %v15180_v39  ;;  %v6898_v53 = vpop.f32.mrb[85].mxu1 }
 0x885   :  { %v15186_v11 = vadd.f32 %v6898_v53, %v15180_v39 }
 0x886   :  { %v7097_v40 = vand.u32 2147483647, %v15183_v58  ;;  %v7481_v25 = vmul.f32 %v15183_v58, %v15183_v58  ;;  %v7601_v59 = vmax.f32 %v15183_v58, 0.0 }
 0x887   :  { %v7098_v32 = vand.u32 2147483647, %v15186_v11  ;;  %v6902_v2 = vpop.f32.mrb[86].mxu1  ;;  %v7482_v41 = vmul.f32 %v15186_v11, %v15186_v11 }
 0x888   :  { %v7121_v0 = vmul.f32 0.23164189, %v7097_v40  ;;  %v15195_v17 = vadd.f32 %v6902_v2, %v15189_v62  ;;  %v6904_v51 = vpop.f32.mrb[87].mxu1  ;;  %v7505_v29 = vmul.f32 -0.5, %v7481_v25 }
 0x889   :  { %v7122_v21 = vmul.f32 0.23164189, %v7098_v32  ;;  %v15200_v52 = vadd.f32 %v6904_v51, %v15189_v62  ;;  %v7506_v60 = vmul.f32 -0.5, %v7482_v41 }
 0x88a   :  { %v7145_v13 = vadd.f32 1.0, %v7121_v0  ;;  %v7103_v27 = vand.u32 2147483647, %v15195_v17  ;;  %v7487_v57 = vmul.f32 %v15195_v17, %v15195_v17  ;;  %v7529_v47 = vmul.f32 1.442695, %v7505_v29 }
 0x88b   :  { %v7146_v33 = vadd.f32 1.0, %v7122_v21  ;;  %v16774_v34 = vand.u32 2147483647, %v15200_v52  ;;  %v6908_v45 = vpop.f32.mrb[88].mxu1  ;;  %v15254_v0 = vmul.f32 1.442695, %v7506_v60 }
 0x88c   :  { %9879 = vrcp.f32 %v7145_v13  ;;  %v7127_v31 = vmul.f32 0.23164189, %v7103_v27  ;;  %v15211_v16 = vadd.f32 %v6908_v45, %v15204_v14  ;;  %v6910_v1 = vpop.f32.mrb[89].mxu1  ;;  %v7511_v51 = vmul.f32 -0.5, %v7487_v57 }
 0x88d   :  { %v7128_v15 = vmul.f32 0.23164189, %v16774_v34  ;;  %9881 = vrcp.f32 %v7146_v33  ;;  %v15217_v24 = vadd.f32 %v6910_v1, %v15204_v14 }
 0x88e   :  { %v7151_v5 = vadd.f32 1.0, %v7127_v31  ;;  %v16773_v56 = vand.u32 2147483647, %v15211_v16 }
 0x88f   :  { %v7152_v36 = vadd.f32 1.0, %v7128_v15  ;;  %v6914_v49 = vpop.f32.mrb[90].mxu1  ;;  %17357 = vst [vmem:[#allocation13_spill] sm:$0xff] %v15217_v24  ;;  %v16771_v20 = vand.u32 2147483647, %v15217_v24 }
 0x890   :  { %9883 = vrcp.f32 %v7151_v5  ;;  %v6916_v19 = vpop.f32.mrb[91].mxu1  ;;  %v7133_v38 = vmul.f32 0.23164189, %v16773_v56  ;;  %v15222_v35 = vadd.f32 %v6914_v49, %v15214_v9 }
 0x891   :  { %9885 = vrcp.f32 %v7152_v36  ;;  %v7134_v61 = vmul.f32 0.23164189, %v16771_v20  ;;  %v15233_v3 = vadd.f32 %v6916_v19, %v15214_v9 }
 0x892   :  { %v7157_v6 = vadd.f32 1.0, %v7133_v38  ;;  %v16772_v42 = vand.u32 2147483647, %v15222_v35 }
 0x893   :  { %17358 = vst [vmem:[#allocation29_spill] sm:$0xff] %v15233_v3  ;;  %v7158_v37 = vadd.f32 1.0, %v7134_v61  ;;  %v16770_v8 = vand.u32 2147483647, %v15233_v3 }
 0x894   :  { %9887 = vrcp.f32 %v7157_v6  ;;  %v7139_v7 = vmul.f32 0.23164189, %v16772_v42 }
 0x895   :  { %9889 = vrcp.f32 %v7158_v37  ;;  %v7140_v50 = vmul.f32 0.23164189, %v16770_v8 }
 0x896   :  { %v9880_v48 = vpop.eup %9879  ;;  %v15237_v54 = vadd.f32 1.0, %v7139_v7 }
 0x897   :  { %v7193_v46 = vmul.f32 %v9880_v48, %v7145_v13  ;;  %v9882_v10 = vpop.eup %9881  ;;  %v15249_v12 = vadd.f32 1.0, %v7140_v50 }
 0x898   :  { %v7194_v26 = vmul.f32 %v9882_v10, %v7146_v33  ;;  %9891 = vrcp.f32 %v15237_v54 }
 0x899   :  { %v7217_v55 = vsub.f32 2.0, %v7193_v46  ;;  %9893 = vrcp.f32 %v15249_v12  ;;  %v15273_v46 = vmul.f32 1.442695, %v7511_v51  ;;  %v7493_v51 = vmul.f32 %v15211_v16, %v15211_v16 }
 0x89a   :  { %v9884_v43 = vpop.eup %9883  ;;  %v7218_v63 = vsub.f32 2.0, %v7194_v26  ;;  %9895 = vpow2.f32 %v7529_v47 }
 0x89b   :  { %v15245_v4 = vmul.f32 %v9880_v48, %v7217_v55  ;;  %v7199_v30 = vmul.f32 %v9884_v43, %v7151_v5  ;;  %v9886_v28 = vpop.eup %9885 }
 0x89c   :  { %v15252_v18 = vmul.f32 %v9882_v10, %v7218_v63  ;;  %v7200_v2 = vmul.f32 %v9886_v28, %v7152_v36  ;;  %v7488_v36 = vmul.f32 %v15200_v52, %v15200_v52 }
 0x89d   :  { %v7265_v44 = vmul.f32 0.5307027, %v15245_v4  ;;  %v7223_v53 = vsub.f32 2.0, %v7199_v30  ;;  %v6985_v13 = vpop.f32.mrb[92].mxu1 }
 0x89e   :  { %v9888_v33 = vpop.eup %9887  ;;  %v7266_v45 = vmul.f32 0.5307027, %v15252_v18  ;;  %v7224_v1 = vsub.f32 2.0, %v7200_v2  ;;  %v15261_v5 = vpop.f32.mrb[93].mxu1  ;;  %v15267_v38 = vadd.f32 %v6985_v13, %v15180_v39  ;;  %v7512_v57 = vmul.f32 -0.5, %v7488_v36 }
 0x89f   :  { %v7289_v31 = vadd.f32 -0.72657603, %v7265_v44  ;;  %v15259_v15 = vmul.f32 %v9884_v43, %v7223_v53  ;;  %v7205_v19 = vmul.f32 %v9888_v33, %v7157_v6  ;;  %v9890_v41 = vpop.eup %9889 }
 0x8a0   :  { %v7290_v61 = vadd.f32 -0.72657603, %v7266_v45  ;;  %v15271_v48 = vmul.f32 %v9886_v28, %v7224_v1  ;;  %v16769_v29 = vand.u32 2147483647, %v15267_v38  ;;  %v7206_v30 = vmul.f32 %v9890_v41, %v7158_v37 }
 0x8a1   :  { %v7313_v25 = vmul.f32 %v7289_v31, %v15245_v4  ;;  %v7271_v7 = vmul.f32 0.5307027, %v15259_v15  ;;  %v7229_v10 = vsub.f32 2.0, %v7205_v19  ;;  %v15276_v55 = vpop.f32.mrb[94].mxu1 }
 0x8a2   :  { %v7314_v26 = vmul.f32 %v7290_v61, %v15252_v18  ;;  %v7272_v43 = vmul.f32 0.5307027, %v15271_v48  ;;  %v9892_v60 = vpop.eup %9891  ;;  %v7123_v28 = vmul.f32 0.23164189, %v16769_v29  ;;  %v15284_v47 = vpop.f32.mrb[95].mxu1  ;;  %v7230_v31 = vsub.f32 2.0, %v7206_v30 }
 0x8a3   :  { %v7337_v6 = vadd.f32 0.7107069, %v7313_v25  ;;  %v7295_v50 = vadd.f32 -0.72657603, %v7271_v7  ;;  %v15280_v63 = vmul.f32 %v9888_v33, %v7229_v10  ;;  %v7211_v33 = vmul.f32 %v9892_v60, %v15237_v54  ;;  %v9894_v7 = vpop.eup %9893 }
 0x8a4   :  { %v7296_v2 = vadd.f32 -0.72657603, %v7272_v43  ;;  %v15292_v45 = vadd.f32 1.0, %v7123_v28  ;;  %v7338_v1 = vadd.f32 0.7107069, %v7314_v26  ;;  %v7494_v25 = vmul.f32 %v15217_v24, %v15217_v24 }
 0x8a5   :  { %v7361_v44 = vmul.f32 %v7337_v6, %v15245_v4  ;;  %v7319_v53 = vmul.f32 %v7295_v50, %v15259_v15  ;;  %v7277_v13 = vmul.f32 0.5307027, %v15280_v63  ;;  %v15294_v37 = vpop.f32.mrb[96].mxu1  ;;  %v15301_v6 = vmul.f32 %v9890_v41, %v7230_v31 }
 0x8a6   :  { %v7320_v19 = vmul.f32 %v7296_v2, %v15271_v48  ;;  %v15299_v61 = vpop.f32.mrb[97].mxu1  ;;  %v7235_v50 = vsub.f32 2.0, %v7211_v33  ;;  %9897 = vrcp.f32 %v15292_v45  ;;  %v7517_v26 = vmul.f32 -0.5, %v7493_v51  ;;  %v15318_v51 = vpop.eup %9895 }
 0x8a7   :  { %v7343_v36 = vadd.f32 0.7107069, %v7319_v53  ;;  %v7301_v10 = vadd.f32 -0.72657603, %v7277_v13  ;;  %v7385_v54 = vadd.f32 -0.14224836, %v7361_v44  ;;  %v7212_v23 = vmul.f32 %v9894_v7, %v15249_v12 }
 0x8a8   :  { %v7344_v30 = vadd.f32 0.7107069, %v7320_v19  ;;  %v7278_v53 = vmul.f32 0.5307027, %v15301_v6  ;;  %v15307_v2 = vmul.f32 %v9892_v60, %v7235_v50  ;;  %v7518_v13 = vmul.f32 -0.5, %v7494_v25 }
 0x8a9   :  { %v7367_v43 = vmul.f32 %v7343_v36, %v15259_v15  ;;  %v7325_v28 = vmul.f32 %v7301_v10, %v15280_v63  ;;  %v15310_v49 = vpop.f32.mrb[98].mxu1  ;;  %v7499_v31 = vmul.f32 %v15222_v35, %v15222_v35  ;;  %v7500_v44 = vmul.f32 %v15233_v3, %v15233_v3 }
 0x8aa   :  { %v15316_v33 = vpop.f32.mrb[99].mxu1  ;;  %v7362_v36 = vmul.f32 %v7338_v1, %v15252_v18  ;;  %v7302_v19 = vadd.f32 -0.72657603, %v7278_v53  ;;  %v7283_v12 = vmul.f32 0.5307027, %v15307_v2  ;;  %v7409_v10 = vmul.f32 %v7385_v54, %v15245_v4 }
 0x8ab   :  { %v7391_v41 = vadd.f32 -0.14224836, %v7367_v43  ;;  %v7349_v60 = vadd.f32 0.7107069, %v7325_v28  ;;  %v7368_v25 = vmul.f32 %v7344_v30, %v15271_v48  ;;  %v7543_v50 = vmul.f32 1.442695, %v7512_v57 }
 0x8ac   :  { %v7553_v8 = vmul.f32 1.442695, %v7517_v26  ;;  %v7307_v20 = vadd.f32 -0.72657603, %v7283_v12  ;;  %v7236_v42 = vsub.f32 2.0, %v7212_v23  ;;  %v7326_v1 = vmul.f32 %v7302_v19, %v15301_v6 }
 0x8ad   :  { %v7373_v29 = vmul.f32 %v7349_v60, %v15280_v63  ;;  %v15326_v56 = vpop.f32.mrb[100].mxu1  ;;  %v7555_v28 = vmul.f32 1.442695, %v7518_v13  ;;  %v7523_v53 = vmul.f32 -0.5, %v7499_v31  ;;  %v7524_v34 = vmul.f32 -0.5, %v7500_v44 }
 0x8ae   :  { %v15329_v21 = vpop.f32.mrb[101].mxu1  ;;  %v7386_v54 = vadd.f32 -0.14224836, %v7362_v36  ;;  %v7415_v30 = vmul.f32 %v7391_v41, %v15259_v15  ;;  %v7331_v57 = vmul.f32 %v7307_v20, %v15307_v2  ;;  %v15333_v43 = vmul.f32 %v9894_v7, %v7236_v42 }
 0x8af   :  { %v7433_v60 = vadd.f32 0.1274148, %v7409_v10  ;;  %9899 = vpow2.f32 %v15273_v46  ;;  %v7392_v23 = vadd.f32 -0.14224836, %v7368_v25  ;;  %v7397_v26 = vadd.f32 -0.14224836, %v7373_v29 }
 0x8b0   :  { %v9898_v12 = vpop.eup %9897  ;;  %9901 = vpow2.f32 %v15254_v0  ;;  %v7355_v31 = vadd.f32 0.7107069, %v7331_v57  ;;  %v7284_v44 = vmul.f32 0.5307027, %v15333_v43  ;;  %v7350_v41 = vadd.f32 0.7107069, %v7326_v1 }
 0x8b1   :  { %v15339_v36 = vpop.f32.mrb[102].mxu1  ;;  %9903 = vpow2.f32 %v7543_v50  ;;  %v7565_v20 = vmul.f32 1.442695, %v7523_v53  ;;  %v7410_v46 = vmul.f32 %v7386_v54, %v15252_v18  ;;  %v7439_v29 = vadd.f32 0.1274148, %v7415_v30 }
 0x8b2   :  { %v15342_v7 = vpop.f32.mrb[103].mxu1  ;;  %v7379_v19 = vmul.f32 %v7355_v31, %v15307_v2  ;;  %v7308_v0 = vadd.f32 -0.72657603, %v7284_v44  ;;  %9905 = vpow2.f32 %v7553_v8  ;;  %v7567_v10 = vmul.f32 1.442695, %v7524_v34 }
 0x8b3   :  { %v7195_v25 = vmul.f32 %v9898_v12, %v15292_v45  ;;  %v15349_v57 = vadd.f32 %v15261_v5, %v15180_v39  ;;  %v7457_v50 = vmul.f32 %v7433_v60, %v15245_v4  ;;  %v7416_v1 = vmul.f32 %v7392_v23, %v15271_v48 }
 0x8b4   :  { %v7421_v53 = vmul.f32 %v7397_v26, %v15280_v63  ;;  %v7332_v54 = vmul.f32 %v7308_v0, %v15333_v43  ;;  %v7374_v31 = vmul.f32 %v7350_v41, %v15301_v6  ;;  %9907 = vpow2.f32 %v7555_v28 }
 0x8b5   :  { %v15355_v30 = vpop.f32.mrb[104].mxu1  ;;  %v7219_v8 = vsub.f32 2.0, %v7195_v25  ;;  %v7434_v5 = vadd.f32 0.1274148, %v7410_v46  ;;  %v7463_v44 = vmul.f32 %v7439_v29, %v15259_v15  ;;  %v7403_v4 = vadd.f32 -0.14224836, %v7379_v19 }
 0x8b6   :  { %v15359_v45 = vpop.f32.mrb[105].mxu1  ;;  %9909 = vpow2.f32 %v7565_v20  ;;  %v7356_v60 = vadd.f32 0.7107069, %v7332_v54  ;;  %v16775_v26 = vand.u32 2147483647, %v15349_v57  ;;  %v7577_v0 = vmul.f32 %v15318_v51, %v7457_v50 }
 0x8b7   :  { %9911 = vpow2.f32 %v7567_v10  ;;  %v15362_v23 = vmul.f32 %v9898_v12, %v7219_v8  ;;  %v7440_v41 = vadd.f32 0.1274148, %v7416_v1  ;;  %v7445_v28 = vadd.f32 0.1274148, %v7421_v53 }
 0x8b8   :  { %v7483_v25 = vmul.f32 %v15267_v38, %v15267_v38  ;;  %v7398_v13 = vadd.f32 -0.14224836, %v7374_v31  ;;  %v7124_v20 = vmul.f32 0.23164189, %v16775_v26  ;;  %v15375_v12 = vadd.f32 %v15276_v55, %v15189_v62 }
 0x8b9   :  { %v15368_v34 = vpop.f32.mrb[106].mxu1  ;;  %v9900_v46 = vpop.eup %9899  ;;  %v7267_v15 = vmul.f32 0.5307027, %v15362_v23  ;;  %v7458_v51 = vmul.f32 %v7434_v5, %v15252_v18  ;;  %v7427_v10 = vmul.f32 %v7403_v4, %v15307_v2  ;;  %v7380_v54 = vmul.f32 %v7356_v60, %v15333_v43 }
 0x8ba   :  { %v9902_v29 = vpop.eup %9901  ;;  %v7583_v19 = vmul.f32 %v9900_v46, %v7463_v44  ;;  %v15380_v1 = vpop.f32.mrb[107].mxu1  ;;  %v7148_v8 = vadd.f32 1.0, %v7124_v20  ;;  %v16781_v26 = vand.u32 2147483647, %v15375_v12  ;;  %v7625_v55 = vmul.f32 %v7577_v0, %v7097_v40 }
 0x8bb   :  { %v9904_v53 = vpop.eup %9903  ;;  %v7291_v31 = vadd.f32 -0.72657603, %v7267_v15  ;;  %v7464_v42 = vmul.f32 %v7440_v41, %v15271_v48  ;;  %v7507_v18 = vmul.f32 -0.5, %v7483_v25  ;;  %v7484_v5 = vmul.f32 %v15349_v57, %v15349_v57 }
 0x8bc   :  { %v9906_v44 = vpop.eup %9905  ;;  %v7469_v4 = vmul.f32 %v7445_v28, %v15280_v63  ;;  %v7422_v46 = vmul.f32 %v7398_v13, %v15301_v6  ;;  %9913 = vrcp.f32 %v7148_v8  ;;  %v7129_v60 = vmul.f32 0.23164189, %v16781_v26 }
 0x8bd   :  { %v7578_v15 = vmul.f32 %v9902_v29, %v7458_v51  ;;  %v7631_v20 = vmul.f32 %v7583_v19, %v7103_v27  ;;  %v7451_v40 = vadd.f32 0.1274148, %v7427_v10  ;;  %v15397_v48 = vadd.f32 %v15284_v47, %v15189_v62 }
 0x8be   :  { %v9908_v0 = vpop.eup %9907  ;;  %v7404_v41 = vadd.f32 -0.14224836, %v7380_v54  ;;  %v7315_v25 = vmul.f32 %v7291_v31, %v15362_v23  ;;  %v7153_v63 = vadd.f32 1.0, %v7129_v60  ;;  %v15402_v13 = vadd.f32 %v15294_v37, %v15204_v14 }
 0x8bf   :  { %v15406_v29 = vsub.f32 %v7601_v59, %v7625_v55  ;;  %v7584_v27 = vmul.f32 %v9904_v53, %v7464_v42  ;;  %v16776_v51 = vand.u32 2147483647, %v15397_v48  ;;  %v15411_v47 = vadd.f32 %v15299_v61, %v15204_v14 }
 0x8c0   :  { %v9910_v28 = vpop.eup %9909  ;;  %v7589_v10 = vmul.f32 %v9906_v44, %v7469_v4  ;;  %v7446_v54 = vadd.f32 0.1274148, %v7422_v46  ;;  %v7533_v31 = vmul.f32 1.442695, %v7507_v18  ;;  %9915 = vrcp.f32 %v7153_v63 }
 0x8c1   :  { %17359 = vst [vmem:[#allocation16_spill] sm:$0xff] %v15406_v29  ;;  %v9912_v19 = vpop.eup %9911  ;;  %v15415_v37 = vmul.f32 %v7578_v15, %v7098_v32  ;;  %v7475_v58 = vmul.f32 %v7451_v40, %v15307_v2  ;;  %v7130_v59 = vmul.f32 0.23164189, %v16776_v51  ;;  %v16780_v42 = vand.u32 2147483647, %v15402_v13 }
 0x8c2   :  { %v17360_v53 = vmax.f32 %v15195_v17, 0.0  ;;  %v7428_v55 = vmul.f32 %v7404_v41, %v15333_v43  ;;  %v7339_v44 = vadd.f32 0.7107069, %v7315_v25  ;;  %v7508_v18 = vmul.f32 -0.5, %v7484_v5 }
 0x8c3   :  { %v17362_v4 = vand.u32 2147483647, %v15200_v52  ;;  %v7154_v32 = vadd.f32 1.0, %v7130_v59  ;;  %v7135_v2 = vmul.f32 0.23164189, %v16780_v42  ;;  %v7470_v17 = vmul.f32 %v7446_v54, %v15301_v6 }
 0x8c4   :  { %v15423_v61 = vsub.f32 %v17360_v53, %v7631_v20  ;;  %v16777_v60 = vand.u32 2147483647, %v15411_v47  ;;  %v17363_v15 = vand.u32 2147483647, %v15211_v16  ;;  %9917 = vpow2.f32 %v7533_v31 }
 0x8c5   :  { %v15428_v46 = vmul.f32 %v7584_v27, %v17362_v4  ;;  %v7489_v20 = vmul.f32 %v15375_v12, %v15375_v12  ;;  %v7595_v5 = vmul.f32 %v9910_v28, %v7475_v58  ;;  %9919 = vrcp.f32 %v7154_v32 }
 0x8c6   :  { %17361 = vst [vmem:[#allocation39_spill] sm:$0xff] %v15423_v61  ;;  %v7637_v40 = vmul.f32 %v7589_v10, %v17363_v15  ;;  %v7159_v41 = vadd.f32 1.0, %v7135_v2  ;;  %v7136_v25 = vmul.f32 0.23164189, %v16777_v60  ;;  %v9914_v27 = vpop.eup %9913  ;;  %v7452_v59 = vadd.f32 0.1274148, %v7428_v55 }
 0x8c7   :  { %v7363_v53 = vmul.f32 %v7339_v44, %v15362_v23  ;;  %v7535_v4 = vmul.f32 1.442695, %v7508_v18  ;;  %v7196_v10 = vmul.f32 %v9914_v27, %v7148_v8  ;;  %v15444_v54 = vadd.f32 %v15310_v49, %v15214_v9 }
 0x8c8   :  { %9921 = vrcp.f32 %v7159_v41  ;;  %v7160_v6 = vadd.f32 1.0, %v7136_v25  ;;  %v17364_v28 = vmax.f32 %v15211_v16, 0.0  ;;  %v7590_v58 = vmul.f32 %v9908_v0, %v7470_v17 }
 0x8c9   :  { %v7513_v2 = vmul.f32 -0.5, %v7489_v20  ;;  %v15452_v55 = vadd.f32 %v15316_v33, %v15214_v9  ;;  %v17366_v44 = vand.u32 2147483647, %v15222_v35  ;;  %v7220_v8 = vsub.f32 2.0, %v7196_v10 }
 0x8ca   :  { %v15448_v31 = vsub.f32 %v17364_v28, %v7637_v40  ;;  %9923 = vrcp.f32 %v7160_v6  ;;  %v16779_v15 = vand.u32 2147483647, %v15444_v54  ;;  %v9916_v25 = vpop.eup %9915  ;;  %v7476_v49 = vmul.f32 %v7452_v59, %v15333_v43 }
 0x8cb   :  { %v7643_v18 = vmul.f32 %v7595_v5, %v17366_v44  ;;  %9925 = vpow2.f32 %v7535_v4  ;;  %v7490_v16 = vmul.f32 %v15397_v48, %v15397_v48  ;;  %v16778_v0 = vand.u32 2147483647, %v15452_v55 }
 0x8cc   :  { %17365 = vst [vmem:[#allocation47_spill] sm:$0xff] %v15448_v31  ;;  %v7387_v40 = vadd.f32 -0.14224836, %v7363_v53  ;;  %v15461_v17 = vmul.f32 %v9914_v27, %v7220_v8  ;;  %v7201_v33 = vmul.f32 %v9916_v25, %v7153_v63  ;;  %v7141_v20 = vmul.f32 0.23164189, %v16779_v15 }
 0x8cd   :  { %v17367_v5 = vand.u32 2147483647, %v15217_v24  ;;  %v7545_v28 = vmul.f32 1.442695, %v7513_v2  ;;  %v7142_v59 = vmul.f32 0.23164189, %v16778_v0  ;;  %v7596_v51 = vmul.f32 %v9912_v19, %v7476_v49 }
 0x8ce   :  { %v17369_v4 = vmax.f32 %v15222_v35, 0.0  ;;  %v7268_v27 = vmul.f32 0.5307027, %v15461_v17  ;;  %v7225_v63 = vsub.f32 2.0, %v7201_v33  ;;  %v7165_v53 = vadd.f32 1.0, %v7141_v20  ;;  %v9918_v8 = vpop.eup %9917 }
 0x8cf   :  { %v15467_v10 = vmul.f32 %v7590_v58, %v17367_v5  ;;  %v15478_v58 = vadd.f32 1.0, %v7142_v59  ;;  %v15482_v2 = vadd.f32 %v15326_v56, %v15180_v39  ;;  %v9920_v5 = vpop.eup %9919  ;;  %v7411_v0 = vmul.f32 %v7387_v40, %v15362_v23 }
 0x8d0   :  { %v15474_v44 = vsub.f32 %v17369_v4, %v7643_v18  ;;  %v15485_v35 = vmul.f32 %v9916_v25, %v7225_v63  ;;  %v7514_v18 = vmul.f32 -0.5, %v7490_v16  ;;  %9927 = vrcp.f32 %v7165_v53 }
 0x8d1   :  { %17368 = vst [vmem:[#allocation48_spill] sm:$0xff] %v15467_v10  ;;  %9929 = vpow2.f32 %v7545_v28  ;;  %v7202_v33 = vmul.f32 %v9920_v5, %v7154_v32  ;;  %v7495_v19 = vmul.f32 %v15402_v13, %v15402_v13  ;;  %v16782_v49 = vand.u32 2147483647, %v15482_v2 }
 0x8d2   :  { %17370 = vst [vmem:[#allocation32_spill] sm:$0xff] %v15474_v44  ;;  %v9922_v20 = vpop.eup %9921  ;;  %v7292_v59 = vadd.f32 -0.72657603, %v7268_v27  ;;  %v7273_v4 = vmul.f32 0.5307027, %v15485_v35  ;;  %9931 = vrcp.f32 %v15478_v58  ;;  %v15494_v56 = vadd.f32 %v15329_v21, %v15180_v39 }
 0x8d3   :  { %v7226_v25 = vsub.f32 2.0, %v7202_v33  ;;  %v7207_v16 = vmul.f32 %v9922_v20, %v7159_v41  ;;  %v7125_v32 = vmul.f32 0.23164189, %v16782_v49  ;;  %v7435_v63 = vadd.f32 0.1274148, %v7411_v0 }
 0x8d4   :  { %17371 = vst [vmem:[#allocation21_spill] sm:$0xff] %v15494_v56  ;;  %v9924_v28 = vpop.eup %9923  ;;  %v7297_v60 = vadd.f32 -0.72657603, %v7273_v4  ;;  %v7547_v15 = vmul.f32 1.442695, %v7514_v18  ;;  %v7496_v27 = vmul.f32 %v15411_v47, %v15411_v47  ;;  %v7316_v41 = vmul.f32 %v7292_v59, %v15461_v17 }
 0x8d5   :  { %v15501_v42 = vpop.eup %9925  ;;  %v15503_v43 = vmul.f32 %v9920_v5, %v7226_v25  ;;  %v7231_v39 = vsub.f32 2.0, %v7207_v16  ;;  %v7208_v21 = vmul.f32 %v9924_v28, %v7160_v6  ;;  %v7149_v33 = vadd.f32 1.0, %v7125_v32 }
 0x8d6   :  { %v7321_v40 = vmul.f32 %v7297_v60, %v15485_v35  ;;  %v7519_v26 = vmul.f32 -0.5, %v7495_v19  ;;  %v16784_v49 = vand.u32 2147483647, %v15494_v56  ;;  %v7459_v50 = vmul.f32 %v7435_v63, %v15362_v23 }
 0x8d7   :  { %v7274_v0 = vmul.f32 0.5307027, %v15503_v43  ;;  %v15509_v18 = vmul.f32 %v9922_v20, %v7231_v39  ;;  %v7232_v4 = vsub.f32 2.0, %v7208_v21  ;;  %9933 = vrcp.f32 %v7149_v33 }
 0x8d8   :  { %v7345_v5 = vadd.f32 0.7107069, %v7321_v40  ;;  %v7520_v25 = vmul.f32 -0.5, %v7496_v27  ;;  %v7126_v6 = vmul.f32 0.23164189, %v16784_v49  ;;  %9935 = vpow2.f32 %v7547_v15 }
 0x8d9   :  { %v17372_v59 = vand.u32 2147483647, %v15233_v3  ;;  %v7298_v60 = vadd.f32 -0.72657603, %v7274_v0  ;;  %v7279_v19 = vmul.f32 0.5307027, %v15509_v18  ;;  %v15519_v32 = vmul.f32 %v9924_v28, %v7232_v4 }
 0x8da   :  { %v9928_v20 = vpop.eup %9927  ;;  %v7340_v39 = vadd.f32 0.7107069, %v7316_v41  ;;  %v7557_v21 = vmul.f32 1.442695, %v7519_v26  ;;  %v7150_v22 = vadd.f32 1.0, %v7126_v6  ;;  %v7369_v40 = vmul.f32 %v7345_v5, %v15485_v35 }
 0x8db   :  { %v15516_v16 = vmul.f32 %v7596_v51, %v17372_v59  ;;  %v15521_v23 = vpop.eup %9929  ;;  %v7303_v63 = vadd.f32 -0.72657603, %v7279_v19  ;;  %v7280_v27 = vmul.f32 0.5307027, %v15519_v32  ;;  %v7213_v49 = vmul.f32 %v9928_v20, %v7165_v53 }
 0x8dc   :  { %v9932_v51 = vpop.eup %9931  ;;  %v7579_v59 = vmul.f32 %v9918_v8, %v7459_v50  ;;  %v7559_v0 = vmul.f32 1.442695, %v7520_v25  ;;  %v7501_v28 = vmul.f32 %v15444_v54, %v15444_v54  ;;  %9937 = vrcp.f32 %v7150_v22 }
 0x8dd   :  { %17373 = vst [vmem:[#allocation22_spill] sm:$0xff] %v15516_v16  ;;  %v7322_v41 = vmul.f32 %v7298_v60, %v15503_v43  ;;  %v7327_v26 = vmul.f32 %v7303_v63, %v15509_v18  ;;  %v7304_v15 = vadd.f32 -0.72657603, %v7280_v27  ;;  %v7237_v4 = vsub.f32 2.0, %v7213_v49 }
 0x8de   :  { %v7364_v6 = vmul.f32 %v7340_v39, %v15461_v17  ;;  %9939 = vpow2.f32 %v7557_v21  ;;  %v7214_v53 = vmul.f32 %v9932_v51, %v15478_v58  ;;  %v7393_v19 = vadd.f32 -0.14224836, %v7369_v40 }
 0x8df   :  { %v7351_v50 = vadd.f32 0.7107069, %v7327_v26  ;;  %v7328_v8 = vmul.f32 %v7304_v15, %v15519_v32  ;;  %v15533_v25 = vmul.f32 %v9928_v20, %v7237_v4  ;;  %9941 = vpow2.f32 %v7559_v0 }
 0x8e0   :  { %v7525_v44 = vmul.f32 -0.5, %v7501_v28  ;;  %v7238_v63 = vsub.f32 2.0, %v7214_v53  ;;  %v17374_v49 = vand.u32 2147483647, %v15267_v38  ;;  %v7346_v21 = vadd.f32 0.7107069, %v7322_v41 }
 0x8e1   :  { %v9934_v27 = vpop.eup %9933  ;;  %v7352_v5 = vadd.f32 0.7107069, %v7328_v8  ;;  %v7285_v58 = vmul.f32 0.5307027, %v15533_v25  ;;  %v7375_v40 = vmul.f32 %v7351_v50, %v15509_v18  ;;  %v7502_v20 = vmul.f32 %v15452_v55, %v15452_v55 }
 0x8e2   :  { %v15538_v39 = vmul.f32 %v7579_v59, %v17374_v49  ;;  %v15542_v26 = vmul.f32 %v9932_v51, %v7238_v63  ;;  %v7197_v0 = vmul.f32 %v9934_v27, %v7149_v33  ;;  %v7388_v28 = vadd.f32 -0.14224836, %v7364_v6  ;;  %v15549_v53 = vpop.eup %9935 }
 0x8e3   :  { %v7417_v15 = vmul.f32 %v7393_v19, %v15485_v35  ;;  %v7309_v4 = vadd.f32 -0.72657603, %v7285_v58  ;;  %v7485_v59 = vmul.f32 %v15482_v2, %v15482_v2  ;;  %v15555_v51 = vadd.f32 %v15339_v36, %v15189_v62 }
 0x8e4   :  { %v7286_v41 = vmul.f32 0.5307027, %v15542_v26  ;;  %v7221_v50 = vsub.f32 2.0, %v7197_v0  ;;  %v7370_v33 = vmul.f32 %v7346_v21, %v15503_v43  ;;  %v7376_v6 = vmul.f32 %v7352_v5, %v15519_v32 }
 0x8e5   :  { %v7333_v19 = vmul.f32 %v7309_v4, %v15533_v25  ;;  %v7569_v63 = vmul.f32 1.442695, %v7525_v44  ;;  %v7399_v58 = vadd.f32 -0.14224836, %v7375_v40  ;;  %v7526_v31 = vmul.f32 -0.5, %v7502_v20 }
 0x8e6   :  { %v9938_v49 = vpop.eup %9937  ;;  %v7310_v60 = vadd.f32 -0.72657603, %v7286_v41  ;;  %v15560_v3 = vmul.f32 %v9934_v27, %v7221_v50  ;;  %v7412_v8 = vmul.f32 %v7388_v28, %v15461_v17  ;;  %v7441_v0 = vadd.f32 0.1274148, %v7417_v15 }
 0x8e7   :  { %v7357_v16 = vadd.f32 0.7107069, %v7333_v19  ;;  %v7509_v24 = vmul.f32 -0.5, %v7485_v59  ;;  %v7198_v5 = vmul.f32 %v9938_v49, %v7150_v22  ;;  %v7107_v4 = vand.u32 2147483647, %v15555_v51 }
 0x8e8   :  { %v9940_v36 = vpop.eup %9939  ;;  %v7334_v10 = vmul.f32 %v7310_v60, %v15542_v26  ;;  %v7269_v21 = vmul.f32 0.5307027, %v15560_v3  ;;  %v7394_v44 = vadd.f32 -0.14224836, %v7370_v33  ;;  %v7400_v61 = vadd.f32 -0.14224836, %v7376_v6 }
 0x8e9   :  { %v7381_v40 = vmul.f32 %v7357_v16, %v15533_v25  ;;  %v7486_v27 = vmul.f32 %v15494_v56, %v15494_v56  ;;  %v15569_v20 = vpop.eup %9941  ;;  %v7423_v28 = vmul.f32 %v7399_v58, %v15509_v18  ;;  %v7222_v41 = vsub.f32 2.0, %v7198_v5 }
 0x8ea   :  { %v7358_v15 = vadd.f32 0.7107069, %v7334_v10  ;;  %v7293_v59 = vadd.f32 -0.72657603, %v7269_v21  ;;  %v7436_v60 = vadd.f32 0.1274148, %v7412_v8  ;;  %v7465_v50 = vmul.f32 %v7441_v0, %v15485_v35 }
 0x8eb   :  { %v7405_v22 = vadd.f32 -0.14224836, %v7381_v40  ;;  %v7571_v19 = vmul.f32 1.442695, %v7526_v31  ;;  %v15575_v16 = vmul.f32 %v9938_v49, %v7222_v41  ;;  %v7131_v56 = vmul.f32 0.23164189, %v7107_v4 }
 0x8ec   :  { %v7382_v33 = vmul.f32 %v7358_v15, %v15542_v26  ;;  %v7317_v6 = vmul.f32 %v7293_v59, %v15560_v3  ;;  %v7418_v29 = vmul.f32 %v7394_v44, %v15503_v43  ;;  %9943 = vpow2.f32 %v7569_v63 }
 0x8ed   :  { %v7429_v10 = vmul.f32 %v7405_v22, %v15533_v25  ;;  %v7537_v58 = vmul.f32 1.442695, %v7509_v24  ;;  %v7447_v8 = vadd.f32 0.1274148, %v7423_v28  ;;  %v7424_v35 = vmul.f32 %v7400_v61, %v15519_v32 }
 0x8ee   :  { %v7510_v0 = vmul.f32 -0.5, %v7486_v27  ;;  %v15584_v31 = vadd.f32 %v15342_v7, %v15189_v62  ;;  %v7460_v49 = vmul.f32 %v7436_v60, %v15461_v17  ;;  %v7406_v21 = vadd.f32 -0.14224836, %v7382_v33 }
 0x8ef   :  { %v7270_v5 = vmul.f32 0.5307027, %v15575_v16  ;;  %v7155_v40 = vadd.f32 1.0, %v7131_v56  ;;  %v17375_v44 = vmax.f32 %v15267_v38, 0.0  ;;  %v7585_v24 = vmul.f32 %v15521_v23, %v7465_v50 }
 0x8f0   :  { %9945 = vpow2.f32 %v7571_v19  ;;  %v7341_v61 = vadd.f32 0.7107069, %v7317_v6  ;;  %v7442_v63 = vadd.f32 0.1274148, %v7418_v29  ;;  %v7453_v27 = vadd.f32 0.1274148, %v7429_v10 }
 0x8f1   :  { %v15591_v15 = vsub.f32 %v17375_v44, %v15538_v39  ;;  %9947 = vrcp.f32 %v7155_v40  ;;  %v7108_v62 = vand.u32 2147483647, %v15584_v31  ;;  %v7471_v7 = vmul.f32 %v7447_v8, %v15509_v18 }
 0x8f2   :  { %v7448_v17 = vadd.f32 0.1274148, %v7424_v35  ;;  %9949 = vpow2.f32 %v7537_v58  ;;  %v7539_v28 = vmul.f32 1.442695, %v7510_v0  ;;  %v7580_v56 = vmul.f32 %v15501_v42, %v7460_v49 }
 0x8f3   :  { %v7430_v38 = vmul.f32 %v7406_v21, %v15542_v26  ;;  %v7294_v39 = vadd.f32 -0.72657603, %v7270_v5  ;;  %v7132_v23 = vmul.f32 0.23164189, %v7108_v62  ;;  %v17376_v59 = vand.u32 2147483647, %v15375_v12 }
 0x8f4   :  { %v7365_v41 = vmul.f32 %v7341_v61, %v15560_v3  ;;  %v7491_v60 = vmul.f32 %v15555_v51, %v15555_v51  ;;  %v15607_v18 = vadd.f32 %v15355_v30, %v15204_v14  ;;  %v7466_v42 = vmul.f32 %v7442_v63, %v15503_v43 }
 0x8f5   :  { %v7633_v29 = vmul.f32 %v7585_v24, %v17376_v59  ;;  %v7477_v50 = vmul.f32 %v7453_v27, %v15533_v25  ;;  %v7156_v22 = vadd.f32 1.0, %v7132_v23  ;;  %v15613_v19 = vadd.f32 %v15359_v45, %v15204_v14 }
 0x8f6   :  { %v7591_v33 = vmul.f32 %v9940_v36, %v7471_v7  ;;  %v7472_v6 = vmul.f32 %v7448_v17, %v15519_v32  ;;  %9951 = vpow2.f32 %v7539_v28  ;;  %v7113_v10 = vand.u32 2147483647, %v15607_v18  ;;  %v9944_v58 = vpop.eup %9943 }
 0x8f7   :  { %v7454_v8 = vadd.f32 0.1274148, %v7430_v38  ;;  %v7605_v30 = vmax.f32 %v15482_v2, 0.0  ;;  %v7318_v35 = vmul.f32 %v7294_v39, %v15575_v16  ;;  %9953 = vrcp.f32 %v7156_v22 }
 0x8f8   :  { %v17377_v43 = vand.u32 2147483647, %v15349_v57  ;;  %v7389_v0 = vadd.f32 -0.14224836, %v7365_v41  ;;  %v7515_v14 = vmul.f32 -0.5, %v7491_v60  ;;  %v17378_v32 = vmax.f32 %v15375_v12, 0.0 }
 0x8f9   :  { %v7137_v45 = vmul.f32 0.23164189, %v7113_v10  ;;  %v7586_v49 = vmul.f32 %v15549_v53, %v7466_v42  ;;  %v7597_v21 = vmul.f32 %v9944_v58, %v7477_v50  ;;  %v7114_v5 = vand.u32 2147483647, %v15613_v19 }
 0x8fa   :  { %v15621_v25 = vmul.f32 %v7580_v56, %v17377_v43  ;;  %v15627_v36 = vsub.f32 %v17378_v32, %v7633_v29  ;;  %v9946_v44 = vpop.eup %9945  ;;  %v17379_v24 = vand.u32 2147483647, %v15402_v13  ;;  %v7592_v63 = vmul.f32 %v15569_v20, %v7472_v6 }
 0x8fb   :  { %v7492_v27 = vmul.f32 %v15584_v31, %v15584_v31  ;;  %v7161_v7 = vadd.f32 1.0, %v7137_v45  ;;  %v9948_v17 = vpop.eup %9947  ;;  %v7478_v12 = vmul.f32 %v7454_v8, %v15542_v26  ;;  %v7342_v28 = vadd.f32 0.7107069, %v7318_v35 }
 0x8fc   :  { %v7639_v61 = vmul.f32 %v7591_v33, %v17379_v24  ;;  %v7138_v53 = vmul.f32 0.23164189, %v7114_v5  ;;  %v15641_v56 = vadd.f32 %v15368_v34, %v15214_v9  ;;  %v15643_v38 = vpop.eup %9949  ;;  %v7413_v39 = vmul.f32 %v7389_v0, %v15560_v3 }
 0x8fd   :  { %v7203_v20 = vmul.f32 %v9948_v17, %v7155_v40  ;;  %v7549_v23 = vmul.f32 1.442695, %v7515_v14  ;;  %9955 = vrcp.f32 %v7161_v7  ;;  %v17380_v59 = vand.u32 2147483647, %v15397_v48 }
 0x8fe   :  { %v17381_v26 = vand.u32 2147483647, %v15444_v54  ;;  %v7162_v60 = vadd.f32 1.0, %v7138_v53  ;;  %v7119_v42 = vand.u32 2147483647, %v15641_v56  ;;  %v17382_v50 = vmax.f32 %v15402_v13, 0.0 }
 0x8ff   :  { %v7634_v29 = vmul.f32 %v7586_v49, %v17380_v59  ;;  %v17383_v33 = vand.u32 2147483647, %v15411_v47  ;;  %v7227_v58 = vsub.f32 2.0, %v7203_v20  ;;  %v7516_v40 = vmul.f32 -0.5, %v7492_v27 }
 0x900   :  { %v7645_v41 = vmul.f32 %v7597_v21, %v17381_v26  ;;  %v15653_v34 = vsub.f32 %v17382_v50, %v7639_v61  ;;  %v7598_v8 = vmul.f32 %v9946_v44, %v7478_v12  ;;  %v7366_v35 = vmul.f32 %v7342_v28, %v15575_v16  ;;  %v15660_v0 = vpop.eup %9951  ;;  %v17388_v26 = vld [vmem:[#allocation16_spill] sm:$0xff]  ;;  %v17391_v50 = vld [vmem:[#allocation13_spill] sm:$0xff] }
 0x901   :  { %v7640_v6 = vmul.f32 %v7592_v63, %v17383_v33  ;;  %9957 = vrcp.f32 %v7162_v60  ;;  %v7143_v43 = vmul.f32 0.23164189, %v7119_v42  ;;  %v7437_v14 = vadd.f32 0.1274148, %v7413_v39  ;;  %v9954_v32 = vpop.eup %9953 }
 0x902   :  { %v15662_v45 = vmul.f32 %v9948_v17, %v7227_v58  ;;  %9959 = vpow2.f32 %v7549_v23  ;;  %v15666_v13 = vadd.f32 %v15380_v1, %v15214_v9  ;;  %v17384_v49 = vmax.f32 %v15444_v54, 0.0 }
 0x903   :  { %v7497_v44 = vmul.f32 %v15607_v18, %v15607_v18  ;;  %v15674_v24 = vadd.f32 1.0, %v7143_v43  ;;  %v17385_v61 = vmax.f32 %v15200_v52, 0.0  ;;  %v7204_v17 = vmul.f32 %v9954_v32, %v7156_v22  ;;  %v17394_v43 = vld [vmem:[#allocation29_spill] sm:$0xff] }
 0x904   :  { %v15670_v21 = vsub.f32 %v17384_v49, %v7645_v41  ;;  %v7275_v27 = vmul.f32 0.5307027, %v15662_v45  ;;  %v7551_v12 = vmul.f32 1.442695, %v7516_v40  ;;  %v17386_v9 = vmax.f32 %v15186_v11, 0.0  ;;  %v17389_v11 = vld [vmem:[#allocation39_spill] sm:$0xff] }
 0x905   :  { %v7656_v63 = vsub.f32 %v17385_v61, %v15428_v46  ;;  %v17387_v54 = vand.u32 2147483647, %v15452_v55  ;;  %v7390_v53 = vadd.f32 -0.14224836, %v7366_v35  ;;  %9961 = vrcp.f32 %v15674_v24  ;;  %v17390_v41 = vld [vmem:[#allocation48_spill] sm:$0xff] }
 0x906   :  { %v7650_v1 = vsub.f32 %v17386_v9, %v15415_v37  ;;  %v7120_v39 = vand.u32 2147483647, %v15666_v13  ;;  %v7461_v20 = vmul.f32 %v7437_v14, %v15560_v3  ;;  %v7299_v52 = vadd.f32 -0.72657603, %v7275_v27  ;;  %v17393_v3 = vld [vmem:[#allocation22_spill] sm:$0xff]  ;;  %v17397_v61 = vld [vmem:[#allocation32_spill] sm:$0xff] }
 0x907   :  { %v7646_v28 = vmul.f32 %v7598_v8, %v17387_v54  ;;  %v7228_v46 = vsub.f32 2.0, %v7204_v17  ;;  %v7521_v59 = vmul.f32 -0.5, %v7497_v44  ;;  %v9217_v37 = vpack.c.bf16 %v17389_v11, %v17388_v26  ;;  %v9956_v40 = vpop.eup %9955  ;;  %v17396_v44 = vld [vmem:[#allocation47_spill] sm:$0xff] }
 0x908   :  { %v9215_v23 = vpack.c.bf16 %v7656_v63, %v7650_v1  ;;  %v7144_v22 = vmul.f32 0.23164189, %v7120_v39  ;;  %v17392_v33 = vmax.f32 %v17391_v50, 0.0  ;;  %v7323_v8 = vmul.f32 %v7299_v52, %v15662_v45 }
 0x909   :  { %v15696_v35 = vmul.f32 %v9954_v32, %v7228_v46  ;;  %v17395_v14 = vmax.f32 %v17394_v43, 0.0  ;;  %v9221_v63 = vpack.c.bf16 %v17397_v61, %v17396_v44  ;;  %v7414_v27 = vmul.f32 %v7390_v53, %v15575_v16 }
 0x90a   :  { %v7662_v58 = vsub.f32 %v17392_v33, %v17390_v41  ;;  %9216 = vmatprep.subr.bf16.mxu0 %v9215_v23  ;;  %v7209_v17 = vmul.f32 %v9956_v40, %v7161_v7  ;;  %v7498_v9 = vmul.f32 %v15613_v19, %v15613_v19  ;;  %v15706_v1 = vadd.f32 1.0, %v7144_v22 }
 0x90b   :  { %v7668_v49 = vsub.f32 %v17395_v14, %v17393_v3  ;;  %9218 = vmatpush1.bf16.msra.mxu0 %v9217_v37  ;;  %v7347_v54 = vadd.f32 0.7107069, %v7323_v8  ;;  %v7276_v32 = vmul.f32 0.5307027, %v15696_v35  ;;  %v17398_v46 = vmax.f32 %v15397_v48, 0.0  ;;  %v9958_v26 = vpop.eup %9957 }
 0x90c   :  { %v7233_v11 = vsub.f32 2.0, %v7209_v17  ;;  %9963 = vrcp.f32 %v15706_v1  ;;  %v17399_v7 = vmax.f32 %v15349_v57, 0.0  ;;  %v9225_v22 = vpack.c.bf16 %v15627_v36, %v15591_v15  ;;  %v9960_v41 = vpop.eup %9959  ;;  %v15725_v57 = vld [vmem:[%s16503_s1 + $0x140] sm:$0xff] }
 0x90d   :  { %v9219_v52 = vpack.c.bf16 %v7668_v49, %v7662_v58  ;;  %v7658_v23 = vsub.f32 %v17398_v46, %v7634_v29  ;;  %v7371_v37 = vmul.f32 %v7347_v54, %v15662_v45  ;;  %v7300_v50 = vadd.f32 -0.72657603, %v7276_v32 }
 0x90e   :  { %v7652_v53 = vsub.f32 %v17399_v7, %v15621_v25  ;;  %v7210_v33 = vmul.f32 %v9958_v26, %v7162_v60  ;;  %v17400_v48 = vmax.f32 %v15411_v47, 0.0  ;;  %v15720_v58 = vmul.f32 %v9956_v40, %v7233_v11 }
 0x90f   :  { %9220 = vmatprep.subr.bf16.mxu0 %v9219_v52  ;;  %v17401_v15 = vmax.f32 %v15452_v55, 0.0  ;;  %v9229_v8 = vpack.c.bf16 %v15670_v21, %v15653_v34  ;;  %v7395_v60 = vadd.f32 -0.14224836, %v7371_v37  ;;  %v7324_v3 = vmul.f32 %v7300_v50, %v15696_v35 }
 0x910   :  { %v7664_v29 = vsub.f32 %v17400_v48, %v7640_v6  ;;  %9222 = vmatpush1.bf16.msra.mxu0 %v9221_v63  ;;  %v9223_v25 = vpack.c.bf16 %v7658_v23, %v7652_v53  ;;  %9965 = vpow2.f32 %v7551_v12  ;;  %v7234_v47 = vsub.f32 2.0, %v7210_v33  ;;  %v9962_v6 = vpop.eup %9961  ;;  %v15746_v63 = vld [vmem:[%s16503_s1 + $0x148] sm:$0xff] }
 0x911   :  { %v7670_v36 = vsub.f32 %v17401_v15, %v7646_v28  ;;  %v7581_v40 = vmul.f32 %v15643_v38, %v7461_v20  ;;  %v7438_v43 = vadd.f32 0.1274148, %v7414_v27  ;;  %v7281_v14 = vmul.f32 0.5307027, %v15720_v58 }
 0x912   :  { %9224 = vmatprep.subr.bf16.mxu1 %v9223_v25  ;;  %v7419_v44 = vmul.f32 %v7395_v60, %v15662_v45  ;;  %v7348_v55 = vadd.f32 0.7107069, %v7324_v3  ;;  %v15735_v28 = vmul.f32 %v9958_v26, %v7234_v47  ;;  %v7215_v34 = vmul.f32 %v9962_v6, %v15674_v24 }
 0x913   :  { %v9227_v49 = vpack.c.bf16 %v7670_v36, %v7664_v29  ;;  %8963 = vmatmul.mubr.msk.f32.vlgmr.msra.gmra.mrb[84].mxu0 %vm887_vm0, %v15725_v57  ;;  %9226 = vmatpush1.bf16.msra.mxu1 %v9225_v22  ;;  %v7305_v21 = vadd.f32 -0.72657603, %v7281_v14  ;;  %v7561_v12 = vmul.f32 1.442695, %v7521_v59  ;;  %v7522_v61 = vmul.f32 -0.5, %v7498_v9 }
 0x914   :  { %v7503_v38 = vmul.f32 %v15641_v56, %v15641_v56  ;;  %v17402_v20 = vmov 0.0   ;;  %v7443_v27 = vadd.f32 0.1274148, %v7419_v44  ;;  %v7372_v24 = vmul.f32 %v7348_v55, %v15696_v35  ;;  %v17404_v55 = vld [vmem:[#allocation21_spill] sm:$0xff] }
 0x915   :  { %7775 = vmatprep.mubr.f32.mxu0 %v17402_v20  ;;  %9228 = vmatprep.subr.bf16.mxu1 %v9227_v49  ;;  %v7282_v17 = vmul.f32 0.5307027, %v15735_v28  ;;  %v7239_v54 = vsub.f32 2.0, %v7215_v34  ;;  %v17403_v59 = vand.u32 2147483647, %v15482_v2  ;;  %v7462_v32 = vmul.f32 %v7438_v43, %v15575_v16  ;;  %v15764_v16 = vld [vmem:[%s16503_s1 + $0x150] sm:$0xff] }
 0x916   :  { %v7611_v52 = vmax.f32 %v15555_v51, 0.0  ;;  %v7329_v46 = vmul.f32 %v7305_v21, %v15720_v58  ;;  %v7467_v23 = vmul.f32 %v7443_v27, %v15662_v45  ;;  %v7396_v26 = vadd.f32 -0.14224836, %v7372_v24  ;;  %v9964_v53 = vpop.eup %9963  ;;  %v15787_v51 = vld [vmem:[%s16503_s1 + $0x158] sm:$0xff]  ;;  %s10108_s1 = smov [#allocation2]  }
 0x917   :  { %v7629_v9 = vmul.f32 %v7581_v40, %v17403_v59  ;;  %v7306_v11 = vadd.f32 -0.72657603, %v7282_v17  ;;  %v15756_v7 = vmul.f32 %v9962_v6, %v7239_v54  ;;  %8964 = vmatmul.mubr.msk.f32.gmra.mrb[86].mxu0 %vm887_vm0, %v15746_v63  ;;  %9230 = vmatpush1.bf16.msra.mxu1 %v9229_v8  ;;  %9967 = vpow2.f32 %v7561_v12  ;;  %s8715_s17 = sshll.u32 %s10108_s1, 4  ;;  %s8716_s17 = int_to_ptr.vmem [resolvable:$true] %s8715_s17 }
 0x918   :  { %v7353_v22 = vadd.f32 0.7107069, %v7329_v46  ;;  %v7563_v37 = vmul.f32 1.442695, %v7522_v61  ;;  %v7527_v50 = vmul.f32 -0.5, %v7503_v38  ;;  %7781 = vmatprep.mubr.f32.mxu0 %v17402_v20  ;;  %v7587_v45 = vmul.f32 %v9960_v41, %v7467_v23  ;;  %s10081_s18 = scalar_lea.vmem %s8716_s17, 96  ;;  %p10086_p1 = scmp.lt.s32.totalorder %s8716_s17, %s8716_s17 }
 0x919   :  { %v7420_v33 = vmul.f32 %v7396_v26, %v15696_v35  ;;  %v7330_v48 = vmul.f32 %v7306_v11, %v15735_v28  ;;  %v7287_v29 = vmul.f32 0.5307027, %v15756_v7  ;;  %v7582_v25 = vmul.f32 %v15660_v0, %v7462_v32  ;;  %p10082_p0 = scmp.ne.s32.totalorder %s8716_s17, %s10081_s18  ;;  %p10087_p2 = scmp.lt.s32.totalorder %s10081_s18, %s10081_s18 }
 0x91a   :  { %v7377_v15 = vmul.f32 %v7353_v22, %v15720_v58  ;;  %v7216_v36 = vmul.f32 %v9964_v53, %v15706_v1  ;;  %v7504_v8 = vmul.f32 %v15666_v13, %v15666_v13  ;;  %8967 = vmatmul.mubr.msk.f32.vlgmr.msra.gmra.mrb[108].mxu1 %vm887_vm0, %v15725_v57  ;;  %v9966_v60 = vpop.eup %9965  ;;  %v7635_v41 = vmul.f32 %v7587_v45, %v7107_v4 }
 0x91b   :  { %v7444_v3 = vadd.f32 0.1274148, %v7420_v33  ;;  %v7354_v47 = vadd.f32 0.7107069, %v7330_v48  ;;  %v7311_v6 = vadd.f32 -0.72657603, %v7287_v29  ;;  %8965 = vmatmul.mubr.msk.f32.gmra.mrb[88].mxu0 %vm887_vm0, %v15764_v16  ;;  %7864 = vmatprep.mubr.f32.mxu1 %v17402_v20  ;;  %v7653_v0 = vsub.f32 %v7605_v30, %v7629_v9  ;;  %p10088_p3 = por %p10087_p2, %p10086_p1 }
 0x91c   :  { %v7401_v1 = vadd.f32 -0.14224836, %v7377_v15  ;;  %v7573_v40 = vmul.f32 1.442695, %v7527_v50  ;;  %v7240_v43 = vsub.f32 2.0, %v7216_v36  ;;  %7787 = vmatprep.mubr.f32.mxu0 %v17402_v20  ;;  %v7659_v4 = vsub.f32 %v7611_v52, %v7635_v41 }
 0x91d   :  { %v7468_v14 = vmul.f32 %v7444_v3, %v15696_v35  ;;  %v7378_v49 = vmul.f32 %v7354_v47, %v15735_v28  ;;  %v7335_v44 = vmul.f32 %v7311_v6, %v15756_v7  ;;  %v17405_v2 = vand.u32 2147483647, %v17404_v55  ;;  %p10089_p4 = pnand %p10088_p3, %p10082_p0 }
 0x91e   :  { %v7425_v34 = vmul.f32 %v7401_v1, %v15720_v58  ;;  %v7264_v21 = vmul.f32 %v9964_v53, %v7240_v43  ;;  %v7528_v12 = vmul.f32 -0.5, %v7504_v8  ;;  %8968 = vmatmul.mubr.msk.f32.gmra.mrb[110].mxu1 %vm887_vm0, %v15746_v63  ;;  %v9233_v35 = vpack.c.bf16 %v7659_v4, %v7653_v0 }
 0x91f   :  { %v7630_v30 = vmul.f32 %v7582_v25, %v17405_v2  ;;  %v7588_v61 = vmul.f32 %v9966_v60, %v7468_v14  ;;  %v7402_v38 = vadd.f32 -0.14224836, %v7378_v49  ;;  %v7359_v27 = vadd.f32 0.7107069, %v7335_v44  ;;  %8966 = vmatmul.mubr.msk.f32.gmra.mrb[90].mxu0 %vm887_vm0, %v15787_v51  ;;  %7870 = vmatprep.mubr.f32.mxu1 %v17402_v20 }
 0x920   :  { %v7449_v24 = vadd.f32 0.1274148, %v7425_v34  ;;  %9969 = vpow2.f32 %v7573_v40  ;;  %v7288_v17 = vmul.f32 0.5307027, %v7264_v21  ;;  %7947 = vmatprep.mubr.f32.mxu0 %v17402_v20  ;;  %v7606_v54 = vmax.f32 %v17404_v55, 0.0  ;;  %v15850_v34 = vpop.permute.xlu1 %7680 }
 0x921   :  { %v7612_v59 = vmax.f32 %v15584_v31, 0.0  ;;  %v7636_v9 = vmul.f32 %v7588_v61, %v7108_v62  ;;  %v7383_v32 = vmul.f32 %v7359_v27, %v15756_v7  ;;  %v9968_v52 = vpop.eup %9967  ;;  %v7426_v46 = vmul.f32 %v7402_v38, %v15735_v28 }
 0x922   :  { %9971 = vpow2.f32 %v7563_v37  ;;  %v7312_v23 = vadd.f32 -0.72657603, %v7288_v17  ;;  %v7575_v26 = vmul.f32 1.442695, %v7528_v12  ;;  %8969 = vmatmul.mubr.msk.f32.gmra.mrb[112].mxu1 %vm887_vm0, %v15764_v16  ;;  %v7473_v11 = vmul.f32 %v7449_v24, %v15720_v58 }
 0x923   :  { %v7407_v53 = vadd.f32 -0.14224836, %v7383_v32  ;;  %v7654_v22 = vsub.f32 %v7606_v54, %v7630_v30  ;;  %v7660_v50 = vsub.f32 %v7612_v59, %v7636_v9  ;;  %7876 = vmatprep.mubr.f32.mxu1 %v17402_v20  ;;  %v7450_v33 = vadd.f32 0.1274148, %v7426_v46 }
 0x924   :  { %v7336_v31 = vmul.f32 %v7312_v23, %v7264_v21  ;;  %v7593_v37 = vmul.f32 %v9968_v52, %v7473_v11  ;;  %9973 = vpow2.f32 %v7575_v26  ;;  %v7617_v6 = vmax.f32 %v15607_v18, 0.0 }
 0x925   :  { %v7431_v62 = vmul.f32 %v7407_v53, %v15756_v7  ;;  %v9231_v45 = vpack.c.bf16 %v7660_v50, %v7654_v22  ;;  %v7474_v36 = vmul.f32 %v7450_v33, %v15735_v28  ;;  %v7623_v0 = vmax.f32 %v15641_v56, 0.0 }
 0x926   :  { %v7360_v48 = vadd.f32 0.7107069, %v7336_v31  ;;  %8970 = vmatmul.mubr.msk.f32.gmra.mrb[114].mxu1 %vm887_vm0, %v15787_v51  ;;  %v7641_v60 = vmul.f32 %v7593_v37, %v7113_v10  ;;  %v7618_v55 = vmax.f32 %v15613_v19, 0.0  ;;  %v7624_v18 = vmax.f32 %v15666_v13, 0.0  ;;  %v15839_v19 = vpop.permute.xlu0 %7675 }
 0x927   :  { %v7455_v29 = vadd.f32 0.1274148, %v7431_v62  ;;  %9232 = vmatprep.subr.bf16.mxu0 %v9231_v45 }
 0x928   :  { %v7384_v25 = vmul.f32 %v7360_v48, %v7264_v21  ;;  %9234 = vmatpush1.bf16.msra.mxu0 %v9233_v35 }
 0x929   :  { %v7479_v58 = vmul.f32 %v7455_v29, %v15756_v7  ;;  %v7665_v7 = vsub.f32 %v7617_v6, %v7641_v60  ;;  %v15897_v60 = vpop.permute.xlu1 %7690 }
 0x92a   :  { %v9970_v15 = vpop.eup %9969  ;;  %v7408_v8 = vadd.f32 -0.14224836, %v7384_v25  ;;  %v15868_v32 = vpop.permute.xlu0 %7685 }
 0x92b   :  { %v7599_v41 = vmul.f32 %v9970_v15, %v7479_v58 }
 0x92c   :  { %v9972_v3 = vpop.eup %9971  ;;  %v7432_v47 = vmul.f32 %v7408_v8, %v7264_v21 }
 0x92d   :  { %v7647_v1 = vmul.f32 %v7599_v41, %v7119_v42  ;;  %v7594_v40 = vmul.f32 %v9972_v3, %v7474_v36 }
 0x92e   :  { %v7456_v43 = vadd.f32 0.1274148, %v7432_v47  ;;  %v9974_v28 = vpop.eup %9973 }
 0x92f   :  { %v7671_v4 = vsub.f32 %v7623_v0, %v7647_v1  ;;  %v7642_v10 = vmul.f32 %v7594_v40, %v7114_v5 }
 0x930   :  { %v7480_v14 = vmul.f32 %v7456_v43, %v7264_v21 }
 0x931   :  { %v9237_v49 = vpack.c.bf16 %v7671_v4, %v7665_v7  ;;  %v7666_v56 = vsub.f32 %v7618_v55, %v7642_v10 }
 0x932   :  { %v7600_v44 = vmul.f32 %v9974_v28, %v7480_v14 }
 0x934   :  { %v7648_v2 = vmul.f32 %v7600_v44, %v7120_v39 }
 0x936   :  { %v7672_v42 = vsub.f32 %v7624_v18, %v7648_v2 }
 0x938   :  { %v9235_v30 = vpack.c.bf16 %v7672_v42, %v7666_v56 }
 0x93a   :  { %9236 = vmatprep.subr.bf16.mxu0 %v9235_v30 }
 0x93b   :  { %9238 = vmatpush1.bf16.msra.mxu0 %v9237_v49 }
 0x93e   :  { %8971 = vmatmul.mubr.msk.f32.vlgmr.msra.gmra.mrb[92].mxu0 %vm887_vm0, %v15725_v57 }
 0x93f   :  { %7953 = vmatprep.mubr.f32.mxu0 %v17402_v20 }
 0x942   :  { %8972 = vmatmul.mubr.msk.f32.gmra.mrb[94].mxu0 %vm887_vm0, %v15746_v63 }
 0x943   :  { %7959 = vmatprep.mubr.f32.mxu0 %v17402_v20 }
 0x946   :  { %8973 = vmatmul.mubr.msk.f32.gmra.mrb[96].mxu0 %vm887_vm0, %v15764_v16 }
 0x947   :  { %7965 = vmatprep.mubr.f32.mxu0 %v17402_v20 }
 0x94a   :  { %8974 = vmatmul.mubr.msk.f32.gmra.mrb[98].mxu0 %vm887_vm0, %v15787_v51 }
 0x9e6   :  { %v7771_v5 = vpop.f32.mrb[84].mxu0 }
 0x9e7   :  { %v15842_v13 = vadd.f32 %v7771_v5, %v15839_v19  ;;  %v7773_v39 = vpop.f32.mrb[85].mxu0 }
 0x9e8   :  { %v15845_v57 = vadd.f32 %v7773_v39, %v15839_v19 }
 0x9e9   :  { %v7972_v63 = vand.u32 2147483647, %v15842_v13  ;;  %v8356_v16 = vmul.f32 %v15842_v13, %v15842_v13  ;;  %v8476_v29 = vmax.f32 %v15842_v13, 0.0 }
 0x9ea   :  { %v7973_v20 = vand.u32 2147483647, %v15845_v57  ;;  %v7777_v51 = vpop.f32.mrb[86].mxu0  ;;  %v8357_v12 = vmul.f32 %v15845_v57, %v15845_v57  ;;  %v8477_v3 = vmax.f32 %v15845_v57, 0.0 }
 0x9eb   :  { %v7996_v21 = vmul.f32 0.23164189, %v7972_v63  ;;  %v15858_v61 = vadd.f32 %v7777_v51, %v15850_v34  ;;  %v7779_v38 = vpop.f32.mrb[87].mxu0  ;;  %v8380_v27 = vmul.f32 -0.5, %v8356_v16 }
 0x9ec   :  { %v7997_v35 = vmul.f32 0.23164189, %v7973_v20  ;;  %v15863_v24 = vadd.f32 %v7779_v38, %v15850_v34  ;;  %v8381_v23 = vmul.f32 -0.5, %v8357_v12 }
 0x9ed   :  { %v8020_v17 = vadd.f32 1.0, %v7996_v21  ;;  %v16796_v54 = vand.u32 2147483647, %v15858_v61  ;;  %v8362_v59 = vmul.f32 %v15858_v61, %v15858_v61  ;;  %v7860_v9 = vpop.f32.mrb[108].mxu1  ;;  %v8404_v22 = vmul.f32 1.442695, %v8380_v27 }
 0x9ee   :  { %v15870_v52 = vadd.f32 1.0, %v7997_v35  ;;  %v16795_v46 = vand.u32 2147483647, %v15863_v24  ;;  %v7783_v11 = vpop.f32.mrb[88].mxu0  ;;  %v15875_v53 = vpop.f32.mrb[109].mxu1  ;;  %v8363_v31 = vmul.f32 %v15863_v24, %v15863_v24  ;;  %v15933_v21 = vadd.f32 %v7860_v9, %v15839_v19 }
 0x9ef   :  { %9975 = vrcp.f32 %v8020_v17  ;;  %v8002_v26 = vmul.f32 0.23164189, %v16796_v54  ;;  %v15882_v62 = vadd.f32 %v7783_v11, %v15868_v32  ;;  %v7785_v45 = vpop.f32.mrb[89].mxu0  ;;  %v8386_v48 = vmul.f32 -0.5, %v8362_v59 }
 0x9f0   :  { %v8003_v50 = vmul.f32 0.23164189, %v16795_v46  ;;  %9977 = vrcp.f32 %v15870_v52  ;;  %v8406_v41 = vmul.f32 1.442695, %v8381_v23  ;;  %v15902_v47 = vadd.f32 %v7785_v45, %v15868_v32 }
 0x9f1   :  { %v15885_v33 = vadd.f32 1.0, %v8002_v26  ;;  %v15887_v37 = vpop.f32.mrb[110].mxu1  ;;  %v16794_v58 = vand.u32 2147483647, %v15882_v62  ;;  %v8368_v15 = vmul.f32 %v15882_v62, %v15882_v62  ;;  %v8387_v0 = vmul.f32 -0.5, %v8363_v31 }
 0x9f2   :  { %v15890_v25 = vadd.f32 1.0, %v8003_v50  ;;  %v7789_v36 = vpop.f32.mrb[90].mxu0  ;;  %v15895_v8 = vpop.f32.mrb[111].mxu1  ;;  %v8416_v43 = vmul.f32 1.442695, %v8386_v48  ;;  %v8369_v2 = vmul.f32 %v15902_v47, %v15902_v47  ;;  %v17407_v57 = vmax.f32 %v15858_v61, 0.0 }
 0x9f3   :  { %9979 = vrcp.f32 %v15885_v33  ;;  %v7791_v6 = vpop.f32.mrb[91].mxu0  ;;  %v8008_v1 = vmul.f32 0.23164189, %v16794_v58  ;;  %v15907_v40 = vadd.f32 %v7789_v36, %v15897_v60  ;;  %v16793_v4 = vand.u32 2147483647, %v15902_v47 }
 0x9f4   :  { %9981 = vpow2.f32 %v8404_v22  ;;  %v8392_v10 = vmul.f32 -0.5, %v8368_v15  ;;  %v8418_v42 = vmul.f32 1.442695, %v8387_v0  ;;  %v15927_v5 = vadd.f32 %v7791_v6, %v15897_v60 }
 0x9f5   :  { %9983 = vrcp.f32 %v15890_v25  ;;  %v15912_v14 = vpop.f32.mrb[112].mxu1  ;;  %v8032_v49 = vadd.f32 1.0, %v8008_v1  ;;  %v16791_v44 = vand.u32 2147483647, %v15907_v40  ;;  %v8009_v18 = vmul.f32 0.23164189, %v16793_v4 }
 0x9f6   :  { %v15916_v55 = vpop.f32.mrb[113].mxu1  ;;  %9985 = vpow2.f32 %v8406_v41  ;;  %v8374_v56 = vmul.f32 %v15907_v40, %v15907_v40  ;;  %v8428_v27 = vmul.f32 1.442695, %v8392_v10  ;;  %v16789_v59 = vand.u32 2147483647, %v15927_v5 }
 0x9f7   :  { %9987 = vrcp.f32 %v8032_v49  ;;  %v8014_v30 = vmul.f32 0.23164189, %v16791_v44  ;;  %v15930_v51 = vadd.f32 1.0, %v8009_v18  ;;  %v8393_v11 = vmul.f32 -0.5, %v8369_v2 }
 0x9f8   :  { %9989 = vpow2.f32 %v8416_v43  ;;  %v8398_v22 = vmul.f32 -0.5, %v8374_v56  ;;  %v8375_v50 = vmul.f32 %v15927_v5, %v15927_v5  ;;  %v16790_v36 = vand.u32 2147483647, %v15933_v21 }
 0x9f9   :  { %v9976_v39 = vpop.eup %9975  ;;  %v15935_v12 = vpop.f32.mrb[114].mxu1  ;;  %v15937_v35 = vadd.f32 1.0, %v8014_v30  ;;  %9991 = vrcp.f32 %v15930_v51  ;;  %v8430_v43 = vmul.f32 1.442695, %v8393_v11 }
 0x9fa   :  { %v8068_v38 = vmul.f32 %v9976_v39, %v8020_v17  ;;  %v15940_v23 = vpop.f32.mrb[115].mxu1  ;;  %v9978_v26 = vpop.eup %9977  ;;  %9993 = vpow2.f32 %v8418_v42  ;;  %v8015_v17 = vmul.f32 0.23164189, %v16789_v59  ;;  %v8440_v10 = vmul.f32 1.442695, %v8398_v22 }
 0x9fb   :  { %v8069_v31 = vmul.f32 %v9978_v26, %v15870_v52  ;;  %9995 = vrcp.f32 %v15937_v35  ;;  %v8399_v2 = vmul.f32 -0.5, %v8375_v50 }
 0x9fc   :  { %v8092_v9 = vsub.f32 2.0, %v8068_v38  ;;  %9997 = vpow2.f32 %v8428_v27  ;;  %v15957_v18 = vadd.f32 1.0, %v8015_v17  ;;  %v15972_v27 = vadd.f32 %v15875_v53, %v15839_v19 }
 0x9fd   :  { %v9980_v45 = vpop.eup %9979  ;;  %v8093_v0 = vsub.f32 2.0, %v8069_v31  ;;  %v8442_v17 = vmul.f32 1.442695, %v8399_v2 }
 0x9fe   :  { %v15952_v41 = vpop.eup %9981  ;;  %v15954_v6 = vmul.f32 %v9976_v39, %v8092_v9  ;;  %v8074_v52 = vmul.f32 %v9980_v45, %v15885_v33  ;;  %9999 = vrcp.f32 %v15957_v18  ;;  %v7998_v33 = vmul.f32 0.23164189, %v16790_v36 }
 0x9ff   :  { %v9984_v1 = vpop.eup %9983  ;;  %v15960_v42 = vmul.f32 %v9978_v26, %v8093_v0  ;;  %v8358_v39 = vmul.f32 %v15933_v21, %v15933_v21  ;;  %10001 = vpow2.f32 %v8430_v43  ;;  %v16792_v0 = vand.u32 2147483647, %v15972_v27 }
 0xa00   :  { %v8140_v56 = vmul.f32 0.5307027, %v15954_v6  ;;  %v8098_v30 = vsub.f32 2.0, %v8074_v52  ;;  %v8075_v38 = vmul.f32 %v9984_v1, %v15890_v25  ;;  %v15963_v59 = vpop.eup %9985  ;;  %10003 = vpow2.f32 %v8440_v10 }
 0xa01   :  { %v9988_v11 = vpop.eup %9987  ;;  %v8141_v22 = vmul.f32 0.5307027, %v15960_v42  ;;  %10005 = vpow2.f32 %v8442_v17  ;;  %v7999_v10 = vmul.f32 0.23164189, %v16792_v0 }
 0xa02   :  { %v8164_v26 = vadd.f32 -0.72657603, %v8140_v56  ;;  %v15975_v50 = vmul.f32 %v9980_v45, %v8098_v30  ;;  %v8099_v25 = vsub.f32 2.0, %v8075_v38  ;;  %v15977_v9 = vpop.eup %9989  ;;  %v8080_v31 = vmul.f32 %v9988_v11, %v8032_v49 }
 0xa03   :  { %v8165_v36 = vadd.f32 -0.72657603, %v8141_v22  ;;  %v9992_v56 = vpop.eup %9991  ;;  %v15984_v45 = vadd.f32 1.0, %v7998_v33  ;;  %v15986_v30 = vmul.f32 -0.5, %v8358_v39 }
 0xa04   :  { %v8188_v52 = vmul.f32 %v8164_v26, %v15954_v6  ;;  %v8146_v53 = vmul.f32 0.5307027, %v15975_v50  ;;  %v15982_v15 = vmul.f32 %v9984_v1, %v8099_v25  ;;  %v8104_v44 = vsub.f32 2.0, %v8080_v31  ;;  %v15988_v38 = vpop.eup %9993 }
 0xa05   :  { %v8189_v43 = vmul.f32 %v8165_v36, %v15960_v42  ;;  %v9996_v22 = vpop.eup %9995  ;;  %v8081_v1 = vmul.f32 %v9992_v56, %v15930_v51  ;;  %10007 = vrcp.f32 %v15984_v45 }
 0xa06   :  { %v8212_v49 = vadd.f32 0.7107069, %v8188_v52  ;;  %v8170_v2 = vadd.f32 -0.72657603, %v8146_v53  ;;  %v8147_v26 = vmul.f32 0.5307027, %v15982_v15  ;;  %v15992_v48 = vmul.f32 %v9988_v11, %v8104_v44  ;;  %v15997_v33 = vpop.eup %9997 }
 0xa07   :  { %v8213_v25 = vadd.f32 0.7107069, %v8189_v43  ;;  %v8105_v53 = vsub.f32 2.0, %v8081_v1  ;;  %v8086_v44 = vmul.f32 %v9996_v22, %v15937_v35 }
 0xa08   :  { %v8236_v39 = vmul.f32 %v8212_v49, %v15954_v6  ;;  %v8194_v31 = vmul.f32 %v8170_v2, %v15975_v50  ;;  %v8171_v36 = vadd.f32 -0.72657603, %v8147_v26  ;;  %v8152_v52 = vmul.f32 0.5307027, %v15992_v48  ;;  %v10000_v4 = vpop.eup %9999 }
 0xa09   :  { %v8237_v11 = vmul.f32 %v8213_v25, %v15960_v42  ;;  %v16006_v49 = vmul.f32 %v9992_v56, %v8105_v53  ;;  %v8110_v43 = vsub.f32 2.0, %v8086_v44  ;;  %v16008_v2 = vadd.f32 1.0, %v7999_v10  ;;  %v16012_v28 = vpop.eup %10001 }
 0xa0a   :  { %v8260_v51 = vadd.f32 -0.14224836, %v8236_v39  ;;  %v8218_v17 = vadd.f32 0.7107069, %v8194_v31  ;;  %v8195_v0 = vmul.f32 %v8171_v36, %v15982_v15  ;;  %v8176_v16 = vadd.f32 -0.72657603, %v8152_v52  ;;  %v16021_v44 = vpop.eup %10003 }
 0xa0b   :  { %v8261_v1 = vadd.f32 -0.14224836, %v8237_v11  ;;  %v8153_v25 = vmul.f32 0.5307027, %v16006_v49  ;;  %v16016_v31 = vmul.f32 %v9996_v22, %v8110_v43  ;;  %v8087_v56 = vmul.f32 %v10000_v4, %v15957_v18  ;;  %v16027_v43 = vpop.eup %10005 }
 0xa0c   :  { %v8284_v26 = vmul.f32 %v8260_v51, %v15954_v6  ;;  %v8242_v35 = vmul.f32 %v8218_v17, %v15975_v50  ;;  %v8219_v58 = vadd.f32 0.7107069, %v8195_v0  ;;  %v8200_v39 = vmul.f32 %v8176_v16, %v15992_v48 }
 0xa0d   :  { %v8285_v10 = vmul.f32 %v8261_v1, %v15960_v42  ;;  %v8177_v0 = vadd.f32 -0.72657603, %v8153_v25  ;;  %v8158_v11 = vmul.f32 0.5307027, %v16016_v31  ;;  %10009 = vrcp.f32 %v16008_v2 }
 0xa0e   :  { %v8308_v36 = vadd.f32 0.1274148, %v8284_v26  ;;  %v8266_v52 = vadd.f32 -0.14224836, %v8242_v35  ;;  %v8243_v53 = vmul.f32 %v8219_v58, %v15982_v15  ;;  %v8224_v51 = vadd.f32 0.7107069, %v8200_v39 }
 0xa0f   :  { %v8309_v22 = vadd.f32 0.1274148, %v8285_v10  ;;  %v8201_v58 = vmul.f32 %v8177_v0, %v16006_v49  ;;  %v8182_v1 = vadd.f32 -0.72657603, %v8158_v11  ;;  %v8111_v35 = vsub.f32 2.0, %v8087_v56  ;;  %v10008_v10 = vpop.eup %10007 }
 0xa10   :  { %v8332_v16 = vmul.f32 %v8308_v36, %v15954_v6  ;;  %v8290_v17 = vmul.f32 %v8266_v52, %v15975_v50  ;;  %v8267_v18 = vadd.f32 -0.14224836, %v8243_v53  ;;  %v8248_v26 = vmul.f32 %v8224_v51, %v15992_v48 }
 0xa11   :  { %v16031_v39 = vpop.f32.mrb[92].mxu0  ;;  %v8333_v46 = vmul.f32 %v8309_v22, %v15960_v42  ;;  %v8225_v53 = vadd.f32 0.7107069, %v8201_v58  ;;  %v8206_v51 = vmul.f32 %v8182_v1, %v16016_v31  ;;  %v16039_v54 = vmul.f32 %v10000_v4, %v8111_v35 }
 0xa12   :  { %v8452_v25 = vmul.f32 %v15952_v41, %v8332_v16  ;;  %v8314_v7 = vadd.f32 0.1274148, %v8290_v17  ;;  %v8291_v6 = vmul.f32 %v8267_v18, %v15982_v15  ;;  %v16036_v36 = vpop.f32.mrb[93].mxu0  ;;  %v8272_v52 = vadd.f32 -0.14224836, %v8248_v26 }
 0xa13   :  { %v8453_v0 = vmul.f32 %v15963_v59, %v8333_v46  ;;  %v8249_v16 = vmul.f32 %v8225_v53, %v16006_v49  ;;  %v8230_v22 = vadd.f32 0.7107069, %v8206_v51  ;;  %v8159_v17 = vmul.f32 0.5307027, %v16039_v54 }
 0xa14   :  { %v8500_v56 = vmul.f32 %v8452_v25, %v7972_v63  ;;  %v8338_v41 = vmul.f32 %v8314_v7, %v15975_v50  ;;  %v8315_v42 = vadd.f32 0.1274148, %v8291_v6  ;;  %v8296_v11 = vmul.f32 %v8272_v52, %v15992_v48  ;;  %v16058_v50 = vpop.permute.xlu0 %8550 }
 0xa15   :  { %v16048_v18 = vpop.f32.mrb[94].mxu0  ;;  %v8501_v63 = vmul.f32 %v8453_v0, %v7973_v20  ;;  %v8273_v58 = vadd.f32 -0.14224836, %v8249_v16  ;;  %v8254_v1 = vmul.f32 %v8230_v22, %v16016_v31  ;;  %v8183_v35 = vadd.f32 -0.72657603, %v8159_v17 }
 0xa16   :  { %v8524_v4 = vsub.f32 %v8476_v29, %v8500_v56  ;;  %v8458_v46 = vmul.f32 %v15977_v9, %v8338_v41  ;;  %v8339_v7 = vmul.f32 %v8315_v42, %v15982_v15  ;;  %v16056_v59 = vpop.f32.mrb[95].mxu0  ;;  %v8320_v26 = vadd.f32 0.1274148, %v8296_v11 }
 0xa17   :  { %v8525_v13 = vsub.f32 %v8477_v3, %v8501_v63  ;;  %v17406_v20 = vand.u32 2147483647, %v15858_v61  ;;  %v10010_v15 = vpop.eup %10009  ;;  %v8297_v52 = vmul.f32 %v8273_v58, %v16006_v49  ;;  %v8278_v53 = vadd.f32 -0.14224836, %v8254_v1 }
 0xa18   :  { %v8568_v25 = vmul.f32 %v16058_v50, %v8524_v4  ;;  %v8459_v9 = vmul.f32 %v15988_v38, %v8339_v7  ;;  %v8344_v6 = vmul.f32 %v8320_v26, %v15992_v48  ;;  %v8207_v51 = vmul.f32 %v8183_v35, %v16039_v54  ;;  %v16080_v48 = vpop.permute.xlu1 %8555 }
 0xa19   :  { %v8506_v29 = vmul.f32 %v8458_v46, %v17406_v20  ;;  %v16070_v56 = vpop.f32.mrb[96].mxu0  ;;  %v8569_v0 = vmul.f32 %v16058_v50, %v8525_v13  ;;  %v17408_v41 = vand.u32 2147483647, %v15863_v24  ;;  %v8070_v38 = vmul.f32 %v10008_v10, %v15984_v45 }
 0xa1a   :  { %v16078_v11 = vpop.f32.mrb[97].mxu0  ;;  %v8464_v16 = vmul.f32 %v15997_v33, %v8344_v6  ;;  %v8321_v22 = vadd.f32 0.1274148, %v8297_v52  ;;  %v8302_v17 = vmul.f32 %v8278_v53, %v16016_v31  ;;  %v8231_v4 = vadd.f32 0.7107069, %v8207_v51 }
 0xa1b   :  { %v8530_v3 = vsub.f32 %v17407_v57, %v8506_v29  ;;  %v8507_v42 = vmul.f32 %v8459_v9, %v17408_v41  ;;  %v17409_v61 = vmax.f32 %v15863_v24, 0.0  ;;  %v8094_v7 = vsub.f32 2.0, %v8070_v38  ;;  %v16103_v57 = vpop.permute.xlu0 %8560 }
 0xa1c   :  { %v8071_v26 = vmul.f32 %v10010_v15, %v16008_v2  ;;  %v17410_v45 = vand.u32 2147483647, %v15882_v62  ;;  %v8345_v1 = vmul.f32 %v8321_v22, %v16006_v49  ;;  %v8326_v35 = vadd.f32 0.1274148, %v8302_v17 }
 0xa1d   :  { %v8574_v63 = vmul.f32 %v16080_v48, %v8530_v3  ;;  %v8531_v46 = vsub.f32 %v17409_v61, %v8507_v42  ;;  %v8255_v33 = vmul.f32 %v8231_v4, %v16039_v54  ;;  %v16092_v13 = vpop.f32.mrb[98].mxu0  ;;  %v16095_v9 = vmul.f32 %v10008_v10, %v8094_v7 }
 0xa1e   :  { %v8512_v58 = vmul.f32 %v8464_v16, %v17410_v45  ;;  %v8095_v24 = vsub.f32 2.0, %v8071_v26  ;;  %v16097_v6 = vpop.f32.mrb[99].mxu0  ;;  %v17411_v2 = vmax.f32 %v15882_v62, 0.0  ;;  %v8465_v53 = vmul.f32 %v16012_v28, %v8345_v1 }
 0xa1f   :  { %v8592_v20 = vadd.f32 %v8574_v63, %v8568_v25  ;;  %v8575_v29 = vmul.f32 %v16080_v48, %v8531_v46  ;;  %v8350_v49 = vmul.f32 %v8326_v35, %v16016_v31  ;;  %v8279_v51 = vadd.f32 -0.14224836, %v8255_v33 }
 0xa20   :  { %v8536_v52 = vsub.f32 %v17411_v2, %v8512_v58  ;;  %v8142_v25 = vmul.f32 0.5307027, %v16095_v9  ;;  %v16106_v41 = vmul.f32 %v10010_v15, %v8095_v24  ;;  %v8359_v10 = vmul.f32 %v15972_v27, %v15972_v27 }
 0xa21   :  { %v8601_v3 = vadd.f32 %v8575_v29, %v8569_v0  ;;  %v17412_v62 = vand.u32 2147483647, %v15902_v47  ;;  %v8470_v28 = vmul.f32 %v16021_v44, %v8350_v49  ;;  %v8303_v31 = vmul.f32 %v8279_v51, %v16039_v54 }
 0xa22   :  { %v8580_v42 = vmul.f32 %v16103_v57, %v8536_v52  ;;  %v8166_v16 = vadd.f32 -0.72657603, %v8142_v25  ;;  %v8143_v22 = vmul.f32 0.5307027, %v16106_v41  ;;  %v16118_v0 = vadd.f32 %v15887_v37, %v15850_v34 }
 0xa23   :  { %v8513_v38 = vmul.f32 %v8465_v53, %v17412_v62  ;;  %v16122_v15 = vadd.f32 %v15895_v8, %v15850_v34  ;;  %v17413_v4 = vmax.f32 %v15902_v47, 0.0  ;;  %v17414_v61 = vand.u32 2147483647, %v15907_v40  ;;  %v16135_v47 = vpop.permute.xlu1 %8565 }
 0xa24   :  { %v8593_v17 = vadd.f32 %v8592_v20, %v8580_v42  ;;  %v8327_v46 = vadd.f32 0.1274148, %v8303_v31  ;;  %v8190_v7 = vmul.f32 %v8166_v16, %v16095_v9  ;;  %v8167_v26 = vadd.f32 -0.72657603, %v8143_v22 }
 0xa25   :  { %v8537_v63 = vsub.f32 %v17413_v4, %v8513_v38  ;;  %v8518_v44 = vmul.f32 %v8470_v28, %v17414_v61  ;;  %v7980_v45 = vand.u32 2147483647, %v16118_v0  ;;  %v17415_v58 = vmax.f32 %v15907_v40, 0.0 }
 0xa26   :  { %v8351_v8 = vmul.f32 %v8327_v46, %v16039_v54  ;;  %v8408_v35 = vmul.f32 1.442695, %v15986_v30  ;;  %v8214_v33 = vadd.f32 0.7107069, %v8190_v7  ;;  %v8191_v20 = vmul.f32 %v8167_v26, %v16106_v41 }
 0xa27   :  { %v8581_v37 = vmul.f32 %v16103_v57, %v8537_v63  ;;  %v8542_v1 = vsub.f32 %v17415_v58, %v8518_v44  ;;  %v8383_v29 = vmul.f32 -0.5, %v8359_v10  ;;  %v8004_v24 = vmul.f32 0.23164189, %v7980_v45 }
 0xa28   :  { %v8471_v53 = vmul.f32 %v16027_v43, %v8351_v8  ;;  %v7981_v40 = vand.u32 2147483647, %v16122_v15  ;;  %v8495_v54 = vmax.f32 %v15927_v5, 0.0  ;;  %v8238_v30 = vmul.f32 %v8214_v33, %v16095_v9 }
 0xa29   :  { %v8602_v2 = vadd.f32 %v8601_v3, %v8581_v37  ;;  %v8586_v52 = vmul.f32 %v16135_v47, %v8542_v1  ;;  %v8215_v49 = vadd.f32 0.7107069, %v8191_v20  ;;  %v8028_v51 = vadd.f32 1.0, %v8004_v24 }
 0xa2a   :  { %v17416_v42 = vand.u32 2147483647, %v15927_v5  ;;  %10011 = vpow2.f32 %v8408_v35  ;;  %v8005_v3 = vmul.f32 0.23164189, %v7981_v40  ;;  %v8262_v62 = vadd.f32 -0.14224836, %v8238_v30 }
 0xa2b   :  { %v8594_v25 = vadd.f32 %v8593_v17, %v8586_v52  ;;  %v8239_v38 = vmul.f32 %v8215_v49, %v16106_v41  ;;  %10013 = vrcp.f32 %v8028_v51  ;;  %v8364_v43 = vmul.f32 %v16118_v0, %v16118_v0 }
 0xa2c   :  { %v8519_v10 = vmul.f32 %v8471_v53, %v17416_v42  ;;  %v8410_v31 = vmul.f32 1.442695, %v8383_v29  ;;  %v8029_v16 = vadd.f32 1.0, %v8005_v3  ;;  %v8286_v22 = vmul.f32 %v8262_v62, %v16095_v9 }
 0xa2d   :  { %v8263_v17 = vadd.f32 -0.14224836, %v8239_v38  ;;  %v16155_v5 = vadd.f32 %v15912_v14, %v15868_v32  ;;  %v8365_v63 = vmul.f32 %v16122_v15, %v16122_v15  ;;  %v16162_v61 = vadd.f32 %v15916_v55, %v15868_v32 }
 0xa2e   :  { %v8543_v28 = vsub.f32 %v8495_v54, %v8519_v10  ;;  %10015 = vrcp.f32 %v8029_v16  ;;  %v8310_v44 = vadd.f32 0.1274148, %v8286_v22  ;;  %v8388_v7 = vmul.f32 -0.5, %v8364_v43 }
 0xa2f   :  { %v8287_v46 = vmul.f32 %v8263_v17, %v16106_v41  ;;  %v7986_v26 = vand.u32 2147483647, %v16155_v5  ;;  %10017 = vpow2.f32 %v8410_v31  ;;  %v8370_v14 = vmul.f32 %v16155_v5, %v16155_v5 }
 0xa30   :  { %v8587_v4 = vmul.f32 %v16135_v47, %v8543_v28  ;;  %v8334_v58 = vmul.f32 %v8310_v44, %v16095_v9  ;;  %v8389_v8 = vmul.f32 -0.5, %v8365_v63  ;;  %v7987_v55 = vand.u32 2147483647, %v16162_v61 }
 0xa31   :  { %v8010_v1 = vmul.f32 0.23164189, %v7986_v26  ;;  %v8311_v35 = vadd.f32 0.1274148, %v8287_v46  ;;  %v8420_v33 = vmul.f32 1.442695, %v8388_v7  ;;  %v8371_v3 = vmul.f32 %v16162_v61, %v16162_v61 }
 0xa32   :  { %v16166_v37 = vadd.f32 %v8602_v2, %v8587_v4  ;;  %v8478_v24 = vmax.f32 %v15933_v21, 0.0  ;;  %v8394_v2 = vmul.f32 -0.5, %v8370_v14  ;;  %v8011_v52 = vmul.f32 0.23164189, %v7987_v55 }
 0xa33   :  { %v8034_v20 = vadd.f32 1.0, %v8010_v1  ;;  %v8595_v54 = vrot.slane %v8594_v25, 4  ;;  %v8479_v9 = vmax.f32 %v15972_v27, 0.0  ;;  %v8422_v42 = vmul.f32 1.442695, %v8389_v8 }
 0xa34   :  { %v10012_v29 = vpop.eup %10011  ;;  %v8035_v10 = vadd.f32 1.0, %v8011_v52  ;;  %v8335_v62 = vmul.f32 %v8311_v35, %v16106_v41  ;;  %v8484_v38 = vmax.f32 %v16118_v0, 0.0  ;;  %v8485_v43 = vmax.f32 %v16122_v15, 0.0 }
 0xa35   :  { %v10014_v53 = vpop.eup %10013  ;;  %v8454_v30 = vmul.f32 %v10012_v29, %v8334_v58  ;;  %10019 = vrcp.f32 %v8034_v20  ;;  %v8432_v22 = vmul.f32 1.442695, %v8394_v2  ;;  %v16185_v17 = vadd.f32 %v15935_v12, %v15897_v60 }
 0xa36   :  { %v8076_v49 = vmul.f32 %v10014_v53, %v8028_v51  ;;  %10021 = vpow2.f32 %v8420_v33  ;;  %v16187_v51 = vadd.f32 %v8595_v54, %v8594_v25  ;;  %v17417_v4 = vand.u32 2147483647, %v15933_v21 }
 0xa37   :  { %10023 = vrcp.f32 %v8035_v10  ;;  %v8490_v41 = vmax.f32 %v16155_v5, 0.0  ;;  %v8395_v14 = vmul.f32 -0.5, %v8371_v3  ;;  %v16799_v58 = vand.u32 2147483647, %v16185_v17 }
 0xa38   :  { %v10016_v28 = vpop.eup %10015  ;;  %v8100_v31 = vsub.f32 2.0, %v8076_v49  ;;  %v8502_v63 = vmul.f32 %v8454_v30, %v17417_v4  ;;  %10025 = vpow2.f32 %v8422_v42  ;;  %v16198_v25 = vadd.f32 %v15940_v23, %v15897_v60 }
 0xa39   :  { %v8077_v44 = vmul.f32 %v10016_v28, %v8029_v16  ;;  %v10018_v46 = vpop.eup %10017  ;;  %10027 = vpow2.f32 %v8432_v22  ;;  %v8016_v16 = vmul.f32 0.23164189, %v16799_v58  ;;  %v16205_v35 = vadd.f32 %v16031_v39, %v15839_v19 }
 0xa3a   :  { %v16192_v7 = vmul.f32 %v10014_v53, %v8100_v31  ;;  %v8455_v8 = vmul.f32 %v10018_v46, %v8335_v62  ;;  %v8526_v33 = vsub.f32 %v8478_v24, %v8502_v63  ;;  %v8376_v2 = vmul.f32 %v16185_v17, %v16185_v17 }
 0xa3b   :  { %v8101_v12 = vsub.f32 2.0, %v8077_v44  ;;  %v16797_v52 = vand.u32 2147483647, %v16198_v25  ;;  %v8434_v53 = vmul.f32 1.442695, %v8395_v14  ;;  %v8040_v54 = vadd.f32 1.0, %v8016_v16 }
 0xa3c   :  { %v8148_v21 = vmul.f32 0.5307027, %v16192_v7  ;;  %v8377_v30 = vmul.f32 %v16198_v25, %v16198_v25  ;;  %v17418_v42 = vand.u32 2147483647, %v15972_v27  ;;  %v16798_v22 = vand.u32 2147483647, %v16205_v35 }
 0xa3d   :  { %v16207_v29 = vmul.f32 %v10016_v28, %v8101_v12  ;;  %v8017_v62 = vmul.f32 0.23164189, %v16797_v52  ;;  %10029 = vrcp.f32 %v8040_v54  ;;  %v16223_v63 = vmul.f32 %v16058_v50, %v8526_v33 }
 0xa3e   :  { %v8172_v23 = vadd.f32 -0.72657603, %v8148_v21  ;;  %v8503_v3 = vmul.f32 %v8455_v8, %v17418_v42  ;;  %v8400_v46 = vmul.f32 -0.5, %v8376_v2  ;;  %v8401_v16 = vmul.f32 -0.5, %v8377_v30 }
 0xa3f   :  { %v10020_v49 = vpop.eup %10019  ;;  %v8149_v39 = vmul.f32 0.5307027, %v16207_v29  ;;  %v8041_v14 = vadd.f32 1.0, %v8017_v62  ;;  %v8000_v42 = vmul.f32 0.23164189, %v16798_v22  ;;  %v16230_v52 = vadd.f32 %v16036_v36, %v15839_v19 }
 0xa40   :  { %v8196_v28 = vmul.f32 %v8172_v23, %v16192_v7  ;;  %v8082_v31 = vmul.f32 %v10020_v49, %v8034_v20  ;;  %v10022_v4 = vpop.eup %10021  ;;  %v8527_v2 = vsub.f32 %v8479_v9, %v8503_v3  ;;  %v8444_v22 = vmul.f32 1.442695, %v8400_v46 }
 0xa41   :  { %v8173_v44 = vadd.f32 -0.72657603, %v8149_v39  ;;  %v10024_v8 = vpop.eup %10023  ;;  %10031 = vrcp.f32 %v8041_v14  ;;  %v8024_v30 = vadd.f32 1.0, %v8000_v42  ;;  %v16800_v27 = vand.u32 2147483647, %v16230_v52 }
 0xa42   :  { %v8220_v12 = vadd.f32 0.7107069, %v8196_v28  ;;  %v8106_v21 = vsub.f32 2.0, %v8082_v31  ;;  %v8083_v20 = vmul.f32 %v10024_v8, %v8035_v10  ;;  %v10026_v33 = vpop.eup %10025  ;;  %v8360_v10 = vmul.f32 %v16205_v35, %v16205_v35 }
 0xa43   :  { %v8197_v23 = vmul.f32 %v8173_v44, %v16207_v29  ;;  %v16239_v44 = vpop.eup %10027  ;;  %10033 = vrcp.f32 %v8024_v30  ;;  %v16247_v3 = vmul.f32 %v16058_v50, %v8527_v2  ;;  %v16289_v0 = vadd.f32 %v16056_v59, %v15850_v34 }
 0xa44   :  { %v8244_v39 = vmul.f32 %v8220_v12, %v16192_v7  ;;  %v16235_v62 = vmul.f32 %v10020_v49, %v8106_v21  ;;  %v8107_v31 = vsub.f32 2.0, %v8083_v20  ;;  %10035 = vpow2.f32 %v8434_v53 }
 0xa45   :  { %v8221_v28 = vadd.f32 0.7107069, %v8197_v23  ;;  %v8446_v49 = vmul.f32 1.442695, %v8401_v16  ;;  %v8001_v21 = vmul.f32 0.23164189, %v16800_v27  ;;  %10037 = vpow2.f32 %v8444_v22 }
 0xa46   :  { %v8268_v58 = vadd.f32 -0.14224836, %v8244_v39  ;;  %v8154_v19 = vmul.f32 0.5307027, %v16235_v62  ;;  %v16244_v9 = vmul.f32 %v10024_v8, %v8107_v31  ;;  %v8384_v20 = vmul.f32 -0.5, %v8360_v10 }
 0xa47   :  { %v8245_v36 = vmul.f32 %v8221_v28, %v16207_v29  ;;  %v16255_v39 = vadd.f32 %v16048_v18, %v15850_v34  ;;  %v10030_v8 = vpop.eup %10029  ;;  %v8025_v2 = vadd.f32 1.0, %v8001_v21  ;;  %10039 = vpow2.f32 %v8446_v49 }
 0xa48   :  { %v8292_v46 = vmul.f32 %v8268_v58, %v16192_v7  ;;  %v8178_v12 = vadd.f32 -0.72657603, %v8154_v19  ;;  %v8155_v23 = vmul.f32 0.5307027, %v16244_v9  ;;  %v8088_v31 = vmul.f32 %v10030_v8, %v8040_v54 }
 0xa49   :  { %v8269_v42 = vadd.f32 -0.14224836, %v8245_v36  ;;  %10041 = vrcp.f32 %v8025_v2  ;;  %v7982_v10 = vand.u32 2147483647, %v16255_v39  ;;  %v8412_v24 = vmul.f32 1.442695, %v8384_v20 }
 0xa4a   :  { %v8316_v53 = vadd.f32 0.1274148, %v8292_v46  ;;  %v8202_v16 = vmul.f32 %v8178_v12, %v16235_v62  ;;  %v8179_v28 = vadd.f32 -0.72657603, %v8155_v23  ;;  %v8112_v46 = vsub.f32 2.0, %v8088_v31 }
 0xa4b   :  { %v8293_v58 = vmul.f32 %v8269_v42, %v16207_v29  ;;  %v10032_v27 = vpop.eup %10031  ;;  %v8006_v54 = vmul.f32 0.23164189, %v7982_v10  ;;  %v16270_v23 = vmul.f32 %v16230_v52, %v16230_v52  ;;  %v8366_v34 = vmul.f32 %v16255_v39, %v16255_v39 }
 0xa4c   :  { %v8340_v19 = vmul.f32 %v8316_v53, %v16192_v7  ;;  %v8226_v36 = vadd.f32 0.7107069, %v8202_v16  ;;  %v8203_v1 = vmul.f32 %v8179_v28, %v16244_v9  ;;  %v8089_v21 = vmul.f32 %v10032_v27, %v8041_v14 }
 0xa4d   :  { %v8317_v18 = vadd.f32 0.1274148, %v8293_v58  ;;  %v16266_v42 = vmul.f32 %v10030_v8, %v8112_v46  ;;  %v10034_v53 = vpop.eup %10033  ;;  %v8030_v58 = vadd.f32 1.0, %v8006_v54 }
 0xa4e   :  { %v8460_v12 = vmul.f32 %v10022_v4, %v8340_v19  ;;  %v8250_v22 = vmul.f32 %v8226_v36, %v16235_v62  ;;  %v8227_v7 = vadd.f32 0.7107069, %v8203_v1  ;;  %v8113_v16 = vsub.f32 2.0, %v8089_v21  ;;  %v10036_v14 = vpop.eup %10035 }
 0xa4f   :  { %v8341_v49 = vmul.f32 %v8317_v18, %v16207_v29  ;;  %v8160_v29 = vmul.f32 0.5307027, %v16266_v42  ;;  %v8072_v1 = vmul.f32 %v10034_v53, %v8024_v30  ;;  %10043 = vrcp.f32 %v8030_v58 }
 0xa50   :  { %v8508_v20 = vmul.f32 %v8460_v12, %v7980_v45  ;;  %v8274_v4 = vadd.f32 -0.14224836, %v8250_v22  ;;  %v8251_v31 = vmul.f32 %v8227_v7, %v16244_v9  ;;  %v16279_v36 = vmul.f32 %v10032_v27, %v8113_v16 }
 0xa51   :  { %v8461_v28 = vmul.f32 %v10026_v33, %v8341_v49  ;;  %v8184_v46 = vadd.f32 -0.72657603, %v8160_v29  ;;  %v8096_v12 = vsub.f32 2.0, %v8072_v1  ;;  %v16283_v33 = vpop.eup %10037  ;;  %10045 = vpow2.f32 %v8412_v24 }
 0xa52   :  { %v8532_v8 = vsub.f32 %v8484_v38, %v8508_v20  ;;  %v8298_v19 = vmul.f32 %v8274_v4, %v16235_v62  ;;  %v8275_v18 = vadd.f32 -0.14224836, %v8251_v31  ;;  %v8161_v30 = vmul.f32 0.5307027, %v16279_v36  ;;  %v16291_v38 = vpop.eup %10039 }
 0xa53   :  { %v8509_v45 = vmul.f32 %v8461_v28, %v7981_v40  ;;  %v8208_v54 = vmul.f32 %v8184_v46, %v16266_v42  ;;  %v16297_v49 = vmul.f32 %v10034_v53, %v8096_v12  ;;  %v10042_v7 = vpop.eup %10041  ;;  %v7983_v46 = vand.u32 2147483647, %v16289_v0 }
 0xa54   :  { %v8576_v22 = vmul.f32 %v16080_v48, %v8532_v8  ;;  %v8322_v21 = vadd.f32 0.1274148, %v8298_v19  ;;  %v8299_v40 = vmul.f32 %v8275_v18, %v16244_v9  ;;  %v8185_v16 = vadd.f32 -0.72657603, %v8161_v30 }
 0xa55   :  { %v8533_v27 = vsub.f32 %v8485_v43, %v8509_v45  ;;  %v8232_v15 = vadd.f32 0.7107069, %v8208_v54  ;;  %v8144_v43 = vmul.f32 0.5307027, %v16297_v49  ;;  %v8073_v29 = vmul.f32 %v10042_v7, %v8025_v2 }
 0xa56   :  { %v8610_v20 = vadd.f32 %v8576_v22, %v16223_v63  ;;  %v8346_v4 = vmul.f32 %v8322_v21, %v16235_v62  ;;  %v8323_v28 = vadd.f32 0.1274148, %v8299_v40  ;;  %v8209_v53 = vmul.f32 %v8185_v16, %v16279_v36 }
 0xa57   :  { %v8577_v59 = vmul.f32 %v16080_v48, %v8533_v27  ;;  %v8256_v1 = vmul.f32 %v8232_v15, %v16266_v42  ;;  %v8168_v8 = vadd.f32 -0.72657603, %v8144_v43  ;;  %v8097_v18 = vsub.f32 2.0, %v8073_v29 }
 0xa58   :  { %v8466_v31 = vmul.f32 %v16239_v44, %v8346_v4  ;;  %v8347_v62 = vmul.f32 %v8323_v28, %v16244_v9  ;;  %v8233_v45 = vadd.f32 0.7107069, %v8209_v53  ;;  %v8390_v24 = vmul.f32 -0.5, %v8366_v34 }
 0xa59   :  { %v8619_v63 = vadd.f32 %v8577_v59, %v16247_v3  ;;  %v8280_v44 = vadd.f32 -0.14224836, %v8256_v1  ;;  %v8192_v22 = vmul.f32 %v8168_v8, %v16297_v49  ;;  %v10044_v2 = vpop.eup %10043  ;;  %v16317_v21 = vmul.f32 %v10042_v7, %v8097_v18 }
 0xa5a   :  { %v8514_v19 = vmul.f32 %v8466_v31, %v7986_v26  ;;  %v8467_v12 = vmul.f32 %v10036_v14, %v8347_v62  ;;  %v8257_v9 = vmul.f32 %v8233_v45, %v16279_v36  ;;  %v8007_v26 = vmul.f32 0.23164189, %v7983_v46 }
 0xa5b   :  { %v8304_v14 = vmul.f32 %v8280_v44, %v16266_v42  ;;  %v8216_v27 = vadd.f32 0.7107069, %v8192_v22  ;;  %v8078_v40 = vmul.f32 %v10044_v2, %v8030_v58  ;;  %v8145_v5 = vmul.f32 0.5307027, %v16317_v21  ;;  %v10046_v62 = vpop.eup %10045 }
 0xa5c   :  { %v8538_v3 = vsub.f32 %v8490_v41, %v8514_v19  ;;  %v8515_v30 = vmul.f32 %v8467_v12, %v7987_v55  ;;  %v8281_v4 = vadd.f32 -0.14224836, %v8257_v9  ;;  %v8031_v41 = vadd.f32 1.0, %v8007_v26 }
 0xa5d   :  { %v17419_v16 = vmax.f32 %v16162_v61, 0.0  ;;  %v8328_v34 = vadd.f32 0.1274148, %v8304_v14  ;;  %v8240_v59 = vmul.f32 %v8216_v27, %v16297_v49  ;;  %v8102_v28 = vsub.f32 2.0, %v8078_v40 }
 0xa5e   :  { %v8582_v54 = vmul.f32 %v16103_v57, %v8538_v3  ;;  %v8305_v55 = vmul.f32 %v8281_v4, %v16279_v36  ;;  %v8169_v43 = vadd.f32 -0.72657603, %v8145_v5  ;;  %10047 = vrcp.f32 %v8031_v41 }
 0xa5f   :  { %v8539_v7 = vsub.f32 %v17419_v16, %v8515_v30  ;;  %v8352_v31 = vmul.f32 %v8328_v34, %v16266_v42  ;;  %v8264_v53 = vadd.f32 -0.14224836, %v8240_v59  ;;  %v16332_v29 = vmul.f32 %v10044_v2, %v8102_v28 }
 0xa60   :  { %v8611_v15 = vadd.f32 %v8610_v20, %v8582_v54  ;;  %v17420_v61 = vrot.slane %v16166_v37, 4  ;;  %v8496_v8 = vmax.f32 %v16185_v17, 0.0  ;;  %v8329_v19 = vadd.f32 0.1274148, %v8305_v55 }
 0xa61   :  { %v8583_v58 = vmul.f32 %v16103_v57, %v8539_v7  ;;  %v8193_v20 = vmul.f32 %v8169_v43, %v16317_v21  ;;  %v8472_v18 = vmul.f32 %v16283_v33, %v8352_v31  ;;  %v8288_v12 = vmul.f32 %v8264_v53, %v16297_v49 }
 0xa62   :  { %v8605_v1 = vadd.f32 %v17420_v61, %v16166_v37  ;;  %v8150_v42 = vmul.f32 0.5307027, %v16332_v29  ;;  %v8353_v44 = vmul.f32 %v8329_v19, %v16279_v36  ;;  %v8385_v2 = vmul.f32 -0.5, %v16270_v23 }
 0xa63   :  { %v8620_v45 = vadd.f32 %v8619_v63, %v8583_v58  ;;  %v8217_v22 = vadd.f32 0.7107069, %v8193_v20  ;;  %v16346_v37 = vadd.f32 %v16070_v56, %v15868_v32  ;;  %v17421_v3 = vand.u32 2147483647, %v16185_v17 }
 0xa64   :  { %v8312_v26 = vadd.f32 0.1274148, %v8288_v12  ;;  %v8174_v63 = vadd.f32 -0.72657603, %v8150_v42  ;;  %v8424_v30 = vmul.f32 1.442695, %v8390_v24  ;;  %v8473_v33 = vmul.f32 %v16291_v38, %v8353_v44 }
 0xa65   :  { %v8520_v9 = vmul.f32 %v8472_v18, %v17421_v3  ;;  %v8241_v14 = vmul.f32 %v8217_v22, %v16317_v21  ;;  %v7988_v27 = vand.u32 2147483647, %v16346_v37  ;;  %v16355_v36 = vadd.f32 %v16078_v11, %v15868_v32 }
 0xa66   :  { %v8597_v23 = vrot.slane %v16187_v51, 2  ;;  %v8606_v56 = vrot.slane %v8605_v1, 2  ;;  %v8198_v17 = vmul.f32 %v8174_v63, %v16332_v29  ;;  %v8497_v54 = vmax.f32 %v16198_v25, 0.0 }
 0xa67   :  { %v8544_v40 = vsub.f32 %v8496_v8, %v8520_v9  ;;  %v17422_v24 = vand.u32 2147483647, %v16198_v25  ;;  %v8336_v38 = vmul.f32 %v8312_v26, %v16297_v49  ;;  %v8012_v5 = vmul.f32 0.23164189, %v7988_v27 }
 0xa68   :  { %v8414_v32 = vmul.f32 1.442695, %v8385_v2  ;;  %v8222_v11 = vadd.f32 0.7107069, %v8198_v17  ;;  %10049 = vpow2.f32 %v8424_v30  ;;  %v10048_v7 = vpop.eup %10047  ;;  %v8265_v59 = vadd.f32 -0.14224836, %v8241_v14 }
 0xa69   :  { %v8521_v4 = vmul.f32 %v8473_v33, %v17422_v24  ;;  %v8588_v16 = vmul.f32 %v16135_v47, %v8544_v40  ;;  %v8036_v28 = vadd.f32 1.0, %v8012_v5  ;;  %v7989_v55 = vand.u32 2147483647, %v16355_v36 }
 0xa6a   :  { %v8246_v25 = vmul.f32 %v8222_v11, %v16332_v29  ;;  %v8079_v58 = vmul.f32 %v10048_v7, %v8031_v41  ;;  %v8367_v49 = vmul.f32 %v16289_v0, %v16289_v0  ;;  %v16371_v31 = vadd.f32 %v8597_v23, %v16187_v51 }
 0xa6b   :  { %v8545_v34 = vsub.f32 %v8497_v54, %v8521_v4  ;;  %v8612_v43 = vadd.f32 %v8611_v15, %v8588_v16  ;;  %v8456_v61 = vmul.f32 %v10046_v62, %v8336_v38  ;;  %10051 = vrcp.f32 %v8036_v28 }
 0xa6c   :  { %v16374_v8 = vadd.f32 %v8606_v56, %v8605_v1  ;;  %v8270_v20 = vadd.f32 -0.14224836, %v8246_v25  ;;  %v8103_v18 = vsub.f32 2.0, %v8079_v58  ;;  %v8289_v15 = vmul.f32 %v8265_v59, %v16317_v21 }
 0xa6d   :  { %v8589_v53 = vmul.f32 %v16135_v47, %v8545_v34  ;;  %v8613_v19 = vrot.slane %v8612_v43, 4  ;;  %10053 = vpow2.f32 %v8414_v32  ;;  %v8013_v41 = vmul.f32 0.23164189, %v7989_v55 }
 0xa6e   :  { %v8294_v51 = vmul.f32 %v8270_v20, %v16332_v29  ;;  %v16380_v44 = vmul.f32 %v10048_v7, %v8103_v18  ;;  %v8391_v22 = vmul.f32 -0.5, %v8367_v49  ;;  %v8599_v62 = vrot.slane %v16371_v31, 1 }
 0xa6f   :  { %v8621_v12 = vadd.f32 %v8620_v45, %v8589_v53  ;;  %v8614_v42 = vadd.f32 %v8613_v19, %v8612_v43  ;;  %v17423_v2 = vand.u32 2147483647, %v16205_v35  ;;  %v8037_v9 = vadd.f32 1.0, %v8013_v41 }
 0xa70   :  { %v8608_v45 = vrot.slane %v16374_v8, 1  ;;  %v8480_v26 = vmax.f32 %v16205_v35, 0.0  ;;  %v8318_v63 = vadd.f32 0.1274148, %v8294_v51  ;;  %v8151_v30 = vmul.f32 0.5307027, %v16380_v44 }
 0xa71   :  { %v8622_v1 = vrot.slane %v8621_v12, 4  ;;  %v8504_v3 = vmul.f32 %v8456_v61, %v17423_v2  ;;  %v8615_v33 = vrot.slane %v8614_v42, 2  ;;  %v8313_v23 = vadd.f32 0.1274148, %v8289_v15 }
 0xa72   :  { %10055 = vrcp.f32 %v8037_v9  ;;  %v10050_v56 = vpop.eup %10049  ;;  %v8342_v40 = vmul.f32 %v8318_v63, %v16332_v29  ;;  %v8175_v17 = vadd.f32 -0.72657603, %v8151_v30  ;;  %v8426_v54 = vmul.f32 1.442695, %v8391_v22 }
 0xa73   :  { %v8623_v14 = vadd.f32 %v8622_v1, %v8621_v12  ;;  %v16391_v24 = vadd.f32 %v16092_v13, %v15897_v60  ;;  %v8528_v38 = vsub.f32 %v8480_v26, %v8504_v3  ;;  %v8372_v35 = vmul.f32 %v16346_v37, %v16346_v37 }
 0xa74   :  { %v16397_v5 = vadd.f32 %v16097_v6, %v15897_v60  ;;  %v8481_v16 = vmax.f32 %v16230_v52, 0.0  ;;  %v8462_v32 = vmul.f32 %v10050_v56, %v8342_v40  ;;  %v8199_v29 = vmul.f32 %v8175_v17, %v16380_v44 }
 0xa75   :  { %v8624_v4 = vrot.slane %v8623_v14, 2  ;;  %v7994_v11 = vand.u32 2147483647, %v16391_v24  ;;  %v10052_v7 = vpop.eup %10051  ;;  %v8616_v34 = vadd.f32 %v8615_v33, %v8614_v42  ;;  %v8337_v59 = vmul.f32 %v8313_v23, %v16317_v21 }
 0xa76   :  { %v8486_v43 = vmax.f32 %v16255_v39, 0.0  ;;  %v8510_v25 = vmul.f32 %v8462_v32, %v7982_v10  ;;  %v8223_v58 = vadd.f32 0.7107069, %v8199_v29  ;;  %v8084_v60 = vmul.f32 %v10052_v7, %v8036_v28 }
 0xa77   :  { %v8625_v13 = vadd.f32 %v8624_v4, %v8623_v14  ;;  %v8018_v6 = vmul.f32 0.23164189, %v7994_v11  ;;  %v10054_v49 = vpop.eup %10053  ;;  %v8572_v53 = vmul.f32 %v16058_v50, %v8528_v38  ;;  %10057 = vpow2.f32 %v8426_v54  ;;  %v16426_v54 = vpop.permute.xlu0 %8648 }
 0xa78   :  { %v8396_v61 = vmul.f32 -0.5, %v8372_v35  ;;  %v7995_v19 = vand.u32 2147483647, %v16397_v5  ;;  %v8534_v20 = vsub.f32 %v8486_v43, %v8510_v25  ;;  %v8247_v21 = vmul.f32 %v8223_v58, %v16380_v44 }
 0xa79   :  { %v8108_v18 = vsub.f32 2.0, %v8084_v60  ;;  %v8042_v12 = vadd.f32 1.0, %v8018_v6  ;;  %v8617_v15 = vrot.slane %v8616_v34, 1  ;;  %v8626_v39 = vrot.slane %v8625_v13, 1 }
 0xa7a   :  { %v8457_v10 = vmul.f32 %v10054_v49, %v8337_v59  ;;  %v8019_v28 = vmul.f32 0.23164189, %v7995_v19  ;;  %v8578_v41 = vmul.f32 %v16080_v48, %v8534_v20  ;;  %v8271_v42 = vadd.f32 -0.14224836, %v8247_v21 }
 0xa7b   :  { %v16414_v51 = vmul.f32 %v10052_v7, %v8108_v18  ;;  %10059 = vrcp.f32 %v8042_v12  ;;  %v8436_v1 = vmul.f32 1.442695, %v8396_v61  ;;  %v8373_v2 = vmul.f32 %v16355_v36, %v16355_v36 }
 0xa7c   :  { %v10056_v22 = vpop.eup %10055  ;;  %v8043_v3 = vadd.f32 1.0, %v8019_v28  ;;  %v8600_v26 = vadd.f32 %v8599_v62, %v16371_v31  ;;  %v16419_v63 = vadd.f32 %v8578_v41, %v8572_v53  ;;  %v8295_v30 = vmul.f32 %v8271_v42, %v16380_v44 }
 0xa7d   :  { %v8156_v33 = vmul.f32 0.5307027, %v16414_v51  ;;  %v8085_v14 = vmul.f32 %v10056_v22, %v8037_v9  ;;  %v17424_v23 = vand.u32 2147483647, %v16230_v52  ;;  %v8609_v40 = vadd.f32 %v8608_v45, %v16374_v8 }
 0xa7e   :  { %10061 = vrcp.f32 %v8043_v3  ;;  %v8618_v17 = vadd.f32 %v8617_v15, %v8616_v34  ;;  %v8319_v4 = vadd.f32 0.1274148, %v8295_v30  ;;  %v8627_v31 = vadd.f32 %v8626_v39, %v8625_v13 }
 0xa7f   :  { %v8505_v56 = vmul.f32 %v8457_v10, %v17424_v23  ;;  %v8180_v38 = vadd.f32 -0.72657603, %v8156_v33  ;;  %v8109_v35 = vsub.f32 2.0, %v8085_v14  ;;  %v8397_v62 = vmul.f32 -0.5, %v8373_v2 }
 0xa80   :  { %v8651_v32 = vadd.f32 %v16426_v54, %v8600_v26  ;;  %v8652_v29 = vadd.f32 %v16426_v54, %v8609_v40  ;;  %v8653_v9 = vadd.f32 %v16426_v54, %v8618_v17  ;;  %v8343_v52 = vmul.f32 %v8319_v4, %v16380_v44  ;;  %v17425_v26 = vld [vmem:[#allocation5_spill] sm:$0xff] }
 0xa81   :  { %v8204_v7 = vmul.f32 %v8180_v38, %v16414_v51  ;;  %v16433_v59 = vmul.f32 %v10056_v22, %v8109_v35  ;;  %v8654_v8 = vadd.f32 %v16426_v54, %v8627_v31  ;;  %v10058_v45 = vpop.eup %10057  ;;  %v8529_v34 = vsub.f32 %v8481_v16, %v8505_v56 }
 0xa82   :  { %v8663_v43 = vcombine.low %v8651_v32, %v8652_v29  ;;  %v8463_v25 = vmul.f32 %v10058_v45, %v8343_v52  ;;  %10063 = vpow2.f32 %v8436_v1  ;;  %v8438_v6 = vmul.f32 1.442695, %v8397_v62 }
 0xa83   :  { %v8228_v13 = vadd.f32 0.7107069, %v8204_v7  ;;  %v8157_v58 = vmul.f32 0.5307027, %v16433_v59  ;;  %v8664_v60 = vcombine.low %v8653_v9, %v8654_v8  ;;  %v8378_v49 = vmul.f32 %v16391_v24, %v16391_v24 }
 0xa84   :  { %v10107_v44 = vmov 1966171168   ;;  %v8487_v20 = vmax.f32 %v16289_v0, 0.0  ;;  %v8511_v21 = vmul.f32 %v8463_v25, %v7983_v46  ;;  %v8573_v10 = vmul.f32 %v16058_v50, %v8529_v34 }
 0xa85   :  { %v8667_v53 = vunpack.c.l.s4 %v10107_v44  ;;  %v10060_v61 = vpop.eup %10059  ;;  %v8252_v16 = vmul.f32 %v8228_v13, %v16414_v51  ;;  %v8181_v18 = vadd.f32 -0.72657603, %v8157_v58  ;;  %10065 = vpow2.f32 %v8438_v6 }
 0xa86   :  { %v8090_v15 = vmul.f32 %v10060_v61, %v8042_v12  ;;  %v8535_v28 = vsub.f32 %v8487_v20, %v8511_v21  ;;  %v8402_v2 = vmul.f32 -0.5, %v8378_v49  ;;  %v8379_v50 = vmul.f32 %v16397_v5, %v16397_v5 }
 0xa87   :  { %v8668_v39 = vunpack.c.0.s8 %v8667_v53  ;;  %v8276_v41 = vadd.f32 -0.14224836, %v8252_v16  ;;  %v8205_v42 = vmul.f32 %v8181_v18, %v16433_v59 }
 0xa88   :  { %v10062_v22 = vpop.eup %10061  ;;  %v8114_v1 = vsub.f32 2.0, %v8090_v15  ;;  %v8579_v0 = vmul.f32 %v16080_v48, %v8535_v28  ;;  %v8403_v9 = vmul.f32 -0.5, %v8379_v50  ;;  %v8448_v8 = vmul.f32 1.442695, %v8402_v2 }
 0xa89   :  { %v16446_v30 = vsub.s32 %v8668_v39, %v17425_v26  ;;  %v8300_v46 = vmul.f32 %v8276_v41, %v16414_v51  ;;  %v8229_v33 = vadd.f32 0.7107069, %v8205_v42  ;;  %v8091_v12 = vmul.f32 %v10062_v22, %v8043_v3 }
 0xa8a   :  { %v8138_v14 = vmul.f32 %v10060_v61, %v8114_v1  ;;  %v8637_v40 = vadd.f32 %v8579_v0, %v8573_v10  ;;  %v8450_v6 = vmul.f32 1.442695, %v8403_v9  ;;  %10067 = vpow2.f32 %v8448_v8 }
 0xa8b   :  { %v16453_v23 = vrot.slane %v8663_v43, %v16446_v30  ;;  %v16456_v56 = vrot.slane %v8664_v60, %v16446_v30  ;;  %v8324_v17 = vadd.f32 0.1274148, %v8300_v46  ;;  %v8253_v4 = vmul.f32 %v8229_v33, %v16433_v59 }
 0xa8c   :  { %v8115_v38 = vsub.f32 2.0, %v8091_v12  ;;  %v8162_v48 = vmul.f32 0.5307027, %v8138_v14  ;;  %v10064_v32 = vpop.eup %10063  ;;  %v8492_v43 = vmax.f32 %v16346_v37, 0.0  ;;  %10069 = vpow2.f32 %v8450_v6 }
 0xa8d   :  { %v8687_v35 = vcombine.low %v16453_v23, %v16456_v56  ;;  %v8348_v3 = vmul.f32 %v8324_v17, %v16414_v51  ;;  %v8277_v31 = vadd.f32 -0.14224836, %v8253_v4  ;;  %v8498_v12 = vmax.f32 %v16391_v24, 0.0 }
 0xa8e   :  { %v8139_v62 = vmul.f32 %v10062_v22, %v8115_v38  ;;  %v8186_v29 = vadd.f32 -0.72657603, %v8162_v48  ;;  %v8499_v17 = vmax.f32 %v16397_v5, 0.0 }
 0xa8f   :  { %v8468_v52 = vmul.f32 %v10064_v32, %v8348_v3  ;;  %v8301_v7 = vmul.f32 %v8277_v31, %v16433_v59  ;;  %v10066_v60 = vpop.eup %10065 }
 0xa90   :  { %v8163_v45 = vmul.f32 0.5307027, %v8139_v62  ;;  %v8210_v34 = vmul.f32 %v8186_v29, %v8138_v14 }
 0xa91   :  { %v8516_v25 = vmul.f32 %v8468_v52, %v7988_v27  ;;  %v8325_v13 = vadd.f32 0.1274148, %v8301_v7  ;;  %v8493_v27 = vmax.f32 %v16355_v36, 0.0 }
 0xa92   :  { %v8187_v58 = vadd.f32 -0.72657603, %v8163_v45  ;;  %v8234_v51 = vadd.f32 0.7107069, %v8210_v34 }
 0xa93   :  { %v8540_v49 = vsub.f32 %v8492_v43, %v8516_v25  ;;  %v8349_v44 = vmul.f32 %v8325_v13, %v16433_v59  ;;  %v8694_v43 = vrot.slane %v8687_v35, %v16446_v30  ;;  %v17426_v13 = vlaneseq }
 0xa94   :  { %v8211_v53 = vmul.f32 %v8187_v58, %v8139_v62  ;;  %v8258_v61 = vmul.f32 %v8234_v51, %v8138_v14  ;;  %v10068_v2 = vpop.eup %10067 }
 0xa95   :  { %v8584_v20 = vmul.f32 %v16103_v57, %v8540_v49  ;;  %v8469_v21 = vmul.f32 %v10066_v60, %v8349_v44  ;;  %vm8706_vm0 = vcmp.lt.s32.totalorder %v17426_v13, 768 }
 0xa96   :  { %v8235_v16 = vadd.f32 0.7107069, %v8211_v53  ;;  %v8282_v18 = vadd.f32 -0.14224836, %v8258_v61 }
 0xa97   :  { %v8629_v37 = vadd.f32 %v16419_v63, %v8584_v20  ;;  %v8517_v15 = vmul.f32 %v8469_v21, %v7989_v55  ;;  %v10070_v63 = vpop.eup %10069 }
 0xa98   :  { %v8259_v39 = vmul.f32 %v8235_v16, %v8139_v62  ;;  %v8306_v10 = vmul.f32 %v8282_v18, %v8138_v14 }
 0xa99   :  { %v8541_v28 = vsub.f32 %v8493_v27, %v8517_v15 }
 0xa9a   :  { %v8283_v59 = vadd.f32 -0.14224836, %v8259_v39  ;;  %v8330_v41 = vadd.f32 0.1274148, %v8306_v10 }
 0xa9b   :  { %v8585_v42 = vmul.f32 %v16103_v57, %v8541_v28 }
 0xa9c   :  { %v8307_v22 = vmul.f32 %v8283_v59, %v8139_v62  ;;  %v8354_v1 = vmul.f32 %v8330_v41, %v8138_v14 }
 0xa9d   :  { %v8638_v26 = vadd.f32 %v8637_v40, %v8585_v42 }
 0xa9e   :  { %v8331_v0 = vadd.f32 0.1274148, %v8307_v22  ;;  %v8474_v46 = vmul.f32 %v10068_v2, %v8354_v1 }
 0xaa0   :  { %v8355_v33 = vmul.f32 %v8331_v0, %v8139_v62  ;;  %v8522_v36 = vmul.f32 %v8474_v46, %v7994_v11 }
 0xaa2   :  { %v8475_v55 = vmul.f32 %v10070_v63, %v8355_v33  ;;  %v8546_v50 = vsub.f32 %v8498_v12, %v8522_v36 }
 0xaa4   :  { %v8523_v57 = vmul.f32 %v8475_v55, %v7995_v19  ;;  %v8590_v14 = vmul.f32 %v16135_v47, %v8546_v50 }
 0xaa6   :  { %v8547_v4 = vsub.f32 %v8499_v17, %v8523_v57  ;;  %v8630_v40 = vadd.f32 %v8629_v37, %v8590_v14 }
 0xaa8   :  { %v8591_v38 = vmul.f32 %v16135_v47, %v8547_v4  ;;  %v8631_v48 = vrot.slane %v8630_v40, 4 }
 0xaaa   :  { %v8639_v3 = vadd.f32 %v8638_v26, %v8591_v38  ;;  %v8632_v31 = vadd.f32 %v8631_v48, %v8630_v40 }
 0xaac   :  { %v8640_v62 = vrot.slane %v8639_v3, 4  ;;  %v8633_v32 = vrot.slane %v8632_v31, 2 }
 0xaae   :  { %v8641_v24 = vadd.f32 %v8640_v62, %v8639_v3  ;;  %v8634_v11 = vadd.f32 %v8633_v32, %v8632_v31 }
 0xab0   :  { %v8642_v29 = vrot.slane %v8641_v24, 2  ;;  %v8635_v9 = vrot.slane %v8634_v11, 1 }
 0xab2   :  { %v8643_v52 = vadd.f32 %v8642_v29, %v8641_v24  ;;  %v8636_v7 = vadd.f32 %v8635_v9, %v8634_v11 }
 0xab4   :  { %v8644_v8 = vrot.slane %v8643_v52, 1  ;;  %v8655_v19 = vadd.f32 %v16426_v54, %v8636_v7 }
 0xab6   :  { %v8645_v5 = vadd.f32 %v8644_v8, %v8643_v52 }
 0xab8   :  { %v8656_v45 = vadd.f32 %v16426_v54, %v8645_v5 }
 0xaba   :  { %v8665_v34 = vcombine.low %v8655_v19, %v8656_v45 }
 0xabc   :  { %v8686_v47 = vrot.slane %v8665_v34, %v16446_v30 }
 0xabe   :  { %v8701_v25 = vrot.slane %v8686_v47, %v16446_v30 }
 0xac0   :  { %v8702_v58 = vcombine.low %v8694_v43, %v8701_v25 }
 0xac2   :  { %8708 = vst.msk [vmem:[#allocation2] sm:$0x3f] %vm8706_vm0, %v8702_v58 }
 0xac3   :  { %10092 = shalt.err (!%p10089_p4)
}
 0xac4   :  { %s10093_s21 = scalar_lea.hbm %s16505_s3, 96 }
 0xac5   :  { %p10094_p5 = scmp.ne.s32.totalorder %s16505_s3, %s10093_s21  ;;  %p10097_p6 = scmp.lt.u32.totalorder %s10093_s21, %s16505_s3 }
 0xac7   :  { %p10099_p7 = pnand %p10097_p6, %p10094_p5 }
 0xac9   :  { %10102 = shalt.err (!%p10099_p7)
}
 0xaca   :  { %8718 = dma.vmem_to_hbm [thread:$0]  %s8716_s17, 96, %s16505_s3, [#allocation3]  }
 0xacb   :  { %10103 = dma.done.wait [#allocation3], 96  }
 0xacc   :  { %10104 = vsyncadd [#allocation3], 4294967200 }
 0xacd   :  { %8722 = vsyncpa [#allocation3], 1 }

</bundles_post_ra>
